<compile_context>
chip_gen: v5e
topology: v5e:2x2
jax: 0.10.0
libtpu: 0.0.40
codegen_flags: <defaults>
</compile_context>

<pallas_src>
import jax
import jax.numpy as jnp
from jax import lax
from jax.experimental import pallas as pl
from jax.experimental.pallas import tpu as pltpu


def _round_up(v: int, m: int) -> int:
    return ((v + m - 1) // m) * m


def _bilinear_matrix(in_size: int, out_size: int) -> jnp.ndarray:
    """(out_size, in_size) matrix reproducing F.interpolate(mode='bilinear',
    align_corners=False, antialias=False) along one axis."""
    i = jnp.arange(out_size, dtype=jnp.float32)
    src = (i + 0.5) * (in_size / out_size) - 0.5
    src = jnp.maximum(src, 0.0)                        # PyTorch clamps negatives to 0
    i0 = jnp.clip(jnp.floor(src), 0.0, in_size - 1).astype(jnp.int32)
    i1 = jnp.minimum(i0 + 1, in_size - 1)
    lam = src - i0.astype(jnp.float32)
    w0 = jax.nn.one_hot(i0, in_size, dtype=jnp.float32) * (1.0 - lam)[:, None]
    w1 = jax.nn.one_hot(i1, in_size, dtype=jnp.float32) * lam[:, None]
    return w0 + w1


def upconv_block_forward(x, out_shape, weight, bias, gamma, beta,
                         *, gemm_dtype=jnp.bfloat16, eps: float = 1e-5):
    """x: (N, Cin, Hin, Win) NCHW.  out_shape mirrors the module attribute; the
    forward uses out_shape[1:] as the bilinear target (Hout, Wout)."""
    n, cin, hin, win = x.shape
    hout, wout = int(out_shape[1]), int(out_shape[2])
    cout, wcin, kh_sz, kw_sz = weight.shape
    assert wcin == cin and kh_sz == kw_sz
    k = int(kh_sz)
    ho, wo = hout - k + 1, wout - k + 1
    assert ho > 0 and wo > 0

    hw_in = hin * win
    hw_out = hout * wout
    cp = _round_up(cin, 8)                       # pad channels to a full sublane tile
    p_valid = ho * wout                          # conv columns laid out as oh*Wout + ow
    p_pad = _round_up(p_valid, 128)              # lane-dense output width
    s_max = (k - 1) * wout + (k - 1)             # largest im2col lane shift
    src_pad = _round_up(max(hw_out, p_pad + s_max), 128)
    inv_cnt = 1.0 / float(cout * ho * wo)        # GroupNorm(1) element count per sample
    inv_sqrt2 = 0.7071067811865476

    # ---- host-side (XLA) constant prep ----------------------------------------
    ah = _bilinear_matrix(hin, hout)             # (Hout, Hin)
    aw = _bilinear_matrix(win, wout)             # (Wout, Win)
    # rt[i*Win + j, oh*Wout + ow] = ah[oh, i] * aw[ow, j]
    rt = jnp.einsum("hi,wj->ijhw", ah, aw).reshape(hw_in, hw_out).astype(gemm_dtype)
    # weight reordered to (kh, Cout, kw*Cp + c), zero-padded on the channel axis
    w_pad = jnp.pad(weight, ((0, 0), (0, cp - cin), (0, 0), (0, 0)))
    wr = w_pad.transpose(2, 0, 3, 1).reshape(k, cout, k * cp).astype(gemm_dtype)
    # bias / gamma / beta consolidated in one small block (column-broadcast in-kernel)
    aff = jnp.stack([bias, gamma, beta], axis=1).astype(jnp.float32)      # (Cout, 3)
    x2d = jnp.pad(x.reshape(n, cin, hw_in),
                  ((0, 0), (0, cp - cin), (0, 0))).astype(gemm_dtype)     # (N, Cp, Hin*Win)

    def kernel(x_ref, rt_ref, w_ref, aff_ref, o_ref, up_ref, blk_ref):
        # 1) bilinear resize: one lane-dense GEMM per sample -> zero-padded scratch
        up = jnp.dot(x_ref[0], rt_ref[...], preferred_element_type=jnp.float32)
        up_ref[:, :hw_out] = up.astype(up_ref.dtype)
        if src_pad > hw_out:
            up_ref[:, hw_out:] = jnp.zeros((cp, src_pad - hw_out), up_ref.dtype)

        # 2) fused im2col + conv GEMM, output oriented (Cout, P) lane-dense
        acc = jnp.zeros((cout, p_pad), jnp.float32)
        for kh in range(k):
            for kw in range(k):
                s = kh * wout + kw
                blk_ref[kw * cp:(kw + 1) * cp, :] = up_ref[:, s:s + p_pad]
            acc = acc + jnp.dot(w_ref[kh], blk_ref[...],
                                preferred_element_type=jnp.float32)

        bias_c = aff_ref[:, 0:1]
        gamma_c = aff_ref[:, 1:2]
        beta_c = aff_ref[:, 2:3]
        y = acc + bias_c                                           # (Cout, p_pad) f32

        # 3) GroupNorm(num_groups=1): stats over the valid (Cout, Ho, Wo) elements
        lane = lax.broadcasted_iota(jnp.int32, (cout, p_pad), 1)
        valid = jnp.logical_and(lane % wout < wo, lane < p_valid)
        mean = jnp.sum(jnp.where(valid, y, 0.0)) * inv_cnt
        diff = jnp.where(valid, y - mean, 0.0)
        var = jnp.sum(diff * diff) * inv_cnt                       # biased variance
        yn = (y - mean) * lax.rsqrt(var + eps)
        yn = yn * gamma_c + beta_c

        # 4) exact erf GELU (matches torch.nn.GELU(approximate='none'))
        o_ref[0] = 0.5 * yn * (1.0 + lax.erf(yn * inv_sqrt2))

    out = pl.pallas_call(
        kernel,
        out_shape=jax.ShapeDtypeStruct((n, cout, p_pad), jnp.float32),
        grid=(n,),
        in_specs=[
            pl.BlockSpec((1, cp, hw_in), lambda i: (i, 0, 0)),
            pl.BlockSpec((hw_in, hw_out), lambda i: (0, 0)),
            pl.BlockSpec((k, cout, k * cp), lambda i: (0, 0, 0)),
            pl.BlockSpec((cout, 3), lambda i: (0, 0)),
        ],
        out_specs=pl.BlockSpec((1, cout, p_pad), lambda i: (i, 0, 0)),
        scratch_shapes=[
            pltpu.VMEM((cp, src_pad), gemm_dtype),        # flattened upsampled plane
            pltpu.VMEM((k * cp, p_pad), gemm_dtype),      # per-kh staged im2col block
        ],
        compiler_params=pltpu.CompilerParams(dimension_semantics=("parallel",)),
    )(x2d, rt, wr, aff)

    # columns are indexed by oh*Wout + ow; drop the (Wout - Wo) and 128-pad tails
    out = out[:, :, :p_valid].reshape(n, cout, ho, wout)[:, :, :, :wo]
    return out


# ------------------------- pure-JAX reference (f32) --------------------------

def _reference_forward(x, out_shape, weight, bias, gamma, beta, eps=1e-5):
    hin, win = x.shape[2], x.shape[3]
    hout, wout = int(out_shape[1]), int(out_shape[2])
    ah = _bilinear_matrix(hin, hout)
    aw = _bilinear_matrix(win, wout)
    up = jnp.einsum("oi,ncij,pj->ncop", ah, x, aw, precision=lax.Precision.HIGHEST)
    y = lax.conv_general_dilated(up, weight, window_strides=(1, 1), padding="VALID",
                                 dimension_numbers=("NCHW", "OIHW", "NCHW"),
                                 precision=lax.Precision.HIGHEST)
    y = y + bias[None, :, None, None]
    mean = jnp.mean(y, axis=(1, 2, 3), keepdims=True)
    var = jnp.mean((y - mean) ** 2, axis=(1, 2, 3), keepdims=True)
    yn = (y - mean) * lax.rsqrt(var + eps)
    yn = yn * gamma[None, :, None, None] + beta[None, :, None, None]
    return 0.5 * yn * (1.0 + lax.erf(yn * 0.7071067811865476))


if __name__ == "__main__":
    key = jax.random.PRNGKey(0)
    k_x, k_w, k_b = jax.random.split(key, 3)

    N, C_IN, H, W = 2, 4, 16, 16
    C_OUT, K = 8, 8                       # ConvBlock default kernel_size=8, padding=0
    OUT_SHAPE = [C_IN, 32, 32]            # module out_shape; forward uses [1:] = (32, 32)

    x = jax.random.normal(k_x, (N, C_IN, H, W), dtype=jnp.float32)
    fan_in = C_IN * K * K
    weight = jax.random.normal(k_w, (C_OUT, C_IN, K, K), dtype=jnp.float32) / jnp.sqrt(fan_in)
    bias = jax.random.normal(k_b, (C_OUT,), dtype=jnp.float32) * 0.01
    gamma = jnp.ones((C_OUT,), dtype=jnp.float32)   # GroupNorm default affine init
    beta = jnp.zeros((C_OUT,), dtype=jnp.float32)

    @jax.jit
    def fwd(x, weight, bias, gamma, beta):
        return upconv_block_forward(x, OUT_SHAPE, weight, bias, gamma, beta)

    out = jax.block_until_ready(fwd(x, weight, bias, gamma, beta))

    # interpolate to 32x32, then valid 8x8 conv -> 25x25 spatial
    assert out.shape == (N, C_OUT, 32 - K + 1, 32 - K + 1), out.shape
    assert out.dtype == jnp.float32
    assert bool(jnp.all(jnp.isfinite(out)))

    # numerical sanity check vs. pure-JAX f32 reference (bf16 GEMM tolerance)
    ref = _reference_forward(x, OUT_SHAPE, weight, bias, gamma, beta)
    assert bool(jnp.allclose(out, ref, rtol=5e-2, atol=5e-2)), \
        float(jnp.max(jnp.abs(out - ref)))

    print("KERNEL_OK")
</pallas_src>

<mosaic_0001>
module attributes {stable_mosaic.version = 11 : i64} {
  func.func @kernel(%arg0: i32, %arg1: memref<1x8x256xbf16, #tpu.memory_space<vmem>>, %arg2: memref<256x1024xbf16, #tpu.memory_space<vmem>>, %arg3: memref<8x8x64xbf16, #tpu.memory_space<vmem>>, %arg4: memref<8x3xf32, #tpu.memory_space<vmem>>, %arg5: memref<1x8x896xf32, #tpu.memory_space<vmem>>, %arg6: memref<8x1152xbf16, #tpu.memory_space<vmem>>, %arg7: memref<64x896xbf16, #tpu.memory_space<vmem>>) attributes {dimension_semantics = [#tpu.dimension_semantics<parallel>], iteration_bounds = array<i64: 2>, scalar_prefetch = 0 : i64, scratch_operands = 2 : i64, tpu.core_type = #tpu.core_type<tc>, window_params = [{transform_indices = @transform_0, window_bounds = array<i64: 1, 8, 256>}, {pipeline_mode = #tpu.pipeline_mode<synchronous>, transform_indices = @transform_1, window_bounds = array<i64: 256, 1024>}, {pipeline_mode = #tpu.pipeline_mode<synchronous>, transform_indices = @transform_2, window_bounds = array<i64: 8, 8, 64>}, {pipeline_mode = #tpu.pipeline_mode<synchronous>, transform_indices = @transform_3, window_bounds = array<i64: 8, 3>}, {transform_indices = @transform_4, window_bounds = array<i64: 1, 8, 896>}]} {
    %c0 = arith.constant 0 : index
    %c0_0 = arith.constant 0 : index
    %c0_1 = arith.constant 0 : index
    %0 = vector.load %arg1[%c0, %c0_0, %c0_1] : memref<1x8x256xbf16, #tpu.memory_space<vmem>>, vector<1x8x256xbf16>
    %1 = vector.shape_cast %0 : vector<1x8x256xbf16> to vector<8x256xbf16>
    %c0_2 = arith.constant 0 : index
    %c0_3 = arith.constant 0 : index
    %2 = vector.load %arg2[%c0_2, %c0_3] : memref<256x1024xbf16, #tpu.memory_space<vmem>>, vector<256x1024xbf16>
    %cst = arith.constant dense<0.000000e+00> : vector<8x1024xf32>
    %3 = tpu.matmul %1, %2, %cst {dimension_numbers = #tpu.dot_dimension_numbers<[1], [0], [0], [1], [0, 0, 1, 1], [], []>} : vector<8x256xbf16>, vector<256x1024xbf16>, vector<8x1024xf32> -> vector<8x1024xf32>
    %4 = arith.truncf %3 : vector<8x1024xf32> to vector<8x1024xbf16>
    %c0_4 = arith.constant 0 : index
    %c0_5 = arith.constant 0 : index
    %5 = vector.load %arg6[%c0_4, %c0_5] : memref<8x1152xbf16, #tpu.memory_space<vmem>>, vector<8x1024xbf16>
    tpu.vector_store %arg6[%c0_4, %c0_5], %4 {strides = array<i32>} : memref<8x1152xbf16, #tpu.memory_space<vmem>>, vector<8x1024xbf16>,
    %cst_6 = arith.constant 0.000000e+00 : bf16
    %6 = vector.broadcast %cst_6 : bf16 to vector<8x128xbf16>
    %c0_7 = arith.constant 0 : index
    %c1024 = arith.constant 1024 : index
    %7 = vector.load %arg6[%c0_7, %c1024] : memref<8x1152xbf16, #tpu.memory_space<vmem>>, vector<8x128xbf16>
    tpu.vector_store %arg6[%c0_7, %c1024], %6 {strides = array<i32>} : memref<8x1152xbf16, #tpu.memory_space<vmem>>, vector<8x128xbf16>,
    %cst_8 = arith.constant 0.000000e+00 : f32
    %8 = vector.broadcast %cst_8 : f32 to vector<8x896xf32>
    %c0_9 = arith.constant 0 : index
    %c0_10 = arith.constant 0 : index
    %9 = vector.load %arg6[%c0_9, %c0_10] : memref<8x1152xbf16, #tpu.memory_space<vmem>>, vector<8x896xbf16>
    %c0_11 = arith.constant 0 : index
    %c0_12 = arith.constant 0 : index
    %10 = vector.load %arg7[%c0_11, %c0_12] : memref<64x896xbf16, #tpu.memory_space<vmem>>, vector<8x896xbf16>
    tpu.vector_store %arg7[%c0_11, %c0_12], %9 {strides = array<i32>} : memref<64x896xbf16, #tpu.memory_space<vmem>>, vector<8x896xbf16>,
    %c0_13 = arith.constant 0 : index
    %c1 = arith.constant 1 : index
    %11 = vector.load %arg6[%c0_13, %c1] : memref<8x1152xbf16, #tpu.memory_space<vmem>>, vector<8x896xbf16>
    %c8 = arith.constant 8 : index
    %c0_14 = arith.constant 0 : index
    %12 = vector.load %arg7[%c8, %c0_14] : memref<64x896xbf16, #tpu.memory_space<vmem>>, vector<8x896xbf16>
    tpu.vector_store %arg7[%c8, %c0_14], %11 {strides = array<i32>} : memref<64x896xbf16, #tpu.memory_space<vmem>>, vector<8x896xbf16>,
    %c0_15 = arith.constant 0 : index
    %c2 = arith.constant 2 : index
    %13 = vector.load %arg6[%c0_15, %c2] : memref<8x1152xbf16, #tpu.memory_space<vmem>>, vector<8x896xbf16>
    %c16 = arith.constant 16 : index
    %c0_16 = arith.constant 0 : index
    %14 = vector.load %arg7[%c16, %c0_16] : memref<64x896xbf16, #tpu.memory_space<vmem>>, vector<8x896xbf16>
    tpu.vector_store %arg7[%c16, %c0_16], %13 {strides = array<i32>} : memref<64x896xbf16, #tpu.memory_space<vmem>>, vector<8x896xbf16>,
    %c0_17 = arith.constant 0 : index
    %c3 = arith.constant 3 : index
    %15 = vector.load %arg6[%c0_17, %c3] : memref<8x1152xbf16, #tpu.memory_space<vmem>>, vector<8x896xbf16>
    %c24 = arith.constant 24 : index
    %c0_18 = arith.constant 0 : index
    %16 = vector.load %arg7[%c24, %c0_18] : memref<64x896xbf16, #tpu.memory_space<vmem>>, vector<8x896xbf16>
    tpu.vector_store %arg7[%c24, %c0_18], %15 {strides = array<i32>} : memref<64x896xbf16, #tpu.memory_space<vmem>>, vector<8x896xbf16>,
    %c0_19 = arith.constant 0 : index
    %c4 = arith.constant 4 : index
    %17 = vector.load %arg6[%c0_19, %c4] : memref<8x1152xbf16, #tpu.memory_space<vmem>>, vector<8x896xbf16>
    %c32 = arith.constant 32 : index
    %c0_20 = arith.constant 0 : index
    %18 = vector.load %arg7[%c32, %c0_20] : memref<64x896xbf16, #tpu.memory_space<vmem>>, vector<8x896xbf16>
    tpu.vector_store %arg7[%c32, %c0_20], %17 {strides = array<i32>} : memref<64x896xbf16, #tpu.memory_space<vmem>>, vector<8x896xbf16>,
    %c0_21 = arith.constant 0 : index
    %c5 = arith.constant 5 : index
    %19 = vector.load %arg6[%c0_21, %c5] : memref<8x1152xbf16, #tpu.memory_space<vmem>>, vector<8x896xbf16>
    %c40 = arith.constant 40 : index
    %c0_22 = arith.constant 0 : index
    %20 = vector.load %arg7[%c40, %c0_22] : memref<64x896xbf16, #tpu.memory_space<vmem>>, vector<8x896xbf16>
    tpu.vector_store %arg7[%c40, %c0_22], %19 {strides = array<i32>} : memref<64x896xbf16, #tpu.memory_space<vmem>>, vector<8x896xbf16>,
    %c0_23 = arith.constant 0 : index
    %c6 = arith.constant 6 : index
    %21 = vector.load %arg6[%c0_23, %c6] : memref<8x1152xbf16, #tpu.memory_space<vmem>>, vector<8x896xbf16>
    %c48 = arith.constant 48 : index
    %c0_24 = arith.constant 0 : index
    %22 = vector.load %arg7[%c48, %c0_24] : memref<64x896xbf16, #tpu.memory_space<vmem>>, vector<8x896xbf16>
    tpu.vector_store %arg7[%c48, %c0_24], %21 {strides = array<i32>} : memref<64x896xbf16, #tpu.memory_space<vmem>>, vector<8x896xbf16>,
    %c0_25 = arith.constant 0 : index
    %c7 = arith.constant 7 : index
    %23 = vector.load %arg6[%c0_25, %c7] : memref<8x1152xbf16, #tpu.memory_space<vmem>>, vector<8x896xbf16>
    %c56 = arith.constant 56 : index
    %c0_26 = arith.constant 0 : index
    %24 = vector.load %arg7[%c56, %c0_26] : memref<64x896xbf16, #tpu.memory_space<vmem>>, vector<8x896xbf16>
    tpu.vector_store %arg7[%c56, %c0_26], %23 {strides = array<i32>} : memref<64x896xbf16, #tpu.memory_space<vmem>>, vector<8x896xbf16>,
    %c0_27 = arith.constant 0 : index
    %c0_28 = arith.constant 0 : index
    %c0_29 = arith.constant 0 : index
    %25 = vector.load %arg3[%c0_27, %c0_28, %c0_29] : memref<8x8x64xbf16, #tpu.memory_space<vmem>>, vector<1x8x64xbf16>
    %26 = vector.shape_cast %25 : vector<1x8x64xbf16> to vector<8x64xbf16>
    %c0_30 = arith.constant 0 : index
    %c0_31 = arith.constant 0 : index
    %27 = vector.load %arg7[%c0_30, %c0_31] : memref<64x896xbf16, #tpu.memory_space<vmem>>, vector<64x896xbf16>
    %cst_32 = arith.constant dense<0.000000e+00> : vector<8x896xf32>
    %28 = tpu.matmul %26, %27, %cst_32 {dimension_numbers = #tpu.dot_dimension_numbers<[1], [0], [0], [1], [0, 0, 1, 1], [], []>} : vector<8x64xbf16>, vector<64x896xbf16>, vector<8x896xf32> -> vector<8x896xf32>
    %29 = arith.addf %8, %28 : vector<8x896xf32>
    %c0_33 = arith.constant 0 : index
    %c32_34 = arith.constant 32 : index
    %30 = vector.load %arg6[%c0_33, %c32_34] : memref<8x1152xbf16, #tpu.memory_space<vmem>>, vector<8x896xbf16>
    %c0_35 = arith.constant 0 : index
    %c0_36 = arith.constant 0 : index
    %31 = vector.load %arg7[%c0_35, %c0_36] : memref<64x896xbf16, #tpu.memory_space<vmem>>, vector<8x896xbf16>
    tpu.vector_store %arg7[%c0_35, %c0_36], %30 {strides = array<i32>} : memref<64x896xbf16, #tpu.memory_space<vmem>>, vector<8x896xbf16>,
    %c0_37 = arith.constant 0 : index
    %c33 = arith.constant 33 : index
    %32 = vector.load %arg6[%c0_37, %c33] : memref<8x1152xbf16, #tpu.memory_space<vmem>>, vector<8x896xbf16>
    %c8_38 = arith.constant 8 : index
    %c0_39 = arith.constant 0 : index
    %33 = vector.load %arg7[%c8_38, %c0_39] : memref<64x896xbf16, #tpu.memory_space<vmem>>, vector<8x896xbf16>
    tpu.vector_store %arg7[%c8_38, %c0_39], %32 {strides = array<i32>} : memref<64x896xbf16, #tpu.memory_space<vmem>>, vector<8x896xbf16>,
    %c0_40 = arith.constant 0 : index
    %c34 = arith.constant 34 : index
    %34 = vector.load %arg6[%c0_40, %c34] : memref<8x1152xbf16, #tpu.memory_space<vmem>>, vector<8x896xbf16>
    %c16_41 = arith.constant 16 : index
    %c0_42 = arith.constant 0 : index
    %35 = vector.load %arg7[%c16_41, %c0_42] : memref<64x896xbf16, #tpu.memory_space<vmem>>, vector<8x896xbf16>
    tpu.vector_store %arg7[%c16_41, %c0_42], %34 {strides = array<i32>} : memref<64x896xbf16, #tpu.memory_space<vmem>>, vector<8x896xbf16>,
    %c0_43 = arith.constant 0 : index
    %c35 = arith.constant 35 : index
    %36 = vector.load %arg6[%c0_43, %c35] : memref<8x1152xbf16, #tpu.memory_space<vmem>>, vector<8x896xbf16>
    %c24_44 = arith.constant 24 : index
    %c0_45 = arith.constant 0 : index
    %37 = vector.load %arg7[%c24_44, %c0_45] : memref<64x896xbf16, #tpu.memory_space<vmem>>, vector<8x896xbf16>
    tpu.vector_store %arg7[%c24_44, %c0_45], %36 {strides = array<i32>} : memref<64x896xbf16, #tpu.memory_space<vmem>>, vector<8x896xbf16>,
    %c0_46 = arith.constant 0 : index
    %c36 = arith.constant 36 : index
    %38 = vector.load %arg6[%c0_46, %c36] : memref<8x1152xbf16, #tpu.memory_space<vmem>>, vector<8x896xbf16>
    %c32_47 = arith.constant 32 : index
    %c0_48 = arith.constant 0 : index
    %39 = vector.load %arg7[%c32_47, %c0_48] : memref<64x896xbf16, #tpu.memory_space<vmem>>, vector<8x896xbf16>
    tpu.vector_store %arg7[%c32_47, %c0_48], %38 {strides = array<i32>} : memref<64x896xbf16, #tpu.memory_space<vmem>>, vector<8x896xbf16>,
    %c0_49 = arith.constant 0 : index
    %c37 = arith.constant 37 : index
    %40 = vector.load %arg6[%c0_49, %c37] : memref<8x1152xbf16, #tpu.memory_space<vmem>>, vector<8x896xbf16>
    %c40_50 = arith.constant 40 : index
    %c0_51 = arith.constant 0 : index
    %41 = vector.load %arg7[%c40_50, %c0_51] : memref<64x896xbf16, #tpu.memory_space<vmem>>, vector<8x896xbf16>
    tpu.vector_store %arg7[%c40_50, %c0_51], %40 {strides = array<i32>} : memref<64x896xbf16, #tpu.memory_space<vmem>>, vector<8x896xbf16>,
    %c0_52 = arith.constant 0 : index
    %c38 = arith.constant 38 : index
    %42 = vector.load %arg6[%c0_52, %c38] : memref<8x1152xbf16, #tpu.memory_space<vmem>>, vector<8x896xbf16>
    %c48_53 = arith.constant 48 : index
    %c0_54 = arith.constant 0 : index
    %43 = vector.load %arg7[%c48_53, %c0_54] : memref<64x896xbf16, #tpu.memory_space<vmem>>, vector<8x896xbf16>
    tpu.vector_store %arg7[%c48_53, %c0_54], %42 {strides = array<i32>} : memref<64x896xbf16, #tpu.memory_space<vmem>>, vector<8x896xbf16>,
    %c0_55 = arith.constant 0 : index
    %c39 = arith.constant 39 : index
    %44 = vector.load %arg6[%c0_55, %c39] : memref<8x1152xbf16, #tpu.memory_space<vmem>>, vector<8x896xbf16>
    %c56_56 = arith.constant 56 : index
    %c0_57 = arith.constant 0 : index
    %45 = vector.load %arg7[%c56_56, %c0_57] : memref<64x896xbf16, #tpu.memory_space<vmem>>, vector<8x896xbf16>
    tpu.vector_store %arg7[%c56_56, %c0_57], %44 {strides = array<i32>} : memref<64x896xbf16, #tpu.memory_space<vmem>>, vector<8x896xbf16>,
    %c1_58 = arith.constant 1 : index
    %c0_59 = arith.constant 0 : index
    %c0_60 = arith.constant 0 : index
    %46 = vector.load %arg3[%c1_58, %c0_59, %c0_60] : memref<8x8x64xbf16, #tpu.memory_space<vmem>>, vector<1x8x64xbf16>
    %47 = vector.shape_cast %46 : vector<1x8x64xbf16> to vector<8x64xbf16>
    %c0_61 = arith.constant 0 : index
    %c0_62 = arith.constant 0 : index
    %48 = vector.load %arg7[%c0_61, %c0_62] : memref<64x896xbf16, #tpu.memory_space<vmem>>, vector<64x896xbf16>
    %cst_63 = arith.constant dense<0.000000e+00> : vector<8x896xf32>
    %49 = tpu.matmul %47, %48, %cst_63 {dimension_numbers = #tpu.dot_dimension_numbers<[1], [0], [0], [1], [0, 0, 1, 1], [], []>} : vector<8x64xbf16>, vector<64x896xbf16>, vector<8x896xf32> -> vector<8x896xf32>
    %50 = arith.addf %29, %49 : vector<8x896xf32>
    %c0_64 = arith.constant 0 : index
    %c64 = arith.constant 64 : index
    %51 = vector.load %arg6[%c0_64, %c64] : memref<8x1152xbf16, #tpu.memory_space<vmem>>, vector<8x896xbf16>
    %c0_65 = arith.constant 0 : index
    %c0_66 = arith.constant 0 : index
    %52 = vector.load %arg7[%c0_65, %c0_66] : memref<64x896xbf16, #tpu.memory_space<vmem>>, vector<8x896xbf16>
    tpu.vector_store %arg7[%c0_65, %c0_66], %51 {strides = array<i32>} : memref<64x896xbf16, #tpu.memory_space<vmem>>, vector<8x896xbf16>,
    %c0_67 = arith.constant 0 : index
    %c65 = arith.constant 65 : index
    %53 = vector.load %arg6[%c0_67, %c65] : memref<8x1152xbf16, #tpu.memory_space<vmem>>, vector<8x896xbf16>
    %c8_68 = arith.constant 8 : index
    %c0_69 = arith.constant 0 : index
    %54 = vector.load %arg7[%c8_68, %c0_69] : memref<64x896xbf16, #tpu.memory_space<vmem>>, vector<8x896xbf16>
    tpu.vector_store %arg7[%c8_68, %c0_69], %53 {strides = array<i32>} : memref<64x896xbf16, #tpu.memory_space<vmem>>, vector<8x896xbf16>,
    %c0_70 = arith.constant 0 : index
    %c66 = arith.constant 66 : index
    %55 = vector.load %arg6[%c0_70, %c66] : memref<8x1152xbf16, #tpu.memory_space<vmem>>, vector<8x896xbf16>
    %c16_71 = arith.constant 16 : index
    %c0_72 = arith.constant 0 : index
    %56 = vector.load %arg7[%c16_71, %c0_72] : memref<64x896xbf16, #tpu.memory_space<vmem>>, vector<8x896xbf16>
    tpu.vector_store %arg7[%c16_71, %c0_72], %55 {strides = array<i32>} : memref<64x896xbf16, #tpu.memory_space<vmem>>, vector<8x896xbf16>,
    %c0_73 = arith.constant 0 : index
    %c67 = arith.constant 67 : index
    %57 = vector.load %arg6[%c0_73, %c67] : memref<8x1152xbf16, #tpu.memory_space<vmem>>, vector<8x896xbf16>
    %c24_74 = arith.constant 24 : index
    %c0_75 = arith.constant 0 : index
    %58 = vector.load %arg7[%c24_74, %c0_75] : memref<64x896xbf16, #tpu.memory_space<vmem>>, vector<8x896xbf16>
    tpu.vector_store %arg7[%c24_74, %c0_75], %57 {strides = array<i32>} : memref<64x896xbf16, #tpu.memory_space<vmem>>, vector<8x896xbf16>,
    %c0_76 = arith.constant 0 : index
    %c68 = arith.constant 68 : index
    %59 = vector.load %arg6[%c0_76, %c68] : memref<8x1152xbf16, #tpu.memory_space<vmem>>, vector<8x896xbf16>
    %c32_77 = arith.constant 32 : index
    %c0_78 = arith.constant 0 : index
    %60 = vector.load %arg7[%c32_77, %c0_78] : memref<64x896xbf16, #tpu.memory_space<vmem>>, vector<8x896xbf16>
    tpu.vector_store %arg7[%c32_77, %c0_78], %59 {strides = array<i32>} : memref<64x896xbf16, #tpu.memory_space<vmem>>, vector<8x896xbf16>,
    %c0_79 = arith.constant 0 : index
    %c69 = arith.constant 69 : index
    %61 = vector.load %arg6[%c0_79, %c69] : memref<8x1152xbf16, #tpu.memory_space<vmem>>, vector<8x896xbf16>
    %c40_80 = arith.constant 40 : index
    %c0_81 = arith.constant 0 : index
    %62 = vector.load %arg7[%c40_80, %c0_81] : memref<64x896xbf16, #tpu.memory_space<vmem>>, vector<8x896xbf16>
    tpu.vector_store %arg7[%c40_80, %c0_81], %61 {strides = array<i32>} : memref<64x896xbf16, #tpu.memory_space<vmem>>, vector<8x896xbf16>,
    %c0_82 = arith.constant 0 : index
    %c70 = arith.constant 70 : index
    %63 = vector.load %arg6[%c0_82, %c70] : memref<8x1152xbf16, #tpu.memory_space<vmem>>, vector<8x896xbf16>
    %c48_83 = arith.constant 48 : index
    %c0_84 = arith.constant 0 : index
    %64 = vector.load %arg7[%c48_83, %c0_84] : memref<64x896xbf16, #tpu.memory_space<vmem>>, vector<8x896xbf16>
    tpu.vector_store %arg7[%c48_83, %c0_84], %63 {strides = array<i32>} : memref<64x896xbf16, #tpu.memory_space<vmem>>, vector<8x896xbf16>,
    %c0_85 = arith.constant 0 : index
    %c71 = arith.constant 71 : index
    %65 = vector.load %arg6[%c0_85, %c71] : memref<8x1152xbf16, #tpu.memory_space<vmem>>, vector<8x896xbf16>
    %c56_86 = arith.constant 56 : index
    %c0_87 = arith.constant 0 : index
    %66 = vector.load %arg7[%c56_86, %c0_87] : memref<64x896xbf16, #tpu.memory_space<vmem>>, vector<8x896xbf16>
    tpu.vector_store %arg7[%c56_86, %c0_87], %65 {strides = array<i32>} : memref<64x896xbf16, #tpu.memory_space<vmem>>, vector<8x896xbf16>,
    %c2_88 = arith.constant 2 : index
    %c0_89 = arith.constant 0 : index
    %c0_90 = arith.constant 0 : index
    %67 = vector.load %arg3[%c2_88, %c0_89, %c0_90] : memref<8x8x64xbf16, #tpu.memory_space<vmem>>, vector<1x8x64xbf16>
    %68 = vector.shape_cast %67 : vector<1x8x64xbf16> to vector<8x64xbf16>
    %c0_91 = arith.constant 0 : index
    %c0_92 = arith.constant 0 : index
    %69 = vector.load %arg7[%c0_91, %c0_92] : memref<64x896xbf16, #tpu.memory_space<vmem>>, vector<64x896xbf16>
    %cst_93 = arith.constant dense<0.000000e+00> : vector<8x896xf32>
    %70 = tpu.matmul %68, %69, %cst_93 {dimension_numbers = #tpu.dot_dimension_numbers<[1], [0], [0], [1], [0, 0, 1, 1], [], []>} : vector<8x64xbf16>, vector<64x896xbf16>, vector<8x896xf32> -> vector<8x896xf32>
    %71 = arith.addf %50, %70 : vector<8x896xf32>
    %c0_94 = arith.constant 0 : index
    %c96 = arith.constant 96 : index
    %72 = vector.load %arg6[%c0_94, %c96] : memref<8x1152xbf16, #tpu.memory_space<vmem>>, vector<8x896xbf16>
    %c0_95 = arith.constant 0 : index
    %c0_96 = arith.constant 0 : index
    %73 = vector.load %arg7[%c0_95, %c0_96] : memref<64x896xbf16, #tpu.memory_space<vmem>>, vector<8x896xbf16>
    tpu.vector_store %arg7[%c0_95, %c0_96], %72 {strides = array<i32>} : memref<64x896xbf16, #tpu.memory_space<vmem>>, vector<8x896xbf16>,
    %c0_97 = arith.constant 0 : index
    %c97 = arith.constant 97 : index
    %74 = vector.load %arg6[%c0_97, %c97] : memref<8x1152xbf16, #tpu.memory_space<vmem>>, vector<8x896xbf16>
    %c8_98 = arith.constant 8 : index
    %c0_99 = arith.constant 0 : index
    %75 = vector.load %arg7[%c8_98, %c0_99] : memref<64x896xbf16, #tpu.memory_space<vmem>>, vector<8x896xbf16>
    tpu.vector_store %arg7[%c8_98, %c0_99], %74 {strides = array<i32>} : memref<64x896xbf16, #tpu.memory_space<vmem>>, vector<8x896xbf16>,
    %c0_100 = arith.constant 0 : index
    %c98 = arith.constant 98 : index
    %76 = vector.load %arg6[%c0_100, %c98] : memref<8x1152xbf16, #tpu.memory_space<vmem>>, vector<8x896xbf16>
    %c16_101 = arith.constant 16 : index
    %c0_102 = arith.constant 0 : index
    %77 = vector.load %arg7[%c16_101, %c0_102] : memref<64x896xbf16, #tpu.memory_space<vmem>>, vector<8x896xbf16>
    tpu.vector_store %arg7[%c16_101, %c0_102], %76 {strides = array<i32>} : memref<64x896xbf16, #tpu.memory_space<vmem>>, vector<8x896xbf16>,
    %c0_103 = arith.constant 0 : index
    %c99 = arith.constant 99 : index
    %78 = vector.load %arg6[%c0_103, %c99] : memref<8x1152xbf16, #tpu.memory_space<vmem>>, vector<8x896xbf16>
    %c24_104 = arith.constant 24 : index
    %c0_105 = arith.constant 0 : index
    %79 = vector.load %arg7[%c24_104, %c0_105] : memref<64x896xbf16, #tpu.memory_space<vmem>>, vector<8x896xbf16>
    tpu.vector_store %arg7[%c24_104, %c0_105], %78 {strides = array<i32>} : memref<64x896xbf16, #tpu.memory_space<vmem>>, vector<8x896xbf16>,
    %c0_106 = arith.constant 0 : index
    %c100 = arith.constant 100 : index
    %80 = vector.load %arg6[%c0_106, %c100] : memref<8x1152xbf16, #tpu.memory_space<vmem>>, vector<8x896xbf16>
    %c32_107 = arith.constant 32 : index
    %c0_108 = arith.constant 0 : index
    %81 = vector.load %arg7[%c32_107, %c0_108] : memref<64x896xbf16, #tpu.memory_space<vmem>>, vector<8x896xbf16>
    tpu.vector_store %arg7[%c32_107, %c0_108], %80 {strides = array<i32>} : memref<64x896xbf16, #tpu.memory_space<vmem>>, vector<8x896xbf16>,
    %c0_109 = arith.constant 0 : index
    %c101 = arith.constant 101 : index
    %82 = vector.load %arg6[%c0_109, %c101] : memref<8x1152xbf16, #tpu.memory_space<vmem>>, vector<8x896xbf16>
    %c40_110 = arith.constant 40 : index
    %c0_111 = arith.constant 0 : index
    %83 = vector.load %arg7[%c40_110, %c0_111] : memref<64x896xbf16, #tpu.memory_space<vmem>>, vector<8x896xbf16>
    tpu.vector_store %arg7[%c40_110, %c0_111], %82 {strides = array<i32>} : memref<64x896xbf16, #tpu.memory_space<vmem>>, vector<8x896xbf16>,
    %c0_112 = arith.constant 0 : index
    %c102 = arith.constant 102 : index
    %84 = vector.load %arg6[%c0_112, %c102] : memref<8x1152xbf16, #tpu.memory_space<vmem>>, vector<8x896xbf16>
    %c48_113 = arith.constant 48 : index
    %c0_114 = arith.constant 0 : index
    %85 = vector.load %arg7[%c48_113, %c0_114] : memref<64x896xbf16, #tpu.memory_space<vmem>>, vector<8x896xbf16>
    tpu.vector_store %arg7[%c48_113, %c0_114], %84 {strides = array<i32>} : memref<64x896xbf16, #tpu.memory_space<vmem>>, vector<8x896xbf16>,
    %c0_115 = arith.constant 0 : index
    %c103 = arith.constant 103 : index
    %86 = vector.load %arg6[%c0_115, %c103] : memref<8x1152xbf16, #tpu.memory_space<vmem>>, vector<8x896xbf16>
    %c56_116 = arith.constant 56 : index
    %c0_117 = arith.constant 0 : index
    %87 = vector.load %arg7[%c56_116, %c0_117] : memref<64x896xbf16, #tpu.memory_space<vmem>>, vector<8x896xbf16>
    tpu.vector_store %arg7[%c56_116, %c0_117], %86 {strides = array<i32>} : memref<64x896xbf16, #tpu.memory_space<vmem>>, vector<8x896xbf16>,
    %c3_118 = arith.constant 3 : index
    %c0_119 = arith.constant 0 : index
    %c0_120 = arith.constant 0 : index
    %88 = vector.load %arg3[%c3_118, %c0_119, %c0_120] : memref<8x8x64xbf16, #tpu.memory_space<vmem>>, vector<1x8x64xbf16>
    %89 = vector.shape_cast %88 : vector<1x8x64xbf16> to vector<8x64xbf16>
    %c0_121 = arith.constant 0 : index
    %c0_122 = arith.constant 0 : index
    %90 = vector.load %arg7[%c0_121, %c0_122] : memref<64x896xbf16, #tpu.memory_space<vmem>>, vector<64x896xbf16>
    %cst_123 = arith.constant dense<0.000000e+00> : vector<8x896xf32>
    %91 = tpu.matmul %89, %90, %cst_123 {dimension_numbers = #tpu.dot_dimension_numbers<[1], [0], [0], [1], [0, 0, 1, 1], [], []>} : vector<8x64xbf16>, vector<64x896xbf16>, vector<8x896xf32> -> vector<8x896xf32>
    %92 = arith.addf %71, %91 : vector<8x896xf32>
    %c0_124 = arith.constant 0 : index
    %c128 = arith.constant 128 : index
    %93 = vector.load %arg6[%c0_124, %c128] : memref<8x1152xbf16, #tpu.memory_space<vmem>>, vector<8x896xbf16>
    %c0_125 = arith.constant 0 : index
    %c0_126 = arith.constant 0 : index
    %94 = vector.load %arg7[%c0_125, %c0_126] : memref<64x896xbf16, #tpu.memory_space<vmem>>, vector<8x896xbf16>
    tpu.vector_store %arg7[%c0_125, %c0_126], %93 {strides = array<i32>} : memref<64x896xbf16, #tpu.memory_space<vmem>>, vector<8x896xbf16>,
    %c0_127 = arith.constant 0 : index
    %c129 = arith.constant 129 : index
    %95 = vector.load %arg6[%c0_127, %c129] : memref<8x1152xbf16, #tpu.memory_space<vmem>>, vector<8x896xbf16>
    %c8_128 = arith.constant 8 : index
    %c0_129 = arith.constant 0 : index
    %96 = vector.load %arg7[%c8_128, %c0_129] : memref<64x896xbf16, #tpu.memory_space<vmem>>, vector<8x896xbf16>
    tpu.vector_store %arg7[%c8_128, %c0_129], %95 {strides = array<i32>} : memref<64x896xbf16, #tpu.memory_space<vmem>>, vector<8x896xbf16>,
    %c0_130 = arith.constant 0 : index
    %c130 = arith.constant 130 : index
    %97 = vector.load %arg6[%c0_130, %c130] : memref<8x1152xbf16, #tpu.memory_space<vmem>>, vector<8x896xbf16>
    %c16_131 = arith.constant 16 : index
    %c0_132 = arith.constant 0 : index
    %98 = vector.load %arg7[%c16_131, %c0_132] : memref<64x896xbf16, #tpu.memory_space<vmem>>, vector<8x896xbf16>
    tpu.vector_store %arg7[%c16_131, %c0_132], %97 {strides = array<i32>} : memref<64x896xbf16, #tpu.memory_space<vmem>>, vector<8x896xbf16>,
    %c0_133 = arith.constant 0 : index
    %c131 = arith.constant 131 : index
    %99 = vector.load %arg6[%c0_133, %c131] : memref<8x1152xbf16, #tpu.memory_space<vmem>>, vector<8x896xbf16>
    %c24_134 = arith.constant 24 : index
    %c0_135 = arith.constant 0 : index
    %100 = vector.load %arg7[%c24_134, %c0_135] : memref<64x896xbf16, #tpu.memory_space<vmem>>, vector<8x896xbf16>
    tpu.vector_store %arg7[%c24_134, %c0_135], %99 {strides = array<i32>} : memref<64x896xbf16, #tpu.memory_space<vmem>>, vector<8x896xbf16>,
    %c0_136 = arith.constant 0 : index
    %c132 = arith.constant 132 : index
    %101 = vector.load %arg6[%c0_136, %c132] : memref<8x1152xbf16, #tpu.memory_space<vmem>>, vector<8x896xbf16>
    %c32_137 = arith.constant 32 : index
    %c0_138 = arith.constant 0 : index
    %102 = vector.load %arg7[%c32_137, %c0_138] : memref<64x896xbf16, #tpu.memory_space<vmem>>, vector<8x896xbf16>
    tpu.vector_store %arg7[%c32_137, %c0_138], %101 {strides = array<i32>} : memref<64x896xbf16, #tpu.memory_space<vmem>>, vector<8x896xbf16>,
    %c0_139 = arith.constant 0 : index
    %c133 = arith.constant 133 : index
    %103 = vector.load %arg6[%c0_139, %c133] : memref<8x1152xbf16, #tpu.memory_space<vmem>>, vector<8x896xbf16>
    %c40_140 = arith.constant 40 : index
    %c0_141 = arith.constant 0 : index
    %104 = vector.load %arg7[%c40_140, %c0_141] : memref<64x896xbf16, #tpu.memory_space<vmem>>, vector<8x896xbf16>
    tpu.vector_store %arg7[%c40_140, %c0_141], %103 {strides = array<i32>} : memref<64x896xbf16, #tpu.memory_space<vmem>>, vector<8x896xbf16>,
    %c0_142 = arith.constant 0 : index
    %c134 = arith.constant 134 : index
    %105 = vector.load %arg6[%c0_142, %c134] : memref<8x1152xbf16, #tpu.memory_space<vmem>>, vector<8x896xbf16>
    %c48_143 = arith.constant 48 : index
    %c0_144 = arith.constant 0 : index
    %106 = vector.load %arg7[%c48_143, %c0_144] : memref<64x896xbf16, #tpu.memory_space<vmem>>, vector<8x896xbf16>
    tpu.vector_store %arg7[%c48_143, %c0_144], %105 {strides = array<i32>} : memref<64x896xbf16, #tpu.memory_space<vmem>>, vector<8x896xbf16>,
    %c0_145 = arith.constant 0 : index
    %c135 = arith.constant 135 : index
    %107 = vector.load %arg6[%c0_145, %c135] : memref<8x1152xbf16, #tpu.memory_space<vmem>>, vector<8x896xbf16>
    %c56_146 = arith.constant 56 : index
    %c0_147 = arith.constant 0 : index
    %108 = vector.load %arg7[%c56_146, %c0_147] : memref<64x896xbf16, #tpu.memory_space<vmem>>, vector<8x896xbf16>
    tpu.vector_store %arg7[%c56_146, %c0_147], %107 {strides = array<i32>} : memref<64x896xbf16, #tpu.memory_space<vmem>>, vector<8x896xbf16>,
    %c4_148 = arith.constant 4 : index
    %c0_149 = arith.constant 0 : index
    %c0_150 = arith.constant 0 : index
    %109 = vector.load %arg3[%c4_148, %c0_149, %c0_150] : memref<8x8x64xbf16, #tpu.memory_space<vmem>>, vector<1x8x64xbf16>
    %110 = vector.shape_cast %109 : vector<1x8x64xbf16> to vector<8x64xbf16>
    %c0_151 = arith.constant 0 : index
    %c0_152 = arith.constant 0 : index
    %111 = vector.load %arg7[%c0_151, %c0_152] : memref<64x896xbf16, #tpu.memory_space<vmem>>, vector<64x896xbf16>
    %cst_153 = arith.constant dense<0.000000e+00> : vector<8x896xf32>
    %112 = tpu.matmul %110, %111, %cst_153 {dimension_numbers = #tpu.dot_dimension_numbers<[1], [0], [0], [1], [0, 0, 1, 1], [], []>} : vector<8x64xbf16>, vector<64x896xbf16>, vector<8x896xf32> -> vector<8x896xf32>
    %113 = arith.addf %92, %112 : vector<8x896xf32>
    %c0_154 = arith.constant 0 : index
    %c160 = arith.constant 160 : index
    %114 = vector.load %arg6[%c0_154, %c160] : memref<8x1152xbf16, #tpu.memory_space<vmem>>, vector<8x896xbf16>
    %c0_155 = arith.constant 0 : index
    %c0_156 = arith.constant 0 : index
    %115 = vector.load %arg7[%c0_155, %c0_156] : memref<64x896xbf16, #tpu.memory_space<vmem>>, vector<8x896xbf16>
    tpu.vector_store %arg7[%c0_155, %c0_156], %114 {strides = array<i32>} : memref<64x896xbf16, #tpu.memory_space<vmem>>, vector<8x896xbf16>,
    %c0_157 = arith.constant 0 : index
    %c161 = arith.constant 161 : index
    %116 = vector.load %arg6[%c0_157, %c161] : memref<8x1152xbf16, #tpu.memory_space<vmem>>, vector<8x896xbf16>
    %c8_158 = arith.constant 8 : index
    %c0_159 = arith.constant 0 : index
    %117 = vector.load %arg7[%c8_158, %c0_159] : memref<64x896xbf16, #tpu.memory_space<vmem>>, vector<8x896xbf16>
    tpu.vector_store %arg7[%c8_158, %c0_159], %116 {strides = array<i32>} : memref<64x896xbf16, #tpu.memory_space<vmem>>, vector<8x896xbf16>,
    %c0_160 = arith.constant 0 : index
    %c162 = arith.constant 162 : index
    %118 = vector.load %arg6[%c0_160, %c162] : memref<8x1152xbf16, #tpu.memory_space<vmem>>, vector<8x896xbf16>
    %c16_161 = arith.constant 16 : index
    %c0_162 = arith.constant 0 : index
    %119 = vector.load %arg7[%c16_161, %c0_162] : memref<64x896xbf16, #tpu.memory_space<vmem>>, vector<8x896xbf16>
    tpu.vector_store %arg7[%c16_161, %c0_162], %118 {strides = array<i32>} : memref<64x896xbf16, #tpu.memory_space<vmem>>, vector<8x896xbf16>,
    %c0_163 = arith.constant 0 : index
    %c163 = arith.constant 163 : index
    %120 = vector.load %arg6[%c0_163, %c163] : memref<8x1152xbf16, #tpu.memory_space<vmem>>, vector<8x896xbf16>
    %c24_164 = arith.constant 24 : index
    %c0_165 = arith.constant 0 : index
    %121 = vector.load %arg7[%c24_164, %c0_165] : memref<64x896xbf16, #tpu.memory_space<vmem>>, vector<8x896xbf16>
    tpu.vector_store %arg7[%c24_164, %c0_165], %120 {strides = array<i32>} : memref<64x896xbf16, #tpu.memory_space<vmem>>, vector<8x896xbf16>,
    %c0_166 = arith.constant 0 : index
    %c164 = arith.constant 164 : index
    %122 = vector.load %arg6[%c0_166, %c164] : memref<8x1152xbf16, #tpu.memory_space<vmem>>, vector<8x896xbf16>
    %c32_167 = arith.constant 32 : index
    %c0_168 = arith.constant 0 : index
    %123 = vector.load %arg7[%c32_167, %c0_168] : memref<64x896xbf16, #tpu.memory_space<vmem>>, vector<8x896xbf16>
    tpu.vector_store %arg7[%c32_167, %c0_168], %122 {strides = array<i32>} : memref<64x896xbf16, #tpu.memory_space<vmem>>, vector<8x896xbf16>,
    %c0_169 = arith.constant 0 : index
    %c165 = arith.constant 165 : index
    %124 = vector.load %arg6[%c0_169, %c165] : memref<8x1152xbf16, #tpu.memory_space<vmem>>, vector<8x896xbf16>
    %c40_170 = arith.constant 40 : index
    %c0_171 = arith.constant 0 : index
    %125 = vector.load %arg7[%c40_170, %c0_171] : memref<64x896xbf16, #tpu.memory_space<vmem>>, vector<8x896xbf16>
    tpu.vector_store %arg7[%c40_170, %c0_171], %124 {strides = array<i32>} : memref<64x896xbf16, #tpu.memory_space<vmem>>, vector<8x896xbf16>,
    %c0_172 = arith.constant 0 : index
    %c166 = arith.constant 166 : index
    %126 = vector.load %arg6[%c0_172, %c166] : memref<8x1152xbf16, #tpu.memory_space<vmem>>, vector<8x896xbf16>
    %c48_173 = arith.constant 48 : index
    %c0_174 = arith.constant 0 : index
    %127 = vector.load %arg7[%c48_173, %c0_174] : memref<64x896xbf16, #tpu.memory_space<vmem>>, vector<8x896xbf16>
    tpu.vector_store %arg7[%c48_173, %c0_174], %126 {strides = array<i32>} : memref<64x896xbf16, #tpu.memory_space<vmem>>, vector<8x896xbf16>,
    %c0_175 = arith.constant 0 : index
    %c167 = arith.constant 167 : index
    %128 = vector.load %arg6[%c0_175, %c167] : memref<8x1152xbf16, #tpu.memory_space<vmem>>, vector<8x896xbf16>
    %c56_176 = arith.constant 56 : index
    %c0_177 = arith.constant 0 : index
    %129 = vector.load %arg7[%c56_176, %c0_177] : memref<64x896xbf16, #tpu.memory_space<vmem>>, vector<8x896xbf16>
    tpu.vector_store %arg7[%c56_176, %c0_177], %128 {strides = array<i32>} : memref<64x896xbf16, #tpu.memory_space<vmem>>, vector<8x896xbf16>,
    %c5_178 = arith.constant 5 : index
    %c0_179 = arith.constant 0 : index
    %c0_180 = arith.constant 0 : index
    %130 = vector.load %arg3[%c5_178, %c0_179, %c0_180] : memref<8x8x64xbf16, #tpu.memory_space<vmem>>, vector<1x8x64xbf16>
    %131 = vector.shape_cast %130 : vector<1x8x64xbf16> to vector<8x64xbf16>
    %c0_181 = arith.constant 0 : index
    %c0_182 = arith.constant 0 : index
    %132 = vector.load %arg7[%c0_181, %c0_182] : memref<64x896xbf16, #tpu.memory_space<vmem>>, vector<64x896xbf16>
    %cst_183 = arith.constant dense<0.000000e+00> : vector<8x896xf32>
    %133 = tpu.matmul %131, %132, %cst_183 {dimension_numbers = #tpu.dot_dimension_numbers<[1], [0], [0], [1], [0, 0, 1, 1], [], []>} : vector<8x64xbf16>, vector<64x896xbf16>, vector<8x896xf32> -> vector<8x896xf32>
    %134 = arith.addf %113, %133 : vector<8x896xf32>
    %c0_184 = arith.constant 0 : index
    %c192 = arith.constant 192 : index
    %135 = vector.load %arg6[%c0_184, %c192] : memref<8x1152xbf16, #tpu.memory_space<vmem>>, vector<8x896xbf16>
    %c0_185 = arith.constant 0 : index
    %c0_186 = arith.constant 0 : index
    %136 = vector.load %arg7[%c0_185, %c0_186] : memref<64x896xbf16, #tpu.memory_space<vmem>>, vector<8x896xbf16>
    tpu.vector_store %arg7[%c0_185, %c0_186], %135 {strides = array<i32>} : memref<64x896xbf16, #tpu.memory_space<vmem>>, vector<8x896xbf16>,
    %c0_187 = arith.constant 0 : index
    %c193 = arith.constant 193 : index
    %137 = vector.load %arg6[%c0_187, %c193] : memref<8x1152xbf16, #tpu.memory_space<vmem>>, vector<8x896xbf16>
    %c8_188 = arith.constant 8 : index
    %c0_189 = arith.constant 0 : index
    %138 = vector.load %arg7[%c8_188, %c0_189] : memref<64x896xbf16, #tpu.memory_space<vmem>>, vector<8x896xbf16>
    tpu.vector_store %arg7[%c8_188, %c0_189], %137 {strides = array<i32>} : memref<64x896xbf16, #tpu.memory_space<vmem>>, vector<8x896xbf16>,
    %c0_190 = arith.constant 0 : index
    %c194 = arith.constant 194 : index
    %139 = vector.load %arg6[%c0_190, %c194] : memref<8x1152xbf16, #tpu.memory_space<vmem>>, vector<8x896xbf16>
    %c16_191 = arith.constant 16 : index
    %c0_192 = arith.constant 0 : index
    %140 = vector.load %arg7[%c16_191, %c0_192] : memref<64x896xbf16, #tpu.memory_space<vmem>>, vector<8x896xbf16>
    tpu.vector_store %arg7[%c16_191, %c0_192], %139 {strides = array<i32>} : memref<64x896xbf16, #tpu.memory_space<vmem>>, vector<8x896xbf16>,
    %c0_193 = arith.constant 0 : index
    %c195 = arith.constant 195 : index
    %141 = vector.load %arg6[%c0_193, %c195] : memref<8x1152xbf16, #tpu.memory_space<vmem>>, vector<8x896xbf16>
    %c24_194 = arith.constant 24 : index
    %c0_195 = arith.constant 0 : index
    %142 = vector.load %arg7[%c24_194, %c0_195] : memref<64x896xbf16, #tpu.memory_space<vmem>>, vector<8x896xbf16>
    tpu.vector_store %arg7[%c24_194, %c0_195], %141 {strides = array<i32>} : memref<64x896xbf16, #tpu.memory_space<vmem>>, vector<8x896xbf16>,
    %c0_196 = arith.constant 0 : index
    %c196 = arith.constant 196 : index
    %143 = vector.load %arg6[%c0_196, %c196] : memref<8x1152xbf16, #tpu.memory_space<vmem>>, vector<8x896xbf16>
    %c32_197 = arith.constant 32 : index
    %c0_198 = arith.constant 0 : index
    %144 = vector.load %arg7[%c32_197, %c0_198] : memref<64x896xbf16, #tpu.memory_space<vmem>>, vector<8x896xbf16>
    tpu.vector_store %arg7[%c32_197, %c0_198], %143 {strides = array<i32>} : memref<64x896xbf16, #tpu.memory_space<vmem>>, vector<8x896xbf16>,
    %c0_199 = arith.constant 0 : index
    %c197 = arith.constant 197 : index
    %145 = vector.load %arg6[%c0_199, %c197] : memref<8x1152xbf16, #tpu.memory_space<vmem>>, vector<8x896xbf16>
    %c40_200 = arith.constant 40 : index
    %c0_201 = arith.constant 0 : index
    %146 = vector.load %arg7[%c40_200, %c0_201] : memref<64x896xbf16, #tpu.memory_space<vmem>>, vector<8x896xbf16>
    tpu.vector_store %arg7[%c40_200, %c0_201], %145 {strides = array<i32>} : memref<64x896xbf16, #tpu.memory_space<vmem>>, vector<8x896xbf16>,
    %c0_202 = arith.constant 0 : index
    %c198 = arith.constant 198 : index
    %147 = vector.load %arg6[%c0_202, %c198] : memref<8x1152xbf16, #tpu.memory_space<vmem>>, vector<8x896xbf16>
    %c48_203 = arith.constant 48 : index
    %c0_204 = arith.constant 0 : index
    %148 = vector.load %arg7[%c48_203, %c0_204] : memref<64x896xbf16, #tpu.memory_space<vmem>>, vector<8x896xbf16>
    tpu.vector_store %arg7[%c48_203, %c0_204], %147 {strides = array<i32>} : memref<64x896xbf16, #tpu.memory_space<vmem>>, vector<8x896xbf16>,
    %c0_205 = arith.constant 0 : index
    %c199 = arith.constant 199 : index
    %149 = vector.load %arg6[%c0_205, %c199] : memref<8x1152xbf16, #tpu.memory_space<vmem>>, vector<8x896xbf16>
    %c56_206 = arith.constant 56 : index
    %c0_207 = arith.constant 0 : index
    %150 = vector.load %arg7[%c56_206, %c0_207] : memref<64x896xbf16, #tpu.memory_space<vmem>>, vector<8x896xbf16>
    tpu.vector_store %arg7[%c56_206, %c0_207], %149 {strides = array<i32>} : memref<64x896xbf16, #tpu.memory_space<vmem>>, vector<8x896xbf16>,
    %c6_208 = arith.constant 6 : index
    %c0_209 = arith.constant 0 : index
    %c0_210 = arith.constant 0 : index
    %151 = vector.load %arg3[%c6_208, %c0_209, %c0_210] : memref<8x8x64xbf16, #tpu.memory_space<vmem>>, vector<1x8x64xbf16>
    %152 = vector.shape_cast %151 : vector<1x8x64xbf16> to vector<8x64xbf16>
    %c0_211 = arith.constant 0 : index
    %c0_212 = arith.constant 0 : index
    %153 = vector.load %arg7[%c0_211, %c0_212] : memref<64x896xbf16, #tpu.memory_space<vmem>>, vector<64x896xbf16>
    %cst_213 = arith.constant dense<0.000000e+00> : vector<8x896xf32>
    %154 = tpu.matmul %152, %153, %cst_213 {dimension_numbers = #tpu.dot_dimension_numbers<[1], [0], [0], [1], [0, 0, 1, 1], [], []>} : vector<8x64xbf16>, vector<64x896xbf16>, vector<8x896xf32> -> vector<8x896xf32>
    %155 = arith.addf %134, %154 : vector<8x896xf32>
    %c0_214 = arith.constant 0 : index
    %c224 = arith.constant 224 : index
    %156 = vector.load %arg6[%c0_214, %c224] : memref<8x1152xbf16, #tpu.memory_space<vmem>>, vector<8x896xbf16>
    %c0_215 = arith.constant 0 : index
    %c0_216 = arith.constant 0 : index
    %157 = vector.load %arg7[%c0_215, %c0_216] : memref<64x896xbf16, #tpu.memory_space<vmem>>, vector<8x896xbf16>
    tpu.vector_store %arg7[%c0_215, %c0_216], %156 {strides = array<i32>} : memref<64x896xbf16, #tpu.memory_space<vmem>>, vector<8x896xbf16>,
    %c0_217 = arith.constant 0 : index
    %c225 = arith.constant 225 : index
    %158 = vector.load %arg6[%c0_217, %c225] : memref<8x1152xbf16, #tpu.memory_space<vmem>>, vector<8x896xbf16>
    %c8_218 = arith.constant 8 : index
    %c0_219 = arith.constant 0 : index
    %159 = vector.load %arg7[%c8_218, %c0_219] : memref<64x896xbf16, #tpu.memory_space<vmem>>, vector<8x896xbf16>
    tpu.vector_store %arg7[%c8_218, %c0_219], %158 {strides = array<i32>} : memref<64x896xbf16, #tpu.memory_space<vmem>>, vector<8x896xbf16>,
    %c0_220 = arith.constant 0 : index
    %c226 = arith.constant 226 : index
    %160 = vector.load %arg6[%c0_220, %c226] : memref<8x1152xbf16, #tpu.memory_space<vmem>>, vector<8x896xbf16>
    %c16_221 = arith.constant 16 : index
    %c0_222 = arith.constant 0 : index
    %161 = vector.load %arg7[%c16_221, %c0_222] : memref<64x896xbf16, #tpu.memory_space<vmem>>, vector<8x896xbf16>
    tpu.vector_store %arg7[%c16_221, %c0_222], %160 {strides = array<i32>} : memref<64x896xbf16, #tpu.memory_space<vmem>>, vector<8x896xbf16>,
    %c0_223 = arith.constant 0 : index
    %c227 = arith.constant 227 : index
    %162 = vector.load %arg6[%c0_223, %c227] : memref<8x1152xbf16, #tpu.memory_space<vmem>>, vector<8x896xbf16>
    %c24_224 = arith.constant 24 : index
    %c0_225 = arith.constant 0 : index
    %163 = vector.load %arg7[%c24_224, %c0_225] : memref<64x896xbf16, #tpu.memory_space<vmem>>, vector<8x896xbf16>
    tpu.vector_store %arg7[%c24_224, %c0_225], %162 {strides = array<i32>} : memref<64x896xbf16, #tpu.memory_space<vmem>>, vector<8x896xbf16>,
    %c0_226 = arith.constant 0 : index
    %c228 = arith.constant 228 : index
    %164 = vector.load %arg6[%c0_226, %c228] : memref<8x1152xbf16, #tpu.memory_space<vmem>>, vector<8x896xbf16>
    %c32_227 = arith.constant 32 : index
    %c0_228 = arith.constant 0 : index
    %165 = vector.load %arg7[%c32_227, %c0_228] : memref<64x896xbf16, #tpu.memory_space<vmem>>, vector<8x896xbf16>
    tpu.vector_store %arg7[%c32_227, %c0_228], %164 {strides = array<i32>} : memref<64x896xbf16, #tpu.memory_space<vmem>>, vector<8x896xbf16>,
    %c0_229 = arith.constant 0 : index
    %c229 = arith.constant 229 : index
    %166 = vector.load %arg6[%c0_229, %c229] : memref<8x1152xbf16, #tpu.memory_space<vmem>>, vector<8x896xbf16>
    %c40_230 = arith.constant 40 : index
    %c0_231 = arith.constant 0 : index
    %167 = vector.load %arg7[%c40_230, %c0_231] : memref<64x896xbf16, #tpu.memory_space<vmem>>, vector<8x896xbf16>
    tpu.vector_store %arg7[%c40_230, %c0_231], %166 {strides = array<i32>} : memref<64x896xbf16, #tpu.memory_space<vmem>>, vector<8x896xbf16>,
    %c0_232 = arith.constant 0 : index
    %c230 = arith.constant 230 : index
    %168 = vector.load %arg6[%c0_232, %c230] : memref<8x1152xbf16, #tpu.memory_space<vmem>>, vector<8x896xbf16>
    %c48_233 = arith.constant 48 : index
    %c0_234 = arith.constant 0 : index
    %169 = vector.load %arg7[%c48_233, %c0_234] : memref<64x896xbf16, #tpu.memory_space<vmem>>, vector<8x896xbf16>
    tpu.vector_store %arg7[%c48_233, %c0_234], %168 {strides = array<i32>} : memref<64x896xbf16, #tpu.memory_space<vmem>>, vector<8x896xbf16>,
    %c0_235 = arith.constant 0 : index
    %c231 = arith.constant 231 : index
    %170 = vector.load %arg6[%c0_235, %c231] : memref<8x1152xbf16, #tpu.memory_space<vmem>>, vector<8x896xbf16>
    %c56_236 = arith.constant 56 : index
    %c0_237 = arith.constant 0 : index
    %171 = vector.load %arg7[%c56_236, %c0_237] : memref<64x896xbf16, #tpu.memory_space<vmem>>, vector<8x896xbf16>
    tpu.vector_store %arg7[%c56_236, %c0_237], %170 {strides = array<i32>} : memref<64x896xbf16, #tpu.memory_space<vmem>>, vector<8x896xbf16>,
    %c7_238 = arith.constant 7 : index
    %c0_239 = arith.constant 0 : index
    %c0_240 = arith.constant 0 : index
    %172 = vector.load %arg3[%c7_238, %c0_239, %c0_240] : memref<8x8x64xbf16, #tpu.memory_space<vmem>>, vector<1x8x64xbf16>
    %173 = vector.shape_cast %172 : vector<1x8x64xbf16> to vector<8x64xbf16>
    %c0_241 = arith.constant 0 : index
    %c0_242 = arith.constant 0 : index
    %174 = vector.load %arg7[%c0_241, %c0_242] : memref<64x896xbf16, #tpu.memory_space<vmem>>, vector<64x896xbf16>
    %cst_243 = arith.constant dense<0.000000e+00> : vector<8x896xf32>
    %175 = tpu.matmul %173, %174, %cst_243 {dimension_numbers = #tpu.dot_dimension_numbers<[1], [0], [0], [1], [0, 0, 1, 1], [], []>} : vector<8x64xbf16>, vector<64x896xbf16>, vector<8x896xf32> -> vector<8x896xf32>
    %176 = arith.addf %155, %175 : vector<8x896xf32>
    %c0_244 = arith.constant 0 : index
    %c0_245 = arith.constant 0 : index
    %177 = vector.load %arg4[%c0_244, %c0_245] : memref<8x3xf32, #tpu.memory_space<vmem>>, vector<8x1xf32>
    %c0_246 = arith.constant 0 : index
    %c1_247 = arith.constant 1 : index
    %178 = vector.load %arg4[%c0_246, %c1_247] : memref<8x3xf32, #tpu.memory_space<vmem>>, vector<8x1xf32>
    %c0_248 = arith.constant 0 : index
    %c2_249 = arith.constant 2 : index
    %179 = vector.load %arg4[%c0_248, %c2_249] : memref<8x3xf32, #tpu.memory_space<vmem>>, vector<8x1xf32>
    %180 = vector.broadcast %177 : vector<8x1xf32> to vector<8x896xf32>
    %181 = arith.addf %176, %180 : vector<8x896xf32>
    %182 = tpu.iota {dimensions = array<i32: 1>} : vector<8x896xi32>
    %c32_i32 = arith.constant 32 : i32
    %c0_i32 = arith.constant 0 : i32
    %183 = arith.cmpi eq, %c32_i32, %c0_i32 : i32
    %c1_i32 = arith.constant 1 : i32
    %184 = arith.select %183, %c1_i32, %c32_i32 : i32
    %185 = vector.broadcast %184 : i32 to vector<8x896xi32>
    %186 = arith.remsi %182, %185 : vector<8x896xi32>
    %c0_i32_250 = arith.constant 0 : i32
    %187 = vector.broadcast %c0_i32_250 : i32 to vector<8x896xi32>
    %188 = arith.cmpi ne, %186, %187 : vector<8x896xi32>
    %c0_i32_251 = arith.constant 0 : i32
    %189 = vector.broadcast %c0_i32_251 : i32 to vector<8x896xi32>
    %190 = arith.cmpi slt, %186, %189 : vector<8x896xi32>
    %c0_i32_252 = arith.constant 0 : i32
    %191 = arith.cmpi slt, %184, %c0_i32_252 : i32
    %192 = vector.broadcast %191 : i1 to vector<8x896xi1>
    %193 = vector.broadcast %192 : vector<8x896xi1> to vector<8x896xi1>
    %194 = arith.xori %190, %193 : vector<8x896xi1>
    %195 = arith.andi %194, %188 : vector<8x896xi1>
    %196 = vector.broadcast %184 : i32 to vector<8x896xi32>
    %197 = arith.addi %186, %196 : vector<8x896xi32>
    %198 = arith.select %195, %197, %186 : vector<8x896xi1>, vector<8x896xi32>
    %c25_i32 = arith.constant 25 : i32
    %199 = vector.broadcast %c25_i32 : i32 to vector<8x896xi32>
    %200 = arith.cmpi slt, %198, %199 : vector<8x896xi32>
    %c800_i32 = arith.constant 800 : i32
    %201 = vector.broadcast %c800_i32 : i32 to vector<8x896xi32>
    %202 = arith.cmpi slt, %182, %201 : vector<8x896xi32>
    %203 = arith.andi %200, %202 : vector<8x896xi1>
    %cst_253 = arith.constant 0.000000e+00 : f32
    %204 = vector.broadcast %cst_253 : f32 to vector<8x896xf32>
    %205 = arith.select %203, %181, %204 : vector<8x896xi1>, vector<8x896xf32>
    %206 = vector.shape_cast %205 : vector<8x896xf32> to vector<1x8x896xf32>
    %cst_254 = arith.constant dense<0.000000e+00> : vector<1xf32>
    %207 = vector.multi_reduction <add>, %206, %cst_254 [1, 2] : vector<1x8x896xf32> to vector<1xf32>
    %208 = vector.shape_cast %207 : vector<1xf32> to vector<1x1x1xf32>
    %209 = vector.extract %208[0, 0, 0] : f32 from vector<1x1x1xf32>
    %cst_255 = arith.constant 2.000000e-04 : f32
    %210 = arith.mulf %209, %cst_255 : f32
    %211 = vector.broadcast %210 : f32 to vector<8x896xf32>
    %212 = arith.subf %181, %211 : vector<8x896xf32>
    %cst_256 = arith.constant 0.000000e+00 : f32
    %213 = vector.broadcast %cst_256 : f32 to vector<8x896xf32>
    %214 = arith.select %203, %212, %213 : vector<8x896xi1>, vector<8x896xf32>
    %215 = arith.mulf %214, %214 : vector<8x896xf32>
    %216 = vector.shape_cast %215 : vector<8x896xf32> to vector<1x8x896xf32>
    %cst_257 = arith.constant dense<0.000000e+00> : vector<1xf32>
    %217 = vector.multi_reduction <add>, %216, %cst_257 [1, 2] : vector<1x8x896xf32> to vector<1xf32>
    %218 = vector.shape_cast %217 : vector<1xf32> to vector<1x1x1xf32>
    %219 = vector.extract %218[0, 0, 0] : f32 from vector<1x1x1xf32>
    %cst_258 = arith.constant 2.000000e-04 : f32
    %220 = arith.mulf %219, %cst_258 : f32
    %221 = vector.broadcast %210 : f32 to vector<8x896xf32>
    %222 = arith.subf %181, %221 : vector<8x896xf32>
    %cst_259 = arith.constant 9.99999974E-6 : f32
    %223 = arith.addf %220, %cst_259 : f32
    %224 = math.rsqrt %223 : f32
    %225 = vector.broadcast %224 : f32 to vector<8x896xf32>
    %226 = arith.mulf %222, %225 : vector<8x896xf32>
    %227 = vector.broadcast %178 : vector<8x1xf32> to vector<8x896xf32>
    %228 = arith.mulf %226, %227 : vector<8x896xf32>
    %229 = vector.broadcast %179 : vector<8x1xf32> to vector<8x896xf32>
    %230 = arith.addf %228, %229 : vector<8x896xf32>
    %cst_260 = arith.constant 5.000000e-01 : f32
    %231 = vector.broadcast %cst_260 : f32 to vector<8x896xf32>
    %232 = arith.mulf %231, %230 : vector<8x896xf32>
    %cst_261 = arith.constant 0.707106769 : f32
    %233 = vector.broadcast %cst_261 : f32 to vector<8x896xf32>
    %234 = arith.mulf %230, %233 : vector<8x896xf32>
    %235 = math.erf %234 : vector<8x896xf32>
    %cst_262 = arith.constant 1.000000e+00 : f32
    %236 = vector.broadcast %cst_262 : f32 to vector<8x896xf32>
    %237 = arith.addf %236, %235 : vector<8x896xf32>
    %238 = arith.mulf %232, %237 : vector<8x896xf32>
    %c0_263 = arith.constant 0 : index
    %c0_264 = arith.constant 0 : index
    %c0_265 = arith.constant 0 : index
    %239 = vector.load %arg5[%c0_263, %c0_264, %c0_265] : memref<1x8x896xf32, #tpu.memory_space<vmem>>, vector<1x8x896xf32>
    %240 = vector.shape_cast %239 : vector<1x8x896xf32> to vector<8x896xf32>
    %241 = vector.shape_cast %238 : vector<8x896xf32> to vector<1x8x896xf32>
    tpu.vector_store %arg5[%c0_263, %c0_264, %c0_265], %241 {strides = array<i32>} : memref<1x8x896xf32, #tpu.memory_space<vmem>>, vector<1x8x896xf32>,
    return
  }
  func.func @transform_0(%arg0: i32) -> (i32, i32, i32) {
    %c0_i32 = arith.constant 0 : i32
    %c0_i32_0 = arith.constant 0 : i32
    %c0_i32_1 = arith.constant 0 : i32
    return %arg0, %c0_i32, %c0_i32_0 : i32, i32, i32
  }
  func.func @transform_1(%arg0: i32) -> (i32, i32) {
    %c0_i32 = arith.constant 0 : i32
    %c0_i32_0 = arith.constant 0 : i32
    %c0_i32_1 = arith.constant 0 : i32
    return %c0_i32, %c0_i32_0 : i32, i32
  }
  func.func @transform_2(%arg0: i32) -> (i32, i32, i32) {
    %c0_i32 = arith.constant 0 : i32
    %c0_i32_0 = arith.constant 0 : i32
    %c0_i32_1 = arith.constant 0 : i32
    %c0_i32_2 = arith.constant 0 : i32
    return %c0_i32, %c0_i32_0, %c0_i32_1 : i32, i32, i32
  }
  func.func @transform_3(%arg0: i32) -> (i32, i32) {
    %c0_i32 = arith.constant 0 : i32
    %c0_i32_0 = arith.constant 0 : i32
    %c0_i32_1 = arith.constant 0 : i32
    return %c0_i32, %c0_i32_0 : i32, i32
  }
  func.func @transform_4(%arg0: i32) -> (i32, i32, i32) {
    %c0_i32 = arith.constant 0 : i32
    %c0_i32_0 = arith.constant 0 : i32
    %c0_i32_1 = arith.constant 0 : i32
    return %arg0, %c0_i32, %c0_i32_0 : i32, i32, i32
  }
}

</mosaic_0001>

<bundles_post_ra>
// kernel: fwd.1
= control target key start
LH: loop header
LB: loop body
LE: loop exit
PB: predicated region body
PF: predicated region fallthrough
CT: control target
= control target key end

     0   :  { %s8206_s15 = smov 0   ;;  %s11736_s0 = inlined_call_operand.vmem [shape: bf16[2,8,256], index: 0, kind: input, shape index: {}]   ;;  %s11737_s1 = inlined_call_operand.vmem [shape: bf16[256,1024], index: 1, kind: input, shape index: {}]   ;;  %s11738_s2 = inlined_call_operand.vmem [shape: bf16[8,8,64], index: 2, kind: input, shape index: {}]   ;;  %s11739_s3 = inlined_call_operand.vmem [shape: f32[8,3], index: 3, kind: input, shape index: {}]   ;;  %s11740_s4 = inlined_call_operand.vmem [shape: f32[2,8,896], index: 4, kind: output, shape index: {}]  }
   0x1 LB: > { %s6228_s16 = sadd.s32 4294967295, %s8145_s15   ;;  %p6232_p0 = scmp.ge.s32.totalorder %s8145_s15, 1  ;;  %s8145_s15 = sphi %s8206_s15, %s14_s15  }
   0x2   : > { %p162_p1 = scmp.lt.s32.totalorder %s8145_s15, 3 }
   0x4   : > { %p163_p2 = pnand %p6232_p0, %p162_p1 }
   0x6   : > { %166 = sbr.rel (%p163_p2) target bundleno = 1668 (0x684), region = 36 }
   0xb   : > { %v6462_v0 = vld [vmem:[%s11737_s1 + $0x1c0] sm:$0xf]  ;;  %v7773_v5 = vld [vmem:[%s11737_s1 + $0x1c4] sm:$0xf]  ;;  %p188_p3 = scmp.lt.s32.totalorder %s6228_s16, 1  ;;  %s8148_s30 = smov 122  }
   0xc   : > { %v7777_v1 = vld [vmem:[%s11737_s1 + $0x1dc] sm:$0xf0]  ;;  %v6464_v6 = vld [vmem:[%s11737_s1 + $0x1e0] sm:$0xf0]  ;;  %s8149_s5 = smov 127   ;;  %s8150_s6 = smov 123  }
   0xd   : > { %v6718_v2 = vld [vmem:[%s11737_s1 + $0x3c0] sm:$0xf]  ;;  %v6463_v3 = vor.u32 %v7777_v1, %v6462_v0  ;;  %v6467_v8 = vor.u32 %v7773_v5, %v6464_v6  ;;  %v7837_v9 = vld [vmem:[%s11737_s1 + $0x3c4] sm:$0xf]  ;;  %s12094_s16 = smov (!%p188_p3, %s6228_s16), 1  ;;  %s8151_s7 = smov 124  }
   0xe   : > { %v7841_v4 = vld [vmem:[%s11737_s1 + $0x3dc] sm:$0xf0]  ;;  %v6720_v10 = vld [vmem:[%s11737_s1 + $0x3e0] sm:$0xf0]  ;;  %s7716_s29 = sshll.u32 %s12094_s16, 3  ;;  %s8152_s8 = smov 125  }
   0xf   : > { %v6719_v7 = vor.u32 %v7841_v4, %v6718_v2  ;;  %v6430_v11 = vld [vmem:[%s11737_s1 + $0x180] sm:$0xf]  ;;  %975 = vmatpush.bf16.msra.mxu0 %v6463_v3  ;;  %v6723_v12 = vor.u32 %v7837_v9, %v6720_v10  ;;  %1001 = vmatpush.bf16.msra.mxu2 %v6467_v8  ;;  %v7765_v18 = vld [vmem:[%s11737_s1 + $0x184] sm:$0xf]  ;;  %s192_s10 = scalar_lea.vmem %s11736_s0, %s7716_s29  ;;  %s8147_s29 = smov 121   ;;  %vm1220_vm0 = vcmask 1043456  }
  0x10   : > { %v7769_v13 = vld [vmem:[%s11737_s1 + $0x19c] sm:$0xf0]  ;;  %v6432_v19 = vld [vmem:[%s11737_s1 + $0x1a0] sm:$0xf0]  ;;  %s8153_s9 = smov 90   ;;  %s8155_s11 = smov 94  }
  0x11   : > { %v6686_v14 = vld [vmem:[%s11737_s1 + $0x380] sm:$0xf]  ;;  %988 = vmatpush.bf16.msra.mxu1 %v6719_v7  ;;  %v6431_v16 = vor.u32 %v7769_v13, %v6430_v11  ;;  %v7829_v20 = vld [vmem:[%s11737_s1 + $0x384] sm:$0xf]  ;;  %1014 = vmatpush.bf16.msra.mxu3 %v6723_v12  ;;  %v6435_v21 = vor.u32 %v7765_v18, %v6432_v19  ;;  %s8156_s12 = smov 92   ;;  %s8157_s13 = smov 89  }
  0x12   : > { %v7833_v15 = vld [vmem:[%s11737_s1 + $0x39c] sm:$0xf0]  ;;  %v6688_v22 = vld [vmem:[%s11737_s1 + $0x3a0] sm:$0xf0]  ;;  %s8158_s14 = smov 95   ;;  %s8159_s17 = smov 93  }
  0x13   : > { %v6687_v17 = vor.u32 %v7833_v15, %v6686_v14  ;;  %v6398_v23 = vld [vmem:[%s11737_s1 + $0x140] sm:$0xf]  ;;  %v6691_v25 = vor.u32 %v7829_v20, %v6688_v22  ;;  %v7757_v28 = vld [vmem:[%s11737_s1 + $0x144] sm:$0xf]  ;;  %976 = vmatpush.bf16.msra.mxu0 %v6431_v16  ;;  %1002 = vmatpush.bf16.msra.mxu2 %v6435_v21  ;;  %s8160_s18 = smov 91   ;;  %s8161_s19 = smov 58  }
  0x14   : > { %v7761_v24 = vld [vmem:[%s11737_s1 + $0x15c] sm:$0xf0]  ;;  %v6400_v30 = vld [vmem:[%s11737_s1 + $0x160] sm:$0xf0]  ;;  %s11802_s20 = smov 60   ;;  %s8163_s21 = smov 96  }
  0x15   : > { %v6654_v26 = vld [vmem:[%s11737_s1 + $0x340] sm:$0xf]  ;;  %v6399_v29 = vor.u32 %v7761_v24, %v6398_v23  ;;  %v7821_v31 = vld [vmem:[%s11737_s1 + $0x344] sm:$0xf]  ;;  %989 = vmatpush.bf16.msra.mxu1 %v6687_v17  ;;  %v6403_v34 = vor.u32 %v7757_v28, %v6400_v30  ;;  %1015 = vmatpush.bf16.msra.mxu3 %v6691_v25  ;;  %v7774_v28 = vld [vmem:[%s11737_s1 + $0x1cc] sm:$0xf] }
  0x16   : > { %v7825_v27 = vld [vmem:[%s11737_s1 + $0x35c] sm:$0xf0]  ;;  %v6656_v32 = vld [vmem:[%s11737_s1 + $0x360] sm:$0xf0]  ;;  %s11800_s22 = smov 59   ;;  %s11789_s23 = smov 61  }
  0x17   : > { %v6655_v33 = vor.u32 %v7825_v27, %v6654_v26  ;;  %v6366_v35 = vld [vmem:[%s11737_s1 + $0x100] sm:$0xf]  ;;  %v6659_v38 = vor.u32 %v7821_v31, %v6656_v32  ;;  %v7749_v40 = vld [vmem:[%s11737_s1 + $0x104] sm:$0xf]  ;;  %977 = vmatpush.bf16.msra.mxu0 %v6399_v29  ;;  %1003 = vmatpush.bf16.msra.mxu2 %v6403_v34  ;;  %v6472_v29 = vld [vmem:[%s11737_s1 + $0x1e8] sm:$0xf0] }
  0x18   : > { %v7753_v36 = vld [vmem:[%s11737_s1 + $0x11c] sm:$0xf0]  ;;  %v6368_v41 = vld [vmem:[%s11737_s1 + $0x120] sm:$0xf0]  ;;  %v7838_v31 = vld [vmem:[%s11737_s1 + $0x3cc] sm:$0xf] }
  0x19   : > { %v6622_v37 = vld [vmem:[%s11737_s1 + $0x300] sm:$0xf]  ;;  %v7813_v42 = vld [vmem:[%s11737_s1 + $0x304] sm:$0xf]  ;;  %v6367_v44 = vor.u32 %v7753_v36, %v6366_v35  ;;  %990 = vmatpush.bf16.msra.mxu1 %v6655_v33  ;;  %v6371_v46 = vor.u32 %v7749_v40, %v6368_v41  ;;  %1016 = vmatpush.bf16.msra.mxu3 %v6659_v38  ;;  %v6728_v32 = vld [vmem:[%s11737_s1 + $0x3e8] sm:$0xf0] }
  0x1a   : > { %v7817_v39 = vld [vmem:[%s11737_s1 + $0x31c] sm:$0xf0]  ;;  %v6624_v43 = vld [vmem:[%s11737_s1 + $0x320] sm:$0xf0]  ;;  %v7766_v40 = vld [vmem:[%s11737_s1 + $0x18c] sm:$0xf] }
  0x1b   : > { %v6623_v45 = vor.u32 %v7817_v39, %v6622_v37  ;;  %v6334_v47 = vld [vmem:[%s11737_s1 + $0xc0] sm:$0xf]  ;;  %v6627_v50 = vor.u32 %v7813_v42, %v6624_v43  ;;  %v7741_v52 = vld [vmem:[%s11737_s1 + $0xc4] sm:$0xf]  ;;  %978 = vmatpush.bf16.msra.mxu0 %v6367_v44  ;;  %1004 = vmatpush.bf16.msra.mxu2 %v6371_v46  ;;  %v6475_v37 = vor.u32 %v7774_v28, %v6472_v29  ;;  %v6470_v41 = vld [vmem:[%s11737_s1 + $0x1c8] sm:$0xf] }
  0x1c   : > { %v7745_v48 = vld [vmem:[%s11737_s1 + $0xdc] sm:$0xf0]  ;;  %v6336_v53 = vld [vmem:[%s11737_s1 + $0xe0] sm:$0xf0]  ;;  %v7778_v42 = vld [vmem:[%s11737_s1 + $0x1e4] sm:$0xf0]  ;;  %v6731_v43 = vor.u32 %v7838_v31, %v6728_v32 }
  0x1d   : > { %v6590_v49 = vld [vmem:[%s11737_s1 + $0x2c0] sm:$0xf]  ;;  %v7805_v54 = vld [vmem:[%s11737_s1 + $0x2c4] sm:$0xf]  ;;  %v6335_v56 = vor.u32 %v7745_v48, %v6334_v47  ;;  %991 = vmatpush.bf16.msra.mxu1 %v6623_v45  ;;  %v6339_v58 = vor.u32 %v7741_v52, %v6336_v53  ;;  %1017 = vmatpush.bf16.msra.mxu3 %v6627_v50  ;;  %v6440_v44 = vld [vmem:[%s11737_s1 + $0x1a8] sm:$0xf0] }
  0x1e   : > { %v7809_v51 = vld [vmem:[%s11737_s1 + $0x2dc] sm:$0xf0]  ;;  %v6592_v55 = vld [vmem:[%s11737_s1 + $0x2e0] sm:$0xf0]  ;;  %v6726_v45 = vld [vmem:[%s11737_s1 + $0x3c8] sm:$0xf]  ;;  %v6443_v52 = vor.u32 %v7766_v40, %v6440_v44 }
  0x1f   : > { %v6591_v57 = vor.u32 %v7809_v51, %v6590_v49  ;;  %v6302_v59 = vld [vmem:[%s11737_s1 + $0x80] sm:$0xf]  ;;  %v6595_v62 = vor.u32 %v7805_v54, %v6592_v55  ;;  %v7733_v0 = vld [vmem:[%s11737_s1 + $0x84] sm:$0xf]  ;;  %979 = vmatpush.bf16.msra.mxu0 %v6335_v56  ;;  %1005 = vmatpush.bf16.msra.mxu2 %v6339_v58  ;;  %v7842_v46 = vld [vmem:[%s11737_s1 + $0x3e4] sm:$0xf0]  ;;  %v6471_v51 = vor.u32 %v7778_v42, %v6470_v41 }
  0x20   : > { %v7737_v60 = vld [vmem:[%s11737_s1 + $0x9c] sm:$0xf0]  ;;  %v6304_v1 = vld [vmem:[%s11737_s1 + $0xa0] sm:$0xf0]  ;;  %v7830_v49 = vld [vmem:[%s11737_s1 + $0x38c] sm:$0xf]  ;;  %v6727_v53 = vor.u32 %v7842_v46, %v6726_v45 }
  0x21   : > { %v6558_v61 = vld [vmem:[%s11737_s1 + $0x280] sm:$0xf]  ;;  %v7797_v2 = vld [vmem:[%s11737_s1 + $0x284] sm:$0xf]  ;;  %v6303_v4 = vor.u32 %v7737_v60, %v6302_v59  ;;  %992 = vmatpush.bf16.msra.mxu1 %v6591_v57  ;;  %v6307_v6 = vor.u32 %v7733_v0, %v6304_v1  ;;  %1018 = vmatpush.bf16.msra.mxu3 %v6595_v62  ;;  %v6696_v50 = vld [vmem:[%s11737_s1 + $0x3a8] sm:$0xf0] }
  0x22   : > { %v7801_v63 = vld [vmem:[%s11737_s1 + $0x29c] sm:$0xf0]  ;;  %v6560_v3 = vld [vmem:[%s11737_s1 + $0x2a0] sm:$0xf0]  ;;  %v7758_v54 = vld [vmem:[%s11737_s1 + $0x14c] sm:$0xf]  ;;  %v6699_v57 = vor.u32 %v7830_v49, %v6696_v50 }
  0x23   : > { %v6559_v5 = vor.u32 %v7801_v63, %v6558_v61  ;;  %v6270_v7 = vld [vmem:[%s11737_s1 + $0x40] sm:$0xf]  ;;  %v6563_v10 = vor.u32 %v7797_v2, %v6560_v3  ;;  %v7725_v12 = vld [vmem:[%s11737_s1 + $0x44] sm:$0xf]  ;;  %980 = vmatpush.bf16.msra.mxu0 %v6303_v4  ;;  %1006 = vmatpush.bf16.msra.mxu2 %v6307_v6  ;;  %v6438_v55 = vld [vmem:[%s11737_s1 + $0x188] sm:$0xf] }
  0x24   : > { %v7729_v8 = vld [vmem:[%s11737_s1 + $0x5c] sm:$0xf0]  ;;  %v6272_v13 = vld [vmem:[%s11737_s1 + $0x60] sm:$0xf0]  ;;  %v7770_v56 = vld [vmem:[%s11737_s1 + $0x1a4] sm:$0xf0] }
  0x25   : > { %v6526_v9 = vld [vmem:[%s11737_s1 + $0x240] sm:$0xf]  ;;  %v7789_v14 = vld [vmem:[%s11737_s1 + $0x244] sm:$0xf]  ;;  %v6271_v16 = vor.u32 %v7729_v8, %v6270_v7  ;;  %993 = vmatpush.bf16.msra.mxu1 %v6559_v5  ;;  %v6275_v21 = vor.u32 %v7725_v12, %v6272_v13  ;;  %1019 = vmatpush.bf16.msra.mxu3 %v6563_v10  ;;  %v6408_v58 = vld [vmem:[%s11737_s1 + $0x168] sm:$0xf0]  ;;  %v6439_v63 = vor.u32 %v7770_v56, %v6438_v55 }
  0x26   : > { %v7793_v11 = vld [vmem:[%s11737_s1 + $0x25c] sm:$0xf0]  ;;  %v6528_v15 = vld [vmem:[%s11737_s1 + $0x260] sm:$0xf0]  ;;  %v6694_v59 = vld [vmem:[%s11737_s1 + $0x388] sm:$0xf]  ;;  %v6411_v0 = vor.u32 %v7758_v54, %v6408_v58 }
  0x27   : > { %v6238_v17 = vld [vmem:[%s11737_s1] sm:$0xf]  ;;  %v6527_v20 = vor.u32 %v7793_v11, %v6526_v9  ;;  %v7717_v23 = vld [vmem:[%s11737_s1 + $0x4] sm:$0xf]  ;;  %v6531_v24 = vor.u32 %v7789_v14, %v6528_v15  ;;  %981 = vmatpush.bf16.msra.mxu0 %v6271_v16  ;;  %1007 = vmatpush.bf16.msra.mxu2 %v6275_v21  ;;  %v7834_v60 = vld [vmem:[%s11737_s1 + $0x3a4] sm:$0xf0] }
  0x28   : > { %v7721_v18 = vld [vmem:[%s11737_s1 + $0x1c] sm:$0xf0]  ;;  %v6240_v25 = vld [vmem:[%s11737_s1 + $0x20] sm:$0xf0]  ;;  %v7822_v61 = vld [vmem:[%s11737_s1 + $0x34c] sm:$0xf]  ;;  %v6695_v1 = vor.u32 %v7834_v60, %v6694_v59 }
  0x29   : > { %v6494_v19 = vld [vmem:[%s11737_s1 + $0x200] sm:$0xf]  ;;  %v7781_v26 = vld [vmem:[%s11737_s1 + $0x204] sm:$0xf]  ;;  %v6239_v30 = vor.u32 %v7721_v18, %v6238_v17  ;;  %994 = vmatpush.bf16.msra.mxu1 %v6527_v20  ;;  %v6243_v34 = vor.u32 %v7717_v23, %v6240_v25  ;;  %1020 = vmatpush.bf16.msra.mxu3 %v6531_v24  ;;  %v6664_v62 = vld [vmem:[%s11737_s1 + $0x368] sm:$0xf0] }
  0x2a   : > { %v7785_v22 = vld [vmem:[%s11737_s1 + $0x21c] sm:$0xf0]  ;;  %v6496_v27 = vld [vmem:[%s11737_s1 + $0x220] sm:$0xf0]  ;;  %v7750_v2 = vld [vmem:[%s11737_s1 + $0x10c] sm:$0xf]  ;;  %v6667_v5 = vor.u32 %v7822_v61, %v6664_v62 }
  0x2b   : > { %v6495_v33 = vor.u32 %v7785_v22, %v6494_v19  ;;  %v199_v35 = vld [vmem:[%s192_s10] sm:$0xff]  ;;  %v6499_v36 = vor.u32 %v7781_v26, %v6496_v27  ;;  %982 = vmatpush.bf16.msra.mxu0 %v6239_v30  ;;  %1008 = vmatpush.bf16.msra.mxu2 %v6243_v34  ;;  %v6406_v3 = vld [vmem:[%s11737_s1 + $0x148] sm:$0xf]  ;;  %v6376_v6 = vld [vmem:[%s11737_s1 + $0x128] sm:$0xf0]  ;;  %s8154_s10 = smov 126  }
  0x2c   : > { %v329_v38 = vunpack.c.l.b16 %v199_v35  ;;  %v330_v39 = vunpack.c.h.b16 %v199_v35  ;;  %v7762_v4 = vld [vmem:[%s11737_s1 + $0x164] sm:$0xf0]  ;;  %v7814_v9 = vld [vmem:[%s11737_s1 + $0x30c] sm:$0xf]  ;;  %v6379_v12 = vor.u32 %v7750_v2, %v6376_v6  ;;  %v7775_v61 = vld [vmem:[%s11737_s1 + $0x1d4] sm:$0xf] }
  0x2d   : > { %995 = vmatpush.bf16.msra.mxu1 %v6495_v33  ;;  %1021 = vmatpush.bf16.msra.mxu3 %v6499_v36  ;;  %v6662_v7 = vld [vmem:[%s11737_s1 + $0x348] sm:$0xf]  ;;  %v6632_v10 = vld [vmem:[%s11737_s1 + $0x328] sm:$0xf0]  ;;  %v6407_v11 = vor.u32 %v7762_v4, %v6406_v3  ;;  %v6480_v62 = vld [vmem:[%s11737_s1 + $0x1f0] sm:$0xf0] }
  0x2e   : > { %v8446_v47 = vpack.c.b16 %v329_v38, %v329_v38  ;;  %v8448_v48 = vpack.c.b16 %v330_v39, %v330_v39  ;;  %v7826_v8 = vld [vmem:[%s11737_s1 + $0x364] sm:$0xf0]  ;;  %v7742_v14 = vld [vmem:[%s11737_s1 + $0xcc] sm:$0xf]  ;;  %v6635_v17 = vor.u32 %v7814_v9, %v6632_v10  ;;  %v7767_v4 = vld [vmem:[%s11737_s1 + $0x194] sm:$0xf] }
  0x2f   : > { %1053 = vmatpush.bf16.msrb.mxu2 %v6475_v37  ;;  %1027 = vmatpush.bf16.msrb.mxu0 %v6471_v51  ;;  %v6663_v13 = vor.u32 %v7826_v8, %v6662_v7  ;;  %v6374_v15 = vld [vmem:[%s11737_s1 + $0x108] sm:$0xf]  ;;  %v6344_v18 = vld [vmem:[%s11737_s1 + $0xe8] sm:$0xf0]  ;;  %v6483_v8 = vor.u32 %v7775_v61, %v6480_v62  ;;  %v6448_v9 = vld [vmem:[%s11737_s1 + $0x1b0] sm:$0xf0] }
  0x30   : > { %983 = vmatmul.bf16.vlgmr.msra.gmra.mxu0 %v8446_v47  ;;  %996 = vmatmul.bf16.vlgmr.msra.gmra.mxu1 %v8448_v48  ;;  %v7754_v16 = vld [vmem:[%s11737_s1 + $0x124] sm:$0xf0]  ;;  %v7806_v21 = vld [vmem:[%s11737_s1 + $0x2cc] sm:$0xf]  ;;  %v6347_v24 = vor.u32 %v7742_v14, %v6344_v18  ;;  %v6478_v14 = vld [vmem:[%s11737_s1 + $0x1d0] sm:$0xf] }
  0x31   : > { %1066 = vmatpush.bf16.msrb.mxu3 %v6731_v43  ;;  %1009 = vmatmul.bf16.vlgmr.msra.gmra.mxu2 %v8446_v47  ;;  %v6630_v19 = vld [vmem:[%s11737_s1 + $0x308] sm:$0xf]  ;;  %v6600_v22 = vld [vmem:[%s11737_s1 + $0x2e8] sm:$0xf0]  ;;  %v6375_v23 = vor.u32 %v7754_v16, %v6374_v15  ;;  %v7779_v15 = vld [vmem:[%s11737_s1 + $0x1ec] sm:$0xf0] }
  0x32   : > { %1022 = vmatmul.bf16.vlgmr.msra.gmra.mxu3 %v8448_v48  ;;  %1040 = vmatpush.bf16.msrb.mxu1 %v6727_v53  ;;  %v7818_v20 = vld [vmem:[%s11737_s1 + $0x324] sm:$0xf0]  ;;  %v7734_v26 = vld [vmem:[%s11737_s1 + $0x8c] sm:$0xf]  ;;  %v6603_v29 = vor.u32 %v7806_v21, %v6600_v22  ;;  %v6704_v16 = vld [vmem:[%s11737_s1 + $0x3b0] sm:$0xf0]  ;;  %v6451_v21 = vor.u32 %v7767_v4, %v6448_v9  ;;  %v6479_v22 = vor.u32 %v7779_v15, %v6478_v14 }
  0x33   : > { %1054 = vmatpush.bf16.msrb.mxu2 %v6443_v52  ;;  %1028 = vmatpush.bf16.msrb.mxu0 %v6439_v63  ;;  %v6631_v25 = vor.u32 %v7818_v20, %v6630_v19  ;;  %v6342_v27 = vld [vmem:[%s11737_s1 + $0xc8] sm:$0xf]  ;;  %v6312_v30 = vld [vmem:[%s11737_s1 + $0xa8] sm:$0xf0]  ;;  %v7839_v63 = vld [vmem:[%s11737_s1 + $0x3d4] sm:$0xf] }
  0x34   : > { %v7746_v28 = vld [vmem:[%s11737_s1 + $0xe4] sm:$0xf0]  ;;  %v7798_v33 = vld [vmem:[%s11737_s1 + $0x28c] sm:$0xf]  ;;  %v6315_v36 = vor.u32 %v7734_v26, %v6312_v30  ;;  %v6734_v18 = vld [vmem:[%s11737_s1 + $0x3d0] sm:$0xf] }
  0x35   : > { %1067 = vmatpush.bf16.msrb.mxu3 %v6699_v57  ;;  %v6598_v31 = vld [vmem:[%s11737_s1 + $0x2c8] sm:$0xf]  ;;  %v6568_v34 = vld [vmem:[%s11737_s1 + $0x2a8] sm:$0xf0]  ;;  %v6343_v35 = vor.u32 %v7746_v28, %v6342_v27  ;;  %v7843_v19 = vld [vmem:[%s11737_s1 + $0x3ec] sm:$0xf0] }
  0x36   : > { %1041 = vmatpush.bf16.msrb.mxu1 %v6695_v1  ;;  %v7810_v32 = vld [vmem:[%s11737_s1 + $0x2e4] sm:$0xf0]  ;;  %v7726_v38 = vld [vmem:[%s11737_s1 + $0x4c] sm:$0xf]  ;;  %v6571_v41 = vor.u32 %v7798_v33, %v6568_v34  ;;  %v6735_v26 = vor.u32 %v7843_v19, %v6734_v18  ;;  %v7823_v27 = vld [vmem:[%s11737_s1 + $0x354] sm:$0xf] }
  0x37   : > { %1055 = vmatpush.bf16.msrb.mxu2 %v6411_v0  ;;  %1029 = vmatpush.bf16.msrb.mxu0 %v6407_v11  ;;  %v6599_v37 = vor.u32 %v7810_v32, %v6598_v31  ;;  %v6310_v39 = vld [vmem:[%s11737_s1 + $0x88] sm:$0xf]  ;;  %v6280_v42 = vld [vmem:[%s11737_s1 + $0x68] sm:$0xf0]  ;;  %v6736_v0 = vld [vmem:[%s11737_s1 + $0x3f0] sm:$0xf0] }
  0x38   : > { %v7738_v40 = vld [vmem:[%s11737_s1 + $0xa4] sm:$0xf0]  ;;  %v7790_v45 = vld [vmem:[%s11737_s1 + $0x24c] sm:$0xf]  ;;  %v6283_v51 = vor.u32 %v7726_v38, %v6280_v42  ;;  %v6446_v28 = vld [vmem:[%s11737_s1 + $0x190] sm:$0xf] }
  0x39   : > { %1068 = vmatpush.bf16.msrb.mxu3 %v6667_v5  ;;  %v6566_v43 = vld [vmem:[%s11737_s1 + $0x288] sm:$0xf]  ;;  %v6536_v46 = vld [vmem:[%s11737_s1 + $0x268] sm:$0xf0]  ;;  %v6311_v49 = vor.u32 %v7738_v40, %v6310_v39  ;;  %v6672_v30 = vld [vmem:[%s11737_s1 + $0x370] sm:$0xf0] }
  0x3a   : > { %1042 = vmatpush.bf16.msrb.mxu1 %v6663_v13  ;;  %v7802_v44 = vld [vmem:[%s11737_s1 + $0x2a4] sm:$0xf0]  ;;  %v7718_v50 = vld [vmem:[%s11737_s1 + $0xc] sm:$0xf]  ;;  %v6539_v56 = vor.u32 %v7790_v45, %v6536_v46  ;;  %v7831_v13 = vld [vmem:[%s11737_s1 + $0x394] sm:$0xf] }
  0x3b   : > { %1056 = vmatpush.bf16.msrb.mxu2 %v6379_v12  ;;  %1030 = vmatpush.bf16.msrb.mxu0 %v6375_v23  ;;  %v6567_v52 = vor.u32 %v7802_v44, %v6566_v43  ;;  %v6248_v53 = vld [vmem:[%s11737_s1 + $0x28] sm:$0xf0]  ;;  %v6278_v54 = vld [vmem:[%s11737_s1 + $0x48] sm:$0xf]  ;;  %v6739_v12 = vor.u32 %v7839_v63, %v6736_v0  ;;  %v7759_v23 = vld [vmem:[%s11737_s1 + $0x154] sm:$0xf] }
  0x3c   : > { %v7730_v55 = vld [vmem:[%s11737_s1 + $0x64] sm:$0xf0]  ;;  %v7782_v57 = vld [vmem:[%s11737_s1 + $0x20c] sm:$0xf]  ;;  %v6251_v2 = vor.u32 %v7718_v50, %v6248_v53  ;;  %v6702_v31 = vld [vmem:[%s11737_s1 + $0x390] sm:$0xf] }
  0x3d   : > { %1069 = vmatpush.bf16.msrb.mxu3 %v6635_v17  ;;  %v6534_v58 = vld [vmem:[%s11737_s1 + $0x248] sm:$0xf]  ;;  %v6504_v60 = vld [vmem:[%s11737_s1 + $0x228] sm:$0xf0]  ;;  %v6279_v1 = vor.u32 %v7730_v55, %v6278_v54  ;;  %v7835_v32 = vld [vmem:[%s11737_s1 + $0x3ac] sm:$0xf0] }
  0x3e   : > { %1043 = vmatpush.bf16.msrb.mxu1 %v6631_v25  ;;  %v7794_v59 = vld [vmem:[%s11737_s1 + $0x264] sm:$0xf0]  ;;  %v6507_v7 = vor.u32 %v7782_v57, %v6504_v60  ;;  %v6707_v25 = vor.u32 %v7831_v13, %v6704_v16  ;;  %v6703_v38 = vor.u32 %v7835_v32, %v6702_v31  ;;  %v7815_v39 = vld [vmem:[%s11737_s1 + $0x314] sm:$0xf]  ;;  %v6414_v40 = vld [vmem:[%s11737_s1 + $0x150] sm:$0xf] }
  0x3f   : > { %1057 = vmatpush.bf16.msrb.mxu2 %v6347_v24  ;;  %1031 = vmatpush.bf16.msrb.mxu0 %v6343_v35  ;;  %v6535_v3 = vor.u32 %v7794_v59, %v6534_v58  ;;  %v6246_v5 = vld [vmem:[%s11737_s1 + $0x8] sm:$0xf]  ;;  %v6416_v24 = vld [vmem:[%s11737_s1 + $0x170] sm:$0xf0]  ;;  %v6670_v43 = vld [vmem:[%s11737_s1 + $0x350] sm:$0xf] }
  0x40   : > { %v7722_v6 = vld [vmem:[%s11737_s1 + $0x24] sm:$0xf0]  ;;  %v6419_v33 = vor.u32 %v7759_v23, %v6416_v24  ;;  %v7751_v35 = vld [vmem:[%s11737_s1 + $0x114] sm:$0xf]  ;;  %v7827_v44 = vld [vmem:[%s11737_s1 + $0x36c] sm:$0xf0] }
  0x41   : > { %1070 = vmatpush.bf16.msrb.mxu3 %v6603_v29  ;;  %v6502_v10 = vld [vmem:[%s11737_s1 + $0x208] sm:$0xf]  ;;  %v6247_v17 = vor.u32 %v7722_v6, %v6246_v5  ;;  %v7771_v29 = vld [vmem:[%s11737_s1 + $0x1ac] sm:$0xf0]  ;;  %v6640_v42 = vld [vmem:[%s11737_s1 + $0x330] sm:$0xf0] }
  0x42   : > { %1044 = vmatpush.bf16.msrb.mxu1 %v6599_v37  ;;  %v7786_v11 = vld [vmem:[%s11737_s1 + $0x224] sm:$0xf0]  ;;  %v6447_v34 = vor.u32 %v7771_v29, %v6446_v28  ;;  %v6675_v37 = vor.u32 %v7823_v27, %v6672_v30  ;;  %v6352_v50 = vld [vmem:[%s11737_s1 + $0xf0] sm:$0xf0]  ;;  %v6382_v54 = vld [vmem:[%s11737_s1 + $0x110] sm:$0xf] }
  0x43   : > { %1058 = vmatpush.bf16.msrb.mxu2 %v6315_v36  ;;  %1032 = vmatpush.bf16.msrb.mxu0 %v6311_v49  ;;  %v6503_v20 = vor.u32 %v7786_v11, %v6502_v10  ;;  %v6384_v36 = vld [vmem:[%s11737_s1 + $0x130] sm:$0xf0]  ;;  %v7755_v55 = vld [vmem:[%s11737_s1 + $0x12c] sm:$0xf0]  ;;  %v7776_v31 = vld [vmem:[%s11737_s1 + $0x1dc] sm:$0xf] }
  0x44   : > { %v6387_v45 = vor.u32 %v7751_v35, %v6384_v36  ;;  %v7743_v49 = vld [vmem:[%s11737_s1 + $0xd4] sm:$0xf]  ;;  %v6638_v57 = vld [vmem:[%s11737_s1 + $0x310] sm:$0xf]  ;;  %v6383_v60 = vor.u32 %v7755_v55, %v6382_v54  ;;  %v6488_v32 = vld [vmem:[%s11737_s1 + $0x1f8] sm:$0xf0] }
  0x45   : > { %1071 = vmatpush.bf16.msrb.mxu3 %v6571_v41  ;;  %v7763_v41 = vld [vmem:[%s11737_s1 + $0x16c] sm:$0xf0]  ;;  %v7807_v53 = vld [vmem:[%s11737_s1 + $0x2d4] sm:$0xf]  ;;  %v6355_v59 = vor.u32 %v7743_v49, %v6352_v50  ;;  %v7780_v49 = vld [vmem:[%s11737_s1 + $0x1f4] sm:$0xf0] }
  0x46   : > { %1045 = vmatpush.bf16.msrb.mxu1 %v6567_v52  ;;  %v6415_v46 = vor.u32 %v7763_v41, %v6414_v40  ;;  %v6671_v52 = vor.u32 %v7827_v44, %v6670_v43  ;;  %v7819_v58 = vld [vmem:[%s11737_s1 + $0x32c] sm:$0xf0]  ;;  %v7735_v61 = vld [vmem:[%s11737_s1 + $0x94] sm:$0xf]  ;;  %v6491_v43 = vor.u32 %v7776_v31, %v6488_v32  ;;  %v6456_v50 = vld [vmem:[%s11737_s1 + $0x1b8] sm:$0xf0] }
  0x47   : > { %1059 = vmatpush.bf16.msrb.mxu2 %v6283_v51  ;;  %1033 = vmatpush.bf16.msrb.mxu0 %v6279_v1  ;;  %v6643_v51 = vor.u32 %v7815_v39, %v6640_v42  ;;  %v6320_v62 = vld [vmem:[%s11737_s1 + $0xb0] sm:$0xf0]  ;;  %v6639_v0 = vor.u32 %v7819_v58, %v6638_v57  ;;  %v6606_v5 = vld [vmem:[%s11737_s1 + $0x2d0] sm:$0xf]  ;;  %v6742_v54 = vld [vmem:[%s11737_s1 + $0x3d8] sm:$0xf] }
  0x48   : > { %v7799_v1 = vld [vmem:[%s11737_s1 + $0x294] sm:$0xf]  ;;  %v7811_v6 = vld [vmem:[%s11737_s1 + $0x2ec] sm:$0xf0]  ;;  %v7844_v55 = vld [vmem:[%s11737_s1 + $0x3f4] sm:$0xf0] }
  0x49   : > { %1072 = vmatpush.bf16.msrb.mxu3 %v6539_v56  ;;  %v6608_v56 = vld [vmem:[%s11737_s1 + $0x2f0] sm:$0xf0]  ;;  %v6318_v14 = vld [vmem:[%s11737_s1 + $0x90] sm:$0xf]  ;;  %v7736_v32 = vld [vmem:[%s11737_s1 + $0x9c] sm:$0xf] }
  0x4a   : > { %1046 = vmatpush.bf16.msrb.mxu1 %v6535_v3  ;;  %v6611_v63 = vor.u32 %v7807_v53, %v6608_v56  ;;  %v7747_v3 = vld [vmem:[%s11737_s1 + $0xec] sm:$0xf0]  ;;  %v6576_v4 = vld [vmem:[%s11737_s1 + $0x2b0] sm:$0xf0]  ;;  %s11804_s24 = smov 57   ;;  %s11782_s25 = smov 64  }
  0x4b   : > { %1060 = vmatpush.bf16.msrb.mxu2 %v6251_v2  ;;  %1034 = vmatpush.bf16.msrb.mxu0 %v6247_v17  ;;  %v6350_v2 = vld [vmem:[%s11737_s1 + $0xd0] sm:$0xf]  ;;  %v7727_v9 = vld [vmem:[%s11737_s1 + $0x54] sm:$0xf]  ;;  %v6579_v11 = vor.u32 %v7799_v1, %v6576_v4  ;;  %v7824_v1 = vld [vmem:[%s11737_s1 + $0x35c] sm:$0xf] }
  0x4c   : > { %v6288_v10 = vld [vmem:[%s11737_s1 + $0x70] sm:$0xf0]  ;;  %v7739_v15 = vld [vmem:[%s11737_s1 + $0xac] sm:$0xf0]  ;;  %v7836_v4 = vld [vmem:[%s11737_s1 + $0x3b4] sm:$0xf0] }
  0x4d   : > { %1073 = vmatpush.bf16.msrb.mxu3 %v6507_v7  ;;  %v6323_v7 = vor.u32 %v7735_v61, %v6320_v62  ;;  %v7791_v13 = vld [vmem:[%s11737_s1 + $0x254] sm:$0xf]  ;;  %v6574_v17 = vld [vmem:[%s11737_s1 + $0x290] sm:$0xf]  ;;  %v6291_v19 = vor.u32 %v7727_v9, %v6288_v10  ;;  %v6454_v61 = vld [vmem:[%s11737_s1 + $0x198] sm:$0xf] }
  0x4e   : > { %1061 = vmatmul.bf16.vlgmr.msrb.gmra.mxu2 %v8446_v47  ;;  %1047 = vmatpush.bf16.msrb.mxu1 %v6503_v20  ;;  %v6544_v16 = vld [vmem:[%s11737_s1 + $0x270] sm:$0xf0]  ;;  %v7803_v18 = vld [vmem:[%s11737_s1 + $0x2ac] sm:$0xf0]  ;;  %v6319_v20 = vor.u32 %v7739_v15, %v6318_v14  ;;  %v7772_v62 = vld [vmem:[%s11737_s1 + $0x1b4] sm:$0xf0] }
  0x4f   : > { %1105 = vmatpush.bf16.msra.mxu2 %v6483_v8  ;;  %1079 = vmatpush.bf16.msra.mxu0 %v6479_v22  ;;  %v6351_v8 = vor.u32 %v7747_v3, %v6350_v2  ;;  %v6256_v22 = vld [vmem:[%s11737_s1 + $0x30] sm:$0xf0]  ;;  %v6547_v24 = vor.u32 %v7791_v13, %v6544_v16  ;;  %v6286_v27 = vld [vmem:[%s11737_s1 + $0x50] sm:$0xf]  ;;  %v6680_v2 = vld [vmem:[%s11737_s1 + $0x378] sm:$0xf0] }
  0x50   : > { %1074 = vmatmul.bf16.vlgmr.msrb.gmra.mxu3 %v8448_v48  ;;  %1035 = vmatmul.bf16.vlgmr.msrb.gmra.mxu0 %v8446_v47  ;;  %v7783_v23 = vld [vmem:[%s11737_s1 + $0x214] sm:$0xf]  ;;  %v7731_v28 = vld [vmem:[%s11737_s1 + $0x6c] sm:$0xf0]  ;;  %v6710_v3 = vld [vmem:[%s11737_s1 + $0x398] sm:$0xf] }
  0x51   : > { %1118 = vmatpush.bf16.msra.mxu3 %v6739_v12  ;;  %1048 = vmatmul.bf16.vlgmr.msrb.gmra.mxu1 %v8448_v48  ;;  %v6607_v12 = vor.u32 %v7811_v6, %v6606_v5  ;;  %v6542_v29 = vld [vmem:[%s11737_s1 + $0x250] sm:$0xf]  ;;  %v6287_v36 = vor.u32 %v7731_v28, %v6286_v27  ;;  %v6455_v5 = vor.u32 %v7772_v62, %v6454_v61  ;;  %v6422_v9 = vld [vmem:[%s11737_s1 + $0x158] sm:$0xf]  ;;  %v7816_v13 = vld [vmem:[%s11737_s1 + $0x31c] sm:$0xf] }
  0x52   : > { %1092 = vmatpush.bf16.msra.mxu1 %v6735_v26  ;;  %v6512_v26 = vld [vmem:[%s11737_s1 + $0x230] sm:$0xf0]  ;;  %v7795_v30 = vld [vmem:[%s11737_s1 + $0x26c] sm:$0xf0]  ;;  %v7764_v10 = vld [vmem:[%s11737_s1 + $0x174] sm:$0xf0] }
  0x53   : > { %1106 = vmatpush.bf16.msra.mxu2 %v6451_v21  ;;  %1080 = vmatpush.bf16.msra.mxu0 %v6447_v34  ;;  %v7719_v21 = vld [vmem:[%s11737_s1 + $0x14] sm:$0xf]  ;;  %v6744_v34 = vld [vmem:[%s11737_s1 + $0x3f8] sm:$0xf0]  ;;  %v6543_v39 = vor.u32 %v7795_v30, %v6542_v29  ;;  %v7723_v40 = vld [vmem:[%s11737_s1 + $0x2c] sm:$0xf0] }
  0x54   : > { %v6259_v35 = vor.u32 %v7719_v21, %v6256_v22  ;;  %v6510_v41 = vld [vmem:[%s11737_s1 + $0x210] sm:$0xf]  ;;  %v6648_v14 = vld [vmem:[%s11737_s1 + $0x338] sm:$0xf0]  ;;  %v6678_v15 = vld [vmem:[%s11737_s1 + $0x358] sm:$0xf] }
  0x55   : > { %1119 = vmatpush.bf16.msra.mxu3 %v6707_v25  ;;  %v6575_v25 = vor.u32 %v7803_v18, %v6574_v17  ;;  %v7787_v42 = vld [vmem:[%s11737_s1 + $0x22c] sm:$0xf0]  ;;  %v7828_v16 = vld [vmem:[%s11737_s1 + $0x374] sm:$0xf0]  ;;  %v6423_v17 = vor.u32 %v7764_v10, %v6422_v9  ;;  %v6264_v62 = vld [vmem:[%s11737_s1 + $0x38] sm:$0xf0] }
  0x56   : > { %1093 = vmatpush.bf16.msra.mxu1 %v6703_v38  ;;  %v6515_v38 = vor.u32 %v7783_v23, %v6512_v26  ;;  %v6511_v56 = vor.u32 %v7787_v42, %v6510_v41  ;;  %v6390_v21 = vld [vmem:[%s11737_s1 + $0x118] sm:$0xf]  ;;  %v6679_v23 = vor.u32 %v7828_v16, %v6678_v15  ;;  %v6616_v26 = vld [vmem:[%s11737_s1 + $0x2f8] sm:$0xf0]  ;;  %s11795_s26 = smov 62   ;;  %s11772_s27 = smov 63  }
  0x57   : > { %1107 = vmatpush.bf16.msra.mxu2 %v6419_v33  ;;  %1081 = vmatpush.bf16.msra.mxu0 %v6415_v46  ;;  %v7840_v33 = vld [vmem:[%s11737_s1 + $0x3dc] sm:$0xf]  ;;  %v6486_v46 = vld [vmem:[%s11737_s1 + $0x1d8] sm:$0xf]  ;;  %vm1438_vm1 = vcmask 990208   ;;  %vm1402_vm2 = vcmask 998400  }
  0x58   : > { %v6747_v44 = vor.u32 %v7840_v33, %v6744_v34  ;;  %v6487_v57 = vor.u32 %v7780_v49, %v6486_v46  ;;  %v7756_v22 = vld [vmem:[%s11737_s1 + $0x134] sm:$0xf0]  ;;  %vm1366_vm3 = vcmask 1006592   ;;  %vm1222_vm4 = vcmask 1039360   ;;  %s11811_s28 = smov 26  }
  0x59   : > { %1120 = vmatpush.bf16.msra.mxu3 %v6675_v37  ;;  %v6254_v37 = vld [vmem:[%s11737_s1 + $0x10] sm:$0xf]  ;;  %v6646_v27 = vld [vmem:[%s11737_s1 + $0x318] sm:$0xf]  ;;  %v6391_v29 = vor.u32 %v7756_v22, %v6390_v21  ;;  %vm1723_vm5 = vcmask 736256   ;;  %vm1294_vm6 = vcmask 1022976  }
  0x5a   : > { %1094 = vmatpush.bf16.msra.mxu1 %v6671_v52  ;;  %v6712_v52 = vld [vmem:[%s11737_s1 + $0x3b8] sm:$0xf0]  ;;  %v6255_v53 = vor.u32 %v7723_v40, %v6254_v37  ;;  %v7820_v28 = vld [vmem:[%s11737_s1 + $0x334] sm:$0xf0]  ;;  %vm11768_vm7 = vcmask 1014784   ;;  %vm11813_vm8 = vcmask 777216  }
  0x5b   : > { %1108 = vmatpush.bf16.msra.mxu2 %v6387_v45  ;;  %1082 = vmatpush.bf16.msra.mxu0 %v6383_v60  ;;  %v7768_v45 = vld [vmem:[%s11737_s1 + $0x19c] sm:$0xf]  ;;  %v6358_v33 = vld [vmem:[%s11737_s1 + $0xd8] sm:$0xf]  ;;  %vm11754_vm9 = vcmask 744448   ;;  %vm1258_vm10 = vcmask 1031168  }
  0x5c   : > { %v6459_v58 = vor.u32 %v7768_v45, %v6456_v50  ;;  %v7760_v60 = vld [vmem:[%s11737_s1 + $0x15c] sm:$0xf]  ;;  %v7748_v34 = vld [vmem:[%s11737_s1 + $0xf4] sm:$0xf0]  ;;  %vm11762_vm11 = vcmask 474112   ;;  %vm11743_vm12 = vcmask 760832  }
  0x5d   : > { %1121 = vmatpush.bf16.msra.mxu3 %v6643_v51  ;;  %v7832_v51 = vld [vmem:[%s11737_s1 + $0x39c] sm:$0xf]  ;;  %v7812_v40 = vld [vmem:[%s11737_s1 + $0x2f4] sm:$0xf0]  ;;  %v6359_v41 = vor.u32 %v7748_v34, %v6358_v33  ;;  %vm1759_vm13 = vcmask 728064   ;;  %vm11753_vm14 = vcmask 482304  }
  0x5e   : > { %1095 = vmatpush.bf16.msra.mxu1 %v6639_v0  ;;  %v6424_v0 = vld [vmem:[%s11737_s1 + $0x178] sm:$0xf0]  ;;  %v6326_v45 = vld [vmem:[%s11737_s1 + $0x98] sm:$0xf]  ;;  %vm11752_vm15 = vcmask 785408  }
  0x5f   : > { %1109 = vmatpush.bf16.msra.mxu2 %v6355_v59  ;;  %1083 = vmatpush.bf16.msra.mxu0 %v6351_v8  ;;  %v6715_v59 = vor.u32 %v7832_v51, %v6712_v52  ;;  %v6427_v6 = vor.u32 %v7760_v60, %v6424_v0  ;;  %v7752_v8 = vld [vmem:[%s11737_s1 + $0x11c] sm:$0xf]  ;;  %v7740_v46 = vld [vmem:[%s11737_s1 + $0xb4] sm:$0xf0] }
  0x60   : > { %v7800_v37 = vld [vmem:[%s11737_s1 + $0x29c] sm:$0xf]  ;;  %v7732_v60 = vld [vmem:[%s11737_s1 + $0x74] sm:$0xf0] }
  0x61   : > { %1122 = vmatpush.bf16.msra.mxu3 %v6611_v63  ;;  %v6743_v63 = vor.u32 %v7844_v55, %v6742_v54  ;;  %v6296_v50 = vld [vmem:[%s11737_s1 + $0x78] sm:$0xf0]  ;;  %v7804_v54 = vld [vmem:[%s11737_s1 + $0x2b4] sm:$0xf0]  ;;  %v6327_v55 = vor.u32 %v7740_v46, %v6326_v45 }
  0x62   : > { %1096 = vmatpush.bf16.msra.mxu1 %v6607_v12  ;;  %v6392_v12 = vld [vmem:[%s11737_s1 + $0x138] sm:$0xf0]  ;;  %v6518_v9 = vld [vmem:[%s11737_s1 + $0x218] sm:$0xf] }
  0x63   : > { %1110 = vmatpush.bf16.msra.mxu2 %v6323_v7  ;;  %1084 = vmatpush.bf16.msra.mxu0 %v6319_v20  ;;  %v6683_v7 = vor.u32 %v7824_v1, %v6680_v2  ;;  %v6395_v18 = vor.u32 %v7752_v8, %v6392_v12  ;;  %v7744_v20 = vld [vmem:[%s11737_s1 + $0xdc] sm:$0xf]  ;;  %v6550_v1 = vld [vmem:[%s11737_s1 + $0x258] sm:$0xf] }
  0x64   : > { %v7792_v51 = vld [vmem:[%s11737_s1 + $0x25c] sm:$0xf]  ;;  %v7796_v2 = vld [vmem:[%s11737_s1 + $0x274] sm:$0xf0] }
  0x65   : > { %1123 = vmatpush.bf16.msra.mxu3 %v6579_v11  ;;  %v6711_v11 = vor.u32 %v7836_v4, %v6710_v3  ;;  %v6552_v52 = vld [vmem:[%s11737_s1 + $0x278] sm:$0xf0]  ;;  %v7724_v8 = vld [vmem:[%s11737_s1 + $0x34] sm:$0xf0] }
  0x66   : > { %1097 = vmatpush.bf16.msra.mxu1 %v6575_v25  ;;  %v7808_v25 = vld [vmem:[%s11737_s1 + $0x2dc] sm:$0xf]  ;;  %v7788_v10 = vld [vmem:[%s11737_s1 + $0x234] sm:$0xf0] }
  0x67   : > { %1111 = vmatpush.bf16.msra.mxu2 %v6291_v19  ;;  %1085 = vmatpush.bf16.msra.mxu0 %v6287_v36  ;;  %v6651_v19 = vor.u32 %v7816_v13, %v6648_v14  ;;  %v6619_v31 = vor.u32 %v7808_v25, %v6616_v26  ;;  %v6328_v36 = vld [vmem:[%s11737_s1 + $0xb8] sm:$0xf0]  ;;  %v6519_v12 = vor.u32 %v7788_v10, %v6518_v9  ;;  %v8170_v10 = vmov 0  }
  0x68   : > { %v6331_v42 = vor.u32 %v7736_v32, %v6328_v36  ;;  %v6520_v0 = vld [vmem:[%s11737_s1 + $0x238] sm:$0xf0]  ;;  %1191 = vst [vmem:[#allocation2 + $0x20] sm:$0xf] %v8170_v10  ;;  %8118 = vset.pattern.permute.xlu2 %v8170_v10 }
  0x69   : > { %1124 = vmatpush.bf16.msra.mxu3 %v6547_v24  ;;  %v6360_v24 = vld [vmem:[%s11737_s1 + $0xf8] sm:$0xf0] }
  0x6a   : > { %1098 = vmatpush.bf16.msra.mxu1 %v6543_v39  ;;  %v6363_v30 = vor.u32 %v7744_v20, %v6360_v24  ;;  %v6614_v39 = vld [vmem:[%s11737_s1 + $0x2d8] sm:$0xf] }
  0x6b   : > { %1112 = vmatpush.bf16.msra.mxu2 %v6259_v35  ;;  %1086 = vmatpush.bf16.msra.mxu0 %v6255_v53  ;;  %v6647_v35 = vor.u32 %v7820_v28, %v6646_v27  ;;  %v6615_v49 = vor.u32 %v7812_v40, %v6614_v39  ;;  %v6582_v53 = vld [vmem:[%s11737_s1 + $0x298] sm:$0xf] }
  0x6c   : > { %v6583_v61 = vor.u32 %v7804_v54, %v6582_v53 }
  0x6d   : > { %1125 = vmatpush.bf16.msra.mxu3 %v6515_v38  ;;  %v6584_v38 = vld [vmem:[%s11737_s1 + $0x2b8] sm:$0xf0] }
  0x6e   : > { %1113 = vmatmul.bf16.vlgmr.msra.gmra.mxu2 %v8446_v47  ;;  %1099 = vmatpush.bf16.msra.mxu1 %v6511_v56 }
  0x6f   : > { %1157 = vmatpush.bf16.msrb.mxu2 %v6491_v43  ;;  %1131 = vmatpush.bf16.msrb.mxu0 %v6487_v57  ;;  %v6587_v43 = vor.u32 %v7800_v37, %v6584_v38  ;;  %v6555_v57 = vor.u32 %v7792_v51, %v6552_v52 }
  0x70   : > { %1126 = vmatmul.bf16.vlgmr.msra.gmra.mxu3 %v8448_v48  ;;  %1087 = vmatmul.bf16.vlgmr.msra.gmra.mxu0 %v8446_v47 }
  0x71   : > { %1170 = vmatpush.bf16.msrb.mxu3 %v6747_v44  ;;  %1100 = vmatmul.bf16.vlgmr.msra.gmra.mxu1 %v8448_v48  ;;  %v7728_v44 = vld [vmem:[%s11737_s1 + $0x5c] sm:$0xf] }
  0x72   : > { %1144 = vmatpush.bf16.msrb.mxu1 %v6743_v63  ;;  %v6299_v56 = vor.u32 %v7728_v44, %v6296_v50  ;;  %v7784_v63 = vld [vmem:[%s11737_s1 + $0x21c] sm:$0xf] }
  0x73   : > { %1158 = vmatpush.bf16.msrb.mxu2 %v6459_v58  ;;  %1132 = vmatpush.bf16.msrb.mxu0 %v6455_v5  ;;  %v7720_v58 = vld [vmem:[%s11737_s1 + $0x1c] sm:$0xf]  ;;  %v6523_v5 = vor.u32 %v7784_v63, %v6520_v0 }
  0x74   : > { %v6267_v4 = vor.u32 %v7720_v58, %v6264_v62 }
  0x75   : > { %1171 = vmatpush.bf16.msrb.mxu3 %v6715_v59  ;;  %v6294_v59 = vld [vmem:[%s11737_s1 + $0x58] sm:$0xf] }
  0x76   : > { %1145 = vmatpush.bf16.msrb.mxu1 %v6711_v11  ;;  %v6295_v3 = vor.u32 %v7732_v60, %v6294_v59 }
  0x77   : > { %1159 = vmatpush.bf16.msrb.mxu2 %v6427_v6  ;;  %1133 = vmatpush.bf16.msrb.mxu0 %v6423_v17  ;;  %v6551_v6 = vor.u32 %v7796_v2, %v6550_v1 }
  0x79   : > { %1172 = vmatpush.bf16.msrb.mxu3 %v6683_v7  ;;  %v6262_v7 = vld [vmem:[%s11737_s1 + $0x18] sm:$0xf] }
  0x7a   : > { %1146 = vmatpush.bf16.msrb.mxu1 %v6679_v23  ;;  %v6263_v11 = vor.u32 %v7724_v8, %v6262_v7 }
  0x7b   : > { %1160 = vmatpush.bf16.msrb.mxu2 %v6395_v18  ;;  %1134 = vmatpush.bf16.msrb.mxu0 %v6391_v29 }
  0x7d   : > { %1173 = vmatpush.bf16.msrb.mxu3 %v6651_v19 }
  0x7e   : > { %1147 = vmatpush.bf16.msrb.mxu1 %v6647_v35 }
  0x7f   : > { %1161 = vmatpush.bf16.msrb.mxu2 %v6363_v30  ;;  %1135 = vmatpush.bf16.msrb.mxu0 %v6359_v41 }
  0x81   : > { %1174 = vmatpush.bf16.msrb.mxu3 %v6619_v31 }
  0x82   : > { %1148 = vmatpush.bf16.msrb.mxu1 %v6615_v49 }
  0x83   : > { %1162 = vmatpush.bf16.msrb.mxu2 %v6331_v42  ;;  %1136 = vmatpush.bf16.msrb.mxu0 %v6327_v55 }
  0x85   : > { %1175 = vmatpush.bf16.msrb.mxu3 %v6587_v43 }
  0x86   : > { %1149 = vmatpush.bf16.msrb.mxu1 %v6583_v61 }
  0x87   : > { %1163 = vmatpush.bf16.msrb.mxu2 %v6299_v56  ;;  %1137 = vmatpush.bf16.msrb.mxu0 %v6295_v3 }
  0x89   : > { %1176 = vmatpush.bf16.msrb.mxu3 %v6555_v57 }
  0x8a   : > { %1150 = vmatpush.bf16.msrb.mxu1 %v6551_v6 }
  0x8b   : > { %1164 = vmatpush.bf16.msrb.mxu2 %v6267_v4  ;;  %1138 = vmatpush.bf16.msrb.mxu0 %v6263_v11 }
  0x8d   : > { %1177 = vmatpush.bf16.msrb.mxu3 %v6523_v5 }
  0x8e   : > { %1165 = vmatmul.bf16.vlgmr.msrb.gmra.mxu2 %v8446_v47  ;;  %1151 = vmatpush.bf16.msrb.mxu1 %v6519_v12 }
  0x8f   : > { %1139 = vmatmul.bf16.vlgmr.msrb.gmra.mxu0 %v8446_v47 }
  0x90   : > { %1178 = vmatmul.bf16.vlgmr.msrb.gmra.mxu3 %v8448_v48 }
  0x91   : > { %1152 = vmatmul.bf16.vlgmr.msrb.gmra.mxu1 %v8448_v48 }
  0xad   : > { %v984_v13 = vpop.f32.mrf.mxu0  ;;  %v997_v14 = vpop.f32.mrf.mxu1 }
  0xae   : > { %v998_v15 = vadd.f32 %v997_v14, %v984_v13 }
  0xb4   : > { %v1010_v16 = vpop.f32.mrf.mxu2 }
  0xb5   : > { %v1023_v17 = vpop.f32.mrf.mxu3  ;;  %v986_v18 = vpop.f32.mrf.mxu0 }
  0xb6   : > { %v1024_v19 = vadd.f32 %v1023_v17, %v1010_v16  ;;  %v999_v20 = vpop.f32.mrf.mxu1 }
  0xb8   : > { %v9012_v21 = vpack.c.bf16 %v1024_v19, %v998_v15 }
  0xba   : > { %1187 = vst [vmem:[#allocation2] sm:$0xff] %v9012_v21  ;;  %1425 = vrot.lane.b32.xlu2 %v9012_v21, %s8147_s29  ;;  %1389 = vrot.lane.b32.xlu1 %v9012_v21, %s8148_s30 }
  0xbb   : > { %1208 = vrot.lane.b32.xlu0 %v9012_v21, %s8149_s5  ;;  %1196 = vst [vmem:[#allocation3] sm:$0xff] %v9012_v21 }
  0xbc   : > { %v1012_v47 = vpop.f32.mrf.mxu2 }
  0xbd   : > { %v1025_v48 = vpop.f32.mrf.mxu3 }
  0xc2   : > { %1353 = vrot.lane.b32.xlu2 %v9012_v21, %s8150_s6  ;;  %1317 = vrot.lane.b32.xlu1 %v9012_v21, %s8151_s7 }
  0xc3   : > { %1281 = vrot.lane.b32.xlu0 %v9012_v21, %s8152_s8 }
  0xca   : > { %1710 = vrot.lane.b32.xlu1 %v9012_v21, %s8153_s9  ;;  %1245 = vrot.lane.b32.xlu2 %v9012_v21, %s8154_s10 }
  0xcb   : > { %1566 = vrot.lane.b32.xlu0 %v9012_v21, %s8155_s11 }
  0xcd   : > { %v1036_v23 = vpop.f32.mrf.mxu0 }
  0xce   : > { %v1049_v22 = vpop.f32.mrf.mxu1 }
  0xcf   : > { %v1050_v25 = vadd.f32 %v1049_v22, %v1036_v23 }
  0xd1   : > { %v1062_v24 = vpop.f32.mrf.mxu2 }
  0xd2   : > { %1638 = vrot.lane.b32.xlu1 %v9012_v21, %s8156_s12  ;;  %1746 = vrot.lane.b32.xlu2 %v9012_v21, %s8157_s13 }
  0xd3   : > { %v1075_v26 = vpop.f32.mrf.mxu3  ;;  %1530 = vrot.lane.b32.xlu0 %v9012_v21, %s8158_s14 }
  0xd4   : > { %v1076_v27 = vadd.f32 %v1075_v26, %v1062_v24 }
  0xd5   : > { %v1038_v29 = vpop.f32.mrf.mxu0 }
  0xd6   : > { %v9040_v28 = vpack.c.bf16 %v1076_v27, %v1050_v25  ;;  %v1051_v30 = vpop.f32.mrf.mxu1 }
  0xd8   : > { %1188 = vst [vmem:[#allocation2 + $0x8] sm:$0xff] %v9040_v28 }
  0xd9   : > { %v1064_v31 = vpop.f32.mrf.mxu2 }
  0xda   : > { %1602 = vrot.lane.b32.xlu1 %v9012_v21, %s8159_s17  ;;  %1674 = vrot.lane.b32.xlu2 %v9012_v21, %s8160_s18 }
  0xdb   : > { %v1077_v32 = vpop.f32.mrf.mxu3  ;;  %2509 = vrot.lane.b32.xlu0 %v9012_v21, %s8161_s19 }
  0xdf   : > { %v9049_v33 = vld [vmem:[#allocation2 + $0x8] sm:$0xff] }
  0xe0   : > { %1197 = vst [vmem:[#allocation3 + $0x8] sm:$0xff] %v9049_v33 }
  0xe2   : > { %2437 = vrot.lane.b32.xlu1 %v9012_v21, %s11802_s20  ;;  %1494 = vrot.lane.b32.xlu2 %v9012_v21, %s8163_s21 }
  0xe3   : > { %2473 = vrot.lane.b32.xlu0 %v9012_v21, %s11800_s22 }
  0xea   : > { %2401 = vrot.lane.b32.xlu1 %v9012_v21, %s11789_s23  ;;  %2545 = vrot.lane.b32.xlu2 %v9012_v21, %s11804_s24 }
  0xeb   : > { %2293 = vrot.lane.b32.xlu0 %v9012_v21, %s11782_s25 }
  0xed   : > { %v1088_v34 = vpop.f32.mrf.mxu0 }
  0xee   : > { %v1101_v35 = vpop.f32.mrf.mxu1 }
  0xef   : > { %v1102_v36 = vadd.f32 %v1101_v35, %v1088_v34 }
  0xf1   : > { %v1114_v37 = vpop.f32.mrf.mxu2 }
  0xf2   : > { %2365 = vrot.lane.b32.xlu2 %v9012_v21, %s11795_s26  ;;  %1391 = vrot.lane.b32.xlu1 %v9040_v28, %s8148_s30 }
  0xf3   : > { %v1127_v38 = vpop.f32.mrf.mxu3  ;;  %1210 = vrot.lane.b32.xlu0 %v9040_v28, %s8149_s5 }
  0xf4   : > { %v1128_v39 = vadd.f32 %v1127_v38, %v1114_v37 }
  0xf5   : > { %v1090_v41 = vpop.f32.mrf.mxu0 }
  0xf6   : > { %v9064_v40 = vpack.c.bf16 %v1128_v39, %v1102_v36  ;;  %v1103_v42 = vpop.f32.mrf.mxu1 }
  0xf8   : > { %1189 = vst [vmem:[#allocation2 + $0x10] sm:$0xff] %v9064_v40 }
  0xf9   : > { %v1116_v43 = vpop.f32.mrf.mxu2 }
  0xfa   : > { %2329 = vrot.lane.b32.xlu2 %v9012_v21, %s11772_s27  ;;  %1712 = vrot.lane.b32.xlu1 %v9040_v28, %s8153_s9 }
  0xfb   : > { %v1129_v44 = vpop.f32.mrf.mxu3  ;;  %1319 = vrot.lane.b32.xlu0 %v9040_v28, %s8151_s7 }
  0xff   : > { %v9091_v49 = vld [vmem:[#allocation2 + $0x10] sm:$0xff] }
 0x100   : > { %1198 = vst [vmem:[#allocation3 + $0x10] sm:$0xff] %v9091_v49 }
 0x102   : > { %1427 = vrot.lane.b32.xlu2 %v9040_v28, %s8147_s29  ;;  %1532 = vrot.lane.b32.xlu1 %v9040_v28, %s8158_s14 }
 0x103   : > { %1247 = vrot.lane.b32.xlu0 %v9040_v28, %s8154_s10 }
 0x10a   : > { %2511 = vrot.lane.b32.xlu1 %v9040_v28, %s8161_s19  ;;  %1355 = vrot.lane.b32.xlu2 %v9040_v28, %s8150_s6 }
 0x10b   : > { %1748 = vrot.lane.b32.xlu0 %v9040_v28, %s8157_s13 }
 0x10c   : > { %v1140_v45 = vpop.f32.mrf.mxu0 }
 0x10e   : > { %v1153_v46 = vpop.f32.mrf.mxu1 }
 0x10f   : > { %v1154_v50 = vadd.f32 %v1153_v46, %v1140_v45 }
 0x111   : > { %v1166_v51 = vpop.f32.mrf.mxu2 }
 0x112   : > { %2475 = vrot.lane.b32.xlu1 %v9040_v28, %s11800_s22  ;;  %1283 = vrot.lane.b32.xlu2 %v9040_v28, %s8152_s8 }
 0x113   : > { %v1179_v52 = vpop.f32.mrf.mxu3  ;;  %1640 = vrot.lane.b32.xlu0 %v9040_v28, %s8156_s12 }
 0x114   : > { %v1180_v53 = vadd.f32 %v1179_v52, %v1166_v51  ;;  %v1142_v55 = vpop.f32.mrf.mxu0  ;;  %v9103_v57 = vpop.permute.xlu2 %1425 }
 0x115   : > { %v1433_v20 = vrot.slane %v9103_v57, 4 }
 0x116   : > { %v9094_v54 = vpack.c.bf16 %v1180_v53, %v1154_v50  ;;  %v1155_v56 = vpop.f32.mrf.mxu1 }
 0x118   : > { %1190 = vst [vmem:[#allocation2 + $0x18] sm:$0xff] %v9094_v54 }
 0x119   : > { %v1168_v58 = vpop.f32.mrf.mxu2 }
 0x11a   : > { %2295 = vrot.lane.b32.xlu1 %v9040_v28, %s11782_s25  ;;  %1676 = vrot.lane.b32.xlu2 %v9040_v28, %s8160_s18 }
 0x11b   : > { %v1181_v59 = vpop.f32.mrf.mxu3  ;;  %1568 = vrot.lane.b32.xlu0 %v9040_v28, %s8155_s11 }
 0x11c   : > { %v9111_v60 = vpop.permute.xlu2 %1353 }
 0x11d   : > { %v1361_v24 = vrot.slane %v9111_v60, 4 }
 0x11f   : > { %v1195_v14 = vld [vmem:[#allocation2 + $0x18] sm:$0xf] }
 0x120   : > { %1199 = vst [vmem:[#allocation3 + $0x18] sm:$0xf] %v1195_v14 }
 0x122   : > { %1604 = vrot.lane.b32.xlu2 %v9040_v28, %s8159_s17  ;;  %1212 = vrot.lane.b32.xlu1 %v9064_v40, %s8149_s5 }
 0x123   : > { %2547 = vrot.lane.b32.xlu0 %v9040_v28, %s11804_s24 }
 0x124   : > { %v9119_v61 = vpop.permute.xlu2 %1245 }
 0x12a   : > { %1496 = vrot.lane.b32.xlu2 %v9040_v28, %s8163_s21  ;;  %1321 = vrot.lane.b32.xlu1 %v9064_v40, %s8151_s7 }
 0x12b   : > { %2367 = vrot.lane.b32.xlu0 %v9040_v28, %s11795_s26 }
 0x12c   : > { %v9127_v62 = vpop.permute.xlu1 %1389  ;;  %v9129_v63 = vpop.permute.xlu2 %1746 }
 0x12d   : > { %v9131_v0 = vpop.permute.xlu0 %1208  ;;  %v1397_v25 = vrot.slane %v9127_v62, 4 }
 0x12e   : > { %v1216_v32 = vrot.slane %v9131_v0, 4 }
 0x132   : > { %2439 = vrot.lane.b32.xlu2 %v9040_v28, %s11802_s20  ;;  %1249 = vrot.lane.b32.xlu1 %v9064_v40, %s8154_s10 }
 0x133   : > { %2331 = vrot.lane.b32.xlu0 %v9040_v28, %s11772_s27 }
 0x134   : > { %v9139_v1 = vpop.permute.xlu1 %1317  ;;  %v9141_v2 = vpop.permute.xlu2 %1674 }
 0x135   : > { %v9143_v3 = vpop.permute.xlu0 %1281  ;;  %v1325_v52 = vrot.slane %v9139_v1, 4 }
 0x136   : > { %v1289_v42 = vrot.slane %v9143_v3, 4 }
 0x13a   : > { %2403 = vrot.lane.b32.xlu2 %v9040_v28, %s11789_s23  ;;  %1750 = vrot.lane.b32.xlu1 %v9064_v40, %s8157_s13 }
 0x13b   : > { %1429 = vrot.lane.b32.xlu0 %v9064_v40, %s8147_s29 }
 0x13c   : > { %v9151_v4 = vpop.permute.xlu1 %1710  ;;  %v9153_v5 = vpop.permute.xlu2 %1494 }
 0x13d   : > { %v9155_v6 = vpop.permute.xlu0 %1566  ;;  %v1718_v43 = vrot.slane %v9151_v4, 4 }
 0x142   : > { %1393 = vrot.lane.b32.xlu2 %v9064_v40, %s8148_s30  ;;  %1642 = vrot.lane.b32.xlu1 %v9064_v40, %s8156_s12 }
 0x143   : > { %1357 = vrot.lane.b32.xlu0 %v9064_v40, %s8150_s6 }
 0x144   : > { %v9163_v7 = vpop.permute.xlu1 %1638  ;;  %v9165_v8 = vpop.permute.xlu2 %2545 }
 0x145   : > { %v9167_v9 = vpop.permute.xlu0 %1530 }
 0x14a   : > { %1714 = vrot.lane.b32.xlu2 %v9064_v40, %s8153_s9  ;;  %1570 = vrot.lane.b32.xlu1 %v9064_v40, %s8155_s11 }
 0x14b   : > { %1285 = vrot.lane.b32.xlu0 %v9064_v40, %s8152_s8 }
 0x14c   : > { %v9175_v11 = vpop.permute.xlu1 %1602  ;;  %v9177_v12 = vpop.permute.xlu2 %2365 }
 0x14d   : > { %v9179_v13 = vpop.permute.xlu0 %2509 }
 0x152   : > { %1534 = vrot.lane.b32.xlu2 %v9064_v40, %s8158_s14  ;;  %2513 = vrot.lane.b32.xlu1 %v9064_v40, %s8161_s19 }
 0x153   : > { %1678 = vrot.lane.b32.xlu0 %v9064_v40, %s8160_s18 }
 0x154   : > { %v9187_v15 = vpop.permute.xlu1 %2437  ;;  %v9189_v16 = vpop.permute.xlu2 %2329 }
 0x155   : > { %v9191_v17 = vpop.permute.xlu0 %2473 }
 0x15a   : > { %2441 = vrot.lane.b32.xlu2 %v9064_v40, %s11802_s20  ;;  %2477 = vrot.lane.b32.xlu1 %v9064_v40, %s11800_s22 }
 0x15b   : > { %1606 = vrot.lane.b32.xlu0 %v9064_v40, %s8159_s17 }
 0x15c   : > { %v9199_v18 = vpop.permute.xlu1 %2401  ;;  %v9201_v19 = vpop.permute.xlu2 %1427 }
 0x15d   : > { %v9204_v47 = vpop.permute.xlu0 %2293  ;;  %v11748_v48 = vrot.slane %v9201_v19, 4 }
 0x15f   : > { %v1437_v22 = vsel %vm1220_vm0, %v1433_v20, %v11748_v48  ;;  %v1682_v20 = vrot.slane %v9141_v2, 4 }
 0x160   : > { %v1439_v23 = vsel %vm1438_vm1, %v9103_v57, %v1437_v22  ;;  %v1538_v22 = vrot.slane %v9167_v9, 4 }
 0x161   : > { %1449 = vst [vmem:[#allocation3 + $0xc4] sm:$0xff] %v1439_v23 }
 0x162   : > { %2405 = vrot.lane.b32.xlu2 %v9064_v40, %s11789_s23  ;;  %1395 = vrot.lane.b32.xlu1 %v9094_v54, %s8148_s30 }
 0x163   : > { %1498 = vrot.lane.b32.xlu0 %v9064_v40, %s8163_s21 }
 0x164   : > { %v9220_v26 = vpop.permute.xlu1 %1391  ;;  %v9222_v27 = vpop.permute.xlu2 %1355 }
 0x165   : > { %v11759_v29 = vrot.slane %v9220_v26, 4  ;;  %v11746_v30 = vrot.slane %v9222_v27, 4  ;;  %v9226_v31 = vpop.permute.xlu0 %1210 }
 0x166   : > { %v1217_v34 = vrot.slane %v9226_v31, 4 }
 0x167   : > { %v1401_v35 = vsel %vm1220_vm0, %v1397_v25, %v11759_v29  ;;  %v1365_v36 = vsel %vm1220_vm0, %v1361_v24, %v11746_v30 }
 0x168   : > { %v1403_v37 = vsel %vm1402_vm2, %v9127_v62, %v1401_v35  ;;  %v1367_v38 = vsel %vm1366_vm3, %v9111_v60, %v1365_v36  ;;  %v1221_v39 = vsel %vm1220_vm0, %v1216_v32, %v1217_v34  ;;  %v1253_v36 = vrot.slane %v9119_v61, 4 }
 0x169   : > { %1413 = vst [vmem:[#allocation3 + $0xa8] sm:$0xff] %v1403_v37  ;;  %v1223_v41 = vsel %vm1222_vm4, %v9131_v0, %v1221_v39  ;;  %v9280_v0 = vld [vmem:[#allocation3 + $0xc0] sm:$0xf0] }
 0x16a   : > { %1377 = vst [vmem:[#allocation3 + $0x8c] sm:$0xff] %v1367_v38  ;;  %1431 = vrot.lane.b32.xlu2 %v9094_v54, %s8147_s29  ;;  %1359 = vrot.lane.b32.xlu1 %v9094_v54, %s8150_s6 }
 0x16b   : > { %1233 = vst [vmem:[#allocation3 + $0x1c] sm:$0xff] %v1223_v41  ;;  %2549 = vrot.lane.b32.xlu0 %v9064_v40, %s11804_s24 }
 0x16c   : > { %v9253_v44 = vpop.permute.xlu1 %1712  ;;  %v9255_v45 = vpop.permute.xlu2 %1283 }
 0x16d   : > { %v11757_v46 = vrot.slane %v9253_v44, 4  ;;  %v11745_v50 = vrot.slane %v9255_v45, 4  ;;  %v9259_v51 = vpop.permute.xlu0 %1319 }
 0x16e   : > { %v11758_v53 = vrot.slane %v9259_v51, 4 }
 0x16f   : > { %v1722_v55 = vsel %vm1220_vm0, %v1718_v43, %v11757_v46  ;;  %v1293_v56 = vsel %vm1220_vm0, %v1289_v42, %v11745_v50 }
 0x170   : > { %v9269_v57 = vld [vmem:[#allocation3 + $0xac] sm:$0xf]  ;;  %v9271_v58 = vld [vmem:[#allocation3 + $0xa8] sm:$0xf]  ;;  %v1724_v59 = vsel %vm1723_vm5, %v9151_v4, %v1722_v55  ;;  %v1295_v60 = vsel %vm1294_vm6, %v9143_v3, %v1293_v56  ;;  %v1329_v62 = vsel %vm1220_vm0, %v1325_v52, %v11758_v53  ;;  %v9292_v4 = vld [vmem:[#allocation3] sm:$0xf] }
 0x171   : > { %1734 = vst [vmem:[#allocation3 + $0xa8] sm:$0xff] %v1724_v59  ;;  %v1331_v10 = vsel %vm11768_vm7, %v9139_v1, %v1329_v62  ;;  %v9325_v55 = vld [vmem:[#allocation3 + $0x8c] sm:$0xf0]  ;;  %v9327_v56 = vld [vmem:[#allocation3 + $0x88] sm:$0xf0] }
 0x172   : > { %1305 = vst [vmem:[#allocation3 + $0x54] sm:$0xff] %v1295_v60  ;;  %1287 = vrot.lane.b32.xlu2 %v9094_v54, %s8152_s8  ;;  %1251 = vrot.lane.b32.xlu1 %v9094_v54, %s8154_s10  ;;  %v9290_v3 = vld [vmem:[#allocation3 + $0x18] sm:$0xf0]  ;;  %v9316_v41 = vld [vmem:[#allocation3 + $0x1c] sm:$0xf0]  ;;  %v1610_v60 = vrot.slane %v9175_v11, 4 }
 0x173   : > { %1341 = vst [vmem:[#allocation3 + $0x70] sm:$0xff] %v1331_v10  ;;  %2369 = vrot.lane.b32.xlu0 %v9064_v40, %s11795_s26 }
 0x174   : > { %v9300_v23 = vpop.permute.xlu1 %1532  ;;  %v9302_v24 = vpop.permute.xlu2 %1676  ;;  %11826 = vst [vmem:[#allocation4_spill] sm:$0xff] %v9316_v41 }
 0x175   : > { %v11749_v25 = vrot.slane %v9300_v23, 4  ;;  %v11742_v32 = vrot.slane %v9302_v24, 4  ;;  %v9306_v35 = vpop.permute.xlu0 %1247 }
 0x176   : > { %v11750_v37 = vrot.slane %v9306_v35, 4 }
 0x177   : > { %v1542_v38 = vsel %vm1220_vm0, %v1538_v22, %v11749_v25  ;;  %v1686_v39 = vsel %vm1220_vm0, %v1682_v20, %v11742_v32 }
 0x178   : > { %v1544_v42 = vsel %vm11813_vm8, %v9167_v9, %v1542_v38  ;;  %v1688_v43 = vsel %vm11754_vm9, %v9141_v2, %v1686_v39  ;;  %v1257_v52 = vsel %vm1220_vm0, %v1253_v36, %v11750_v37  ;;  %v1754_v38 = vrot.slane %v9129_v63, 4 }
 0x179   : > { %1554 = vst [vmem:[#allocation3 + $0x1c] sm:$0xff] %v1544_v42  ;;  %v1259_v59 = vsel %vm1258_vm10, %v9119_v61, %v1257_v52  ;;  %v2517_v61 = vrot.slane %v9179_v13, 4  ;;  %v9363_v1 = vld [vmem:[#allocation3 + $0x50] sm:$0xf0]  ;;  %vm11816_vm9 = vcmask 769024  }
 0x17a   : > { %1698 = vst [vmem:[#allocation3 + $0x8c] sm:$0xff] %v1688_v43  ;;  %1752 = vrot.lane.b32.xlu1 %v9094_v54, %s8157_s13  ;;  %1214 = vrot.lane.b32.xlu2 %v9094_v54, %s8149_s5  ;;  %v9335_v2 = vld [vmem:[#allocation3 + $0x70] sm:$0xf]  ;;  %v9408_v25 = vld [vmem:[#allocation3 + $0x74] sm:$0xf] }
 0x17b   : > { %1269 = vst [vmem:[#allocation3 + $0x38] sm:$0xff] %v1259_v59  ;;  %1323 = vrot.lane.b32.xlu0 %v9094_v54, %s8151_s7  ;;  %v9361_v59 = vld [vmem:[#allocation3 + $0x54] sm:$0xf0] }
 0x17c   : > { %v9343_v62 = vpop.permute.xlu1 %2511  ;;  %v9345_v10 = vpop.permute.xlu2 %1604  ;;  %11827 = vst [vmem:[#allocation5_spill] sm:$0xff] %v9361_v59 }
 0x17d   : > { %v11744_v20 = vrot.slane %v9343_v62, 4  ;;  %v11741_v22 = vrot.slane %v9345_v10, 4  ;;  %v9349_v36 = vpop.permute.xlu0 %1748 }
 0x17e   : > { %v11747_v39 = vrot.slane %v9349_v36, 4 }
 0x17f   : > { %v2521_v42 = vsel %vm1220_vm0, %v2517_v61, %v11744_v20  ;;  %v1614_v43 = vsel %vm1220_vm0, %v1610_v60, %v11741_v22  ;;  %v9370_v61 = vld [vmem:[#allocation3 + $0xc4] sm:$0xf0]  ;;  %v7894_v22 = vld [vmem:[#allocation3 + $0xac] sm:$0xf] }
 0x180   : > { %v2523_v52 = vsel %vm11762_vm11, %v9179_v13, %v2521_v42  ;;  %v1616_v9 = vsel %vm11743_vm12, %v9175_v11, %v1614_v43  ;;  %v1758_v14 = vsel %vm1220_vm0, %v1754_v38, %v11747_v39  ;;  %v6835_v13 = vld [vmem:[#allocation3 + $0xa8] sm:$0xf]  ;;  %vm11820_vm12 = vcmask 752640   ;;  %v9404_v39 = vld [vmem:[#allocation3 + $0x4] sm:$0xf] }
 0x181   : > { %1626 = vst [vmem:[#allocation3 + $0x54] sm:$0xff] %v1616_v9  ;;  %v1760_v60 = vsel %vm1759_vm13, %v9129_v63, %v1758_v14  ;;  %v1502_v63 = vrot.slane %v9153_v5, 4  ;;  %v2481_v14 = vrot.slane %v9191_v17, 4  ;;  %vm11766_vm11 = vcmask 465920  }
 0x182   : > { %1770 = vst [vmem:[#allocation3 + $0xc4] sm:$0xff] %v1760_v60  ;;  %1680 = vrot.lane.b32.xlu1 %v9094_v54, %s8160_s18  ;;  %1572 = vrot.lane.b32.xlu2 %v9094_v54, %s8155_s11  ;;  %v9378_v11 = vld [vmem:[#allocation3 + $0x38] sm:$0xf] }
 0x183   : > { %1716 = vrot.lane.b32.xlu0 %v9094_v54, %s8153_s9  ;;  %2533 = vst [vmem:[#allocation3 + $0xa8] sm:$0xff] %v2523_v52  ;;  %v1646_v52 = vrot.slane %v9163_v7, 4 }
 0x184   : > { %v9386_v38 = vpop.permute.xlu1 %2475  ;;  %v9388_v42 = vpop.permute.xlu2 %1496  ;;  %11828 = vst [vmem:[#allocation6_spill] sm:$0xff] %v9404_v39 }
 0x185   : > { %v11751_v43 = vrot.slane %v9386_v38, 4  ;;  %v11755_v60 = vrot.slane %v9388_v42, 4  ;;  %v9392_v32 = vpop.permute.xlu0 %1640 }
 0x186   : > { %v11756_v9 = vrot.slane %v9392_v32, 4 }
 0x187   : > { %v2485_v20 = vsel %vm1220_vm0, %v2481_v14, %v11751_v43  ;;  %v1506_v50 = vsel %vm1220_vm0, %v1502_v63, %v11755_v60 }
 0x188   : > { %v2487_v30 = vsel %vm11753_vm14, %v9191_v17, %v2485_v20  ;;  %v1508_v48 = vsel %vm11752_vm15, %v9153_v5, %v1506_v50  ;;  %v1650_v37 = vsel %vm1220_vm0, %v1646_v52, %v11756_v9  ;;  %v6809_v50 = vld [vmem:[#allocation3 + $0x8c] sm:$0xf0]  ;;  %v7890_v20 = vld [vmem:[#allocation3 + $0x88] sm:$0xf0]  ;;  %vm11761_vm15 = vcmask 523264  }
 0x189   : > { %1518 = vst [vmem:[#allocation3] sm:$0xff] %v1508_v48  ;;  %v1652_v14 = vsel %vm11820_vm12, %v9163_v7, %v1650_v37  ;;  %v7897_v43 = vld [vmem:[#allocation3 + $0xc0] sm:$0xf0]  ;;  %v6837_v63 = vld [vmem:[#allocation3 + $0xc4] sm:$0xf0]  ;;  %v2445_v48 = vrot.slane %v9187_v15, 4 }
 0x18a   : > { %1662 = vst [vmem:[#allocation3 + $0x70] sm:$0xff] %v1652_v14  ;;  %1500 = vrot.lane.b32.xlu1 %v9094_v54, %s8163_s21  ;;  %1536 = vrot.lane.b32.xlu2 %v9094_v54, %s8158_s14  ;;  %v6836_v5 = vor.u32 %v7897_v43, %v6835_v13  ;;  %v6840_v17 = vor.u32 %v7894_v22, %v6837_v63  ;;  %v2301_v7 = vrot.slane %v9204_v47, 4  ;;  %vm11794_vm14 = vcmask 490496   ;;  %v9443_v9 = vld [vmem:[#allocation3 + $0x3c] sm:$0xf] }
 0x18b   : > { %1644 = vrot.lane.b32.xlu0 %v9094_v54, %s8156_s12  ;;  %2497 = vst [vmem:[#allocation3 + $0x8c] sm:$0xff] %v2487_v30  ;;  %v1574_v30 = vrot.slane %v9155_v6, 4 }
 0x18c   : > { %1960 = vmatpush.bf16.msra.mxu0 %v6836_v5  ;;  %1973 = vmatpush.bf16.msra.mxu1 %v6840_v17  ;;  %v9423_v37 = vpop.permute.xlu1 %2295  ;;  %v9425_v52 = vpop.permute.xlu2 %2439  ;;  %11829 = vst [vmem:[#allocation7_spill] sm:$0xff] %v9443_v9 }
 0x18d   : > { %v11760_v13 = vrot.slane %v9423_v37, 4  ;;  %v11765_v22 = vrot.slane %v9425_v52, 4  ;;  %v9429_v43 = vpop.permute.xlu0 %1568 }
 0x18e   : > { %v11763_v14 = vrot.slane %v9429_v43, 4 }
 0x18f   : > { %v2305_v63 = vsel %vm1220_vm0, %v2301_v7, %v11760_v13  ;;  %v2449_v5 = vsel %vm1220_vm0, %v2445_v48, %v11765_v22 }
 0x190   : > { %v2307_v17 = vsel %vm11761_vm15, %v9204_v47, %v2305_v63  ;;  %v2451_v60 = vsel %vm11794_vm14, %v9187_v15, %v2449_v5  ;;  %v1578_v46 = vsel %vm1220_vm0, %v1574_v30, %v11763_v14  ;;  %v9448_v53 = vld [vmem:[#allocation3 + $0x4] sm:$0xf]  ;;  %v6751_v29 = vld [vmem:[#allocation3] sm:$0xf]  ;;  %vm11817_vm15 = vcmask 498688  }
 0x191   : > { %v1580_v7 = vsel %vm11816_vm9, %v9155_v6, %v1578_v46  ;;  %v7887_v13 = vld [vmem:[#allocation3 + $0x74] sm:$0xf]  ;;  %v6807_v48 = vld [vmem:[#allocation3 + $0x70] sm:$0xf]  ;;  %2317 = vst [vmem:[#allocation3] sm:$0xff] %v2307_v17  ;;  %v2409_v46 = vrot.slane %v9199_v18, 4 }
 0x192   : > { %1590 = vst [vmem:[#allocation3 + $0x38] sm:$0xff] %v1580_v7  ;;  %2551 = vrot.lane.b32.xlu1 %v9094_v54, %s11804_s24  ;;  %2515 = vrot.lane.b32.xlu2 %v9094_v54, %s8161_s19  ;;  %v6808_v15 = vor.u32 %v7890_v20, %v6807_v48  ;;  %v6812_v47 = vor.u32 %v7887_v13, %v6809_v50  ;;  %v2553_v50 = vrot.slane %v9165_v8, 4  ;;  %v7883_v14 = vld [vmem:[#allocation3 + $0x50] sm:$0xf0]  ;;  %s8178_s24 = smov 31  }
 0x193   : > { %1608 = vrot.lane.b32.xlu0 %v9094_v54, %s8159_s17  ;;  %2461 = vst [vmem:[#allocation3 + $0x70] sm:$0xff] %v2451_v60 }
 0x194   : > { %1961 = vmatpush.bf16.msra.mxu0 %v6808_v15  ;;  %1974 = vmatpush.bf16.msra.mxu1 %v6812_v47  ;;  %v9458_v30 = vpop.permute.xlu2 %2403  ;;  %v9460_v6 = vpop.permute.xlu1 %1212  ;;  %v6781_v47 = vld [vmem:[#allocation3 + $0x54] sm:$0xf0] }
 0x195   : > { %v11764_v63 = vrot.slane %v9458_v30, 4  ;;  %v9464_v5 = vpop.permute.xlu0 %2547  ;;  %v11777_v20 = vrot.slane %v9460_v6, 4 }
 0x196   : > { %v11767_v60 = vrot.slane %v9464_v5, 4 }
 0x197   : > { %v2413_v13 = vsel %vm1220_vm0, %v2409_v46, %v11764_v63  ;;  %v1224_v17 = vsel %vm1220_vm0, %v1217_v34, %v11777_v20 }
 0x198   : > { %v2415_v7 = vsel %vm11817_vm15, %v9199_v18, %v2413_v13  ;;  %v2557_v48 = vsel %vm1220_vm0, %v2553_v50, %v11767_v60  ;;  %v1225_v15 = vsel %vm1222_vm4, %v9226_v31, %v1224_v17  ;;  %v2373_v31 = vrot.slane %v9177_v12, 4 }
 0x199   : > { %v2559_v46 = vsel %vm11766_vm11, %v9165_v8, %v2557_v48  ;;  %1234 = vst [vmem:[#allocation3 + $0x24] sm:$0xff] %v1225_v15  ;;  %v6779_v63 = vld [vmem:[#allocation3 + $0x38] sm:$0xf]  ;;  %v7880_v22 = vld [vmem:[#allocation3 + $0x3c] sm:$0xf]  ;;  %vm11818_vm11 = vcmask 506880  }
 0x19a   : > { %2569 = vst [vmem:[#allocation3 + $0xc4] sm:$0xff] %v2559_v46  ;;  %2371 = vrot.lane.b32.xlu1 %v9094_v54, %s11795_s26  ;;  %2479 = vrot.lane.b32.xlu2 %v9094_v54, %s11800_s22  ;;  %v6780_v18 = vor.u32 %v7883_v14, %v6779_v63  ;;  %v6784_v34 = vor.u32 %v7880_v22, %v6781_v47  ;;  %v7876_v14 = vld [vmem:[#allocation3 + $0x18] sm:$0xf0]  ;;  %v6753_v22 = vld [vmem:[#allocation3 + $0x1c] sm:$0xf0]  ;;  %v11830_v47 = vrot.slane %v9220_v26, 4 }
 0x19b   : > { %2443 = vrot.lane.b32.xlu0 %v9094_v54, %s11802_s20  ;;  %2425 = vst [vmem:[#allocation3 + $0x54] sm:$0xff] %v2415_v7  ;;  %v6752_v7 = vor.u32 %v7876_v14, %v6751_v29  ;;  %v6756_v15 = vor.u32 %v9448_v53, %v6753_v22  ;;  %v9522_v22 = vld [vmem:[#allocation3 + $0x8] sm:$0xf]  ;;  %s8175_s26 = smov 30   ;;  %s8176_s22 = smov 29  }
 0x19c   : > { %1962 = vmatpush.bf16.msra.mxu0 %v6780_v18  ;;  %1975 = vmatpush.bf16.msra.mxu1 %v6784_v34  ;;  %v9493_v8 = vpop.permute.xlu2 %1393  ;;  %v9495_v50 = vpop.permute.xlu1 %1321  ;;  %v11831_v18 = vrot.slane %v9259_v51, 4  ;;  %11833 = vst [vmem:[#allocation9_spill] sm:$0xff] %v9522_v22  ;;  %s8177_s20 = smov 32  }
 0x19d   : > { %v9497_v13 = vpop.permute.xlu0 %2367  ;;  %v11778_v17 = vrot.slane %v9493_v8, 4  ;;  %v11769_v48 = vrot.slane %v9495_v50, 4 }
 0x19e   : > { %v11770_v63 = vrot.slane %v9497_v13, 4 }
 0x19f   : > { %v1404_v46 = vsel %vm1220_vm0, %v11830_v47, %v11778_v17  ;;  %v1332_v34 = vsel %vm1220_vm0, %v11831_v18, %v11769_v48 }
 0x1a0   : > { %v2377_v60 = vsel %vm1220_vm0, %v2373_v31, %v11770_v63  ;;  %v1405_v29 = vsel %vm1402_vm2, %v9220_v26, %v1404_v46  ;;  %v1333_v53 = vsel %vm11768_vm7, %v9259_v51, %v1332_v34  ;;  %1963 = vmatpush.bf16.msra.mxu0 %v6752_v7  ;;  %1976 = vmatpush.bf16.msra.mxu1 %v6756_v15  ;;  %v9520_v14 = vld [vmem:[#allocation3 + $0x20] sm:$0xf0]  ;;  %v2337_v7 = vrot.slane %v9189_v16, 4 }
 0x1a1   : > { %11832 = vst [vmem:[#allocation8_spill] sm:$0xff] %v9520_v14  ;;  %v2379_v47 = vsel %vm11818_vm11, %v9177_v12, %v2377_v60  ;;  %vm11791_vm7 = vcmask 515072   ;;  %v11835_v46 = vrot.slane %v9253_v44, 4  ;;  %v11846_v14 = vrot.slane %v9255_v45, 4 }
 0x1a2   : > { %1414 = vst [vmem:[#allocation3 + $0xb0] sm:$0xff] %v1405_v29  ;;  %2297 = vrot.lane.b32.xlu1 %v9064_v40, %s11782_s25  ;;  %2299 = vrot.lane.b32.xlu2 %v9094_v54, %s11782_s25  ;;  %v11836_v29 = vrot.slane %v9306_v35, 4  ;;  %s11809_s25 = smov 28  }
 0x1a3   : > { %2389 = vst [vmem:[#allocation3 + $0x38] sm:$0xff] %v2379_v47  ;;  %2407 = vrot.lane.b32.xlu0 %v9094_v54, %s11789_s23  ;;  %s8174_s23 = smov 27  }
 0x1a4   : > { %1342 = vst [vmem:[#allocation3 + $0x78] sm:$0xff] %v1333_v53  ;;  %v9534_v26 = vpop.permute.xlu2 %1714  ;;  %v9536_v51 = vpop.permute.xlu1 %1249 }
 0x1a5   : > { %v9538_v12 = vpop.permute.xlu0 %2331  ;;  %v11771_v60 = vrot.slane %v9534_v26, 4  ;;  %v11776_v31 = vrot.slane %v9536_v51, 4 }
 0x1a6   : > { %11834 = vst [vmem:[#allocation10_spill] sm:$0xff] %v9538_v12  ;;  %v11774_v15 = vrot.slane %v9538_v12, 4 }
 0x1a7   : > { %v1725_v34 = vsel %vm1220_vm0, %v11835_v46, %v11771_v60  ;;  %v1260_v53 = vsel %vm1220_vm0, %v11836_v29, %v11776_v31  ;;  %v9591_v29 = vld [vmem:[#allocation3 + $0x24] sm:$0xf0] }
 0x1a8   : > { %v2341_v47 = vsel %vm1220_vm0, %v2337_v7, %v11774_v15  ;;  %v1726_v63 = vsel %vm1723_vm5, %v9253_v44, %v1725_v34  ;;  %v1261_v46 = vsel %vm1258_vm10, %v9306_v35, %v1260_v53  ;;  %11839 = vst [vmem:[#allocation11_spill] sm:$0xff] %v9591_v29 }
 0x1a9   : > { %v9557_v18 = vld [vmem:[#allocation3 + $0xb4] sm:$0xf]  ;;  %v9559_v48 = vld [vmem:[#allocation3 + $0xb0] sm:$0xf]  ;;  %v2343_v60 = vsel %vm11791_vm7, %v9189_v16, %v2341_v47  ;;  %1270 = vst [vmem:[#allocation3 + $0x40] sm:$0xff] %v1261_v46  ;;  %v9597_v46 = vld [vmem:[#allocation2] sm:$0xff] }
 0x1aa   : > { %1735 = vst [vmem:[#allocation3 + $0xb0] sm:$0xff] %v1726_v63  ;;  %2335 = vrot.lane.b32.xlu1 %v9094_v54, %s11772_s27  ;;  %3076 = vrot.lane.b32.xlu2 %v9012_v21, %s11811_s28  ;;  %v11837_v54 = vrot.slane %v9300_v23, 4  ;;  %vm11851_vm7 = vcmask 474112  }
 0x1ab   : > { %2353 = vst [vmem:[#allocation3 + $0x1c] sm:$0xff] %v2343_v60  ;;  %2333 = vrot.lane.b32.xlu0 %v9064_v40, %s11772_s27  ;;  %v11838_v60 = vrot.slane %v9201_v19, 4  ;;  %s8172_s27 = smov 25   ;;  %v9629_v20 = vld [vmem:[#allocation3 + $0x7c] sm:$0xf] }
 0x1ac   : > { %v9573_v44 = vpop.permute.xlu2 %1534  ;;  %v9575_v7 = vpop.permute.xlu1 %1750  ;;  %v9631_v17 = vld [vmem:[#allocation3 + $0x78] sm:$0xf] }
 0x1ad   : > { %v9577_v35 = vpop.permute.xlu0 %1429  ;;  %v11775_v16 = vrot.slane %v9573_v44, 4 }
 0x1ae   : > { %v11780_v63 = vrot.slane %v9577_v35, 4 }
 0x1af   : > { %v1545_v21 = vsel %vm1220_vm0, %v11837_v54, %v11775_v16  ;;  %v11779_v54 = vrot.slane %v9575_v7, 4  ;;  %v11842_v16 = vrot.slane %v9222_v27, 4 }
 0x1b0   : > { %v1440_v34 = vsel %vm1220_vm0, %v11838_v60, %v11780_v63  ;;  %v1546_v53 = vsel %vm11813_vm8, %v9300_v23, %v1545_v21  ;;  %v9675_v41 = vld [vmem:[#allocation3 + $0x40] sm:$0xf] }
 0x1b1   : > { %v1441_v47 = vsel %vm1438_vm1, %v9201_v19, %v1440_v34  ;;  %1555 = vst [vmem:[#allocation3 + $0x24] sm:$0xff] %v1546_v53  ;;  %v11840_v34 = vrot.slane %v9349_v36, 4  ;;  %v7895_v22 = vld [vmem:[#allocation3 + $0xb4] sm:$0xf] }
 0x1b2   : > { %1450 = vst [vmem:[#allocation3 + $0xcc] sm:$0xff] %v1441_v47  ;;  %3112 = vrot.lane.b32.xlu1 %v9597_v46, %s8172_s27  ;;  %3114 = vrot.lane.b32.xlu2 %v9040_v28, %s8172_s27 }
 0x1b3   : > { %3078 = vrot.lane.b32.xlu0 %v9040_v28, %s11811_s28  ;;  %v1761_v53 = vsel %vm1220_vm0, %v11840_v34, %v11779_v54  ;;  %v11841_v28 = vrot.slane %v9392_v32, 4  ;;  %11847 = vst [vmem:[#allocation13_spill] sm:$0xff] %v9675_v41 }
 0x1b4   : > { %v9606_v23 = vpop.permute.xlu2 %2441  ;;  %v9608_v21 = vpop.permute.xlu1 %1642 }
 0x1b5   : > { %v9610_v19 = vpop.permute.xlu0 %1357  ;;  %v11781_v60 = vrot.slane %v9608_v21, 4 }
 0x1b6   : > { %v11784_v47 = vrot.slane %v9610_v19, 4 }
 0x1b7   : > { %v1653_v15 = vsel %vm1220_vm0, %v11841_v28, %v11781_v60  ;;  %v1762_v28 = vsel %vm1759_vm13, %v9349_v36, %v1761_v53 }
 0x1b8   : > { %v1368_v31 = vsel %vm1220_vm0, %v11842_v16, %v11784_v47  ;;  %v1654_v34 = vsel %vm11820_vm12, %v9392_v32, %v1653_v15  ;;  %v11787_v15 = vrot.slane %v9606_v23, 4  ;;  %v6843_v47 = vld [vmem:[#allocation3 + $0xb0] sm:$0xf] }
 0x1b9   : > { %v9635_v54 = vld [vmem:[#allocation3 + $0xcc] sm:$0xf0]  ;;  %v9637_v63 = vld [vmem:[#allocation3 + $0xc8] sm:$0xf0]  ;;  %v1369_v60 = vsel %vm1366_vm3, %v9222_v27, %v1368_v31  ;;  %1663 = vst [vmem:[#allocation3 + $0x78] sm:$0xff] %v1654_v34  ;;  %v11843_v34 = vrot.slane %v9425_v52, 4 }
 0x1ba   : > { %1771 = vst [vmem:[#allocation3 + $0xcc] sm:$0xff] %v1762_v28  ;;  %3116 = vrot.lane.b32.xlu1 %v9064_v40, %s8172_s27  ;;  %3004 = vrot.lane.b32.xlu2 %v9597_v46, %s11809_s25 }
 0x1bb   : > { %1378 = vst [vmem:[#allocation3 + $0x94] sm:$0xff] %v1369_v60  ;;  %3080 = vrot.lane.b32.xlu0 %v9064_v40, %s11811_s28  ;;  %v2452_v28 = vsel %vm1220_vm0, %v11843_v34, %v11787_v15  ;;  %v9665_v60 = vld [vmem:[#allocation3 + $0x44] sm:$0xf]  ;;  %v11845_v40 = vrot.slane %v9429_v43, 4 }
 0x1bc   : > { %v9652_v36 = vpop.permute.xlu2 %2405  ;;  %v9654_v27 = vpop.permute.xlu1 %1570  ;;  %11844 = vst [vmem:[#allocation12_spill] sm:$0xff] %v9665_v60  ;;  %v2453_v59 = vsel %vm11794_vm14, %v9425_v52, %v2452_v28  ;;  %v11849_v28 = vrot.slane %v9577_v35, 4  ;;  %vm11852_vm14 = vcmask 744448  }
 0x1bd   : > { %v9656_v31 = vpop.permute.xlu0 %1285  ;;  %v11788_v16 = vrot.slane %v9654_v27, 4 }
 0x1be   : > { %v1291_v53 = vrot.slane %v9656_v31, 4 }
 0x1bf   : > { %v1581_v32 = vsel %vm1220_vm0, %v11845_v40, %v11788_v16 }
 0x1c0   : > { %v1296_v39 = vsel %vm1220_vm0, %v11846_v14, %v1291_v53  ;;  %v1582_v29 = vsel %vm11816_vm9, %v9429_v43, %v1581_v32  ;;  %v9679_v34 = vld [vmem:[#allocation3 + $0x7c] sm:$0xf]  ;;  %v9681_v15 = vld [vmem:[#allocation3 + $0x78] sm:$0xf] }
 0x1c1   : > { %v1297_v9 = vsel %vm1294_vm6, %v9255_v45, %v1296_v39  ;;  %1591 = vst [vmem:[#allocation3 + $0x40] sm:$0xff] %v1582_v29  ;;  %v7898_v40 = vld [vmem:[#allocation3 + $0xc8] sm:$0xf0]  ;;  %v6845_v16 = vld [vmem:[#allocation3 + $0xcc] sm:$0xf0] }
 0x1c2   : > { %1306 = vst [vmem:[#allocation3 + $0x5c] sm:$0xff] %v1297_v9  ;;  %3040 = vrot.lane.b32.xlu1 %v9597_v46, %s8174_s23  ;;  %3042 = vrot.lane.b32.xlu2 %v9049_v33, %s8174_s23  ;;  %v6844_v43 = vor.u32 %v7898_v40, %v6843_v47  ;;  %v6848_v14 = vor.u32 %v7895_v22, %v6845_v16  ;;  %v9691_v32 = vld [vmem:[#allocation3 + $0x90] sm:$0xf0]  ;;  %v11848_v16 = vrot.slane %v9343_v62, 4 }
 0x1c3   : > { %3006 = vrot.lane.b32.xlu0 %v9049_v33, %s11809_s25  ;;  %2462 = vst [vmem:[#allocation3 + $0x78] sm:$0xff] %v2453_v59 }
 0x1c4   : > { %1986 = vmatpush.bf16.msra.mxu2 %v6844_v43  ;;  %1999 = vmatpush.bf16.msra.mxu3 %v6848_v14  ;;  %v9697_v39 = vpop.permute.xlu1 %2513  ;;  %v1432_v9 = vpop.permute.xlu2 %1431  ;;  %v11850_v14 = vrot.slane %v9302_v24, 4 }
 0x1c5   : > { %v9699_v52 = vpop.permute.xlu0 %1678  ;;  %v11797_v29 = vrot.slane %v9697_v39, 4  ;;  %v1436_v47 = vrot.slane %v1432_v9, 4 }
 0x1c6   : > { %v11798_v22 = vrot.slane %v9699_v52, 4 }
 0x1c7   : > { %v2524_v59 = vsel %vm1220_vm0, %v11848_v16, %v11797_v29  ;;  %v1442_v40 = vsel %vm1220_vm0, %v11849_v28, %v1436_v47  ;;  %v1444_v43 = vsel %vm1438_vm1, %v1432_v9, %v1436_v47  ;;  %v9721_v16 = vld [vmem:[#allocation3 + $0x94] sm:$0xf0] }
 0x1c8   : > { %v1689_v45 = vsel %vm1220_vm0, %v11850_v14, %v11798_v22  ;;  %v2525_v12 = vsel %vm11851_vm7, %v9343_v62, %v2524_v59  ;;  %v1443_v60 = vsel %vm1438_vm1, %v9577_v35, %v1442_v40  ;;  %1452 = vst [vmem:[#allocation3 + $0xdc] sm:$0xf] %v1444_v43  ;;  %v11853_v40 = vrot.slane %v9386_v38, 4 }
 0x1c9   : > { %v1690_v28 = vsel %vm11852_vm14, %v9302_v24, %v1689_v45  ;;  %2534 = vst [vmem:[#allocation3 + $0xb0] sm:$0xff] %v2525_v12  ;;  %v9725_v9 = vld [vmem:[#allocation3 + $0x58] sm:$0xf0]  ;;  %v11854_v62 = vrot.slane %v9345_v10, 4  ;;  %vm11855_vm7 = vcmask 482304   ;;  %vm11856_vm14 = vcmask 760832  }
 0x1ca   : > { %1699 = vst [vmem:[#allocation3 + $0x94] sm:$0xff] %v1690_v28  ;;  %3044 = vrot.lane.b32.xlu1 %v9091_v49, %s8174_s23  ;;  %2932 = vrot.lane.b32.xlu2 %v9597_v46, %s8175_s26  ;;  %v9748_v28 = vld [vmem:[#allocation3 + $0x5c] sm:$0xf0] }
 0x1cb   : > { %1451 = vst [vmem:[#allocation3 + $0xd4] sm:$0xff] %v1443_v60  ;;  %3008 = vrot.lane.b32.xlu0 %v9091_v49, %s11809_s25 }
 0x1cc   : > { %v9735_v35 = vpop.permute.xlu1 %2477  ;;  %v1288_v24 = vpop.permute.xlu2 %1287 }
 0x1cd   : > { %v9737_v12 = vpop.permute.xlu0 %1606  ;;  %v11807_v45 = vrot.slane %v9735_v35, 4  ;;  %v1292_v47 = vrot.slane %v1288_v24, 4 }
 0x1ce   : > { %v11806_v59 = vrot.slane %v9737_v12, 4 }
 0x1cf   : > { %v2488_v43 = vsel %vm1220_vm0, %v11853_v40, %v11807_v45  ;;  %v1298_v60 = vsel %vm1220_vm0, %v1291_v53, %v1292_v47  ;;  %v1300_v14 = vsel %vm1294_vm6, %v1288_v24, %v1292_v47 }
 0x1d0   : > { %v1617_v29 = vsel %vm1220_vm0, %v11854_v62, %v11806_v59  ;;  %v2489_v22 = vsel %vm11855_vm7, %v9386_v38, %v2488_v43  ;;  %v1299_v41 = vsel %vm1294_vm6, %v9656_v31, %v1298_v60  ;;  %1308 = vst [vmem:[#allocation3 + $0x6c] sm:$0xf] %v1300_v14  ;;  %v9772_v31 = vld [vmem:[%s11738_s2 + $0x4] sm:$0xf]  ;;  %vm11857_vm7 = vcmask 523264  }
 0x1d1   : > { %v1618_v53 = vsel %vm11856_vm14, %v9345_v10, %v1617_v29  ;;  %1307 = vst [vmem:[#allocation3 + $0x64] sm:$0xff] %v1299_v41  ;;  %v6817_v24 = vld [vmem:[#allocation3 + $0x94] sm:$0xf0]  ;;  %v7891_v47 = vld [vmem:[#allocation3 + $0x90] sm:$0xf0]  ;;  %6861 = vmatmul.msk.bf16.vlgmr.msra.gmra.mxu0 %vm11857_vm7, %v9772_v31  ;;  %vm11858_vm14 = vmmov %vm11857_vm7  ;;  %v11860_v60 = vrot.slane %v9493_v8, 4 }
 0x1d2   : > { %1627 = vst [vmem:[#allocation3 + $0x5c] sm:$0xff] %v1618_v53  ;;  %2968 = vrot.lane.b32.xlu1 %v9597_v46, %s8176_s22  ;;  %2970 = vrot.lane.b32.xlu2 %v9049_v33, %s8176_s22  ;;  %v6816_v38 = vor.u32 %v7891_v47, %v9681_v15  ;;  %v6820_v62 = vor.u32 %v9679_v34, %v6817_v24  ;;  %v11861_v24 = vrot.slane %v9460_v6, 4  ;;  %v7881_v29 = vld [vmem:[#allocation3 + $0x44] sm:$0xf]  ;;  %vm11865_vm7 = vcmask 785408  }
 0x1d3   : > { %2934 = vrot.lane.b32.xlu0 %v9049_v33, %s8175_s26  ;;  %2498 = vst [vmem:[#allocation3 + $0x94] sm:$0xff] %v2489_v22  ;;  %6862 = vmatmul.msk.bf16.vlgmr.msra.gmra.mxu1 %vm11858_vm14, %v9772_v31  ;;  %v9782_v22 = vld [vmem:[#allocation3 + $0xc] sm:$0xf]  ;;  %vm11868_vm14 = vcmask 465920  }
 0x1d4   : > { %1987 = vmatpush.bf16.msra.mxu2 %v6816_v38  ;;  %2000 = vmatpush.bf16.msra.mxu3 %v6820_v62  ;;  %v1396_v41 = vpop.permute.xlu1 %1395  ;;  %v1215_v10 = vpop.permute.xlu2 %1214  ;;  %11859 = vst [vmem:[#allocation14_spill] sm:$0xff] %v9782_v22  ;;  %v11862_v38 = vrot.slane %v9388_v42, 4 }
 0x1d5   : > { %v9775_v40 = vpop.permute.xlu0 %1498  ;;  %v1400_v15 = vrot.slane %v1396_v41, 4  ;;  %v1219_v43 = vrot.slane %v1215_v10, 4 }
 0x1d6   : > { %v11808_v34 = vrot.slane %v9775_v40, 4 }
 0x1d7   : > { %v1406_v14 = vsel %vm1220_vm0, %v11860_v60, %v1400_v15  ;;  %v1408_v53 = vsel %vm1402_vm2, %v1396_v41, %v1400_v15  ;;  %v1226_v47 = vsel %vm1220_vm0, %v11861_v24, %v1219_v43  ;;  %v6787_v60 = vld [vmem:[#allocation3 + $0x40] sm:$0xf]  ;;  %v11863_v41 = vrot.slane %v9652_v36, 4 }
 0x1d8   : > { %v1509_v62 = vsel %vm1220_vm0, %v11862_v38, %v11808_v34  ;;  %v1407_v59 = vsel %vm1402_vm2, %v9493_v8, %v1406_v14  ;;  %1416 = vst [vmem:[#allocation3 + $0xc0] sm:$0xf] %v1408_v53  ;;  %v1227_v45 = vsel %vm1222_vm4, %v9460_v6, %v1226_v47  ;;  %v11864_v15 = vrot.slane %v9458_v30, 4 }
 0x1d9   : > { %v1510_v22 = vsel %vm11865_vm7, %v9388_v42, %v1509_v62  ;;  %1415 = vst [vmem:[#allocation3 + $0xb8] sm:$0xff] %v1407_v59  ;;  %v1228_v38 = vsel %vm1222_vm4, %v1215_v10, %v1219_v43  ;;  %v6789_v34 = vld [vmem:[#allocation3 + $0x5c] sm:$0xf0]  ;;  %v7884_v8 = vld [vmem:[#allocation3 + $0x58] sm:$0xf0]  ;;  %vm11872_vm7 = vcmask 523264  }
 0x1da   : > { %v2416_v24 = vsel %vm1220_vm0, %v11864_v15, %v11863_v41  ;;  %1519 = vst [vmem:[#allocation3 + $0x8] sm:$0xff] %v1510_v22  ;;  %2972 = vrot.lane.b32.xlu1 %v9091_v49, %s8176_s22  ;;  %2860 = vrot.lane.b32.xlu2 %v9597_v46, %s8177_s20  ;;  %v6788_v6 = vor.u32 %v7884_v8, %v6787_v60  ;;  %v7877_v62 = vld [vmem:[#allocation3 + $0x20] sm:$0xf0]  ;;  %v6761_v60 = vld [vmem:[#allocation3 + $0x24] sm:$0xf0] }
 0x1db   : > { %v6792_v14 = vor.u32 %v7881_v29, %v6789_v34  ;;  %1235 = vst [vmem:[#allocation3 + $0x2c] sm:$0xff] %v1227_v45  ;;  %2936 = vrot.lane.b32.xlu0 %v9091_v49, %s8175_s26  ;;  %v2417_v42 = vsel %vm11817_vm15, %v9458_v30, %v2416_v24  ;;  %v11866_v45 = vrot.slane %v9610_v19, 4  ;;  %v11867_v30 = vrot.slane %v9464_v5, 4 }
 0x1dc   : > { %1236 = vst [vmem:[#allocation3 + $0x34] sm:$0xf] %v1228_v38  ;;  %1988 = vmatpush.bf16.msra.mxu2 %v6788_v6  ;;  %v1360_v59 = vpop.permute.xlu1 %1359  ;;  %v9816_v10 = vpop.permute.xlu2 %1572 }
 0x1dd   : > { %2001 = vmatpush.bf16.msra.mxu3 %v6792_v14  ;;  %2426 = vst [vmem:[#allocation3 + $0x5c] sm:$0xff] %v2417_v42  ;;  %v9818_v43 = vpop.permute.xlu0 %2549  ;;  %v1364_v22 = vrot.slane %v1360_v59, 4  ;;  %v11869_v14 = vor.u32 %v9280_v0, %v9271_v58  ;;  %v11873_v58 = vrot.slane %v9497_v13, 4 }
 0x1de   : > { %v11815_v53 = vrot.slane %v9818_v43, 4 }
 0x1df   : > { %v1370_v29 = vsel %vm1220_vm0, %v11866_v45, %v1364_v22  ;;  %v1372_v49 = vsel %vm1366_vm3, %v1360_v59, %v1364_v22  ;;  %v11870_v22 = vrot.slane %v9536_v51, 4 }
 0x1e0   : > { %v2560_v34 = vsel %vm1220_vm0, %v11867_v30, %v11815_v53  ;;  %v1371_v47 = vsel %vm1366_vm3, %v9610_v19, %v1370_v29  ;;  %1380 = vst [vmem:[#allocation3 + $0xa4] sm:$0xf] %v1372_v49  ;;  %v11871_v29 = vrot.slane %v9573_v44, 4 }
 0x1e1   : > { %v2561_v41 = vsel %vm11868_vm14, %v9464_v5, %v2560_v34  ;;  %1379 = vst [vmem:[#allocation3 + $0x9c] sm:$0xff] %v1371_v47  ;;  %v6759_v15 = vld [vmem:[#allocation3 + $0x8] sm:$0xf]  ;;  %v7874_v24 = vld [vmem:[#allocation3 + $0xc] sm:$0xf]  ;;  %vm11874_vm14 = vmmov %vm11872_vm7 }
 0x1e2   : > { %2570 = vst [vmem:[#allocation3 + $0xcc] sm:$0xff] %v2561_v41  ;;  %2896 = vrot.lane.b32.xlu1 %v9597_v46, %s8178_s24  ;;  %2898 = vrot.lane.b32.xlu2 %v9049_v33, %s8178_s24  ;;  %v6760_v38 = vor.u32 %v7877_v62, %v6759_v15  ;;  %v6764_v8 = vor.u32 %v7874_v24, %v6761_v60  ;;  %v9872_v41 = vld [vmem:[#allocation2 + $0x18] sm:$0xff] }
 0x1e3   : > { %2862 = vrot.lane.b32.xlu0 %v9049_v33, %s8177_s20  ;;  %v11875_v60 = vor.u32 %v9327_v56, %v9335_v2  ;;  %v9875_v15 = vld [vmem:[#allocation3 + $0x30] sm:$0xf0]  ;;  %v9883_v56 = vld [vmem:[#allocation3 + $0x28] sm:$0xf0] }
 0x1e4   : > { %1989 = vmatpush.bf16.msra.mxu2 %v6760_v38  ;;  %2002 = vmatpush.bf16.msra.mxu3 %v6764_v8  ;;  %v1252_v19 = vpop.permute.xlu1 %1251  ;;  %v1537_v5 = vpop.permute.xlu2 %1536  ;;  %11876 = vst [vmem:[#allocation15_spill] sm:$0xff] %v9875_v15  ;;  %v8138_v24 = vld [vmem:[#allocation3 + $0x10] sm:$0xff]  ;;  %v11878_v38 = vor.u32 %v9363_v1, %v9378_v11 }
 0x1e5   : > { %v9840_v6 = vpop.permute.xlu0 %2369  ;;  %v1256_v42 = vrot.slane %v1252_v19, 4  ;;  %v1541_v46 = vrot.slane %v1537_v5, 4 }
 0x1e6   : > { %v11814_v59 = vrot.slane %v9840_v6, 4 }
 0x1e7   : > { %v1262_v45 = vsel %vm1220_vm0, %v11870_v22, %v1256_v42  ;;  %v1264_v33 = vsel %vm1258_vm10, %v1252_v19, %v1256_v42  ;;  %v1547_v49 = vsel %vm1220_vm0, %v11871_v29, %v1541_v46  ;;  %6864 = vmatmul.msk.bf16.vlgmr.msra.gmra.mxu3 %vm11872_vm7, %v9772_v31  ;;  %v1549_v34 = vsel %vm11813_vm8, %v1537_v5, %v1541_v46  ;;  %v6970_v5 = vld [vmem:[#allocation3 + $0xb8] sm:$0xf] }
 0x1e8   : > { %2198 = vmatpush.bf16.msrb.mxu3 %v11869_v14  ;;  %v2380_v0 = vsel %vm1220_vm0, %v11873_v58, %v11814_v59  ;;  %v1263_v30 = vsel %vm1258_vm10, %v9536_v51, %v1262_v45  ;;  %1272 = vst [vmem:[#allocation3 + $0x50] sm:$0xf] %v1264_v33  ;;  %6863 = vmatmul.msk.bf16.vlgmr.msra.gmra.mxu2 %vm11874_vm14, %v9772_v31  ;;  %v1577_v51 = vrot.slane %v9816_v10, 4  ;;  %v11879_v22 = vrot.slane %v9575_v7, 4  ;;  %v7871_v33 = vld [vmem:[#allocation3 + $0xd0] sm:$0xf0] }
 0x1e9   : > { %v2381_v47 = vsel %vm11818_vm11, %v9497_v13, %v2380_v0  ;;  %1271 = vst [vmem:[#allocation3 + $0x48] sm:$0xff] %v1263_v30  ;;  %v1548_v62 = vsel %vm11813_vm8, %v9573_v44, %v1547_v49  ;;  %v9881_v13 = vld [vmem:[#allocation3 + $0x2c] sm:$0xf0]  ;;  %v11880_v29 = vrot.slane %v9495_v50, 4  ;;  %vm11881_vm7 = vcmask 1014784  }
 0x1ea   : > { %2390 = vst [vmem:[#allocation3 + $0x40] sm:$0xff] %v2381_v47  ;;  %2900 = vrot.lane.b32.xlu1 %v8138_v24, %s8178_s24  ;;  %3082 = vrot.lane.b32.xlu2 %v9872_v41, %s11811_s28  ;;  %v1585_v42 = vsel %vm11816_vm9, %v9816_v10, %v1577_v51  ;;  %v6971_v58 = vor.u32 %v7871_v33, %v6970_v5  ;;  %v11882_v0 = vrot.slane %v9654_v27, 4  ;;  %vm11883_vm14 = vmmov %vm11881_vm7  ;;  %v11885_v5 = vrot.slane %v9699_v52, 4 }
 0x1eb   : > { %1557 = vst [vmem:[#allocation3 + $0x34] sm:$0xf] %v1549_v34  ;;  %2864 = vrot.lane.b32.xlu0 %v8138_v24, %s8177_s20  ;;  %v9907_v34 = vld [vmem:[#allocation3 + $0xd8] sm:$0xf0]  ;;  %v11894_v59 = vrot.slane %v9697_v39, 4 }
 0x1ec   : > { %2199 = vmatpush.bf16.msrb.mxu3 %v11875_v60  ;;  %11877 = vst [vmem:[#allocation16_spill] sm:$0xff] %v9881_v13  ;;  %v1753_v2 = vpop.permute.xlu1 %1752  ;;  %v9885_v44 = vpop.permute.xlu2 %2515  ;;  %v1583_v10 = vsel %vm1220_vm0, %v11882_v0, %v1577_v51  ;;  %v9931_v24 = vld [vmem:[%s11738_s2] sm:$0xf]  ;;  %v9955_v0 = vld [vmem:[#allocation3 + $0x9c] sm:$0xf0] }
 0x1ed   : > { %1556 = vst [vmem:[#allocation3 + $0x2c] sm:$0xff] %v1548_v62  ;;  %v1324_v8 = vpop.permute.xlu0 %1323  ;;  %v1757_v19 = vrot.slane %v1753_v2, 4  ;;  %v11884_v62 = vor.u32 %v9290_v3, %v9292_v4  ;;  %v1584_v3 = vsel %vm11816_vm9, %v9654_v27, %v1583_v10  ;;  %vm11905_vm9 = vcmask 523264  }
 0x1ee   : > { %v1328_v14 = vrot.slane %v1324_v8, 4 }
 0x1ef   : > { %v9892_v46 = vld [vmem:[#allocation3 + $0x50] sm:$0xf]  ;;  %v1763_v45 = vsel %vm1220_vm0, %v11879_v22, %v1757_v19  ;;  %v1765_v49 = vsel %vm1759_vm13, %v1753_v2, %v1757_v19  ;;  %v9933_v19 = vld [vmem:[#allocation3 + $0xa0] sm:$0xf0]  ;;  %v9943_v22 = vld [vmem:[#allocation3 + $0xc0] sm:$0xf] }
 0x1f0   : > { %2200 = vmatpush.bf16.msrb.mxu3 %v11878_v38  ;;  %1593 = vst [vmem:[#allocation3 + $0x50] sm:$0xf] %v1585_v42  ;;  %v1334_v1 = vsel %vm1220_vm0, %v11880_v29, %v1328_v14  ;;  %v1336_v11 = vsel %vm11881_vm7, %v1324_v8, %v1328_v14  ;;  %v1764_v47 = vsel %vm1759_vm13, %v9575_v7, %v1763_v45  ;;  %v9916_v60 = vld [vmem:[#allocation3 + $0x4c] sm:$0xf]  ;;  %v6914_v51 = vld [vmem:[#allocation3 + $0x48] sm:$0xf] }
 0x1f1   : > { %v1335_v30 = vsel %vm11883_vm14, %v9495_v50, %v1334_v1  ;;  %1344 = vst [vmem:[#allocation3 + $0x88] sm:$0xf] %v1336_v11  ;;  %v9918_v50 = vld [vmem:[#allocation3 + $0xd4] sm:$0xf0]  ;;  %vm11886_vm7 = vcmask 744448   ;;  %vm11887_vm14 = vcmask 523264  }
 0x1f2   : > { %1343 = vst [vmem:[#allocation3 + $0x80] sm:$0xff] %v1335_v30  ;;  %3010 = vrot.lane.b32.xlu1 %v9872_v41, %s11809_s25  ;;  %3046 = vrot.lane.b32.xlu2 %v9872_v41, %s8174_s23  ;;  %v9941_v42 = vld [vmem:[#allocation3 + $0xbc] sm:$0xf]  ;;  %v11888_v45 = vrot.slane %v9534_v26, 4  ;;  %vm11889_vm8 = vmmov %vm11886_vm7  ;;  %v2520_v30 = vrot.slane %v9885_v44, 4 }
 0x1f3   : > { %1773 = vst [vmem:[#allocation3 + $0xdc] sm:$0xf] %v1765_v49  ;;  %3118 = vrot.lane.b32.xlu0 %v9872_v41, %s8172_s27 }
 0x1f4   : > { %2201 = vmatpush.bf16.msrb.mxu3 %v11884_v62  ;;  %1772 = vst [vmem:[#allocation3 + $0xd4] sm:$0xff] %v1764_v47  ;;  %v1681_v4 = vpop.permute.xlu1 %1680  ;;  %v9926_v7 = vpop.permute.xlu2 %2479  ;;  %v2526_v53 = vsel %vm1220_vm0, %v11894_v59, %v2520_v30 }
 0x1f5   : > { %v1717_v2 = vpop.permute.xlu0 %1716  ;;  %v1685_v38 = vrot.slane %v1681_v4, 4  ;;  %1592 = vst [vmem:[#allocation3 + $0x48] sm:$0xff] %v1584_v3  ;;  %v2484_v47 = vrot.slane %v9926_v7, 4 }
 0x1f6   : > { %v1721_v8 = vrot.slane %v1717_v2, 4 }
 0x1f7   : > { %v1691_v14 = vsel %vm1220_vm0, %v11885_v5, %v1685_v38  ;;  %v1693_v27 = vsel %vm11886_vm7, %v1681_v4, %v1685_v38  ;;  %6980 = vmatmul.msk.bf16.vlgmr.msrb.gmra.mxu3 %vm11887_vm14, %v9931_v24  ;;  %v7857_v4 = vld [vmem:[#allocation3 + $0x60] sm:$0xf0]  ;;  %vm11891_vm7 = vcmask 482304   ;;  %vm11895_vm14 = vcmask 785408  }
 0x1f8   : > { %2250 = vmatpush.bf16.msra.mxu3 %v6971_v58  ;;  %v1727_v33 = vsel %vm1220_vm0, %v11888_v45, %v1721_v8  ;;  %v1729_v29 = vsel %vm1723_vm5, %v1717_v2, %v1721_v8  ;;  %v1692_v1 = vsel %vm11889_vm8, %v9699_v52, %v1691_v14  ;;  %1701 = vst [vmem:[#allocation3 + $0xa4] sm:$0xf] %v1693_v27  ;;  %v7864_v58 = vld [vmem:[#allocation3 + $0x98] sm:$0xf0]  ;;  %vm11890_vm8 = vcmask 474112   ;;  %v9973_v45 = vld [vmem:[#allocation2 + $0xc] sm:$0xff] }
 0x1f9   : > { %v1728_v11 = vsel %vm1723_vm5, %v9534_v26, %v1727_v33  ;;  %1737 = vst [vmem:[#allocation3 + $0xc0] sm:$0xf] %v1729_v29  ;;  %v6942_v49 = vld [vmem:[#allocation3 + $0x80] sm:$0xf]  ;;  %v6915_v38 = vor.u32 %v7857_v4, %v6914_v51  ;;  %v2528_v8 = vsel %vm11890_vm8, %v9885_v44, %v2520_v30  ;;  %v2492_v14 = vsel %vm11891_vm7, %v9926_v7, %v2484_v47  ;;  %v9971_v27 = vld [vmem:[#allocation3 + $0x84] sm:$0xf]  ;;  %vm11897_vm8 = vmmov %vm11895_vm14 }
 0x1fa   : > { %1736 = vst [vmem:[#allocation3 + $0xb8] sm:$0xff] %v1728_v11  ;;  %2974 = vrot.lane.b32.xlu1 %v9872_v41, %s8176_s22  ;;  %v6943_v10 = vor.u32 %v7864_v58, %v6942_v49  ;;  %2866 = vrot.lane.b32.xlu2 %v9872_v41, %s8177_s20  ;;  %v7900_v33 = vld [vmem:[#allocation3 + $0xd8] sm:$0xf0]  ;;  %v11892_v49 = vrot.slane %v9608_v21, 4  ;;  %v11893_v58 = vrot.slane %v9775_v40, 4  ;;  %vm11898_vm7 = vcmask 474112  }
 0x1fb   : > { %2938 = vrot.lane.b32.xlu0 %v9872_v41, %s8175_s26  ;;  %1700 = vst [vmem:[#allocation3 + $0x9c] sm:$0xff] %v1692_v1  ;;  %v7899_v29 = vld [vmem:[#allocation3 + $0xd0] sm:$0xf0]  ;;  %v7076_v1 = vld [vmem:[#allocation3 + $0xc4] sm:$0xf0] }
 0x1fc   : > { %2251 = vmatpush.bf16.msra.mxu3 %v6943_v10  ;;  %v1501_v26 = vpop.permute.xlu1 %1500  ;;  %v9963_v52 = vpop.permute.xlu2 %2299  ;;  %v6853_v7 = vld [vmem:[#allocation3 + $0xd4] sm:$0xf0]  ;;  %v6886_v4 = vld [vmem:[#allocation3 + $0x10] sm:$0xf] }
 0x1fd   : > { %v1645_v62 = vpop.permute.xlu0 %1644  ;;  %v1505_v3 = vrot.slane %v1501_v26, 4 }
 0x1fe   : > { %v1649_v2 = vrot.slane %v1645_v62, 4 }
 0x1ff   : > { %v9967_v5 = vld [vmem:[#allocation3 + $0xa0] sm:$0xf0]  ;;  %v1511_v10 = vsel %vm1220_vm0, %v11893_v58, %v1505_v3  ;;  %v1513_v15 = vsel %vm11895_vm14, %v1501_v26, %v1505_v3  ;;  %v9990_v58 = vld [vmem:[#allocation3 + $0x18] sm:$0xf]  ;;  %v6887_v3 = vor.u32 %v9883_v56, %v6886_v4  ;;  %vm11899_vm14 = vcmask 482304  }
 0x200   : > { %v6859_v11 = vld [vmem:[#allocation3 + $0xc0] sm:$0xf]  ;;  %2500 = vst [vmem:[#allocation3 + $0xa4] sm:$0xf] %v2492_v14  ;;  %v1655_v51 = vsel %vm1220_vm0, %v11892_v49, %v1649_v2  ;;  %v1657_v44 = vsel %vm11820_vm12, %v1645_v62, %v1649_v2  ;;  %2252 = vmatpush.bf16.msra.mxu3 %v6915_v38  ;;  %v9988_v2 = vld [vmem:[#allocation3 + $0x88] sm:$0xf]  ;;  %v1512_v26 = vsel %vm11897_vm8, %v9775_v40, %v1511_v10 }
 0x201   : > { %2536 = vst [vmem:[#allocation3 + $0xc0] sm:$0xf] %v2528_v8  ;;  %v1656_v14 = vsel %vm11820_vm12, %v9608_v21, %v1655_v51  ;;  %v6860_v49 = vor.u32 %v7900_v33, %v6859_v11  ;;  %v7896_v13 = vld [vmem:[#allocation3 + $0xbc] sm:$0xf]  ;;  %v6851_v62 = vld [vmem:[#allocation3 + $0xb8] sm:$0xf] }
 0x202   : > { %1664 = vst [vmem:[#allocation3 + $0x80] sm:$0xff] %v1656_v14  ;;  %3612 = vrot.lane.b32.xlu1 %v9973_v45, %s8148_s30  ;;  %v9994_v38 = vld [vmem:[#allocation2 + $0x14] sm:$0xff]  ;;  %v6852_v59 = vor.u32 %v7899_v29, %v6851_v62  ;;  %v6856_v30 = vor.u32 %v7896_v13, %v6853_v7  ;;  %v11896_v8 = vrot.slane %v9735_v35, 4  ;;  %v7922_v33 = vld [vmem:[#allocation3 + $0xac] sm:$0xf]  ;;  %v2527_v29 = vsel %vm11898_vm7, %v9697_v39, %v2526_v53 }
 0x203   : > { %1665 = vst [vmem:[#allocation3 + $0x88] sm:$0xf] %v1657_v44  ;;  %2902 = vrot.lane.b32.xlu0 %v9872_v41, %s8178_s24  ;;  %2038 = vmatpush.bf16.msrb.mxu2 %v6860_v49  ;;  %v7915_v11 = vld [vmem:[#allocation3 + $0x74] sm:$0xf]  ;;  %v6825_v40 = vld [vmem:[#allocation3 + $0x9c] sm:$0xf0] }
 0x204   : > { %v2490_v21 = vsel %vm1220_vm0, %v11896_v8, %v2484_v47  ;;  %1521 = vst [vmem:[#allocation3 + $0x18] sm:$0xf] %v1513_v15  ;;  %3614 = vrot.lane.b32.xlu2 %v9994_v38, %s8148_s30  ;;  %2012 = vmatpush.bf16.msrb.mxu0 %v6852_v59  ;;  %v2552_v13 = vpop.permute.xlu1 %2551  ;;  %v7079_v47 = vor.u32 %v7922_v33, %v7076_v1  ;;  %v10008_v51 = vpop.permute.xlu2 %3076  ;;  %v7892_v44 = vld [vmem:[#allocation3 + $0x98] sm:$0xf0]  ;;  %v10010_v41 = vld [vmem:[#allocation3 + $0x14] sm:$0xf] }
 0x205   : > { %2535 = vst [vmem:[#allocation3 + $0xb8] sm:$0xff] %v2527_v29  ;;  %2025 = vmatpush.bf16.msrb.mxu1 %v6856_v30  ;;  %2253 = vmatpush.bf16.msra.mxu3 %v6887_v3  ;;  %v1609_v56 = vpop.permute.xlu0 %1608  ;;  %v2556_v10 = vrot.slane %v2552_v13, 4  ;;  %v2491_v39 = vsel %vm11899_vm14, %v9735_v35, %v2490_v21  ;;  %v7048_v15 = vld [vmem:[#allocation3 + $0x8c] sm:$0xf0]  ;;  %v2304_v1 = vrot.slane %v9963_v52, 4  ;;  %v11900_v7 = vrot.slane %v9818_v43, 4 }
 0x206   : > { %1520 = vst [vmem:[#allocation3 + $0x10] sm:$0xff] %v1512_v26  ;;  %v1613_v53 = vrot.slane %v1609_v56, 4  ;;  %vm11901_vm8 = vcmask 465920   ;;  %v7051_v49 = vor.u32 %v7915_v11, %v7048_v15  ;;  %v7908_v62 = vld [vmem:[#allocation3 + $0x3c] sm:$0xf]  ;;  %v11902_v35 = vrot.slane %v9737_v12, 4 }
 0x207   : > { %v2562_v4 = vsel %vm1220_vm0, %v11900_v7, %v2556_v10  ;;  %v2564_v14 = vsel %vm11901_vm8, %v2552_v13, %v2556_v10  ;;  %2499 = vst [vmem:[#allocation3 + $0x9c] sm:$0xff] %v2491_v39  ;;  %v10019_v59 = vld [vmem:[#allocation3 + $0x64] sm:$0xf0]  ;;  %v10021_v30 = vld [vmem:[#allocation3 + $0x68] sm:$0xf0]  ;;  %vm11903_vm7 = vcmask 760832   ;;  %vm11904_vm14 = vmmov %vm11901_vm8 }
 0x208   : > { %v1619_v8 = vsel %vm1220_vm0, %v11902_v35, %v1613_v53  ;;  %v1621_v21 = vsel %vm11903_vm7, %v1609_v56, %v1613_v53  ;;  %v2563_v26 = vsel %vm11904_vm14, %v9818_v43, %v2562_v4  ;;  %2572 = vst [vmem:[#allocation3 + $0xdc] sm:$0xf] %v2564_v14  ;;  %6984 = vmatmul.msk.bf16.vlgmr.msra.gmra.mxu3 %vm11905_vm9, %v9931_v24  ;;  %vm11906_vm8 = vmmov %vm11903_vm7  ;;  %v10044_v10 = vld [vmem:[#allocation2 + $0x4] sm:$0xff]  ;;  %v7020_v39 = vld [vmem:[#allocation3 + $0x54] sm:$0xf0]  ;;  %vm11909_vm7 = vcmask 490496  }
 0x209   : > { %2771 = vmatpush.bf16.msrb.mxu3 %v7079_v47  ;;  %v1620_v3 = vsel %vm11906_vm8, %v9737_v12, %v1619_v8  ;;  %1629 = vst [vmem:[#allocation3 + $0x6c] sm:$0xf] %v1621_v21  ;;  %v6823_v33 = vld [vmem:[#allocation3 + $0x80] sm:$0xf]  ;;  %v7889_v11 = vld [vmem:[#allocation3 + $0x84] sm:$0xf]  ;;  %v2312_v43 = vsel %vm11905_vm9, %v9963_v52, %v2304_v1  ;;  %vm11910_vm14 = vmmov %vm11909_vm7  ;;  %v6959_v52 = vor.u32 %v9269_v57, %v9370_v61 }
 0x20a   : > { %1628 = vst [vmem:[#allocation3 + $0x64] sm:$0xff] %v1620_v3  ;;  %3649 = vrot.lane.b32.xlu1 %v9994_v38, %s8147_s29  ;;  %v6831_v29 = vld [vmem:[#allocation3 + $0x88] sm:$0xf]  ;;  %v6824_v13 = vor.u32 %v7892_v44, %v6823_v33  ;;  %v6828_v47 = vor.u32 %v7889_v11, %v6825_v40  ;;  %v7023_v44 = vor.u32 %v7908_v62, %v7020_v39  ;;  %v6992_v4 = vld [vmem:[#allocation3 + $0x1c] sm:$0xf0]  ;;  %v11908_v62 = vrot.slane %v9606_v23, 4  ;;  %vm11913_vm8 = vmmov %vm11905_vm9 }
 0x20b   : > { %v10035_v56 = vld [vmem:[#allocation3 + $0x18] sm:$0xf]  ;;  %2571 = vst [vmem:[#allocation3 + $0xd4] sm:$0xff] %v2563_v26  ;;  %3647 = vrot.lane.b32.xlu0 %v9973_v45, %s8147_s29  ;;  %v6832_v12 = vor.u32 %v9967_v5, %v6831_v29  ;;  %v6803_v5 = vld [vmem:[#allocation3 + $0x50] sm:$0xf]  ;;  %vm11914_vm9 = vmmov %vm11913_vm8  ;;  %v6939_v57 = vor.u32 %v9629_v20, %v9721_v16  ;;  %v11917_v20 = vor.u32 %v9691_v32, %v9631_v17 }
 0x20c   : > { %2320 = vst [vmem:[#allocation3 + $0x18] sm:$0xf] %v2312_v43  ;;  %3610 = vrot.lane.b32.xlu2 %v10044_v10, %s8148_s30  ;;  %2013 = vmatpush.bf16.msrb.mxu0 %v6824_v13  ;;  %v2372_v40 = vpop.permute.xlu1 %2371  ;;  %v10048_v53 = vpop.permute.xlu2 %3114  ;;  %v7901_v21 = vld [vmem:[#allocation3 + $0x4] sm:$0xf]  ;;  %v7882_v26 = vld [vmem:[#allocation3 + $0x4c] sm:$0xf] }
 0x20d   : > { %2772 = vmatpush.bf16.msrb.mxu3 %v7051_v49  ;;  %2039 = vmatpush.bf16.msrb.mxu2 %v6832_v12  ;;  %v2444_v15 = vpop.permute.xlu0 %2443  ;;  %v2376_v7 = vrot.slane %v2372_v40, 4  ;;  %v11907_v49 = vrot.slane %v9840_v6, 4  ;;  %v6995_v29 = vor.u32 %v7901_v21, %v6992_v4 }
 0x20e   : > { %2026 = vmatpush.bf16.msrb.mxu1 %v6828_v47  ;;  %v2448_v14 = vrot.slane %v2444_v15, 4  ;;  %v6795_v47 = vld [vmem:[#allocation3 + $0x48] sm:$0xf] }
 0x20f   : > { %v2382_v35 = vsel %vm1220_vm0, %v11907_v49, %v2376_v7  ;;  %v2384_v8 = vsel %vm11818_vm11, %v2372_v40, %v2376_v7  ;;  %v7924_v7 = vld [vmem:[#allocation3 + $0xbc] sm:$0xf]  ;;  %v7879_v49 = vld [vmem:[#allocation3 + $0x30] sm:$0xf0] }
 0x210   : > { %v2454_v3 = vsel %vm1220_vm0, %v11908_v62, %v2448_v14  ;;  %v2456_v33 = vsel %vm11909_vm7, %v2444_v15, %v2448_v14  ;;  %v2383_v11 = vsel %vm11818_vm11, %v9840_v6, %v2382_v35  ;;  %2392 = vst [vmem:[#allocation3 + $0x50] sm:$0xf] %v2384_v8  ;;  %v7886_v13 = vld [vmem:[#allocation3 + $0x68] sm:$0xf0]  ;;  %v7875_v35 = vld [vmem:[#allocation3 + $0x14] sm:$0xf]  ;;  %vm11916_vm7 = vmmov %vm11913_vm8 }
 0x211   : > { %2773 = vmatpush.bf16.msrb.mxu3 %v7023_v44  ;;  %v2455_v43 = vsel %vm11910_vm14, %v9606_v23, %v2454_v3  ;;  %2464 = vst [vmem:[#allocation3 + $0x88] sm:$0xf] %v2456_v33  ;;  %v6804_v12 = vor.u32 %v7886_v13, %v6803_v5  ;;  %v7885_v39 = vld [vmem:[#allocation3 + $0x60] sm:$0xf0]  ;;  %v6797_v40 = vld [vmem:[#allocation3 + $0x64] sm:$0xf0] }
 0x212   : > { %2463 = vst [vmem:[#allocation3 + $0x80] sm:$0xff] %v2455_v43  ;;  %3542 = vrot.lane.b32.xlu1 %v9973_v45, %s8151_s7  ;;  %v6796_v44 = vor.u32 %v7885_v39, %v6795_v47  ;;  %v6800_v15 = vor.u32 %v7882_v26, %v6797_v40  ;;  %v7092_v6 = vld [vmem:[#allocation3 + $0xd4] sm:$0xf0]  ;;  %v6767_v23 = vld [vmem:[#allocation3 + $0x10] sm:$0xf]  ;;  %v6776_v26 = vor.u32 %v7879_v49, %v10035_v56  ;;  %v11912_v39 = vrot.slane %v9652_v36, 4 }
 0x213   : > { %3645 = vrot.lane.b32.xlu0 %v10044_v10, %s8147_s29  ;;  %2040 = vmatpush.bf16.msrb.mxu2 %v6804_v12  ;;  %2391 = vst [vmem:[#allocation3 + $0x48] sm:$0xff] %v2383_v11  ;;  %v7095_v4 = vor.u32 %v7924_v7, %v7092_v6  ;;  %v7878_v62 = vld [vmem:[#allocation3 + $0x28] sm:$0xf0]  ;;  %v6769_v11 = vld [vmem:[#allocation3 + $0x2c] sm:$0xf0]  ;;  %v6967_v12 = vor.u32 %v9557_v18, %v9635_v54  ;;  %vm11918_vm14 = vcmask 515072  }
 0x214   : > { %3544 = vrot.lane.b32.xlu2 %v9994_v38, %s8151_s7  ;;  %2014 = vmatpush.bf16.msrb.mxu0 %v6796_v44  ;;  %v2298_v14 = vpop.permute.xlu1 %2297  ;;  %v10068_v5 = vpop.permute.xlu2 %3004  ;;  %v6768_v33 = vor.u32 %v7878_v62, %v6767_v23  ;;  %v6772_v43 = vor.u32 %v7875_v35, %v6769_v11  ;;  %v7064_v54 = vld [vmem:[#allocation3 + $0x9c] sm:$0xf0]  ;;  %v11915_v7 = vor.u32 %v9637_v63, %v9559_v48  ;;  %v10120_v23 = vld [vmem:[%s11738_s2 + $0x8] sm:$0xf]  ;;  %v11924_v35 = vld [vmem:[#allocation5_spill] sm:$0xff] }
 0x215   : > { %2774 = vmatpush.bf16.msrb.mxu3 %v6995_v29  ;;  %2027 = vmatpush.bf16.msrb.mxu1 %v6800_v15  ;;  %v2408_v8 = vpop.permute.xlu0 %2407  ;;  %v2303_v21 = vrot.slane %v2298_v14, 4  ;;  %v11911_v29 = vrot.slane %v9423_v37, 4  ;;  %v6931_v48 = vor.u32 %v9408_v25, %v9325_v55  ;;  %v11921_v25 = vld [vmem:[#allocation12_spill] sm:$0xff] }
 0x216   : > { %v2412_v3 = vrot.slane %v2408_v8, 4  ;;  %v6911_v55 = vor.u32 %v11921_v25, %v9748_v28 }
 0x217   : > { %v2308_v13 = vsel %vm1220_vm0, %v11911_v29, %v2303_v21  ;;  %v2310_v47 = vsel %vm1220_vm0, %v2303_v21, %v2304_v1  ;;  %2041 = vmatpush.bf16.msrb.mxu2 %v6776_v26 }
 0x218   : > { %v2418_v56 = vsel %vm1220_vm0, %v11912_v39, %v2412_v3  ;;  %v2420_v40 = vsel %vm11817_vm15, %v2408_v8, %v2412_v3  ;;  %v2309_v44 = vsel %vm11913_vm8, %v9423_v37, %v2308_v13  ;;  %2015 = vmatpush.bf16.msrb.mxu0 %v6768_v33  ;;  %v2311_v15 = vsel %vm11914_vm9, %v2298_v14, %v2310_v47  ;;  %vm11919_vm8 = vmmov %vm11916_vm7  ;;  %v11922_v14 = vld [vmem:[#allocation10_spill] sm:$0xff]  ;;  %v11925_v8 = vld [vmem:[#allocation7_spill] sm:$0xff] }
 0x219   : > { %2823 = vmatpush.bf16.msra.mxu3 %v7095_v4  ;;  %v2419_v1 = vsel %vm11817_vm15, %v9652_v36, %v2418_v56  ;;  %2428 = vst [vmem:[#allocation3 + $0x6c] sm:$0xf] %v2420_v40  ;;  %2028 = vmatpush.bf16.msrb.mxu1 %v6772_v43  ;;  %v7917_v18 = vld [vmem:[#allocation3 + $0x84] sm:$0xf]  ;;  %vm11920_vm9 = vmmov %vm11916_vm7  ;;  %v11923_v49 = vrot.slane %v11922_v14, 4  ;;  %v6903_v21 = vor.u32 %v11925_v8, %v11924_v35  ;;  %v11927_v33 = vld [vmem:[#allocation13_spill] sm:$0xff] }
 0x21a   : > { %2427 = vst [vmem:[#allocation3 + $0x64] sm:$0xff] %v2419_v1  ;;  %v7067_v37 = vor.u32 %v7917_v18, %v7064_v54  ;;  %3579 = vrot.lane.b32.xlu1 %v9994_v38, %s8150_s6  ;;  %6867 = vmatmul.msk.bf16.vlgmr.msrb.gmra.mxu2 %vm11919_vm8, %v9772_v31  ;;  %vm11926_vm8 = vmmov %vm11918_vm14  ;;  %v7910_v26 = vld [vmem:[#allocation3 + $0x4c] sm:$0xf]  ;;  %v7925_v3 = vld [vmem:[#allocation3 + $0xc0] sm:$0xf0]  ;;  %v11928_v11 = vor.u32 %v9725_v9, %v11927_v33  ;;  %v3121_v1 = vrot.slane %v10048_v53, 4 }
 0x21b   : > { %2237 = vmatpush.bf16.msra.mxu2 %v6967_v12  ;;  %2318 = vst [vmem:[#allocation3 + $0x8] sm:$0xff] %v2309_v44  ;;  %3577 = vrot.lane.b32.xlu0 %v9973_v45, %s8150_s6  ;;  %v11929_v13 = vld [vmem:[#allocation11_spill] sm:$0xff]  ;;  %v11930_v47 = vld [vmem:[#allocation14_spill] sm:$0xff]  ;;  %v7074_v12 = vld [vmem:[#allocation3 + $0xa8] sm:$0xf]  ;;  %v6975_v54 = vor.u32 %v9941_v42, %v9918_v50 }
 0x21c   : > { %2211 = vmatpush.bf16.msra.mxu0 %v6959_v52  ;;  %2319 = vst [vmem:[#allocation3 + $0x10] sm:$0xff] %v2311_v15  ;;  %3540 = vrot.lane.b32.xlu2 %v10044_v10, %s8151_s7  ;;  %v2336_v61 = vpop.permute.xlu1 %2335  ;;  %v10103_v63 = vpop.permute.xlu2 %3042  ;;  %v6883_v43 = vor.u32 %v11930_v47, %v11929_v13  ;;  %v11931_v56 = vld [vmem:[#allocation4_spill] sm:$0xff]  ;;  %v11932_v9 = vld [vmem:[#allocation6_spill] sm:$0xff]  ;;  %v7075_v52 = vor.u32 %v7925_v3, %v7074_v12  ;;  %v7918_v42 = vld [vmem:[#allocation3 + $0x88] sm:$0xf0] }
 0x21d   : > { %2224 = vmatpush.bf16.msra.mxu1 %v11915_v7  ;;  %2824 = vmatpush.bf16.msra.mxu3 %v7067_v37  ;;  %v2334_v36 = vpop.permute.xlu0 %2333  ;;  %v2340_v6 = vrot.slane %v2336_v61, 4  ;;  %v6875_v40 = vor.u32 %v11932_v9, %v11931_v56  ;;  %v3084_v7 = vrot.slane %v10008_v51, 4  ;;  %v7911_v35 = vld [vmem:[#allocation3 + $0x50] sm:$0xf0]  ;;  %v7084_v3 = vld [vmem:[#allocation3 + $0xcc] sm:$0xf0] }
 0x21e   : > { %6865 = vmatmul.msk.bf16.vlgmr.msrb.gmra.mxu0 %vm11916_vm7, %v9772_v31  ;;  %v2339_v4 = vrot.slane %v2334_v36, 4  ;;  %6866 = vmatmul.msk.bf16.vlgmr.msrb.gmra.mxu1 %vm11920_vm9, %v9772_v31  ;;  %vm3125_vm9 = vcmask 203776   ;;  %v7090_v47 = vld [vmem:[#allocation3 + $0xb8] sm:$0xf]  ;;  %v7062_v56 = vld [vmem:[#allocation3 + $0x80] sm:$0xf] }
 0x21f   : > { %2238 = vmatpush.bf16.msra.mxu2 %v6939_v57  ;;  %v2348_v16 = vsel %vm11918_vm14, %v2336_v61, %v2340_v6  ;;  %7101 = vmatmul.msk.bf16.vlgmr.msrb.gmra.mxu3 %vm11916_vm7, %v10120_v23  ;;  %vm11819_vm7 = vcmask 211968   ;;  %v11933_v57 = vld [vmem:[#allocation8_spill] sm:$0xff]  ;;  %v11934_v61 = vld [vmem:[#allocation9_spill] sm:$0xff] }
 0x220   : > { %2212 = vmatpush.bf16.msra.mxu0 %v6931_v48  ;;  %v2344_v17 = vsel %vm1220_vm0, %v11923_v49, %v2339_v4  ;;  %v2346_v32 = vsel %vm1220_vm0, %v2339_v4, %v2340_v6  ;;  %2356 = vst [vmem:[#allocation3 + $0x34] sm:$0xf] %v2348_v16  ;;  %v11935_v48 = vor.u32 %v11933_v57, %v11934_v61  ;;  %v7046_v6 = vld [vmem:[#allocation3 + $0x70] sm:$0xf]  ;;  %v7056_v61 = vld [vmem:[#allocation3 + $0x94] sm:$0xf0] }
 0x221   : > { %2225 = vmatpush.bf16.msra.mxu1 %v11917_v20  ;;  %v2345_v28 = vsel %vm11918_vm14, %v11922_v14, %v2344_v17  ;;  %v2347_v31 = vsel %vm11926_vm8, %v2334_v36, %v2346_v32  ;;  %v7036_v62 = vld [vmem:[#allocation3 + $0x64] sm:$0xf0]  ;;  %v6979_v36 = vor.u32 %v9907_v34, %v9943_v22  ;;  %v7047_v25 = vor.u32 %v7918_v42, %v7046_v6  ;;  %v7018_v34 = vld [vmem:[#allocation3 + $0x38] sm:$0xf]  ;;  %v7913_v6 = vld [vmem:[#allocation3 + $0x60] sm:$0xf0] }
 0x222   : > { %2354 = vst [vmem:[#allocation3 + $0x24] sm:$0xff] %v2345_v28  ;;  %v7039_v29 = vor.u32 %v7910_v26, %v7036_v62  ;;  %3472 = vrot.lane.b32.xlu1 %v9973_v45, %s8154_s10  ;;  %v6951_v22 = vor.u32 %v9933_v19, %v9988_v2  ;;  %v6919_v2 = vor.u32 %v9916_v60, %v10019_v59  ;;  %vm11936_vm14 = vcmask 523264   ;;  %v7904_v28 = vld [vmem:[#allocation3 + $0x18] sm:$0xf0]  ;;  %v6990_v26 = vld [vmem:[#allocation3] sm:$0xf] }
 0x223   : > { %2239 = vmatpush.bf16.msra.mxu2 %v6911_v55  ;;  %2355 = vst [vmem:[#allocation3 + $0x2c] sm:$0xff] %v2347_v31  ;;  %3575 = vrot.lane.b32.xlu0 %v10044_v10, %s8150_s6  ;;  %v6947_v55 = vor.u32 %v9971_v27, %v9955_v0  ;;  %v7903_v14 = vld [vmem:[#allocation3 + $0x14] sm:$0xf]  ;;  %v7019_v27 = vor.u32 %v7911_v35, %v7018_v34  ;;  %vm11937_vm8 = vmmov %vm11936_vm14  ;;  %v7026_v42 = vld [vmem:[#allocation3 + $0x40] sm:$0xf] }
 0x224   : > { %2213 = vmatpush.bf16.msra.mxu0 %v6903_v21  ;;  %3474 = vrot.lane.b32.xlu2 %v9994_v38, %s8154_s10  ;;  %v3113_v39 = vpop.permute.xlu1 %3112  ;;  %v10146_v44 = vpop.permute.xlu2 %2932  ;;  %v6923_v21 = vor.u32 %v10021_v30, %v9892_v46  ;;  %v7927_v62 = vld [vmem:[#allocation3 + $0xd0] sm:$0xf0]  ;;  %v7082_v46 = vld [vmem:[#allocation3 + $0xb0] sm:$0xf]  ;;  %v7926_v30 = vld [vmem:[#allocation3 + $0xc8] sm:$0xf0] }
 0x225   : > { %2226 = vmatpush.bf16.msra.mxu1 %v11928_v11  ;;  %2825 = vmatpush.bf16.msra.mxu3 %v7039_v29  ;;  %v3079_v15 = vpop.permute.xlu0 %3078  ;;  %v3120_v18 = vrot.slane %v3113_v39, 4  ;;  %v6991_v11 = vor.u32 %v7904_v28, %v6990_v26  ;;  %v11939_v29 = vld [vmem:[#allocation16_spill] sm:$0xff]  ;;  %vm11940_vm15 = vmmov %vm11937_vm8  ;;  %v7083_v9 = vor.u32 %v7926_v30, %v7082_v46  ;;  %v7034_v34 = vld [vmem:[#allocation3 + $0x48] sm:$0xf] }
 0x226   : > { %v3085_v37 = vrot.slane %v3079_v15, 4  ;;  %v6891_v13 = vor.u32 %v10010_v41, %v11939_v29  ;;  %v7919_v41 = vld [vmem:[#allocation3 + $0x90] sm:$0xf0]  ;;  %v10225_v35 = vld [vmem:[#allocation2 + $0x1c] sm:$0xff]  ;;  %v7028_v28 = vld [vmem:[#allocation3 + $0x5c] sm:$0xf0] }
 0x227   : > { %2240 = vmatpush.bf16.msra.mxu2 %v6883_v43  ;;  %v3124_v4 = vsel %vm1220_vm0, %v3120_v18, %v3121_v1  ;;  %v7923_v43 = vld [vmem:[#allocation3 + $0xb4] sm:$0xf]  ;;  %v7006_v26 = vld [vmem:[#allocation3 + $0x10] sm:$0xf] }
 0x228   : > { %2214 = vmatpush.bf16.msra.mxu0 %v6875_v40  ;;  %v3088_v20 = vsel %vm1220_vm0, %v3084_v7, %v3085_v37  ;;  %v3126_v50 = vsel %vm3125_vm9, %v3113_v39, %v3124_v4  ;;  %v7091_v39 = vor.u32 %v7927_v62, %v7090_v47  ;;  %v3012_v7 = vrot.slane %v10068_v5, 4  ;;  %v7928_v47 = vld [vmem:[#allocation3 + $0xd8] sm:$0xf0] }
 0x229   : > { %2227 = vmatpush.bf16.msra.mxu1 %v11935_v48  ;;  %v3090_v16 = vsel %vm11819_vm7, %v10008_v51, %v3088_v20  ;;  %3136 = vst [vmem:[#allocation3 + $0xc4] sm:$0xff] %v3126_v50  ;;  %v7905_v62 = vld [vmem:[#allocation3 + $0x20] sm:$0xf0]  ;;  %v7000_v29 = vld [vmem:[#allocation3 + $0x24] sm:$0xf0] }
 0x22a   : > { %3100 = vst [vmem:[#allocation3 + $0xa8] sm:$0xff] %v3090_v16  ;;  %v7008_v49 = vld [vmem:[#allocation3 + $0x2c] sm:$0xf0]  ;;  %3509 = vrot.lane.b32.xlu1 %v9994_v38, %s8152_s8  ;;  %6983 = vmatmul.msk.bf16.vlgmr.msra.gmra.mxu2 %vm11937_vm8, %v9931_v24 }
 0x22b   : > { %2758 = vmatpush.bf16.msrb.mxu2 %v7075_v52  ;;  %v7011_v17 = vor.u32 %v7903_v14, %v7008_v49  ;;  %3507 = vrot.lane.b32.xlu0 %v9973_v45, %s8152_s8  ;;  %v7035_v14 = vor.u32 %v7913_v6, %v7034_v34  ;;  %v7909_v49 = vld [vmem:[#allocation3 + $0x44] sm:$0xf]  ;;  %v7914_v34 = vld [vmem:[#allocation3 + $0x68] sm:$0xf0] }
 0x22c   : > { %2263 = vmatpush.bf16.msrb.mxu0 %v6975_v54  ;;  %v10168_v51 = vpop.permute.xlu1 %3116  ;;  %v10170_v32 = vpop.permute.xlu2 %2970  ;;  %3470 = vrot.lane.b32.xlu2 %v10044_v10, %s8154_s10  ;;  %v7920_v54 = vld [vmem:[#allocation3 + $0x98] sm:$0xf0]  ;;  %v7921_v6 = vld [vmem:[#allocation3 + $0xa0] sm:$0xf0] }
 0x22d   : > { %2276 = vmatpush.bf16.msrb.mxu1 %v6979_v36  ;;  %v10176_v19 = vpop.permute.xlu0 %3080  ;;  %v3122_v0 = vrot.slane %v10168_v51, 4  ;;  %2826 = vmatpush.bf16.msra.mxu3 %v7011_v17  ;;  %v7063_v57 = vor.u32 %v7920_v54, %v7062_v56  ;;  %v7054_v36 = vld [vmem:[#allocation3 + $0x78] sm:$0xf]  ;;  %v7070_v56 = vld [vmem:[#allocation3 + $0x88] sm:$0xf] }
 0x22e   : > { %v3086_v8 = vrot.slane %v10176_v19, 4  ;;  %6981 = vmatmul.msk.bf16.vlgmr.msra.gmra.mxu0 %vm11936_vm14, %v9931_v24  ;;  %vm11938_vm14 = vmmov %vm11937_vm8  ;;  %vm3017_vm8 = vcmask 228352   ;;  %v7055_v50 = vor.u32 %v7919_v41, %v7054_v36 }
 0x22f   : > { %2759 = vmatpush.bf16.msrb.mxu2 %v7047_v25  ;;  %v3127_v31 = vsel %vm1220_vm0, %v3121_v1, %v3122_v0  ;;  %6982 = vmatmul.msk.bf16.vlgmr.msra.gmra.mxu1 %vm11938_vm14, %v9931_v24  ;;  %v3049_v1 = vrot.slane %v10103_v63, 4  ;;  %vm11942_vm11 = vmmov %vm11938_vm14 }
 0x230   : > { %2264 = vmatpush.bf16.msrb.mxu0 %v6947_v55  ;;  %v3091_v60 = vsel %vm1220_vm0, %v3085_v37, %v3086_v8  ;;  %v3128_v59 = vsel %vm3125_vm9, %v10048_v53, %v3127_v31  ;;  %7105 = vmatmul.msk.bf16.vlgmr.msra.gmra.mxu3 %vm11940_vm15, %v10120_v23  ;;  %v11941_v53 = vld [vmem:[#allocation15_spill] sm:$0xff]  ;;  %vm11821_vm15 = vcmask 220160  }
 0x231   : > { %2277 = vmatpush.bf16.msrb.mxu1 %v6951_v22  ;;  %v3092_v33 = vsel %vm11819_vm7, %v3079_v15, %v3091_v60  ;;  %3137 = vst [vmem:[#allocation3 + $0xcc] sm:$0xff] %v3128_v59  ;;  %v6895_v12 = vor.u32 %v11941_v53, %v9990_v58  ;;  %v7087_v58 = vor.u32 %v7923_v43, %v7084_v3  ;;  %v7950_v30 = vld [vmem:[#allocation3 + $0xac] sm:$0xf]  ;;  %v7196_v3 = vld [vmem:[#allocation3 + $0xc4] sm:$0xf0] }
 0x232   : > { %3101 = vst [vmem:[#allocation3 + $0xb0] sm:$0xff] %v3092_v33  ;;  %3437 = vrot.lane.b32.xlu1 %v9973_v45, %s8149_s5  ;;  %v7031_v60 = vor.u32 %v7909_v49, %v7028_v28  ;;  %v6998_v53 = vld [vmem:[#allocation3 + $0x8] sm:$0xf] }
 0x233   : > { %2760 = vmatpush.bf16.msrb.mxu2 %v7019_v27  ;;  %3505 = vrot.lane.b32.xlu0 %v10044_v10, %s8152_s8  ;;  %v7912_v27 = vld [vmem:[#allocation3 + $0x58] sm:$0xf0]  ;;  %v6999_v41 = vor.u32 %v7905_v62, %v6998_v53 }
 0x234   : > { %2265 = vmatpush.bf16.msrb.mxu0 %v6919_v2  ;;  %v3041_v40 = vpop.permute.xlu1 %3040  ;;  %v10205_v52 = vpop.permute.xlu2 %2860  ;;  %3439 = vrot.lane.b32.xlu2 %v9994_v38, %s8149_s5  ;;  %v7916_v38 = vld [vmem:[#allocation3 + $0x7c] sm:$0xf]  ;;  %v7906_v2 = vld [vmem:[#allocation3 + $0x28] sm:$0xf0] }
 0x235   : > { %2278 = vmatpush.bf16.msrb.mxu1 %v6923_v21  ;;  %v10212_v15 = vpop.permute.xlu0 %3006  ;;  %v3048_v18 = vrot.slane %v3041_v40, 4  ;;  %v7059_v55 = vor.u32 %v7916_v38, %v7056_v61  ;;  %v7027_v21 = vor.u32 %v7912_v27, %v7026_v42  ;;  %v2977_v38 = vrot.slane %v10170_v32, 4 }
 0x236   : > { %v3013_v37 = vrot.slane %v10212_v15, 4 }
 0x237   : > { %2761 = vmatpush.bf16.msrb.mxu2 %v6991_v11  ;;  %v3052_v48 = vsel %vm1220_vm0, %v3048_v18, %v3049_v1  ;;  %v7007_v11 = vor.u32 %v7906_v2, %v7006_v26  ;;  %v7199_v18 = vor.u32 %v7950_v30, %v7196_v3  ;;  %v7014_v3 = vld [vmem:[#allocation3 + $0x18] sm:$0xf] }
 0x238   : > { %2266 = vmatpush.bf16.msrb.mxu0 %v6891_v13  ;;  %v3016_v4 = vsel %vm1220_vm0, %v3012_v7, %v3013_v37  ;;  %v3054_v20 = vsel %vm11821_vm15, %v3041_v40, %v3052_v48  ;;  %v7954_v16 = vld [vmem:[#allocation3 + $0xc8] sm:$0xf0]  ;;  %v7098_v13 = vld [vmem:[#allocation3 + $0xc0] sm:$0xf] }
 0x239   : > { %2279 = vmatpush.bf16.msrb.mxu1 %v6895_v12  ;;  %v3018_v25 = vsel %vm3017_vm8, %v10068_v5, %v3016_v4  ;;  %3064 = vst [vmem:[#allocation3 + $0x8c] sm:$0xff] %v3054_v20  ;;  %v7202_v22 = vld [vmem:[#allocation3 + $0xb0] sm:$0xf]  ;;  %v7194_v12 = vld [vmem:[#allocation3 + $0xa8] sm:$0xf] }
 0x23a   : > { %3028 = vst [vmem:[#allocation3 + $0x70] sm:$0xff] %v3018_v25  ;;  %v7203_v17 = vor.u32 %v7954_v16, %v7202_v22  ;;  %3616 = vrot.lane.b32.xlu1 %v10225_v35, %s8148_s30  ;;  %7100 = vmatmul.msk.bf16.vlgmr.msrb.gmra.mxu2 %vm11938_vm14, %v10120_v23  ;;  %v2940_v25 = vrot.slane %v10146_v44, 4 }
 0x23b   : > { %2810 = vmatpush.bf16.msra.mxu2 %v7091_v39  ;;  %3435 = vrot.lane.b32.xlu0 %v10044_v10, %s8149_s5  ;;  %v7953_v39 = vld [vmem:[#allocation3 + $0xc0] sm:$0xf0] }
 0x23c   : > { %2784 = vmatpush.bf16.msra.mxu0 %v7083_v9  ;;  %3351 = vmatpush.bf16.msrb.mxu3 %v7203_v17  ;;  %v10227_v31 = vpop.permute.xlu1 %3044  ;;  %v10229_v5 = vpop.permute.xlu2 %2898  ;;  %v7195_v48 = vor.u32 %v7953_v39, %v7194_v12 }
 0x23d   : > { %2797 = vmatpush.bf16.msra.mxu1 %v7087_v58  ;;  %v10235_v59 = vpop.permute.xlu0 %3008  ;;  %v3050_v46 = vrot.slane %v10227_v31, 4  ;;  %3651 = vrot.lane.b32.xlu2 %v10225_v35, %s8147_s29  ;;  %v7902_v58 = vld [vmem:[#allocation3 + $0xc] sm:$0xf] }
 0x23e   : > { %v3014_v33 = vrot.slane %v10235_v59, 4  ;;  %6985 = vmatmul.msk.bf16.vlgmr.msrb.gmra.mxu0 %vm11938_vm14, %v9931_v24  ;;  %vm11825_vm14 = vcmask 244736  }
 0x23f   : > { %2811 = vmatpush.bf16.msra.mxu2 %v7063_v57  ;;  %v3055_v43 = vsel %vm1220_vm0, %v3049_v1, %v3050_v46  ;;  %v7003_v57 = vor.u32 %v7902_v58, %v7000_v29  ;;  %6986 = vmatmul.msk.bf16.vlgmr.msrb.gmra.mxu1 %vm11942_vm11, %v9931_v24  ;;  %vm11824_vm11 = vcmask 236544   ;;  %v7951_v29 = vld [vmem:[#allocation3 + $0xb4] sm:$0xf] }
 0x240   : > { %2785 = vmatpush.bf16.msra.mxu0 %v7055_v50  ;;  %v3019_v9 = vsel %vm1220_vm0, %v3013_v37, %v3014_v33  ;;  %v3056_v40 = vsel %vm11821_vm15, %v10103_v63, %v3055_v43  ;;  %v7946_v54 = vld [vmem:[#allocation3 + $0x88] sm:$0xf0]  ;;  %v7168_v1 = vld [vmem:[#allocation3 + $0x8c] sm:$0xf0]  ;;  %v7099_v37 = vor.u32 %v7928_v47, %v7098_v13 }
 0x241   : > { %2798 = vmatpush.bf16.msra.mxu1 %v7059_v55  ;;  %v3020_v7 = vsel %vm3017_vm8, %v10212_v15, %v3019_v9  ;;  %3065 = vst [vmem:[#allocation3 + $0x94] sm:$0xff] %v3056_v40  ;;  %v7166_v61 = vld [vmem:[#allocation3 + $0x70] sm:$0xf]  ;;  %v7943_v63 = vld [vmem:[#allocation3 + $0x74] sm:$0xf]  ;;  %v7071_v15 = vor.u32 %v7921_v6, %v7070_v56 }
 0x242   : > { %3029 = vst [vmem:[#allocation3 + $0x78] sm:$0xff] %v3020_v7  ;;  %v7171_v36 = vor.u32 %v7943_v63, %v7168_v1  ;;  %v7167_v4 = vor.u32 %v7946_v54, %v7166_v61  ;;  %4171 = vrot.lane.b32.xlu1 %v9973_v45, %s8153_s9 }
 0x243   : > { %2812 = vmatpush.bf16.msra.mxu2 %v7035_v14  ;;  %4169 = vrot.lane.b32.xlu0 %v10044_v10, %s8153_s9 }
 0x244   : > { %2786 = vmatpush.bf16.msra.mxu0 %v7027_v21  ;;  %v2969_v20 = vpop.permute.xlu1 %2968  ;;  %v3083_v50 = vpop.permute.xlu2 %3082  ;;  %v7042_v21 = vld [vmem:[#allocation3 + $0x50] sm:$0xf] }
 0x245   : > { %2799 = vmatpush.bf16.msra.mxu1 %v7031_v60  ;;  %v2935_v24 = vpop.permute.xlu0 %2934  ;;  %v2976_v42 = vrot.slane %v2969_v20, 4  ;;  %v3087_v16 = vrot.slane %v3083_v50, 4  ;;  %4204 = vrot.lane.b32.xlu2 %v10044_v10, %s8157_s13  ;;  %v7043_v62 = vor.u32 %v7914_v34, %v7042_v21 }
 0x246   : > { %v2941_v55 = vrot.slane %v2935_v24, 4 }
 0x247   : > { %2813 = vmatpush.bf16.msra.mxu2 %v7007_v11  ;;  %v2980_v22 = vsel %vm1220_vm0, %v2976_v42, %v2977_v38  ;;  %v3093_v14 = vsel %vm1220_vm0, %v3086_v8, %v3087_v16  ;;  %v3095_v49 = vsel %vm11819_vm7, %v3083_v50, %v3087_v16  ;;  %v7907_v8 = vld [vmem:[#allocation3 + $0x30] sm:$0xf0] }
 0x248   : > { %2787 = vmatpush.bf16.msra.mxu0 %v6999_v41  ;;  %v2944_v17 = vsel %vm1220_vm0, %v2940_v25, %v2941_v55  ;;  %v2982_v27 = vsel %vm11824_vm11, %v2969_v20, %v2980_v22  ;;  %v3094_v2 = vsel %vm11819_vm7, %v10176_v19, %v3093_v14  ;;  %3103 = vst [vmem:[#allocation3 + $0xc0] sm:$0xf] %v3095_v49  ;;  %v7947_v28 = vld [vmem:[#allocation3 + $0x90] sm:$0xf0]  ;;  %v7204_v19 = vld [vmem:[#allocation3 + $0xcc] sm:$0xf0] }
 0x249   : > { %2800 = vmatpush.bf16.msra.mxu1 %v7003_v57  ;;  %v2946_v26 = vsel %vm11825_vm14, %v10146_v44, %v2944_v17  ;;  %2992 = vst [vmem:[#allocation3 + $0x54] sm:$0xff] %v2982_v27  ;;  %v7174_v60 = vld [vmem:[#allocation3 + $0x78] sm:$0xf]  ;;  %v7015_v44 = vor.u32 %v7907_v8, %v7014_v3  ;;  %v7207_v56 = vor.u32 %v7951_v29, %v7204_v19  ;;  %vm11943_vm7 = vcmask 523264  }
 0x24a   : > { %2956 = vst [vmem:[#allocation3 + $0x38] sm:$0xff] %v2946_v26  ;;  %v7175_v30 = vor.u32 %v7947_v28, %v7174_v60  ;;  %3546 = vrot.lane.b32.xlu1 %v10225_v35, %s8151_s7  ;;  %v7176_v9 = vld [vmem:[#allocation3 + $0x94] sm:$0xf0]  ;;  %vm11944_vm12 = vmmov %vm11943_vm7  ;;  %v2868_v20 = vrot.slane %v10205_v52, 4  ;;  %s11953_s7 = smov 59  }
 0x24b   : > { %3338 = vmatpush.bf16.msrb.mxu2 %v7199_v18  ;;  %3102 = vst [vmem:[#allocation3 + $0xb8] sm:$0xff] %v3094_v2  ;;  %4206 = vrot.lane.b32.xlu0 %v9973_v45, %s8157_s13  ;;  %v7944_v18 = vld [vmem:[#allocation3 + $0x7c] sm:$0xf] }
 0x24c   : > { %2836 = vmatpush.bf16.msrb.mxu0 %v7099_v37  ;;  %3352 = vmatpush.bf16.msrb.mxu3 %v7175_v30  ;;  %v10278_v11 = vpop.permute.xlu1 %2972  ;;  %v3047_v43 = vpop.permute.xlu2 %3046 }
 0x24d   : > { %3325 = vmatpush.bf16.msrb.mxu1 %v7195_v48  ;;  %v10284_v13 = vpop.permute.xlu0 %2936  ;;  %v2978_v47 = vrot.slane %v10278_v11, 4  ;;  %3581 = vrot.lane.b32.xlu2 %v10225_v35, %s8150_s6  ;;  %v3051_v12 = vrot.slane %v3047_v43, 4  ;;  %v7179_v48 = vor.u32 %v7944_v18, %v7176_v9  ;;  %v3422_v9 = vld [vmem:[#allocation2 + $0x1c] sm:$0xf]  ;;  %s11952_s6 = smov 60  }
 0x24e   : > { %v2942_v53 = vrot.slane %v10284_v13, 4  ;;  %7102 = vmatmul.msk.bf16.vlgmr.msra.gmra.mxu0 %vm11943_vm7, %v10120_v23  ;;  %7104 = vmatmul.msk.bf16.vlgmr.msra.gmra.mxu2 %vm11944_vm12, %v10120_v23 }
 0x24f   : > { %3339 = vmatpush.bf16.msrb.mxu2 %v7171_v36  ;;  %v2983_v39 = vsel %vm1220_vm0, %v2977_v38, %v2978_v47  ;;  %v3057_v58 = vsel %vm1220_vm0, %v3050_v46, %v3051_v12  ;;  %v3059_v37 = vsel %vm11821_vm15, %v3047_v43, %v3051_v12  ;;  %7103 = vmatmul.msk.bf16.vlgmr.msra.gmra.mxu1 %vm11943_vm7, %v10120_v23  ;;  %v2905_v36 = vrot.slane %v10229_v5, 4 }
 0x250   : > { %2837 = vmatpush.bf16.msrb.mxu0 %v7071_v15  ;;  %v2947_v40 = vsel %vm1220_vm0, %v2941_v55, %v2942_v53  ;;  %v2984_v41 = vsel %vm11824_vm11, %v10170_v32, %v2983_v39  ;;  %v7939_v54 = vld [vmem:[#allocation3 + $0x50] sm:$0xf0]  ;;  %v7140_v1 = vld [vmem:[#allocation3 + $0x54] sm:$0xf0]  ;;  %v3058_v57 = vsel %vm11821_vm15, %v10227_v31, %v3057_v58  ;;  %3067 = vst [vmem:[#allocation3 + $0xa4] sm:$0xf] %v3059_v37 }
 0x251   : > { %3326 = vmatpush.bf16.msrb.mxu1 %v7167_v4  ;;  %v2948_v7 = vsel %vm11825_vm14, %v2935_v24, %v2947_v40  ;;  %2993 = vst [vmem:[#allocation3 + $0x5c] sm:$0xff] %v2984_v41  ;;  %v7138_v32 = vld [vmem:[#allocation3 + $0x38] sm:$0xf]  ;;  %v7936_v61 = vld [vmem:[#allocation3 + $0x3c] sm:$0xf]  ;;  %vm11822_vm15 = vcmask 261120  }
 0x252   : > { %2957 = vst [vmem:[#allocation3 + $0x40] sm:$0xff] %v2948_v7  ;;  %v7139_v63 = vor.u32 %v7939_v54, %v7138_v32  ;;  %v7143_v46 = vor.u32 %v7936_v61, %v7140_v1  ;;  %vm11823_vm7 = vcmask 252928   ;;  %4101 = vrot.lane.b32.xlu1 %v9973_v45, %s8156_s12 }
 0x253   : > { %3066 = vst [vmem:[#allocation3 + $0x9c] sm:$0xff] %v3058_v57  ;;  %4099 = vrot.lane.b32.xlu0 %v10044_v10, %s8156_s12 }
 0x254   : > { %2838 = vmatpush.bf16.msrb.mxu0 %v7043_v62  ;;  %3340 = vmatpush.bf16.msrb.mxu2 %v7143_v46  ;;  %v2897_v31 = vpop.permute.xlu1 %2896  ;;  %v2867_v4 = vpop.permute.xlu2 %2866 }
 0x255   : > { %3327 = vmatpush.bf16.msrb.mxu1 %v7139_v63  ;;  %v2863_v6 = vpop.permute.xlu0 %2862  ;;  %v2904_v15 = vrot.slane %v2897_v31, 4  ;;  %4134 = vrot.lane.b32.xlu2 %v10044_v10, %s8160_s18  ;;  %v2871_v38 = vrot.slane %v2867_v4, 4 }
 0x256   : > { %v2869_v50 = vrot.slane %v2863_v6, 4 }
 0x257   : > { %v2908_v24 = vsel %vm1220_vm0, %v2904_v15, %v2905_v36  ;;  %v2879_v25 = vsel %vm11822_vm15, %v2867_v4, %v2871_v38 }
 0x258   : > { %2839 = vmatpush.bf16.msrb.mxu0 %v7015_v44  ;;  %v2872_v42 = vsel %vm1220_vm0, %v2868_v20, %v2869_v50  ;;  %v2910_v16 = vsel %vm11823_vm7, %v2897_v31, %v2908_v24  ;;  %v7940_v55 = vld [vmem:[#allocation3 + $0x58] sm:$0xf0]  ;;  %v7148_v34 = vld [vmem:[#allocation3 + $0x5c] sm:$0xf0]  ;;  %2887 = vst [vmem:[#allocation3 + $0x18] sm:$0xf] %v2879_v25 }
 0x259   : > { %v2874_v22 = vsel %vm11822_vm15, %v10205_v52, %v2872_v42  ;;  %2920 = vst [vmem:[#allocation3 + $0x1c] sm:$0xff] %v2910_v16  ;;  %v7146_v14 = vld [vmem:[#allocation3 + $0x40] sm:$0xf]  ;;  %v7937_v49 = vld [vmem:[#allocation3 + $0x44] sm:$0xf] }
 0x25a   : > { %2884 = vst [vmem:[#allocation3] sm:$0xff] %v2874_v22  ;;  %v7147_v17 = vor.u32 %v7940_v55, %v7146_v14  ;;  %v7151_v27 = vor.u32 %v7937_v49, %v7148_v34  ;;  %3476 = vrot.lane.b32.xlu1 %v10225_v35, %s8154_s10  ;;  %v7218_v42 = vld [vmem:[#allocation3 + $0xc0] sm:$0xf]  ;;  %v7210_v16 = vld [vmem:[#allocation3 + $0xb8] sm:$0xf]  ;;  %s11958_s10 = smov 64  }
 0x25b   : > { %4136 = vrot.lane.b32.xlu0 %v9973_v45, %s8160_s18  ;;  %v7952_v34 = vld [vmem:[#allocation3 + $0xbc] sm:$0xf] }
 0x25c   : > { %3364 = vmatpush.bf16.msra.mxu0 %v7207_v56  ;;  %3353 = vmatpush.bf16.msrb.mxu3 %v7147_v17  ;;  %v10325_v2 = vpop.permute.xlu1 %2900 }
 0x25d   : > { %v2865_v21 = vpop.permute.xlu0 %2864  ;;  %v2906_v28 = vrot.slane %v10325_v2, 4  ;;  %3511 = vrot.lane.b32.xlu2 %v10225_v35, %s8152_s8  ;;  %s11954_s8 = smov 62  }
 0x25e   : > { %v2870_v52 = vrot.slane %v2865_v21, 4  ;;  %v10334_v26 = vpop.permute.xlu2 %3614  ;;  %7106 = vmatmul.msk.bf16.vlgmr.msrb.gmra.mxu0 %vm11944_vm12, %v10120_v23  ;;  %v10352_v23 = vld [vmem:[#allocation2 + $0xc] sm:$0xff] }
 0x25f   : > { %v2911_v62 = vsel %vm1220_vm0, %v2905_v36, %v2906_v28  ;;  %v10347_v56 = vld [vmem:[#allocation3 + $0x18] sm:$0xf] }
 0x260   : > { %3365 = vmatpush.bf16.msra.mxu0 %v7179_v48  ;;  %v2875_v60 = vsel %vm1220_vm0, %v2869_v50, %v2870_v52  ;;  %v2877_v45 = vsel %vm1220_vm0, %v2870_v52, %v2871_v38  ;;  %v2912_v8 = vsel %vm11823_vm7, %v10229_v5, %v2911_v62  ;;  %v7932_v30 = vld [vmem:[#allocation3 + $0x18] sm:$0xf0]  ;;  %v7112_v3 = vld [vmem:[#allocation3 + $0x1c] sm:$0xf0]  ;;  %3426 = vst [vmem:[#allocation3 + $0x18] sm:$0xf] %v3422_v9 }
 0x261   : > { %v2876_v29 = vsel %vm11822_vm15, %v2863_v6, %v2875_v60  ;;  %v2878_v19 = vsel %vm11822_vm15, %v2865_v21, %v2877_v45  ;;  %2921 = vst [vmem:[#allocation3 + $0x24] sm:$0xff] %v2912_v8  ;;  %v7110_v44 = vld [vmem:[#allocation3] sm:$0xf]  ;;  %v7929_v43 = vld [vmem:[#allocation3 + $0x4] sm:$0xf]  ;;  %v10377_v6 = vld [vmem:[#allocation2 + $0x14] sm:$0xff] }
 0x262   : > { %2885 = vst [vmem:[#allocation3 + $0x8] sm:$0xff] %v2876_v29  ;;  %v7111_v12 = vor.u32 %v7932_v30, %v7110_v44  ;;  %v7115_v39 = vor.u32 %v7929_v43, %v7112_v3  ;;  %4031 = vrot.lane.b32.xlu1 %v10352_v23, %s8155_s11  ;;  %v10391_v50 = vld [vmem:[%s11738_s2 + $0xc] sm:$0xf]  ;;  %vm11945_vm15 = vmmov %vm11944_vm12  ;;  %v7949_v52 = vld [vmem:[#allocation3 + $0xa0] sm:$0xf0]  ;;  %v3620_v60 = vrot.slane %v10334_v26, 4 }
 0x263   : > { %2886 = vst [vmem:[#allocation3 + $0x10] sm:$0xff] %v2878_v19  ;;  %4029 = vrot.lane.b32.xlu0 %v10044_v10, %s8155_s11  ;;  %v10417_v8 = vld [vmem:[#allocation2 + $0x4] sm:$0xff]  ;;  %v7948_v19 = vld [vmem:[#allocation3 + $0x98] sm:$0xf0] }
 0x264   : > { %3366 = vmatpush.bf16.msra.mxu0 %v7151_v27  ;;  %3328 = vmatpush.bf16.msrb.mxu1 %v7111_v12  ;;  %3423 = vst [vmem:[#allocation3] sm:$0xff] %v10044_v10  ;;  %v3011_v5 = vpop.permute.xlu1 %3010 }
 0x265   : > { %3341 = vmatpush.bf16.msrb.mxu2 %v7115_v39  ;;  %v3119_v40 = vpop.permute.xlu0 %3118  ;;  %v3015_v41 = vrot.slane %v3011_v5, 4  ;;  %4064 = vrot.lane.b32.xlu2 %v10044_v10, %s8159_s17  ;;  %v7184_v39 = vld [vmem:[#allocation3 + $0x9c] sm:$0xf0] }
 0x266   : > { %v3123_v58 = vrot.slane %v3119_v40, 4  ;;  %v10358_v18 = vpop.permute.xlu2 %3610 }
 0x267   : > { %v3021_v54 = vsel %vm1220_vm0, %v3014_v33, %v3015_v41  ;;  %v3023_v1 = vsel %vm3017_vm8, %v3011_v5, %v3015_v41  ;;  %v3618_v45 = vrot.slane %v10358_v18, 4 }
 0x268   : > { %v3129_v7 = vsel %vm1220_vm0, %v3122_v0, %v3123_v58  ;;  %v3131_v57 = vsel %vm3125_vm9, %v3119_v40, %v3123_v58  ;;  %v3022_v37 = vsel %vm3017_vm8, %v10235_v59, %v3021_v54  ;;  %3031 = vst [vmem:[#allocation3 + $0x88] sm:$0xf] %v3023_v1  ;;  %v7933_v32 = vld [vmem:[#allocation3 + $0x20] sm:$0xf0]  ;;  %v7120_v61 = vld [vmem:[#allocation3 + $0x24] sm:$0xf0]  ;;  %7221 = vmatmul.msk.bf16.vlgmr.msrb.gmra.mxu2 %vm11944_vm12, %v10391_v50 }
 0x269   : > { %v3130_v63 = vsel %vm3125_vm9, %v10168_v51, %v3129_v7  ;;  %3139 = vst [vmem:[#allocation3 + $0xdc] sm:$0xf] %v3131_v57  ;;  %v7118_v46 = vld [vmem:[#allocation3 + $0x8] sm:$0xf]  ;;  %v7930_v33 = vld [vmem:[#allocation3 + $0xc] sm:$0xf] }
 0x26a   : > { %3138 = vst [vmem:[#allocation3 + $0xd4] sm:$0xff] %v3130_v63  ;;  %v7119_v48 = vor.u32 %v7933_v32, %v7118_v46  ;;  %v7123_v31 = vor.u32 %v7930_v33, %v7120_v61  ;;  %v10372_v36 = vld [vmem:[#allocation3 + $0x10] sm:$0xf]  ;;  %v10374_v0 = vld [vmem:[#allocation3 + $0x14] sm:$0xf]  ;;  %3441 = vrot.lane.b32.xlu1 %v10225_v35, %s8149_s5  ;;  %s11951_s5 = smov 57  }
 0x26b   : > { %3030 = vst [vmem:[#allocation3 + $0x80] sm:$0xff] %v3022_v37  ;;  %4066 = vrot.lane.b32.xlu0 %v10352_v23, %s8159_s17 }
 0x26c   : > { %3354 = vmatpush.bf16.msrb.mxu3 %v7119_v48  ;;  %3367 = vmatpush.bf16.msra.mxu0 %v7123_v31  ;;  %3424 = vst [vmem:[#allocation3 + $0x8] sm:$0xff] %v10352_v23  ;;  %v2975_v59 = vpop.permute.xlu1 %2974 }
 0x26d   : > { %v2939_v51 = vpop.permute.xlu0 %2938  ;;  %v2979_v15 = vrot.slane %v2975_v59, 4  ;;  %3425 = vst [vmem:[#allocation3 + $0x10] sm:$0xff] %v10377_v6  ;;  %3959 = vrot.lane.b32.xlu2 %v10044_v10, %s8163_s21 }
 0x26e   : > { %v2943_v4 = vrot.slane %v2939_v51, 4  ;;  %v10386_v20 = vpop.permute.xlu2 %3544 }
 0x26f   : > { %v2985_v38 = vsel %vm1220_vm0, %v2978_v47, %v2979_v15  ;;  %v2987_v24 = vsel %vm11824_vm11, %v2975_v59, %v2979_v15  ;;  %7222 = vmatmul.msk.bf16.vlgmr.msrb.gmra.mxu3 %vm11945_vm15, %v10391_v50  ;;  %vm11946_vm15 = vmmov %vm11944_vm12  ;;  %7223 = vmatmul.msk.bf16.vlgmr.msra.gmra.mxu0 %vm11944_vm12, %v10391_v50 }
 0x270   : > { %v2949_v10 = vsel %vm1220_vm0, %v2942_v53, %v2943_v4  ;;  %v2951_v25 = vsel %vm11825_vm14, %v2939_v51, %v2943_v4  ;;  %v2986_v55 = vsel %vm11824_vm11, %v10278_v11, %v2985_v38  ;;  %2995 = vst [vmem:[#allocation3 + $0x6c] sm:$0xf] %v2987_v24  ;;  %v7956_v47 = vld [vmem:[#allocation3 + $0xd8] sm:$0xf0]  ;;  %7220 = vmatmul.msk.bf16.vlgmr.msrb.gmra.mxu1 %vm11946_vm15, %v10391_v50  ;;  %v7190_v11 = vld [vmem:[#allocation3 + $0x88] sm:$0xf]  ;;  %vm11947_vm15 = vmmov %vm11944_vm12 }
 0x271   : > { %v2950_v22 = vsel %vm11825_vm14, %v10284_v13, %v2949_v10  ;;  %2959 = vst [vmem:[#allocation3 + $0x50] sm:$0xf] %v2951_v25  ;;  %v7219_v14 = vor.u32 %v7956_v47, %v7218_v42  ;;  %v7955_v49 = vld [vmem:[#allocation3 + $0xd0] sm:$0xf0]  ;;  %v7212_v17 = vld [vmem:[#allocation3 + $0xd4] sm:$0xf0]  ;;  %v7191_v29 = vor.u32 %v7949_v52, %v7190_v11  ;;  %vm11950_vm14 = vmmov %vm11944_vm12 }
 0x272   : > { %2958 = vst [vmem:[#allocation3 + $0x48] sm:$0xff] %v2950_v22  ;;  %v7211_v53 = vor.u32 %v7955_v49, %v7210_v16  ;;  %v7215_v27 = vor.u32 %v7952_v34, %v7212_v17  ;;  %v7182_v21 = vld [vmem:[#allocation3 + $0x80] sm:$0xf]  ;;  %v7945_v62 = vld [vmem:[#allocation3 + $0x84] sm:$0xf]  ;;  %3994 = vrot.lane.b32.xlu1 %v10417_v8, %s8158_s14  ;;  %v3550_v47 = vrot.slane %v10386_v20, 4 }
 0x273   : > { %2994 = vst [vmem:[#allocation3 + $0x64] sm:$0xff] %v2986_v55  ;;  %3403 = vmatpush.bf16.msra.mxu3 %v7219_v14  ;;  %3961 = vrot.lane.b32.xlu0 %v10352_v23, %s8163_s21  ;;  %v7183_v12 = vor.u32 %v7948_v19, %v7182_v21  ;;  %v7187_v40 = vor.u32 %v7945_v62, %v7184_v39 }
 0x274   : > { %3377 = vmatpush.bf16.msra.mxu1 %v7211_v53  ;;  %3390 = vmatpush.bf16.msra.mxu2 %v7215_v27  ;;  %v3613_v13 = vpop.permute.xlu1 %3612 }
 0x275   : > { %v2903_v30 = vpop.permute.xlu0 %2902  ;;  %v3619_v3 = vrot.slane %v3613_v13, 4  ;;  %3996 = vrot.lane.b32.xlu2 %v10352_v23, %s8158_s14 }
 0x276   : > { %v2907_v44 = vrot.slane %v2903_v30, 4  ;;  %v10423_v43 = vpop.permute.xlu2 %3540 }
 0x277   : > { %v3622_v5 = vsel %vm1220_vm0, %v3618_v45, %v3619_v3  ;;  %v3624_v9 = vsel %vm1220_vm0, %v3619_v3, %v3620_v60  ;;  %3404 = vmatpush.bf16.msra.mxu3 %v7191_v29  ;;  %v7942_v41 = vld [vmem:[#allocation3 + $0x68] sm:$0xf0]  ;;  %v3548_v34 = vrot.slane %v10423_v43, 4 }
 0x278   : > { %v2913_v58 = vsel %vm1220_vm0, %v2906_v28, %v2907_v44  ;;  %v2915_v54 = vsel %vm11823_vm7, %v2903_v30, %v2907_v44  ;;  %v3623_v1 = vsel %vm1402_vm2, %v10358_v18, %v3622_v5  ;;  %3378 = vmatpush.bf16.msra.mxu1 %v7183_v12  ;;  %v7162_v7 = vld [vmem:[#allocation3 + $0x50] sm:$0xf]  ;;  %v3625_v37 = vsel %vm1402_vm2, %v3613_v13, %v3624_v9 }
 0x279   : > { %v2914_v57 = vsel %vm11823_vm7, %v10325_v2, %v2913_v58  ;;  %2923 = vst [vmem:[#allocation3 + $0x34] sm:$0xf] %v2915_v54  ;;  %3391 = vmatpush.bf16.msra.mxu2 %v7187_v40  ;;  %v7163_v32 = vor.u32 %v7942_v41, %v7162_v7  ;;  %v7154_v61 = vld [vmem:[#allocation3 + $0x48] sm:$0xf]  ;;  %v7938_v63 = vld [vmem:[#allocation3 + $0x4c] sm:$0xf] }
 0x27a   : > { %2922 = vst [vmem:[#allocation3 + $0x2c] sm:$0xff] %v2914_v57  ;;  %v7941_v46 = vld [vmem:[#allocation3 + $0x60] sm:$0xf0]  ;;  %v7156_v28 = vld [vmem:[#allocation3 + $0x64] sm:$0xf0]  ;;  %4208 = vrot.lane.b32.xlu1 %v10377_v6, %s8157_s13  ;;  %vm11948_vm7 = vcmask 1014784  }
 0x27b   : > { %3633 = vst [vmem:[#allocation3 + $0xa8] sm:$0xff] %v3623_v1  ;;  %3405 = vmatpush.bf16.msra.mxu3 %v7163_v32  ;;  %v7155_v33 = vor.u32 %v7941_v46, %v7154_v61  ;;  %v7159_v48 = vor.u32 %v7938_v63, %v7156_v28  ;;  %4173 = vrot.lane.b32.xlu0 %v10377_v6, %s8153_s9  ;;  %vm11949_vm11 = vmmov %vm11948_vm7 }
 0x27c   : > { %3634 = vst [vmem:[#allocation3 + $0xb0] sm:$0xff] %v3625_v37  ;;  %v10438_v18 = vpop.permute.xlu1 %3649 }
 0x27d   : > { %3379 = vmatpush.bf16.msra.mxu1 %v7155_v33  ;;  %v3648_v2 = vpop.permute.xlu0 %3647  ;;  %v3655_v31 = vrot.slane %v10438_v18, 4  ;;  %4175 = vrot.lane.b32.xlu2 %v10225_v35, %s8153_s9  ;;  %s11955_s9 = smov 61  }
 0x27e   : > { %v3654_v59 = vrot.slane %v3648_v2, 4  ;;  %v10447_v51 = vpop.permute.xlu2 %3474  ;;  %3392 = vmatpush.bf16.msra.mxu2 %v7159_v48 }
 0x27f   : > { %v3480_v7 = vrot.slane %v10447_v51, 4 }
 0x280   : > { %v3659_v15 = vsel %vm1220_vm0, %v3654_v59, %v3655_v31  ;;  %v7935_v4 = vld [vmem:[#allocation3 + $0x30] sm:$0xf0] }
 0x281   : > { %v3660_v38 = vsel %vm1438_vm1, %v3648_v2, %v3659_v15  ;;  %v7135_v24 = vor.u32 %v7935_v4, %v10347_v56  ;;  %v7934_v42 = vld [vmem:[#allocation3 + $0x28] sm:$0xf0]  ;;  %v7128_v16 = vld [vmem:[#allocation3 + $0x2c] sm:$0xf0] }
 0x282   : > { %3669 = vst [vmem:[#allocation3 + $0xcc] sm:$0xff] %v3660_v38  ;;  %v7127_v10 = vor.u32 %v7934_v42, %v10372_v36  ;;  %v7131_v25 = vor.u32 %v10374_v0, %v7128_v16  ;;  %4103 = vrot.lane.b32.xlu1 %v10377_v6, %s8156_s12  ;;  %v7314_v12 = vld [vmem:[#allocation3 + $0xa8] sm:$0xf]  ;;  %v7978_v9 = vld [vmem:[#allocation3 + $0xac] sm:$0xf] }
 0x283   : > { %3406 = vmatpush.bf16.msra.mxu3 %v7135_v24  ;;  %4210 = vrot.lane.b32.xlu0 %v10225_v35, %s8157_s13  ;;  %v7322_v11 = vld [vmem:[#allocation3 + $0xb0] sm:$0xf]  ;;  %v7979_v21 = vld [vmem:[#allocation3 + $0xb4] sm:$0xf] }
 0x284   : > { %3380 = vmatpush.bf16.msra.mxu1 %v7127_v10  ;;  %3393 = vmatpush.bf16.msra.mxu2 %v7131_v25  ;;  %v3543_v55 = vpop.permute.xlu1 %3542 }
 0x285   : > { %v3646_v22 = vpop.permute.xlu0 %3645  ;;  %v3549_v56 = vrot.slane %v3543_v55, 4  ;;  %4138 = vrot.lane.b32.xlu2 %v10377_v6, %s8160_s18 }
 0x286   : > { %v3653_v36 = vrot.slane %v3646_v22, 4  ;;  %v3471_v49 = vpop.permute.xlu2 %3470  ;;  %7226 = vmatmul.msk.bf16.vlgmr.msra.gmra.mxu3 %vm11950_vm14, %v10391_v50 }
 0x287   : > { %v3552_v0 = vsel %vm1220_vm0, %v3548_v34, %v3549_v56  ;;  %v3554_v14 = vsel %vm1220_vm0, %v3549_v56, %v3550_v47  ;;  %7225 = vmatmul.msk.bf16.vlgmr.msra.gmra.mxu2 %vm11947_vm15, %v10391_v50  ;;  %7224 = vmatmul.msk.bf16.vlgmr.msra.gmra.mxu1 %vm11944_vm12, %v10391_v50  ;;  %v3478_v57 = vrot.slane %v3471_v49, 4  ;;  %vm11965_vm15 = vcmask 744448  }
 0x288   : > { %v3657_v17 = vsel %vm1220_vm0, %v3653_v36, %v3654_v59  ;;  %v3553_v53 = vsel %vm11948_vm7, %v10423_v43, %v3552_v0  ;;  %v3555_v27 = vsel %vm11949_vm11, %v3543_v55, %v3554_v14 }
 0x289   : > { %v3658_v13 = vsel %vm1438_vm1, %v3646_v22, %v3657_v17  ;;  %3563 = vst [vmem:[#allocation3 + $0x70] sm:$0xff] %v3553_v53  ;;  %v7982_v52 = vld [vmem:[#allocation3 + $0xc8] sm:$0xf0]  ;;  %v7324_v62 = vld [vmem:[#allocation3 + $0xcc] sm:$0xf0] }
 0x28a   : > { %3668 = vst [vmem:[#allocation3 + $0xc4] sm:$0xff] %v3658_v13  ;;  %v7323_v45 = vor.u32 %v7982_v52, %v7322_v11  ;;  %v7327_v30 = vor.u32 %v7979_v21, %v7324_v62  ;;  %4140 = vrot.lane.b32.xlu1 %v10225_v35, %s8160_s18  ;;  %s11978_s18 = smov 26  }
 0x28b   : > { %3564 = vst [vmem:[#allocation3 + $0x78] sm:$0xff] %v3555_v27  ;;  %4105 = vrot.lane.b32.xlu0 %v10225_v35, %s8156_s12 }
 0x28c   : > { %3883 = vmatpush.bf16.msrb.mxu2 %v7323_v45  ;;  %3896 = vmatpush.bf16.msrb.mxu3 %v7327_v30  ;;  %v10481_v29 = vpop.permute.xlu1 %3579 }
 0x28d   : > { %v3578_v3 = vpop.permute.xlu0 %3577  ;;  %4033 = vrot.lane.b32.xlu2 %v10377_v6, %s8155_s11  ;;  %v3585_v19 = vrot.slane %v10481_v29, 4 }
 0x28e   : > { %v3584_v50 = vrot.slane %v3578_v3, 4  ;;  %v10491_v43 = vpop.permute.xlu2 %3439 }
 0x28f   : > { %v3445_v52 = vrot.slane %v10491_v43, 4 }
 0x290   : > { %v3589_v44 = vsel %vm1220_vm0, %v3584_v50, %v3585_v19  ;;  %v7286_v36 = vld [vmem:[#allocation3 + $0x70] sm:$0xf]  ;;  %v7971_v14 = vld [vmem:[#allocation3 + $0x74] sm:$0xf] }
 0x291   : > { %v3590_v39 = vsel %vm1366_vm3, %v3578_v3, %v3589_v44  ;;  %v7981_v5 = vld [vmem:[#allocation3 + $0xc0] sm:$0xf0]  ;;  %v7316_v40 = vld [vmem:[#allocation3 + $0xc4] sm:$0xf0] }
 0x292   : > { %3599 = vst [vmem:[#allocation3 + $0x94] sm:$0xff] %v3590_v39  ;;  %v7315_v41 = vor.u32 %v7981_v5, %v7314_v12  ;;  %v7319_v58 = vor.u32 %v7978_v9, %v7316_v40  ;;  %4035 = vrot.lane.b32.xlu1 %v10225_v35, %s8155_s11  ;;  %v7294_v33 = vld [vmem:[#allocation3 + $0x78] sm:$0xf]  ;;  %v7972_v48 = vld [vmem:[#allocation3 + $0x7c] sm:$0xf]  ;;  %s11960_s11 = smov 63  }
 0x293   : > { %4068 = vrot.lane.b32.xlu0 %v10377_v6, %s8159_s17 }
 0x294   : > { %3857 = vmatpush.bf16.msrb.mxu0 %v7315_v41  ;;  %3870 = vmatpush.bf16.msrb.mxu1 %v7319_v58  ;;  %v3473_v1 = vpop.permute.xlu1 %3472 }
 0x295   : > { %v3576_v54 = vpop.permute.xlu0 %3575  ;;  %4070 = vrot.lane.b32.xlu2 %v10225_v35, %s8159_s17  ;;  %v3479_v32 = vrot.slane %v3473_v1, 4 }
 0x296   : > { %v3583_v37 = vrot.slane %v3576_v54, 4 }
 0x297   : > { %v3482_v63 = vsel %vm1220_vm0, %v3478_v57, %v3479_v32  ;;  %v3484_v46 = vsel %vm1220_vm0, %v3479_v32, %v3480_v7  ;;  %v3652_v28 = vpop.permute.xlu2 %3651 }
 0x298   : > { %v3587_v61 = vsel %vm1220_vm0, %v3583_v37, %v3584_v50  ;;  %v3483_v59 = vsel %vm1258_vm10, %v3471_v49, %v3482_v63  ;;  %v3485_v15 = vsel %vm1258_vm10, %v3473_v1, %v3484_v46  ;;  %v3656_v4 = vrot.slane %v3652_v28, 4 }
 0x299   : > { %v3588_v2 = vsel %vm1366_vm3, %v3576_v54, %v3587_v61  ;;  %v7975_v38 = vld [vmem:[#allocation3 + $0x90] sm:$0xf0]  ;;  %v7296_v24 = vld [vmem:[#allocation3 + $0x94] sm:$0xf0]  ;;  %3493 = vst [vmem:[#allocation3 + $0x38] sm:$0xff] %v3483_v59 }
 0x29a   : > { %3598 = vst [vmem:[#allocation3 + $0x8c] sm:$0xff] %v3588_v2  ;;  %v7295_v42 = vor.u32 %v7975_v38, %v7294_v33  ;;  %v7299_v16 = vor.u32 %v7972_v48, %v7296_v24  ;;  %v3661_v10 = vsel %vm1220_vm0, %v3655_v31, %v3656_v4  ;;  %v3663_v25 = vsel %vm1438_vm1, %v3652_v28, %v3656_v4  ;;  %v7238_v2 = vld [vmem:[#allocation3 + $0x8] sm:$0xf]  ;;  %v7958_v59 = vld [vmem:[#allocation3 + $0xc] sm:$0xf] }
 0x29b   : > { %3494 = vst [vmem:[#allocation3 + $0x40] sm:$0xff] %v3485_v15  ;;  %v3662_v55 = vsel %vm1438_vm1, %v10438_v18, %v3661_v10  ;;  %3963 = vrot.lane.b32.xlu0 %v10377_v6, %s8163_s21  ;;  %3998 = vrot.lane.b32.xlu1 %v10377_v6, %s8158_s14  ;;  %vm11956_vm1 = vmmov %vm11948_vm7 }
 0x29c   : > { %3884 = vmatpush.bf16.msrb.mxu2 %v7295_v42  ;;  %3897 = vmatpush.bf16.msrb.mxu3 %v7299_v16  ;;  %3670 = vst [vmem:[#allocation3 + $0xd4] sm:$0xff] %v3662_v55  ;;  %v10521_v22 = vpop.permute.xlu1 %3509 }
 0x29d   : > { %3671 = vst [vmem:[#allocation3 + $0xdc] sm:$0xf] %v3663_v25  ;;  %3965 = vrot.lane.b32.xlu2 %v10225_v35, %s8163_s21  ;;  %v3508_v31 = vpop.permute.xlu0 %3507  ;;  %v3515_v56 = vrot.slane %v10521_v22, 4 }
 0x29e   : > { %v3514_v34 = vrot.slane %v3508_v31, 4 }
 0x29f   : > { %v10524_v18 = vpop.permute.xlu2 %4204 }
 0x2a0   : > { %v3519_v17 = vsel %vm1220_vm0, %v3514_v34, %v3515_v56  ;;  %v7258_v33 = vld [vmem:[#allocation3 + $0x38] sm:$0xf]  ;;  %v7964_v48 = vld [vmem:[#allocation3 + $0x3c] sm:$0xf] }
 0x2a1   : > { %v7974_v0 = vld [vmem:[#allocation3 + $0x88] sm:$0xf0]  ;;  %v7288_v49 = vld [vmem:[#allocation3 + $0x8c] sm:$0xf0]  ;;  %v3520_v11 = vsel %vm1294_vm6, %v3508_v31, %v3519_v17  ;;  %v7957_v17 = vld [vmem:[#allocation3 + $0x4] sm:$0xf] }
 0x2a2   : > { %v7287_v53 = vor.u32 %v7974_v0, %v7286_v36  ;;  %v7291_v27 = vor.u32 %v7971_v14, %v7288_v49  ;;  %3529 = vst [vmem:[#allocation3 + $0x5c] sm:$0xff] %v3520_v11  ;;  %v7266_v44 = vld [vmem:[#allocation3 + $0x40] sm:$0xf]  ;;  %v7965_v40 = vld [vmem:[#allocation3 + $0x44] sm:$0xf] }
 0x2a3   : > { %4000 = vrot.lane.b32.xlu0 %v10225_v35, %s8158_s14  ;;  %4728 = vrot.lane.b32.xlu1 %v10417_v8, %s8161_s19  ;;  %v7230_v49 = vld [vmem:[#allocation3] sm:$0xf] }
 0x2a4   : > { %3858 = vmatpush.bf16.msrb.mxu0 %v7287_v53  ;;  %3871 = vmatpush.bf16.msrb.mxu1 %v7291_v27  ;;  %v3438_v13 = vpop.permute.xlu1 %3437  ;;  %v7984_v11 = vld [vmem:[#allocation3 + $0xd8] sm:$0xf0] }
 0x2a5   : > { %4730 = vrot.lane.b32.xlu2 %v10352_v23, %s8161_s19  ;;  %v3506_v21 = vpop.permute.xlu0 %3505  ;;  %v3444_v45 = vrot.slane %v3438_v13, 4 }
 0x2a6   : > { %v3513_v62 = vrot.slane %v3506_v21, 4 }
 0x2a7   : > { %v3582_v30 = vpop.permute.xlu2 %3581  ;;  %v3449_v35 = vsel %vm1220_vm0, %v3444_v45, %v3445_v52 }
 0x2a8   : > { %v3586_v3 = vrot.slane %v3582_v30, 4  ;;  %v3517_v50 = vsel %vm1220_vm0, %v3513_v62, %v3514_v34  ;;  %v3450_v39 = vsel %vm1222_vm4, %v3438_v13, %v3449_v35  ;;  %v7332_v35 = vld [vmem:[#allocation3 + $0xd4] sm:$0xf0] }
 0x2a9   : > { %v3518_v12 = vsel %vm1294_vm6, %v3506_v21, %v3517_v50  ;;  %v7968_v9 = vld [vmem:[#allocation3 + $0x58] sm:$0xf0]  ;;  %v7268_v41 = vld [vmem:[#allocation3 + $0x5c] sm:$0xf0]  ;;  %3459 = vst [vmem:[#allocation3 + $0x24] sm:$0xff] %v3450_v39 }
 0x2aa   : > { %v3591_v5 = vsel %vm1220_vm0, %v3585_v19, %v3586_v3  ;;  %3528 = vst [vmem:[#allocation3 + $0x54] sm:$0xff] %v3518_v12  ;;  %v3593_v54 = vsel %vm1366_vm3, %v3582_v30, %v3586_v3  ;;  %v7267_v1 = vor.u32 %v7968_v9, %v7266_v44  ;;  %v7271_v57 = vor.u32 %v7965_v40, %v7268_v41  ;;  %v7983_v21 = vld [vmem:[#allocation3 + $0xd0] sm:$0xf0] }
 0x2ab   : > { %v3592_v58 = vsel %vm1366_vm3, %v10481_v29, %v3591_v5  ;;  %4763 = vrot.lane.b32.xlu0 %v10417_v8, %s11951_s5  ;;  %4765 = vrot.lane.b32.xlu1 %v10352_v23, %s11951_s5  ;;  %3601 = vst [vmem:[#allocation3 + $0xa4] sm:$0xf] %v3593_v54  ;;  %vm11959_vm3 = vcmask 752640  }
 0x2ac   : > { %3600 = vst [vmem:[#allocation3 + $0x9c] sm:$0xff] %v3592_v58  ;;  %3885 = vmatpush.bf16.msrb.mxu2 %v7267_v1  ;;  %3898 = vmatpush.bf16.msrb.mxu3 %v7271_v57  ;;  %v3617_v29 = vpop.permute.xlu1 %3616  ;;  %v4212_v58 = vrot.slane %v10524_v18, 4 }
 0x2ad   : > { %4658 = vrot.lane.b32.xlu2 %v10417_v8, %s11952_s6  ;;  %v3436_v19 = vpop.permute.xlu0 %3435  ;;  %v3621_v32 = vrot.slane %v3617_v29, 4 }
 0x2ae   : > { %v3443_v37 = vrot.slane %v3436_v19, 4 }
 0x2af   : > { %v10555_v61 = vpop.permute.xlu2 %4134  ;;  %v3626_v46 = vsel %vm1220_vm0, %v3620_v60, %v3621_v32  ;;  %v3628_v28 = vsel %vm1402_vm2, %v3617_v29, %v3621_v32 }
 0x2b0   : > { %v3447_v63 = vsel %vm1220_vm0, %v3443_v37, %v3444_v45  ;;  %v3627_v4 = vsel %vm1402_vm2, %v10334_v26, %v3626_v46  ;;  %3636 = vst [vmem:[#allocation3 + $0xc0] sm:$0xf] %v3628_v28  ;;  %v7961_v10 = vld [vmem:[#allocation3 + $0x20] sm:$0xf0]  ;;  %v7240_v25 = vld [vmem:[#allocation3 + $0x24] sm:$0xf0]  ;;  %vm11957_vm2 = vmmov %vm11956_vm1 }
 0x2b1   : > { %v3448_v15 = vsel %vm1222_vm4, %v3436_v19, %v3447_v63  ;;  %v7967_v38 = vld [vmem:[#allocation3 + $0x50] sm:$0xf0]  ;;  %v7260_v24 = vld [vmem:[#allocation3 + $0x54] sm:$0xf0]  ;;  %3635 = vst [vmem:[#allocation3 + $0xb8] sm:$0xff] %v3627_v4  ;;  %v7239_v60 = vor.u32 %v7961_v10, %v7238_v2  ;;  %v7243_v55 = vor.u32 %v7958_v59, %v7240_v25 }
 0x2b2   : > { %3458 = vst [vmem:[#allocation3 + $0x1c] sm:$0xff] %v3448_v15  ;;  %v7259_v42 = vor.u32 %v7967_v38, %v7258_v33  ;;  %v7263_v16 = vor.u32 %v7964_v48, %v7260_v24  ;;  %v7977_v48 = vld [vmem:[#allocation3 + $0xa0] sm:$0xf0] }
 0x2b3   : > { %4660 = vrot.lane.b32.xlu0 %v10352_v23, %s11952_s6  ;;  %4693 = vrot.lane.b32.xlu1 %v10417_v8, %s11953_s7  ;;  %v7976_v15 = vld [vmem:[#allocation3 + $0x98] sm:$0xf0]  ;;  %v7304_v10 = vld [vmem:[#allocation3 + $0x9c] sm:$0xf0] }
 0x2b4   : > { %3859 = vmatpush.bf16.msrb.mxu0 %v7259_v42  ;;  %3872 = vmatpush.bf16.msrb.mxu1 %v7263_v16  ;;  %v10571_v31 = vpop.permute.xlu1 %4171 }
 0x2b5   : > { %4695 = vrot.lane.b32.xlu2 %v10352_v23, %s11953_s7  ;;  %v4170_v26 = vpop.permute.xlu0 %4169  ;;  %3886 = vmatpush.bf16.msrb.mxu2 %v7239_v60  ;;  %v4178_v36 = vrot.slane %v10571_v31, 4 }
 0x2b6   : > { %3899 = vmatpush.bf16.msrb.mxu3 %v7243_v55  ;;  %v4177_v34 = vrot.slane %v4170_v26, 4 }
 0x2b7   : > { %v3512_v0 = vpop.permute.xlu2 %3511  ;;  %v7338_v27 = vld [vmem:[#allocation3 + $0xc0] sm:$0xf] }
 0x2b8   : > { %v3516_v14 = vrot.slane %v3512_v0, 4  ;;  %v4181_v53 = vsel %vm1220_vm0, %v4177_v34, %v4178_v36  ;;  %v7339_v30 = vor.u32 %v7984_v11, %v7338_v27  ;;  %v7330_v5 = vld [vmem:[#allocation3 + $0xb8] sm:$0xf]  ;;  %v7980_v9 = vld [vmem:[#allocation3 + $0xbc] sm:$0xf]  ;;  %v4142_v34 = vrot.slane %v10555_v61, 4 }
 0x2b9   : > { %v4182_v13 = vsel %vm1723_vm5, %v4170_v26, %v4181_v53  ;;  %v7960_v3 = vld [vmem:[#allocation3 + $0x18] sm:$0xf0]  ;;  %v7232_v50 = vld [vmem:[#allocation3 + $0x1c] sm:$0xf0]  ;;  %v7335_v40 = vor.u32 %v7980_v9, %v7332_v35 }
 0x2ba   : > { %v3521_v62 = vsel %vm1220_vm0, %v3515_v56, %v3516_v14  ;;  %v3523_v45 = vsel %vm1294_vm6, %v3512_v0, %v3516_v14  ;;  %4192 = vst [vmem:[#allocation3 + $0xa8] sm:$0xff] %v4182_v13  ;;  %v7231_v12 = vor.u32 %v7960_v3, %v7230_v49  ;;  %v7235_v39 = vor.u32 %v7957_v17, %v7232_v50  ;;  %v10637_v49 = vld [vmem:[%s11738_s2 + $0x10] sm:$0xf]  ;;  %v10658_v13 = vld [vmem:[#allocation2 + $0x1c] sm:$0xff] }
 0x2bb   : > { %v3522_v44 = vsel %vm1294_vm6, %v10521_v22, %v3521_v62  ;;  %4588 = vrot.lane.b32.xlu0 %v10417_v8, %s11954_s8  ;;  %3935 = vmatpush.bf16.msra.mxu2 %v7339_v30  ;;  %v7331_v56 = vor.u32 %v7983_v21, %v7330_v5  ;;  %3531 = vst [vmem:[#allocation3 + $0x6c] sm:$0xf] %v3523_v45  ;;  %vm11961_vm6 = vmmov %vm11944_vm12  ;;  %vm11967_vm12 = vcmask 760832  }
 0x2bc   : > { %3530 = vst [vmem:[#allocation3 + $0x64] sm:$0xff] %v3522_v44  ;;  %4590 = vrot.lane.b32.xlu1 %v10352_v23, %s11954_s8  ;;  %3860 = vmatpush.bf16.msrb.mxu0 %v7231_v12  ;;  %v3547_v41 = vpop.permute.xlu1 %3546  ;;  %vm11962_vm11 = vmmov %vm11961_vm6 }
 0x2bd   : > { %4623 = vrot.lane.b32.xlu2 %v10417_v8, %s11955_s9  ;;  %3873 = vmatpush.bf16.msrb.mxu1 %v7235_v39  ;;  %v10590_v22 = vpop.permute.xlu0 %4206  ;;  %v3551_v1 = vrot.slane %v3547_v41, 4  ;;  %vm11963_vm14 = vmmov %vm11961_vm6 }
 0x2be   : > { %v4213_v54 = vrot.slane %v10590_v22, 4  ;;  %7343 = vmatmul.msk.bf16.vlgmr.msrb.gmra.mxu3 %vm11962_vm11, %v10637_v49  ;;  %vm11964_vm7 = vmmov %vm11961_vm6 }
 0x2bf   : > { %v10594_v57 = vpop.permute.xlu2 %4064  ;;  %v3556_v29 = vsel %vm1220_vm0, %v3550_v47, %v3551_v1  ;;  %v3558_v37 = vsel %vm11956_vm1, %v3547_v41, %v3551_v1  ;;  %7340 = vmatmul.msk.bf16.vlgmr.msrb.gmra.mxu0 %vm11961_vm6, %v10637_v49  ;;  %7342 = vmatmul.msk.bf16.vlgmr.msrb.gmra.mxu2 %vm11964_vm7, %v10637_v49  ;;  %vm11968_vm1 = vmmov %vm11965_vm15 }
 0x2c0   : > { %3909 = vmatpush.bf16.msra.mxu0 %v7331_v56  ;;  %v4216_v19 = vsel %vm1220_vm0, %v4212_v58, %v4213_v54  ;;  %v3557_v63 = vsel %vm11957_vm2, %v10386_v20, %v3556_v29  ;;  %3566 = vst [vmem:[#allocation3 + $0x88] sm:$0xf] %v3558_v37  ;;  %7341 = vmatmul.msk.bf16.vlgmr.msrb.gmra.mxu1 %vm11963_vm14, %v10637_v49  ;;  %v10686_v37 = vpop.f32.mrf.mxu0  ;;  %vm11970_vm2 = vcmask 777216   ;;  %vm11972_vm11 = vmmov %vm11961_vm6 }
 0x2c1   : > { %3922 = vmatpush.bf16.msra.mxu1 %v7335_v40  ;;  %v4217_v32 = vsel %vm1759_vm13, %v10524_v18, %v4216_v19  ;;  %3565 = vst [vmem:[#allocation3 + $0x80] sm:$0xff] %v3557_v63  ;;  %v7434_v4 = vld [vmem:[#allocation3 + $0xa8] sm:$0xf]  ;;  %v4072_v63 = vrot.slane %v10594_v57, 4  ;;  %vm11973_vm14 = vmmov %vm11961_vm6 }
 0x2c2   : > { %4227 = vst [vmem:[#allocation3 + $0xc4] sm:$0xff] %v4217_v32  ;;  %v7970_v58 = vld [vmem:[#allocation3 + $0x68] sm:$0xf0]  ;;  %vm11974_vm7 = vmmov %vm11967_vm12 }
 0x2c3   : > { %4625 = vrot.lane.b32.xlu0 %v10352_v23, %s11955_s9  ;;  %v7969_v3 = vld [vmem:[#allocation3 + $0x60] sm:$0xf0]  ;;  %v7276_v44 = vld [vmem:[#allocation3 + $0x64] sm:$0xf0] }
 0x2c4   : > { %4518 = vrot.lane.b32.xlu1 %v10417_v8, %s11958_s10  ;;  %v10613_v28 = vpop.permute.xlu1 %4101 }
 0x2c5   : > { %4520 = vrot.lane.b32.xlu2 %v10352_v23, %s11958_s10  ;;  %v4100_v47 = vpop.permute.xlu0 %4099  ;;  %v4108_v20 = vrot.slane %v10613_v28, 4 }
 0x2c6   : > { %v4107_v46 = vrot.slane %v4100_v47, 4 }
 0x2c7   : > { %v10615_v18 = vpop.permute.xlu2 %3959  ;;  %v7310_v33 = vld [vmem:[#allocation3 + $0x88] sm:$0xf] }
 0x2c8   : > { %v4111_v2 = vsel %vm1220_vm0, %v4107_v46, %v4108_v20  ;;  %v7311_v59 = vor.u32 %v7977_v48, %v7310_v33  ;;  %v7302_v42 = vld [vmem:[#allocation3 + $0x80] sm:$0xf]  ;;  %v7973_v16 = vld [vmem:[#allocation3 + $0x84] sm:$0xf] }
 0x2c9   : > { %v8009_v38 = vld [vmem:[#allocation3 + $0xc0] sm:$0xf0]  ;;  %v4112_v24 = vsel %vm11959_vm3, %v4100_v47, %v4111_v2  ;;  %v7303_v60 = vor.u32 %v7976_v15, %v7302_v42  ;;  %v7307_v55 = vor.u32 %v7973_v16, %v7304_v10 }
 0x2ca   : > { %v7435_v25 = vor.u32 %v8009_v38, %v7434_v4  ;;  %4122 = vst [vmem:[#allocation3 + $0x70] sm:$0xff] %v4112_v24  ;;  %3936 = vmatpush.bf16.msra.mxu2 %v7311_v59 }
 0x2cb   : > { %4553 = vrot.lane.b32.xlu0 %v10417_v8, %s11960_s11  ;;  %3910 = vmatpush.bf16.msra.mxu0 %v7303_v60 }
 0x2cc   : > { %4555 = vrot.lane.b32.xlu1 %v10352_v23, %s11960_s11  ;;  %3923 = vmatpush.bf16.msra.mxu1 %v7307_v55  ;;  %v3477_v14 = vpop.permute.xlu1 %3476 }
 0x2cd   : > { %4732 = vrot.lane.b32.xlu2 %v10377_v6, %s8161_s19  ;;  %v10628_v26 = vpop.permute.xlu0 %4136  ;;  %4416 = vmatpush.bf16.msra.mxu3 %v7435_v25  ;;  %v3481_v23 = vrot.slane %v3477_v14, 4 }
 0x2ce   : > { %v4143_v0 = vrot.slane %v10628_v26, 4 }
 0x2cf   : > { %v10632_v8 = vpop.permute.xlu2 %3996  ;;  %v3486_v27 = vsel %vm1220_vm0, %v3480_v7, %v3481_v23  ;;  %v3488_v11 = vsel %vm1258_vm10, %v3477_v14, %v3481_v23  ;;  %v7246_v14 = vld [vmem:[#allocation3 + $0x10] sm:$0xf]  ;;  %v7959_v23 = vld [vmem:[#allocation3 + $0x14] sm:$0xf] }
 0x2d0   : > { %v4146_v17 = vsel %vm1220_vm0, %v4142_v34, %v4143_v0  ;;  %v3487_v21 = vsel %vm1258_vm10, %v10447_v51, %v3486_v27  ;;  %3496 = vst [vmem:[#allocation3 + $0x50] sm:$0xf] %v3488_v11  ;;  %vm11966_vm10 = vcmask 769024   ;;  %v4003_v55 = vrot.slane %v10632_v8, 4 }
 0x2d1   : > { %v4147_v53 = vsel %vm11965_vm15, %v10555_v61, %v4146_v17  ;;  %3495 = vst [vmem:[#allocation3 + $0x48] sm:$0xff] %v3487_v21  ;;  %v7406_v12 = vld [vmem:[#allocation3 + $0x70] sm:$0xf]  ;;  %vm11971_vm3 = vmmov %vm11966_vm10 }
 0x2d2   : > { %4157 = vst [vmem:[#allocation3 + $0x8c] sm:$0xff] %v4147_v53 }
 0x2d3   : > { %4734 = vrot.lane.b32.xlu0 %v10658_v13, %s8161_s19  ;;  %s11988_s19 = smov 28  }
 0x2d4   : > { %4767 = vrot.lane.b32.xlu1 %v10377_v6, %s11951_s5  ;;  %v10666_v62 = vpop.permute.xlu1 %4031 }
 0x2d5   : > { %4769 = vrot.lane.b32.xlu2 %v10658_v13, %s11951_s5  ;;  %v4030_v7 = vpop.permute.xlu0 %4029  ;;  %v4038_v51 = vrot.slane %v10666_v62, 4 }
 0x2d6   : > { %v4037_v61 = vrot.slane %v4030_v7, 4 }
 0x2d7   : > { %v10668_v45 = vpop.permute.xlu2 %4175  ;;  %v7282_v41 = vld [vmem:[#allocation3 + $0x50] sm:$0xf] }
 0x2d8   : > { %v4180_v30 = vrot.slane %v10668_v45, 4  ;;  %v4041_v50 = vsel %vm1220_vm0, %v4037_v61, %v4038_v51  ;;  %v7274_v9 = vld [vmem:[#allocation3 + $0x48] sm:$0xf]  ;;  %v7966_v56 = vld [vmem:[#allocation3 + $0x4c] sm:$0xf]  ;;  %v7283_v29 = vor.u32 %v7970_v58, %v7282_v41  ;;  %v10753_v58 = vpop.f32.mrf.mxu1 }
 0x2d9   : > { %v8002_v39 = vld [vmem:[#allocation3 + $0x88] sm:$0xf0]  ;;  %v4042_v5 = vsel %vm11966_vm10, %v4030_v7, %v4041_v50  ;;  %v7275_v1 = vor.u32 %v7969_v3, %v7274_v9  ;;  %v7279_v19 = vor.u32 %v7966_v56, %v7276_v44  ;;  %v7436_v7 = vld [vmem:[#allocation3 + $0xc4] sm:$0xf0]  ;;  %v10743_v44 = vpop.f32.mrf.mxu3  ;;  %vm11977_vm10 = vcmask 752640  }
 0x2da   : > { %v4187_v35 = vsel %vm1723_vm5, %v10668_v45, %v4180_v30  ;;  %v7407_v40 = vor.u32 %v8002_v39, %v7406_v12  ;;  %4052 = vst [vmem:[#allocation3 + $0x38] sm:$0xff] %v4042_v5  ;;  %3937 = vmatpush.bf16.msra.mxu2 %v7283_v29  ;;  %v7254_v12 = vld [vmem:[#allocation3 + $0x18] sm:$0xf]  ;;  %v8006_v9 = vld [vmem:[#allocation3 + $0xac] sm:$0xf] }
 0x2db   : > { %4195 = vst [vmem:[#allocation3 + $0xc0] sm:$0xf] %v4187_v35  ;;  %4662 = vrot.lane.b32.xlu0 %v10377_v6, %s11952_s6  ;;  %3911 = vmatpush.bf16.msra.mxu0 %v7275_v1  ;;  %v7439_v41 = vor.u32 %v8006_v9, %v7436_v7 }
 0x2dc   : > { %4664 = vrot.lane.b32.xlu1 %v10658_v13, %s11952_s6  ;;  %3924 = vmatpush.bf16.msra.mxu1 %v7279_v19  ;;  %v3442_v46 = vpop.permute.xlu1 %3441  ;;  %s8069_s6 = smul.u32 56, %s12094_s16 }
 0x2dd   : > { %4697 = vrot.lane.b32.xlu2 %v10377_v6, %s11953_s7  ;;  %v10688_v32 = vpop.permute.xlu0 %4066  ;;  %4417 = vmatpush.bf16.msra.mxu3 %v7407_v40  ;;  %v3446_v48 = vrot.slane %v3442_v46, 4 }
 0x2de   : > { %v4073_v47 = vrot.slane %v10688_v32, 4 }
 0x2df   : > { %v10692_v33 = vpop.permute.xlu2 %4138  ;;  %v3451_v4 = vsel %vm1220_vm0, %v3445_v52, %v3446_v48  ;;  %v3453_v38 = vsel %vm1222_vm4, %v3442_v46, %v3446_v48  ;;  %v1967_v52 = vpop.f32.mrf.mxu0 }
 0x2e0   : > { %v4144_v2 = vrot.slane %v10692_v33, 4  ;;  %v4076_v59 = vsel %vm1220_vm0, %v4072_v63, %v4073_v47  ;;  %v3452_v42 = vsel %vm1222_vm4, %v10491_v43, %v3451_v4  ;;  %3461 = vst [vmem:[#allocation3 + $0x34] sm:$0xf] %v3453_v38  ;;  %v3967_v43 = vrot.slane %v10615_v18, 4  ;;  %v7408_v63 = vld [vmem:[#allocation3 + $0x8c] sm:$0xf0] }
 0x2e1   : > { %v4077_v15 = vsel %vm11967_vm12, %v10594_v57, %v4076_v59  ;;  %3460 = vst [vmem:[#allocation3 + $0x2c] sm:$0xff] %v3452_v42  ;;  %vm11969_vm4 = vcmask 785408   ;;  %v7378_v11 = vld [vmem:[#allocation3 + $0x38] sm:$0xf]  ;;  %v7999_v4 = vld [vmem:[#allocation3 + $0x74] sm:$0xf] }
 0x2e2   : > { %v4148_v24 = vsel %vm1220_vm0, %v4143_v0, %v4144_v2  ;;  %4087 = vst [vmem:[#allocation3 + $0x54] sm:$0xff] %v4077_v15  ;;  %v7411_v42 = vor.u32 %v7999_v4, %v7408_v63  ;;  %vm11976_vm15 = vmmov %vm11969_vm4 }
 0x2e3   : > { %v4149_v16 = vsel %vm11968_vm1, %v10628_v26, %v4148_v24  ;;  %4699 = vrot.lane.b32.xlu0 %v10658_v13, %s11953_s7  ;;  %vm11981_vm1 = vmmov %vm11977_vm10 }
 0x2e4   : > { %4592 = vrot.lane.b32.xlu1 %v10377_v6, %s11954_s8  ;;  %4158 = vst [vmem:[#allocation3 + $0x94] sm:$0xff] %v4149_v16  ;;  %v3995_v25 = vpop.permute.xlu1 %3994 }
 0x2e5   : > { %4594 = vrot.lane.b32.xlu2 %v10658_v13, %s11954_s8  ;;  %v10719_v57 = vpop.permute.xlu0 %3961  ;;  %v4002_v26 = vrot.slane %v3995_v25, 4  ;;  %s11709_s8 = scalar_lea.vmem %s11740_s4, %s8069_s6 }
 0x2e6   : > { %v3968_v10 = vrot.slane %v10719_v57, 4 }
 0x2e7   : > { %v10723_v60 = vpop.permute.xlu2 %4033  ;;  %v4006_v53 = vsel %vm1220_vm0, %v4002_v26, %v4003_v55  ;;  %v10751_v56 = vpop.f32.mrf.mxu0 }
 0x2e8   : > { %v4039_v34 = vrot.slane %v10723_v60, 4  ;;  %v3971_v0 = vsel %vm1220_vm0, %v3967_v43, %v3968_v10  ;;  %v4007_v61 = vsel %vm11970_vm2, %v3995_v25, %v4006_v53  ;;  %v7248_v50 = vld [vmem:[#allocation3 + $0x2c] sm:$0xf0]  ;;  %v2006_v43 = vpop.f32.mrf.mxu3  ;;  %v10788_v25 = vpop.f32.mrf.mxu2 }
 0x2e9   : > { %v3972_v17 = vsel %vm11969_vm4, %v10615_v18, %v3971_v0  ;;  %v7995_v21 = vld [vmem:[#allocation3 + $0x50] sm:$0xf0]  ;;  %v7962_v18 = vld [vmem:[#allocation3 + $0x28] sm:$0xf0]  ;;  %4017 = vst [vmem:[#allocation3 + $0x1c] sm:$0xff] %v4007_v61  ;;  %v7251_v5 = vor.u32 %v7959_v23, %v7248_v50  ;;  %v1980_v23 = vpop.f32.mrf.mxu1  ;;  %vm11982_vm4 = vcmask 744448  }
 0x2ea   : > { %v4043_v27 = vsel %vm1220_vm0, %v4038_v51, %v4039_v34  ;;  %3982 = vst [vmem:[#allocation3] sm:$0xff] %v3972_v17  ;;  %v7379_v35 = vor.u32 %v7995_v21, %v7378_v11  ;;  %v7963_v51 = vld [vmem:[#allocation3 + $0x30] sm:$0xf0]  ;;  %v7247_v39 = vor.u32 %v7962_v18, %v7246_v14  ;;  %v7380_v52 = vld [vmem:[#allocation3 + $0x54] sm:$0xf0]  ;;  %vm11983_vm2 = vmmov %vm11982_vm4 }
 0x2eb   : > { %v4044_v3 = vsel %vm11971_vm3, %v10666_v62, %v4043_v27  ;;  %4627 = vrot.lane.b32.xlu0 %v10377_v6, %s11955_s9  ;;  %v7255_v62 = vor.u32 %v7963_v51, %v7254_v12  ;;  %3925 = vmatpush.bf16.msra.mxu1 %v7251_v5  ;;  %v10793_v14 = vld [vmem:[%s11738_s2 + $0x14] sm:$0xf]  ;;  %vm11984_vm3 = vmmov %vm11974_vm7 }
 0x2ec   : > { %4053 = vst [vmem:[#allocation3 + $0x40] sm:$0xff] %v4044_v3  ;;  %4629 = vrot.lane.b32.xlu1 %v10658_v13, %s11955_s9  ;;  %3912 = vmatpush.bf16.msra.mxu0 %v7247_v39  ;;  %v4209_v19 = vpop.permute.xlu1 %4208 }
 0x2ed   : > { %4522 = vrot.lane.b32.xlu2 %v10377_v6, %s11958_s10  ;;  %v4174_v40 = vpop.permute.xlu0 %4173  ;;  %3938 = vmatpush.bf16.msra.mxu2 %v7255_v62  ;;  %v4214_v46 = vrot.slane %v4209_v19, 4  ;;  %v10812_v62 = vld [vmem:[#allocation2 + $0x4] sm:$0xff] }
 0x2ee   : > { %4418 = vmatpush.bf16.msra.mxu3 %v7379_v35  ;;  %v4179_v1 = vrot.slane %v4174_v40, 4  ;;  %7345 = vmatmul.msk.bf16.vlgmr.msra.gmra.mxu1 %vm11972_vm11, %v10637_v49  ;;  %vm11986_vm11 = vcmask 769024  }
 0x2ef   : > { %v10755_v29 = vpop.permute.xlu2 %4070  ;;  %7344 = vmatmul.msk.bf16.vlgmr.msra.gmra.mxu0 %vm11961_vm6, %v10637_v49 }
 0x2f0   : > { %v4075_v48 = vrot.slane %v10755_v29, 4  ;;  %4429 = vmatpush.bf16.msrb.mxu0 %v7439_v41  ;;  %v4183_v59 = vsel %vm1220_vm0, %v4178_v36, %v4179_v1  ;;  %v4185_v15 = vsel %vm1220_vm0, %v4179_v1, %v4180_v30  ;;  %v4218_v36 = vsel %vm1220_vm0, %v4213_v54, %v4214_v46  ;;  %7346 = vmatmul.msk.bf16.vlgmr.msra.gmra.mxu2 %vm11973_vm14, %v10637_v49  ;;  %v7988_v16 = vld [vmem:[#allocation3 + $0x18] sm:$0xf0]  ;;  %v2019_v49 = vpop.f32.mrf.mxu0  ;;  %v7352_v11 = vld [vmem:[#allocation3 + $0x1c] sm:$0xf0]  ;;  %v2203_v9 = vpop.f32.mrf.mxu3  ;;  %vm11987_vm14 = vmmov %vm11986_vm11 }
 0x2f1   : > { %v4184_v38 = vsel %vm1723_vm5, %v10571_v31, %v4183_v59  ;;  %v4186_v24 = vsel %vm1723_vm5, %v4174_v40, %v4185_v15  ;;  %v7350_v45 = vld [vmem:[#allocation3] sm:$0xf]  ;;  %v4219_v30 = vsel %vm1759_vm13, %v10590_v22, %v4218_v36  ;;  %v7992_v22 = vld [vmem:[#allocation3 + $0x3c] sm:$0xf]  ;;  %v7985_v27 = vld [vmem:[#allocation3 + $0x4] sm:$0xf]  ;;  %v10819_v1 = vadd.f32 %v2203_v9, %v10686_v37  ;;  %v10828_v4 = vpop.f32.mrf.mxu1 }
 0x2f2   : > { %4193 = vst [vmem:[#allocation3 + $0xb0] sm:$0xff] %v4184_v38  ;;  %v4082_v31 = vsel %vm11974_vm7, %v10755_v29, %v4075_v48  ;;  %v7351_v54 = vor.u32 %v7988_v16, %v7350_v45  ;;  %v7383_v0 = vor.u32 %v7992_v22, %v7380_v52  ;;  %vm11975_vm5 = vmmov %vm11961_vm6  ;;  %v7355_v12 = vor.u32 %v7985_v27, %v7352_v11 }
 0x2f3   : > { %4194 = vst [vmem:[#allocation3 + $0xb8] sm:$0xff] %v4186_v24  ;;  %4524 = vrot.lane.b32.xlu0 %v10658_v13, %s11958_s10  ;;  %vm11980_vm12 = vmmov %vm11975_vm5 }
 0x2f4   : > { %4430 = vmatpush.bf16.msrb.mxu0 %v7411_v42  ;;  %4228 = vst [vmem:[#allocation3 + $0xcc] sm:$0xff] %v4219_v30  ;;  %4557 = vrot.lane.b32.xlu1 %v10377_v6, %s11960_s11  ;;  %v4104_v53 = vpop.permute.xlu1 %4103  ;;  %v8003_v30 = vld [vmem:[#allocation3 + $0x90] sm:$0xf0]  ;;  %vm11985_vm6 = vmmov %vm11984_vm3 }
 0x2f5   : > { %4559 = vrot.lane.b32.xlu2 %v10658_v13, %s11960_s11  ;;  %4090 = vst [vmem:[#allocation3 + $0x6c] sm:$0xf] %v4082_v31  ;;  %4419 = vmatpush.bf16.msra.mxu3 %v7351_v54  ;;  %v4211_v26 = vpop.permute.xlu0 %4210  ;;  %v4109_v21 = vrot.slane %v4104_v53, 4  ;;  %v7416_v31 = vld [vmem:[#allocation3 + $0x94] sm:$0xf0]  ;;  %vm11989_vm7 = vmmov %vm11976_vm15 }
 0x2f6   : > { %v4215_v17 = vrot.slane %v4211_v26, 4 }
 0x2f7   : > { %v10795_v6 = vpop.permute.xlu2 %3965  ;;  %v4113_v50 = vsel %vm1220_vm0, %v4108_v20, %v4109_v21  ;;  %v10816_v20 = vld [vmem:[#allocation2 + $0xc] sm:$0xff] }
 0x2f8   : > { %v3970_v7 = vrot.slane %v10795_v6, 4  ;;  %4431 = vmatpush.bf16.msrb.mxu0 %v7383_v0  ;;  %v4220_v61 = vsel %vm1220_vm0, %v4214_v46, %v4215_v17  ;;  %v4222_v3 = vsel %vm1759_vm13, %v4211_v26, %v4215_v17  ;;  %7460 = vmatmul.msk.bf16.vlgmr.msra.gmra.mxu3 %vm11975_vm5, %v10793_v14  ;;  %v4114_v5 = vsel %vm11977_vm10, %v10613_v28, %v4113_v50  ;;  %v2216_v63 = vpop.f32.mrf.mxu0  ;;  %v1993_v46 = vpop.f32.mrf.mxu2  ;;  %vm11990_vm5 = vmmov %vm11989_vm7 }
 0x2f9   : > { %v4221_v18 = vsel %vm1759_vm13, %v4209_v19, %v4220_v61  ;;  %4230 = vst [vmem:[#allocation3 + $0xdc] sm:$0xf] %v4222_v3  ;;  %v7442_v51 = vld [vmem:[#allocation3 + $0xb0] sm:$0xf]  ;;  %v8007_v39 = vld [vmem:[#allocation3 + $0xb4] sm:$0xf]  ;;  %v10826_v15 = vadd.f32 %v2216_v63, %v10753_v58  ;;  %vm11979_vm13 = vmmov %vm11977_vm10  ;;  %v2205_v11 = vpop.f32.mrf.mxu3 }
 0x2fa   : > { %v3977_v35 = vsel %vm11976_vm15, %v10795_v6, %v3970_v7  ;;  %4229 = vst [vmem:[#allocation3 + $0xd4] sm:$0xff] %v4221_v18  ;;  %v7450_v16 = vld [vmem:[#allocation3 + $0xb8] sm:$0xf]  ;;  %v8008_v52 = vld [vmem:[#allocation3 + $0xbc] sm:$0xf]  ;;  %v2032_v18 = vpop.f32.mrf.mxu1  ;;  %vm11991_vm15 = vcmask 777216  }
 0x2fb   : > { %4123 = vst [vmem:[#allocation3 + $0x78] sm:$0xff] %v4114_v5  ;;  %5287 = vrot.lane.b32.xlu0 %v10812_v62, %s11978_s18  ;;  %v8010_v40 = vld [vmem:[#allocation3 + $0xc8] sm:$0xf0]  ;;  %v7444_v41 = vld [vmem:[#allocation3 + $0xcc] sm:$0xf0]  ;;  %vm11992_vm10 = vmmov %vm11991_vm15 }
 0x2fc   : > { %4432 = vmatpush.bf16.msrb.mxu0 %v7355_v12  ;;  %3985 = vst [vmem:[#allocation3 + $0x18] sm:$0xf] %v3977_v35  ;;  %5289 = vrot.lane.b32.xlu1 %v10816_v20, %s11978_s18  ;;  %v7443_v28 = vor.u32 %v8010_v40, %v7442_v51  ;;  %v7447_v19 = vor.u32 %v8007_v39, %v7444_v41  ;;  %v4141_v38 = vpop.permute.xlu1 %4140 }
 0x2fd   : > { %5322 = vrot.lane.b32.xlu2 %v10812_v62, %s8172_s27  ;;  %v4106_v59 = vpop.permute.xlu0 %4105  ;;  %v4145_v36 = vrot.slane %v4141_v38, 4 }
 0x2fe   : > { %4442 = vmatpush.bf16.msrb.mxu1 %v7443_v28  ;;  %4455 = vmatpush.bf16.msrb.mxu2 %v7447_v19  ;;  %v4110_v37 = vrot.slane %v4106_v59, 4 }
 0x2ff   : > { %v10830_v24 = vpop.permute.xlu2 %4730  ;;  %7461 = vmatmul.msk.bf16.vlgmr.msrb.gmra.mxu0 %vm11980_vm12, %v10793_v14  ;;  %v4150_v43 = vsel %vm1220_vm0, %v4144_v2, %v4145_v36  ;;  %v4152_v54 = vsel %vm11982_vm4, %v4141_v38, %v4145_v36  ;;  %vm11994_vm12 = vcmask 474112  }
 0x300   : > { %v4115_v42 = vsel %vm1220_vm0, %v4109_v21, %v4110_v37  ;;  %v4117_v45 = vsel %vm11979_vm13, %v4106_v59, %v4110_v37  ;;  %v4151_v26 = vsel %vm11983_vm2, %v10692_v33, %v4150_v43  ;;  %4160 = vst [vmem:[#allocation3 + $0xa4] sm:$0xf] %v4152_v54  ;;  %v2218_v33 = vpop.f32.mrf.mxu0  ;;  %v10851_v61 = vpop.f32.mrf.mxu2  ;;  %v7386_v43 = vld [vmem:[#allocation3 + $0x40] sm:$0xf]  ;;  %vm11993_vm13 = vmmov %vm11992_vm10  ;;  %vm11997_vm2 = vcmask 465920  }
 0x301   : > { %v4116_v58 = vsel %vm11981_vm1, %v4104_v53, %v4115_v42  ;;  %4125 = vst [vmem:[#allocation3 + $0x88] sm:$0xf] %v4117_v45  ;;  %v8011_v22 = vld [vmem:[#allocation3 + $0xd0] sm:$0xf0]  ;;  %v7452_v49 = vld [vmem:[#allocation3 + $0xd4] sm:$0xf0] }
 0x302   : > { %4124 = vst [vmem:[#allocation3 + $0x80] sm:$0xff] %v4116_v58  ;;  %v7414_v0 = vld [vmem:[#allocation3 + $0x78] sm:$0xf]  ;;  %v8000_v23 = vld [vmem:[#allocation3 + $0x7c] sm:$0xf]  ;;  %v7451_v17 = vor.u32 %v8011_v22, %v7450_v16  ;;  %v7455_v27 = vor.u32 %v8008_v52, %v7452_v49  ;;  %v10845_v53 = vld [vmem:[#allocation2 + $0x14] sm:$0xff]  ;;  %v2229_v42 = vpop.f32.mrf.mxu1 }
 0x303   : > { %4159 = vst [vmem:[#allocation3 + $0x9c] sm:$0xff] %v4151_v26  ;;  %5324 = vrot.lane.b32.xlu0 %v10816_v20, %s8172_s27  ;;  %v7415_v2 = vor.u32 %v8003_v30, %v7414_v0  ;;  %v7419_v21 = vor.u32 %v8000_v23, %v7416_v31  ;;  %v10885_v16 = vadd.f32 %v2229_v42, %v10788_v25  ;;  %v7993_v49 = vld [vmem:[#allocation3 + $0x44] sm:$0xf]  ;;  %vm11995_vm1 = vcmask 523264  }
 0x304   : > { %5291 = vrot.lane.b32.xlu1 %v10845_v53, %s11978_s18  ;;  %4468 = vmatpush.bf16.msrb.mxu3 %v7451_v17  ;;  %v4036_v35 = vpop.permute.xlu1 %4035  ;;  %vm11996_vm4 = vmmov %vm11995_vm1 }
 0x305   : > { %5326 = vrot.lane.b32.xlu2 %v10845_v53, %s8172_s27  ;;  %4443 = vmatpush.bf16.msrb.mxu1 %v7415_v2  ;;  %v4069_v3 = vpop.permute.xlu0 %4068  ;;  %v4040_v51 = vrot.slane %v4036_v35, 4 }
 0x306   : > { %4456 = vmatpush.bf16.msrb.mxu2 %v7419_v21  ;;  %4481 = vmatpush.bf16.msra.mxu0 %v7455_v27  ;;  %v4074_v50 = vrot.slane %v4069_v3, 4 }
 0x307   : > { %v10853_v12 = vpop.permute.xlu2 %4658  ;;  %v4045_v41 = vsel %vm1220_vm0, %v4039_v34, %v4040_v51 }
 0x308   : > { %v4078_v39 = vsel %vm1220_vm0, %v4073_v47, %v4074_v50  ;;  %v4080_v5 = vsel %vm1220_vm0, %v4074_v50, %v4075_v48  ;;  %v4046_v63 = vsel %vm11986_vm11, %v10723_v60, %v4045_v41  ;;  %v4047_v47 = vsel %vm11987_vm14, %v4036_v35, %v4040_v51  ;;  %v2255_v48 = vpop.f32.mrf.mxu3  ;;  %v2268_v34 = vpop.f32.mrf.mxu0 }
 0x309   : > { %v4079_v9 = vsel %vm11984_vm3, %v10688_v32, %v4078_v39  ;;  %v4081_v40 = vsel %vm11985_vm6, %v4069_v3, %v4080_v5  ;;  %v7422_v28 = vld [vmem:[#allocation3 + $0x80] sm:$0xf]  ;;  %v8001_v19 = vld [vmem:[#allocation3 + $0x84] sm:$0xf]  ;;  %4054 = vst [vmem:[#allocation3 + $0x48] sm:$0xff] %v4046_v63  ;;  %v10877_v60 = vadd.f32 %v2255_v48, %v10751_v56  ;;  %v2045_v37 = vpop.f32.mrf.mxu2  ;;  %v10880_v36 = vadd.f32 %v2268_v34, %v10828_v4  ;;  %vm11998_vm3 = vmmov %vm11995_vm1 }
 0x30a   : > { %4088 = vst [vmem:[#allocation3 + $0x5c] sm:$0xff] %v4079_v9  ;;  %v8004_v29 = vld [vmem:[#allocation3 + $0x98] sm:$0xf0]  ;;  %v7424_v46 = vld [vmem:[#allocation3 + $0x9c] sm:$0xf0]  ;;  %v2231_v3 = vpop.f32.mrf.mxu1  ;;  %v4737_v51 = vrot.slane %v10830_v24, 4  ;;  %vm11999_vm6 = vmmov %vm11995_vm1 }
 0x30b   : > { %4089 = vst [vmem:[#allocation3 + $0x64] sm:$0xff] %v4081_v40  ;;  %5217 = vrot.lane.b32.xlu0 %v10812_v62, %s11988_s19  ;;  %v7423_v32 = vor.u32 %v8004_v29, %v7422_v28  ;;  %v7427_v59 = vor.u32 %v8001_v19, %v7424_v46  ;;  %v8012_v63 = vld [vmem:[#allocation3 + $0xd8] sm:$0xf0]  ;;  %v4666_v3 = vrot.slane %v10853_v12, 4  ;;  %vm12000_vm11 = vcmask 490496  }
 0x30c   : > { %5219 = vrot.lane.b32.xlu1 %v10816_v20, %s11988_s19  ;;  %4055 = vst [vmem:[#allocation3 + $0x50] sm:$0xf] %v4047_v47  ;;  %vm12001_vm14 = vcmask 482304  }
 0x30d   : > { %5252 = vrot.lane.b32.xlu2 %v10812_v62, %s8174_s23  ;;  %4469 = vmatpush.bf16.msrb.mxu3 %v7423_v32  ;;  %v3964_v38 = vpop.permute.xlu0 %3963  ;;  %v3999_v30 = vpop.permute.xlu1 %3998 }
 0x30e   : > { %4482 = vmatpush.bf16.msra.mxu0 %v7427_v59  ;;  %v3969_v45 = vrot.slane %v3964_v38, 4  ;;  %v4004_v52 = vrot.slane %v3999_v30, 4  ;;  %v7458_v59 = vld [vmem:[#allocation3 + $0xc0] sm:$0xf] }
 0x30f   : > { %v10882_v31 = vpop.permute.xlu2 %4695 }
 0x310   : > { %v3973_v56 = vsel %vm1220_vm0, %v3968_v10, %v3969_v45  ;;  %v3975_v58 = vsel %vm1220_vm0, %v3969_v45, %v3970_v7  ;;  %v4008_v25 = vsel %vm1220_vm0, %v4003_v55, %v4004_v52  ;;  %v2257_v17 = vpop.f32.mrf.mxu3  ;;  %v7994_v27 = vld [vmem:[#allocation3 + $0x4c] sm:$0xf]  ;;  %v2270_v11 = vpop.f32.mrf.mxu0  ;;  %v7459_v45 = vor.u32 %v8012_v63, %v7458_v59 }
 0x311   : > { %v3974_v4 = vsel %vm11989_vm7, %v10719_v57, %v3973_v56  ;;  %v3976_v54 = vsel %vm11990_vm5, %v3964_v38, %v3975_v58  ;;  %v7996_v22 = vld [vmem:[#allocation3 + $0x58] sm:$0xf0]  ;;  %v7388_v26 = vld [vmem:[#allocation3 + $0x5c] sm:$0xf0]  ;;  %v4009_v10 = vsel %vm11991_vm15, %v10632_v8, %v4008_v25  ;;  %v7394_v57 = vld [vmem:[#allocation3 + $0x48] sm:$0xf]  ;;  %v2242_v2 = vpop.f32.mrf.mxu2 }
 0x312   : > { %3983 = vst [vmem:[#allocation3 + $0x8] sm:$0xff] %v3974_v4  ;;  %v7387_v6 = vor.u32 %v7996_v22, %v7386_v43  ;;  %v7391_v0 = vor.u32 %v7993_v49, %v7388_v26  ;;  %v7997_v7 = vld [vmem:[#allocation3 + $0x60] sm:$0xf0]  ;;  %v7396_v23 = vld [vmem:[#allocation3 + $0x64] sm:$0xf0]  ;;  %v10908_v33 = vadd.f32 %v2242_v2, %v10743_v44  ;;  %vm12002_vm7 = vmmov %vm11994_vm12 }
 0x313   : > { %3984 = vst [vmem:[#allocation3 + $0x10] sm:$0xff] %v3976_v54  ;;  %5254 = vrot.lane.b32.xlu0 %v10816_v20, %s8174_s23  ;;  %v7395_v55 = vor.u32 %v7997_v7, %v7394_v57  ;;  %v7399_v8 = vor.u32 %v7994_v27, %v7396_v23  ;;  %v7430_v4 = vld [vmem:[#allocation3 + $0x88] sm:$0xf]  ;;  %v8005_v54 = vld [vmem:[#allocation3 + $0xa0] sm:$0xf0]  ;;  %vm12003_vm5 = vmmov %vm11997_vm2 }
 0x314   : > { %4018 = vst [vmem:[#allocation3 + $0x24] sm:$0xff] %v4009_v10  ;;  %5221 = vrot.lane.b32.xlu1 %v10845_v53, %s11988_s19  ;;  %4444 = vmatpush.bf16.msrb.mxu1 %v7387_v6  ;;  %v7431_v49 = vor.u32 %v8005_v54, %v7430_v4  ;;  %v7402_v23 = vld [vmem:[#allocation3 + $0x50] sm:$0xf]  ;;  %v7998_v57 = vld [vmem:[#allocation3 + $0x68] sm:$0xf0]  ;;  %vm12004_vm15 = vmmov %vm11995_vm1 }
 0x315   : > { %5256 = vrot.lane.b32.xlu2 %v10845_v53, %s8174_s23  ;;  %4457 = vmatpush.bf16.msrb.mxu2 %v7391_v0  ;;  %v4001_v21 = vpop.permute.xlu0 %4000  ;;  %v4729_v50 = vpop.permute.xlu1 %4728  ;;  %v7403_v11 = vor.u32 %v7998_v57, %v7402_v23 }
 0x316   : > { %4470 = vmatpush.bf16.msrb.mxu3 %v7395_v55  ;;  %4483 = vmatpush.bf16.msra.mxu0 %v7399_v8  ;;  %v4005_v18 = vrot.slane %v4001_v21, 4  ;;  %v4736_v39 = vrot.slane %v4729_v50, 4 }
 0x317   : > { %v10910_v35 = vpop.permute.xlu2 %4623 }
 0x318   : > { %v4010_v5 = vsel %vm1220_vm0, %v4004_v52, %v4005_v18  ;;  %v4012_v9 = vsel %vm11992_vm10, %v4001_v21, %v4005_v18  ;;  %v4740_v44 = vsel %vm1220_vm0, %v4736_v39, %v4737_v51  ;;  %v2776_v47 = vpop.f32.mrf.mxu3  ;;  %v2789_v37 = vpop.f32.mrf.mxu0  ;;  %vm12005_vm10 = vcmask 506880  }
 0x319   : > { %v4011_v40 = vsel %vm11993_vm13, %v3999_v30, %v4010_v5  ;;  %4020 = vst [vmem:[#allocation3 + $0x34] sm:$0xf] %v4012_v9  ;;  %v7358_v41 = vld [vmem:[#allocation3 + $0x8] sm:$0xf]  ;;  %v7986_v28 = vld [vmem:[#allocation3 + $0xc] sm:$0xf]  ;;  %v4741_v19 = vsel %vm11994_vm12, %v4729_v50, %v4740_v44  ;;  %v10927_v34 = vadd.f32 %v2776_v47, %v10826_v15  ;;  %v2244_v38 = vpop.f32.mrf.mxu2  ;;  %v10930_v30 = vadd.f32 %v2789_v37, %v10885_v16  ;;  %v2281_v52 = vpop.f32.mrf.mxu1  ;;  %vm12007_vm12 = vmmov %vm11995_vm1 }
 0x31a   : > { %4019 = vst [vmem:[#allocation3 + $0x2c] sm:$0xff] %v4011_v40  ;;  %v10937_v15 = vadd.f32 %v2281_v52, %v10851_v61  ;;  %v7366_v22 = vld [vmem:[#allocation3 + $0x10] sm:$0xf]  ;;  %v7987_v10 = vld [vmem:[#allocation3 + $0x14] sm:$0xf]  ;;  %v4702_v9 = vrot.slane %v10882_v31, 4 }
 0x31b   : > { %4751 = vst [vmem:[#allocation3 + $0xa8] sm:$0xff] %v4741_v19  ;;  %5147 = vrot.lane.b32.xlu0 %v10812_v62, %s8175_s26  ;;  %v7989_v29 = vld [vmem:[#allocation3 + $0x20] sm:$0xf0]  ;;  %v7360_v46 = vld [vmem:[#allocation3 + $0x24] sm:$0xf0]  ;;  %vm12006_vm13 = vcmask 498688  }
 0x31c   : > { %5149 = vrot.lane.b32.xlu1 %v10816_v20, %s8175_s26  ;;  %v7359_v48 = vor.u32 %v7989_v29, %v7358_v41  ;;  %v7363_v32 = vor.u32 %v7986_v28, %v7360_v46  ;;  %v7374_v41 = vld [vmem:[#allocation3 + $0x18] sm:$0xf] }
 0x31d   : > { %5182 = vrot.lane.b32.xlu2 %v10812_v62, %s8176_s22  ;;  %v4764_v42 = vpop.permute.xlu0 %4763  ;;  %v10932_v58 = vpop.permute.xlu1 %4765 }
 0x31e   : > { %4445 = vmatpush.bf16.msrb.mxu1 %v7359_v48  ;;  %4458 = vmatpush.bf16.msrb.mxu2 %v7363_v32  ;;  %v4771_v56 = vrot.slane %v4764_v42, 4  ;;  %v4772_v25 = vrot.slane %v10932_v58, 4 }
 0x31f   : > { %v10934_v43 = vpop.permute.xlu2 %4520 }
 0x320   : > { %v4775_v16 = vsel %vm1220_vm0, %v4771_v56, %v4772_v25  ;;  %v2778_v17 = vpop.f32.mrf.mxu3  ;;  %v2791_v27 = vpop.f32.mrf.mxu0  ;;  %v7991_v5 = vld [vmem:[#allocation3 + $0x30] sm:$0xf0] }
 0x321   : > { %7462 = vmatmul.msk.bf16.vlgmr.msrb.gmra.mxu1 %vm11995_vm1, %v10793_v14  ;;  %7463 = vmatmul.msk.bf16.vlgmr.msrb.gmra.mxu2 %vm11996_vm4, %v10793_v14  ;;  %v7990_v26 = vld [vmem:[#allocation3 + $0x28] sm:$0xf0]  ;;  %v7368_v6 = vld [vmem:[#allocation3 + $0x2c] sm:$0xf0]  ;;  %v4776_v61 = vsel %vm11997_vm2, %v4764_v42, %v4775_v16  ;;  %v2763_v55 = vpop.f32.mrf.mxu2  ;;  %v2283_v21 = vpop.f32.mrf.mxu1  ;;  %v7375_v47 = vor.u32 %v7991_v5, %v7374_v41  ;;  %vm12008_vm1 = vmmov %vm12001_vm14  ;;  %vm12010_vm2 = vcmask 515072  }
 0x322   : > { %4494 = vmatpush.bf16.msra.mxu1 %v7459_v45  ;;  %v7367_v0 = vor.u32 %v7990_v26, %v7366_v22  ;;  %v7371_v7 = vor.u32 %v7987_v10, %v7368_v6  ;;  %4786 = vst [vmem:[#allocation3 + $0xc4] sm:$0xff] %v4776_v61  ;;  %v10957_v2 = vadd.f32 %v2763_v55, %v10819_v1  ;;  %v7554_v29 = vld [vmem:[#allocation3 + $0xa8] sm:$0xf]  ;;  %v8034_v46 = vld [vmem:[#allocation3 + $0xac] sm:$0xf]  ;;  %v4631_v55 = vrot.slane %v10910_v35, 4  ;;  %vm12009_vm4 = vmmov %vm12005_vm10 }
 0x323   : > { %5184 = vrot.lane.b32.xlu0 %v10816_v20, %s8176_s22 }
 0x324   : > { %5151 = vrot.lane.b32.xlu1 %v10845_v53, %s8175_s26  ;;  %4471 = vmatpush.bf16.msrb.mxu3 %v7367_v0 }
 0x325   : > { %5186 = vrot.lane.b32.xlu2 %v10845_v53, %s8176_s22  ;;  %4484 = vmatpush.bf16.msra.mxu0 %v7371_v7  ;;  %v10954_v8 = vpop.permute.xlu0 %4660  ;;  %v4694_v50 = vpop.permute.xlu1 %4693 }
 0x326   : > { %4495 = vmatpush.bf16.msra.mxu1 %v7431_v49  ;;  %v4667_v18 = vrot.slane %v10954_v8, 4  ;;  %v4701_v40 = vrot.slane %v4694_v50, 4 }
 0x327   : > { %v10961_v39 = vpop.permute.xlu2 %4732  ;;  %7464 = vmatmul.msk.bf16.vlgmr.msrb.gmra.mxu3 %vm11998_vm3, %v10793_v14  ;;  %vm12011_vm3 = vmmov %vm12002_vm7 }
 0x328   : > { %v4738_v44 = vrot.slane %v10961_v39, 4  ;;  %v4670_v1 = vsel %vm1220_vm0, %v4666_v3, %v4667_v18  ;;  %7465 = vmatmul.msk.bf16.vlgmr.msra.gmra.mxu0 %vm11999_vm6, %v10793_v14  ;;  %v4705_v19 = vsel %vm1220_vm0, %v4701_v40, %v4702_v9  ;;  %v2828_v37 = vpop.f32.mrf.mxu3  ;;  %vm12012_vm6 = vmmov %vm12011_vm3 }
 0x329   : > { %v4671_v28 = vsel %vm12000_vm11, %v10853_v12, %v4670_v1  ;;  %v4706_v48 = vsel %vm12001_vm14, %v4694_v50, %v4705_v19  ;;  %v8037_v12 = vld [vmem:[#allocation3 + $0xc0] sm:$0xf0]  ;;  %v7556_v59 = vld [vmem:[#allocation3 + $0xc4] sm:$0xf0]  ;;  %v2765_v45 = vpop.f32.mrf.mxu2  ;;  %v10992_v52 = vadd.f32 %v2828_v37, %v10880_v36  ;;  %v2802_v4 = vpop.f32.mrf.mxu1  ;;  %v4527_v50 = vrot.slane %v10934_v43, 4  ;;  %vm12013_vm11 = vmmov %vm12003_vm5 }
 0x32a   : > { %4496 = vmatpush.bf16.msra.mxu1 %v7403_v11  ;;  %v4742_v63 = vsel %vm1220_vm0, %v4737_v51, %v4738_v44  ;;  %4681 = vst [vmem:[#allocation3 + $0x70] sm:$0xff] %v4671_v28  ;;  %v7555_v38 = vor.u32 %v8037_v12, %v7554_v29  ;;  %v7559_v42 = vor.u32 %v8034_v46, %v7556_v59  ;;  %v2841_v51 = vpop.f32.mrf.mxu0  ;;  %vm12014_vm14 = vmmov %vm12003_vm5 }
 0x32b   : > { %v4743_v32 = vsel %vm12002_vm7, %v10830_v24, %v4742_v63  ;;  %4716 = vst [vmem:[#allocation3 + $0x8c] sm:$0xff] %v4706_v48  ;;  %5077 = vrot.lane.b32.xlu0 %v10812_v62, %s8177_s20  ;;  %v10995_v56 = vadd.f32 %v2841_v51, %v10937_v15  ;;  %v2848_v49 = vadd.f32 %v2802_v4, %v10908_v33  ;;  %vm12015_vm7 = vmmov %vm12007_vm12 }
 0x32c   : > { %4752 = vst [vmem:[#allocation3 + $0xb0] sm:$0xff] %v4743_v32  ;;  %5079 = vrot.lane.b32.xlu1 %v10816_v20, %s8177_s20  ;;  %4975 = vmatpush.bf16.msra.mxu2 %v7555_v38 }
 0x32d   : > { %5112 = vrot.lane.b32.xlu2 %v10812_v62, %s8178_s24  ;;  %4988 = vmatpush.bf16.msra.mxu3 %v7559_v42  ;;  %v4589_v24 = vpop.permute.xlu0 %4588 }
 0x32e   : > { %4497 = vmatpush.bf16.msra.mxu1 %v7375_v47  ;;  %v4596_v54 = vrot.slane %v4589_v24, 4  ;;  %v10997_v22 = vpop.permute.xlu1 %4590 }
 0x32f   : > { %v10999_v16 = vpop.permute.xlu2 %4769  ;;  %v4597_v62 = vrot.slane %v10997_v22, 4 }
 0x330   : > { %v4774_v26 = vrot.slane %v10999_v16, 4  ;;  %v2830_v7 = vpop.f32.mrf.mxu3 }
 0x331   : > { %v4600_v36 = vsel %vm1220_vm0, %v4596_v54, %v4597_v62  ;;  %7466 = vmatmul.msk.bf16.vlgmr.msra.gmra.mxu1 %vm12004_vm15, %v10793_v14  ;;  %v7526_v10 = vld [vmem:[#allocation3 + $0x70] sm:$0xf]  ;;  %v8027_v6 = vld [vmem:[#allocation3 + $0x74] sm:$0xf]  ;;  %v2815_v27 = vpop.f32.mrf.mxu2  ;;  %v2804_v40 = vpop.f32.mrf.mxu1 }
 0x332   : > { %v4781_v15 = vsel %vm12003_vm5, %v10999_v16, %v4774_v26  ;;  %v4601_v33 = vsel %vm12005_vm10, %v4589_v24, %v4600_v36  ;;  %v8030_v61 = vld [vmem:[#allocation3 + $0x88] sm:$0xf0]  ;;  %v7528_v0 = vld [vmem:[#allocation3 + $0x8c] sm:$0xf0]  ;;  %v2843_v14 = vpop.f32.mrf.mxu0  ;;  %v11027_v3 = vadd.f32 %v2815_v27, %v10877_v60  ;;  %v5072_v16 = vld [vmem:[#allocation2 + $0x1c] sm:$0xff]  ;;  %vm12018_vm10 = vcmask 490496  }
 0x333   : > { %4789 = vst [vmem:[#allocation3 + $0xdc] sm:$0xf] %v4781_v15  ;;  %5114 = vrot.lane.b32.xlu0 %v10816_v20, %s8178_s24  ;;  %v7527_v23 = vor.u32 %v8030_v61, %v7526_v10  ;;  %v7531_v17 = vor.u32 %v8027_v6, %v7528_v0  ;;  %vm12016_vm5 = vmmov %vm12015_vm7 }
 0x334   : > { %4611 = vst [vmem:[#allocation3 + $0x38] sm:$0xff] %v4601_v33  ;;  %5081 = vrot.lane.b32.xlu1 %v10845_v53, %s8177_s20  ;;  %vm12017_vm15 = vmmov %vm12016_vm5 }
 0x335   : > { %5116 = vrot.lane.b32.xlu2 %v10845_v53, %s8178_s24  ;;  %4976 = vmatpush.bf16.msra.mxu2 %v7527_v23  ;;  %v11020_v57 = vpop.permute.xlu0 %4625 }
 0x336   : > { %4989 = vmatpush.bf16.msra.mxu3 %v7531_v17  ;;  %v4632_v11 = vrot.slane %v11020_v57, 4  ;;  %v4519_v21 = vpop.permute.xlu1 %4518 }
 0x337   : > { %v11024_v20 = vpop.permute.xlu2 %4697  ;;  %v4526_v5 = vrot.slane %v4519_v21, 4 }
 0x338   : > { %v4703_v53 = vrot.slane %v11024_v20, 4  ;;  %v4635_v1 = vsel %vm1220_vm0, %v4631_v55, %v4632_v11  ;;  %v3356_v47 = vpop.f32.mrf.mxu3 }
 0x339   : > { %v4636_v41 = vsel %vm12006_vm13, %v10910_v35, %v4635_v1  ;;  %v4530_v28 = vsel %vm1220_vm0, %v4526_v5, %v4527_v50  ;;  %v11054_v35 = vadd.f32 %v3356_v47, %v10930_v30  ;;  %v3330_v38 = vpop.f32.mrf.mxu1  ;;  %v11115_v47 = vld [vmem:[%s11738_s2 + $0x18] sm:$0xf]  ;;  %vm12019_vm13 = vmmov %vm12018_vm10 }
 0x33a   : > { %v4707_v60 = vsel %vm1220_vm0, %v4702_v9, %v4703_v53  ;;  %4646 = vst [vmem:[#allocation3 + $0x54] sm:$0xff] %v4636_v41  ;;  %v4531_v19 = vsel %vm12007_vm12, %v4519_v21, %v4530_v28  ;;  %v3369_v9 = vpop.f32.mrf.mxu0  ;;  %v3412_v51 = vadd.f32 %v3330_v38, %v10957_v2  ;;  %vm12020_vm12 = vmmov %vm12018_vm10 }
 0x33b   : > { %v4708_v63 = vsel %vm12008_vm1, %v10882_v31, %v4707_v60  ;;  %4541 = vst [vmem:[#allocation3] sm:$0xff] %v4531_v19  ;;  %5293 = vrot.lane.b32.xlu0 %v10658_v13, %s11978_s18  ;;  %v11056_v46 = vadd.f32 %v3369_v9, %v2848_v49  ;;  %v2817_v31 = vpop.f32.mrf.mxu2  ;;  %v7498_v42 = vld [vmem:[#allocation3 + $0x38] sm:$0xf]  ;;  %v8020_v4 = vld [vmem:[#allocation3 + $0x3c] sm:$0xf]  ;;  %vm12021_vm1 = vmmov %vm12010_vm2 }
 0x33c   : > { %4717 = vst [vmem:[#allocation3 + $0x94] sm:$0xff] %v4708_v63  ;;  %5328 = vrot.lane.b32.xlu1 %v10658_v13, %s8172_s27 }
 0x33d   : > { %5223 = vrot.lane.b32.xlu2 %v10658_v13, %s11988_s19  ;;  %v4554_v29 = vpop.permute.xlu0 %4553 }
 0x33e   : > { %v4561_v48 = vrot.slane %v4554_v29, 4  ;;  %v11058_v32 = vpop.permute.xlu1 %4555 }
 0x33f   : > { %v11060_v12 = vpop.permute.xlu2 %4594  ;;  %v4562_v59 = vrot.slane %v11058_v32, 4 }
 0x340   : > { %v4599_v37 = vrot.slane %v11060_v12, 4  ;;  %v3358_v10 = vpop.f32.mrf.mxu3 }
 0x341   : > { %v4565_v30 = vsel %vm1220_vm0, %v4561_v48, %v4562_v59  ;;  %v8023_v24 = vld [vmem:[#allocation3 + $0x50] sm:$0xf0]  ;;  %v7500_v54 = vld [vmem:[#allocation3 + $0x54] sm:$0xf0]  ;;  %v3332_v27 = vpop.f32.mrf.mxu1 }
 0x342   : > { %v4606_v45 = vsel %vm12009_vm4, %v11060_v12, %v4599_v37  ;;  %v4566_v49 = vsel %vm12010_vm2, %v4554_v29, %v4565_v30  ;;  %v7499_v36 = vor.u32 %v8023_v24, %v7498_v42  ;;  %v7503_v15 = vor.u32 %v8020_v4, %v7500_v54  ;;  %v3371_v2 = vpop.f32.mrf.mxu0  ;;  %v7470_v40 = vld [vmem:[#allocation3] sm:$0xf]  ;;  %v8013_v1 = vld [vmem:[#allocation3 + $0x4] sm:$0xf] }
 0x343   : > { %4614 = vst [vmem:[#allocation3 + $0x50] sm:$0xf] %v4606_v45  ;;  %5258 = vrot.lane.b32.xlu0 %v10658_v13, %s8174_s23  ;;  %v3343_v33 = vpop.f32.mrf.mxu2  ;;  %vm12022_vm4 = vcmask 482304  }
 0x344   : > { %4576 = vst [vmem:[#allocation3 + $0x1c] sm:$0xff] %v4566_v49  ;;  %5153 = vrot.lane.b32.xlu1 %v10658_v13, %s8175_s26  ;;  %4977 = vmatpush.bf16.msra.mxu2 %v7499_v36  ;;  %v11082_v23 = vadd.f32 %v3343_v33, %v10927_v34  ;;  %v8035_v36 = vld [vmem:[#allocation3 + $0xb4] sm:$0xf]  ;;  %vm12023_vm2 = vmmov %vm12022_vm4 }
 0x345   : > { %5188 = vrot.lane.b32.xlu2 %v10658_v13, %s8176_s22  ;;  %4990 = vmatpush.bf16.msra.mxu3 %v7503_v15  ;;  %v4735_v6 = vpop.permute.xlu0 %4734 }
 0x346   : > { %v4739_v61 = vrot.slane %v4735_v6, 4  ;;  %v4768_v0 = vpop.permute.xlu1 %4767 }
 0x347   : > { %v11079_v7 = vpop.permute.xlu2 %4522  ;;  %v4773_v17 = vrot.slane %v4768_v0, 4 }
 0x348   : > { %v4528_v14 = vrot.slane %v11079_v7, 4  ;;  %v4744_v13 = vsel %vm1220_vm0, %v4738_v44, %v4739_v61  ;;  %v4746_v55 = vsel %vm12011_vm3, %v4735_v6, %v4739_v61  ;;  %v3408_v60 = vpop.f32.mrf.mxu3  ;;  %vm12024_vm3 = vcmask 506880  }
 0x349   : > { %v4745_v21 = vsel %vm12012_vm6, %v10961_v39, %v4744_v13  ;;  %4754 = vst [vmem:[#allocation3 + $0xc0] sm:$0xf] %v4746_v55  ;;  %v4777_v5 = vsel %vm1220_vm0, %v4772_v25, %v4773_v17  ;;  %v4779_v34 = vsel %vm1220_vm0, %v4773_v17, %v4774_v26  ;;  %v11110_v63 = vadd.f32 %v3408_v60, %v10995_v56  ;;  %v3382_v30 = vpop.f32.mrf.mxu1  ;;  %vm12025_vm6 = vmmov %vm12024_vm3 }
 0x34a   : > { %v4532_v44 = vsel %vm1220_vm0, %v4527_v50, %v4528_v14  ;;  %4753 = vst [vmem:[#allocation3 + $0xb8] sm:$0xff] %v4745_v21  ;;  %v4778_v39 = vsel %vm12013_vm11, %v10932_v58, %v4777_v5  ;;  %v4780_v41 = vsel %vm12014_vm14, %v4768_v0, %v4779_v34  ;;  %v3862_v58 = vpop.f32.mrf.mxu0  ;;  %v11130_v24 = vadd.f32 %v3382_v30, %v11027_v3 }
 0x34b   : > { %v4533_v25 = vsel %vm12015_vm7, %v10934_v43, %v4532_v44  ;;  %v8016_v28 = vld [vmem:[#allocation3 + $0x18] sm:$0xf0]  ;;  %v7472_v26 = vld [vmem:[#allocation3 + $0x1c] sm:$0xf0]  ;;  %4787 = vst [vmem:[#allocation3 + $0xcc] sm:$0xff] %v4778_v39  ;;  %5083 = vrot.lane.b32.xlu0 %v5072_v16, %s8177_s20  ;;  %v11117_v9 = vadd.f32 %v3862_v58, %v3412_v51  ;;  %v3345_v29 = vpop.f32.mrf.mxu2  ;;  %vm12026_vm11 = vcmask 498688  }
 0x34c   : > { %v7471_v19 = vor.u32 %v8016_v28, %v7470_v40  ;;  %v7475_v50 = vor.u32 %v8013_v1, %v7472_v26  ;;  %4788 = vst [vmem:[#allocation3 + $0xd4] sm:$0xff] %v4780_v41  ;;  %5118 = vrot.lane.b32.xlu1 %v5072_v16, %s8178_s24  ;;  %v7562_v51 = vld [vmem:[#allocation3 + $0xb0] sm:$0xf]  ;;  %v8031_v28 = vld [vmem:[#allocation3 + $0x90] sm:$0xf0]  ;;  %vm12027_vm14 = vmmov %vm12026_vm11 }
 0x34d   : > { %4542 = vst [vmem:[#allocation3 + $0x8] sm:$0xff] %v4533_v25  ;;  %v4663_v43 = vpop.permute.xlu0 %4662  ;;  %v7536_v26 = vld [vmem:[#allocation3 + $0x94] sm:$0xf0]  ;;  %vm12028_vm7 = vmmov %vm12026_vm11 }
 0x34e   : > { %4978 = vmatpush.bf16.msra.mxu2 %v7471_v19  ;;  %4991 = vmatpush.bf16.msra.mxu3 %v7475_v50  ;;  %v4668_v31 = vrot.slane %v4663_v43, 4  ;;  %v4665_v48 = vpop.permute.xlu1 %4664 }
 0x34f   : > { %v11119_v38 = vpop.permute.xlu2 %4559  ;;  %v4669_v42 = vrot.slane %v4665_v48, 4 }
 0x350   : > { %v4564_v56 = vrot.slane %v11119_v38, 4  ;;  %v4672_v45 = vsel %vm1220_vm0, %v4667_v18, %v4668_v31  ;;  %v3410_v33 = vpop.f32.mrf.mxu3 }
 0x351   : > { %7580 = vmatmul.msk.bf16.vlgmr.msra.gmra.mxu2 %vm12016_vm5, %v11115_v47  ;;  %7581 = vmatmul.msk.bf16.vlgmr.msra.gmra.mxu3 %vm12017_vm15, %v11115_v47  ;;  %v4673_v4 = vsel %vm12018_vm10, %v10954_v8, %v4672_v45  ;;  %v4674_v54 = vsel %vm1220_vm0, %v4668_v31, %v4669_v42  ;;  %v4676_v49 = vsel %vm12019_vm13, %v4665_v48, %v4669_v42  ;;  %v7570_v15 = vld [vmem:[#allocation3 + $0xb8] sm:$0xf]  ;;  %v8036_v18 = vld [vmem:[#allocation3 + $0xbc] sm:$0xf]  ;;  %v3384_v41 = vpop.f32.mrf.mxu1  ;;  %vm12029_vm15 = vmmov %vm12016_vm5 }
 0x352   : > { %4682 = vst [vmem:[#allocation3 + $0x78] sm:$0xff] %v4673_v4  ;;  %v4675_v10 = vsel %vm12020_vm12, %v4663_v43, %v4674_v54  ;;  %v4571_v2 = vsel %vm12021_vm1, %v11119_v38, %v4564_v56  ;;  %v8038_v3 = vld [vmem:[#allocation3 + $0xc8] sm:$0xf0]  ;;  %v7564_v6 = vld [vmem:[#allocation3 + $0xcc] sm:$0xf0]  ;;  %v3864_v55 = vpop.f32.mrf.mxu0  ;;  %vm12030_vm10 = vmmov %vm12021_vm1  ;;  %vm12032_vm12 = vcmask 211968  }
 0x353   : > { %4683 = vst [vmem:[#allocation3 + $0x80] sm:$0xff] %v4675_v10  ;;  %v7563_v8 = vor.u32 %v8038_v3, %v7562_v51  ;;  %v7567_v61 = vor.u32 %v8035_v36, %v7564_v6  ;;  %v8039_v0 = vld [vmem:[#allocation3 + $0xd0] sm:$0xf0]  ;;  %v7572_v17 = vld [vmem:[#allocation3 + $0xd4] sm:$0xf0]  ;;  %v3395_v5 = vpop.f32.mrf.mxu2  ;;  %vm12031_vm13 = vmmov %vm12021_vm1 }
 0x354   : > { %4684 = vst [vmem:[#allocation3 + $0x88] sm:$0xf] %v4676_v49  ;;  %v7571_v27 = vor.u32 %v8039_v0, %v7570_v15  ;;  %v7575_v13 = vor.u32 %v8036_v18, %v7572_v17  ;;  %v11144_v1 = vadd.f32 %v3395_v5, %v10992_v52  ;;  %vm12033_vm1 = vmmov %vm12016_vm5 }
 0x355   : > { %4579 = vst [vmem:[#allocation3 + $0x34] sm:$0xf] %v4571_v2  ;;  %5001 = vmatpush.bf16.msrb.mxu0 %v7563_v8  ;;  %5014 = vmatpush.bf16.msrb.mxu1 %v7567_v61  ;;  %v4700_v21 = vpop.permute.xlu0 %4699 }
 0x356   : > { %5027 = vmatpush.bf16.msrb.mxu2 %v7571_v27  ;;  %5040 = vmatpush.bf16.msrb.mxu3 %v7575_v13  ;;  %v4704_v34 = vrot.slane %v4700_v21, 4  ;;  %v4593_v44 = vpop.permute.xlu1 %4592 }
 0x357   : > { %v11141_v40 = vpop.permute.xlu2 %5322  ;;  %v4598_v39 = vrot.slane %v4593_v44, 4 }
 0x358   : > { %v4709_v25 = vsel %vm1220_vm0, %v4703_v53, %v4704_v34  ;;  %v4711_v16 = vsel %vm12022_vm4, %v4700_v21, %v4704_v34  ;;  %vm12034_vm4 = vmmov %vm12033_vm1 }
 0x359   : > { %v4710_v60 = vsel %vm12023_vm2, %v11024_v20, %v4709_v25  ;;  %4719 = vst [vmem:[#allocation3 + $0xa4] sm:$0xf] %v4711_v16  ;;  %v4602_v19 = vsel %vm1220_vm0, %v4597_v62, %v4598_v39  ;;  %v4604_v52 = vsel %vm1220_vm0, %v4598_v39, %v4599_v37  ;;  %v7534_v50 = vld [vmem:[#allocation3 + $0x78] sm:$0xf]  ;;  %v8028_v58 = vld [vmem:[#allocation3 + $0x7c] sm:$0xf]  ;;  %v3901_v20 = vpop.f32.mrf.mxu3  ;;  %vm12035_vm2 = vmmov %vm12033_vm1 }
 0x35a   : > { %4718 = vst [vmem:[#allocation3 + $0x9c] sm:$0xff] %v4710_v60  ;;  %v4603_v53 = vsel %vm12024_vm3, %v10997_v22, %v4602_v19  ;;  %v4605_v43 = vsel %vm12025_vm6, %v4593_v44, %v4604_v52  ;;  %v7535_v29 = vor.u32 %v8031_v28, %v7534_v50  ;;  %v7539_v31 = vor.u32 %v8028_v58, %v7536_v26  ;;  %v3875_v22 = vpop.f32.mrf.mxu1  ;;  %v7542_v4 = vld [vmem:[#allocation3 + $0x80] sm:$0xf]  ;;  %v8029_v18 = vld [vmem:[#allocation3 + $0x84] sm:$0xf]  ;;  %vm12036_vm3 = vmmov %vm12033_vm1 }
 0x35b   : > { %4612 = vst [vmem:[#allocation3 + $0x40] sm:$0xff] %v4603_v53  ;;  %v11162_v62 = vadd.f32 %v3901_v20, %v11056_v46  ;;  %v3397_v37 = vpop.f32.mrf.mxu2  ;;  %v11170_v54 = vadd.f32 %v3875_v22, %v11082_v23  ;;  %v7578_v20 = vld [vmem:[#allocation3 + $0xc0] sm:$0xf]  ;;  %vm12037_vm6 = vmmov %vm12032_vm12 }
 0x35c   : > { %4613 = vst [vmem:[#allocation3 + $0x48] sm:$0xff] %v4605_v43  ;;  %5002 = vmatpush.bf16.msrb.mxu0 %v7535_v29  ;;  %5015 = vmatpush.bf16.msrb.mxu1 %v7539_v31 }
 0x35d   : > { %v4628_v12 = vpop.permute.xlu0 %4627 }
 0x35e   : > { %v4633_v48 = vrot.slane %v4628_v12, 4  ;;  %v4630_v42 = vpop.permute.xlu1 %4629 }
 0x35f   : > { %v11164_v30 = vpop.permute.xlu2 %5326  ;;  %v4634_v45 = vrot.slane %v4630_v42, 4 }
 0x360   : > { %v4637_v51 = vsel %vm1220_vm0, %v4632_v11, %v4633_v48 }
 0x361   : > { %v4638_v46 = vsel %vm12026_vm11, %v11020_v57, %v4637_v51  ;;  %v4639_v49 = vsel %vm1220_vm0, %v4633_v48, %v4634_v45  ;;  %v4641_v36 = vsel %vm12027_vm14, %v4630_v42, %v4634_v45  ;;  %v8032_v15 = vld [vmem:[#allocation3 + $0x98] sm:$0xf0]  ;;  %v7544_v10 = vld [vmem:[#allocation3 + $0x9c] sm:$0xf0]  ;;  %v3903_v11 = vpop.f32.mrf.mxu3  ;;  %v7478_v48 = vld [vmem:[#allocation3 + $0x8] sm:$0xf] }
 0x362   : > { %4647 = vst [vmem:[#allocation3 + $0x5c] sm:$0xff] %v4638_v46  ;;  %v4640_v2 = vsel %vm12028_vm7, %v4628_v12, %v4639_v49  ;;  %v7543_v3 = vor.u32 %v8032_v15, %v7542_v4  ;;  %v7547_v6 = vor.u32 %v8029_v18, %v7544_v10  ;;  %v7506_v27 = vld [vmem:[#allocation3 + $0x40] sm:$0xf]  ;;  %v3877_v13 = vpop.f32.mrf.mxu1  ;;  %v8021_v5 = vld [vmem:[#allocation3 + $0x44] sm:$0xf]  ;;  %vm12038_vm11 = vmmov %vm12033_vm1  ;;  %vm12039_vm14 = vcmask 220160  }
 0x363   : > { %4648 = vst [vmem:[#allocation3 + $0x64] sm:$0xff] %v4640_v2  ;;  %v3888_v33 = vpop.f32.mrf.mxu2  ;;  %v7514_v34 = vld [vmem:[#allocation3 + $0x48] sm:$0xf]  ;;  %v8022_v44 = vld [vmem:[#allocation3 + $0x4c] sm:$0xf]  ;;  %vm12040_vm7 = vmmov %vm12039_vm14 }
 0x364   : > { %4649 = vst [vmem:[#allocation3 + $0x6c] sm:$0xf] %v4641_v36  ;;  %5028 = vmatpush.bf16.msrb.mxu2 %v7543_v3  ;;  %5041 = vmatpush.bf16.msrb.mxu3 %v7547_v6  ;;  %v11180_v0 = vadd.f32 %v3888_v33, %v11054_v35  ;;  %v8014_v4 = vld [vmem:[#allocation3 + $0xc] sm:$0xf]  ;;  %v8040_v2 = vld [vmem:[#allocation3 + $0xd8] sm:$0xf0] }
 0x365   : > { %v4525_v23 = vpop.permute.xlu0 %4524  ;;  %v7579_v6 = vor.u32 %v8040_v2, %v7578_v20  ;;  %v5332_v33 = vrot.slane %v11164_v30, 4 }
 0x366   : > { %v4529_v57 = vrot.slane %v4525_v23, 4  ;;  %v4558_v8 = vpop.permute.xlu1 %4557 }
 0x367   : > { %v11177_v61 = vpop.permute.xlu2 %5252  ;;  %v4563_v17 = vrot.slane %v4558_v8, 4 }
 0x368   : > { %v4534_v55 = vsel %vm1220_vm0, %v4528_v14, %v4529_v57  ;;  %v4536_v21 = vsel %vm12016_vm5, %v4525_v23, %v4529_v57  ;;  %v5330_v23 = vrot.slane %v11141_v40, 4  ;;  %vm12041_vm5 = vcmask 244736  }
 0x369   : > { %v4535_v39 = vsel %vm12029_vm15, %v11079_v7, %v4534_v55  ;;  %4544 = vst [vmem:[#allocation3 + $0x18] sm:$0xf] %v4536_v21  ;;  %v4567_v35 = vsel %vm1220_vm0, %v4562_v59, %v4563_v17  ;;  %v4569_v41 = vsel %vm1220_vm0, %v4563_v17, %v4564_v56  ;;  %v8024_v25 = vld [vmem:[#allocation3 + $0x58] sm:$0xf0]  ;;  %v7508_v16 = vld [vmem:[#allocation3 + $0x5c] sm:$0xf0] }
 0x36a   : > { %4543 = vst [vmem:[#allocation3 + $0x10] sm:$0xff] %v4535_v39  ;;  %v4568_v14 = vsel %vm12030_vm10, %v11058_v32, %v4567_v35  ;;  %v4570_v28 = vsel %vm12031_vm13, %v4558_v8, %v4569_v41  ;;  %v7507_v26 = vor.u32 %v8024_v25, %v7506_v27  ;;  %v7511_v60 = vor.u32 %v8021_v5, %v7508_v16  ;;  %v8025_v7 = vld [vmem:[#allocation3 + $0x60] sm:$0xf0]  ;;  %v7516_v19 = vld [vmem:[#allocation3 + $0x64] sm:$0xf0]  ;;  %vm12044_vm13 = vmmov %vm12041_vm5 }
 0x36b   : > { %4577 = vst [vmem:[#allocation3 + $0x24] sm:$0xff] %v4568_v14  ;;  %v7515_v52 = vor.u32 %v8025_v7, %v7514_v34  ;;  %v7519_v50 = vor.u32 %v8022_v44, %v7516_v19  ;;  %v3890_v29 = vpop.f32.mrf.mxu2  ;;  %v3927_v31 = vpop.f32.mrf.mxu1  ;;  %v7550_v27 = vld [vmem:[#allocation3 + $0x88] sm:$0xf]  ;;  %vm12042_vm15 = vcmask 236544  }
 0x36c   : > { %4578 = vst [vmem:[#allocation3 + $0x2c] sm:$0xff] %v4570_v28  ;;  %5003 = vmatpush.bf16.msrb.mxu0 %v7507_v26  ;;  %5016 = vmatpush.bf16.msrb.mxu1 %v7511_v60  ;;  %v3914_v38 = vpop.f32.mrf.mxu0  ;;  %v11203_v12 = vadd.f32 %v3927_v31, %v11144_v1  ;;  %v8033_v1 = vld [vmem:[#allocation3 + $0xa0] sm:$0xf0]  ;;  %vm12043_vm10 = vmmov %vm12042_vm15 }
 0x36d   : > { %5029 = vmatpush.bf16.msrb.mxu2 %v7515_v52  ;;  %5042 = vmatpush.bf16.msrb.mxu3 %v7519_v50  ;;  %v5288_v59 = vpop.permute.xlu0 %5287  ;;  %v11200_v32 = vadd.f32 %v3914_v38, %v11130_v24  ;;  %v7551_v55 = vor.u32 %v8033_v1, %v7550_v27 }
 0x36e   : > { %v5295_v56 = vrot.slane %v5288_v59, 4  ;;  %v5290_v58 = vpop.permute.xlu1 %5289 }
 0x36f   : > { %v11197_v53 = vpop.permute.xlu2 %5256  ;;  %v5296_v43 = vrot.slane %v5290_v58, 4 }
 0x370   : > { %v5262_v2 = vrot.slane %v11197_v53, 4 }
 0x371   : > { %v5299_v37 = vsel %vm1220_vm0, %v5295_v56, %v5296_v43  ;;  %v7486_v42 = vld [vmem:[#allocation3 + $0x10] sm:$0xf]  ;;  %v8015_v45 = vld [vmem:[#allocation3 + $0x14] sm:$0xf] }
 0x372   : > { %v5300_v22 = vsel %vm12032_vm12, %v5288_v59, %v5299_v37  ;;  %v8017_v51 = vld [vmem:[#allocation3 + $0x20] sm:$0xf0]  ;;  %v7480_v46 = vld [vmem:[#allocation3 + $0x24] sm:$0xf0]  ;;  %v7494_v59 = vld [vmem:[#allocation3 + $0x18] sm:$0xf] }
 0x373   : > { %5310 = vst [vmem:[#allocation3 + $0xa8] sm:$0xff] %v5300_v22  ;;  %v7479_v24 = vor.u32 %v8017_v51, %v7478_v48  ;;  %v7483_v49 = vor.u32 %v8014_v4, %v7480_v46  ;;  %v8018_v36 = vld [vmem:[#allocation3 + $0x28] sm:$0xf0]  ;;  %v7488_v15 = vld [vmem:[#allocation3 + $0x2c] sm:$0xf0]  ;;  %v3940_v21 = vpop.f32.mrf.mxu2  ;;  %v3929_v5 = vpop.f32.mrf.mxu1  ;;  %vm12045_vm12 = vcmask 261120  }
 0x374   : > { %v7487_v18 = vor.u32 %v8018_v36, %v7486_v42  ;;  %v7491_v10 = vor.u32 %v8015_v45, %v7488_v15  ;;  %v3916_v11 = vpop.f32.mrf.mxu0  ;;  %v11223_v39 = vadd.f32 %v3940_v21, %v11110_v63  ;;  %v8026_v63 = vld [vmem:[#allocation3 + $0x68] sm:$0xf0] }
 0x375   : > { %5004 = vmatpush.bf16.msrb.mxu0 %v7479_v24  ;;  %5017 = vmatpush.bf16.msrb.mxu1 %v7483_v49  ;;  %v5325_v3 = vpop.permute.xlu0 %5324 }
 0x376   : > { %5030 = vmatpush.bf16.msrb.mxu2 %v7487_v18  ;;  %5043 = vmatpush.bf16.msrb.mxu3 %v7491_v10  ;;  %v5331_v57 = vrot.slane %v5325_v3, 4  ;;  %v11209_v8 = vpop.permute.xlu1 %5291  ;;  %v5260_v10 = vrot.slane %v11177_v61, 4 }
 0x377   : > { %v11211_v17 = vpop.permute.xlu2 %5182  ;;  %v5297_v13 = vrot.slane %v11209_v8, 4 }
 0x378   : > { %v5334_v34 = vsel %vm1220_vm0, %v5330_v23, %v5331_v57  ;;  %v5336_v44 = vsel %vm1220_vm0, %v5331_v57, %v5332_v33  ;;  %7582 = vmatmul.msk.bf16.vlgmr.msrb.gmra.mxu0 %vm12033_vm1, %v11115_v47  ;;  %7583 = vmatmul.msk.bf16.vlgmr.msrb.gmra.mxu1 %vm12034_vm4, %v11115_v47  ;;  %vm12048_vm4 = vcmask 252928  }
 0x379   : > { %5053 = vmatpush.bf16.msra.mxu0 %v7579_v6  ;;  %v5335_v35 = vsel %vm3125_vm9, %v11141_v40, %v5334_v34  ;;  %v5337_v41 = vsel %vm3125_vm9, %v5325_v3, %v5336_v44  ;;  %v5301_v25 = vsel %vm1220_vm0, %v5296_v43, %v5297_v13  ;;  %7584 = vmatmul.msk.bf16.vlgmr.msrb.gmra.mxu2 %vm12035_vm2, %v11115_v47  ;;  %v7522_v40 = vld [vmem:[#allocation3 + $0x50] sm:$0xf]  ;;  %v8019_v43 = vld [vmem:[#allocation3 + $0x30] sm:$0xf0]  ;;  %vm12049_vm2 = vmmov %vm12048_vm4 }
 0x37a   : > { %7585 = vmatmul.msk.bf16.vlgmr.msrb.gmra.mxu3 %vm12036_vm3, %v11115_v47  ;;  %5345 = vst [vmem:[#allocation3 + $0xc4] sm:$0xff] %v5335_v35  ;;  %v5302_v16 = vsel %vm12037_vm6, %v5290_v58, %v5301_v25  ;;  %v7523_v60 = vor.u32 %v8026_v63, %v7522_v40  ;;  %v7674_v29 = vld [vmem:[#allocation3 + $0xa8] sm:$0xf]  ;;  %v8062_v37 = vld [vmem:[#allocation3 + $0xac] sm:$0xf]  ;;  %vm12050_vm3 = vmmov %vm12045_vm12 }
 0x37b   : > { %5346 = vst [vmem:[#allocation3 + $0xcc] sm:$0xff] %v5337_v41  ;;  %v4421_v14 = vpop.f32.mrf.mxu3  ;;  %v3942_v58 = vpop.f32.mrf.mxu2 }
 0x37c   : > { %5311 = vst [vmem:[#allocation3 + $0xb0] sm:$0xff] %v5302_v16  ;;  %v11237_v28 = vadd.f32 %v4421_v14, %v11117_v9  ;;  %v4434_v7 = vpop.f32.mrf.mxu0  ;;  %v7495_v9 = vor.u32 %v8019_v43, %v7494_v59 }
 0x37d   : > { %5054 = vmatpush.bf16.msra.mxu0 %v7551_v55  ;;  %v5218_v26 = vpop.permute.xlu0 %5217  ;;  %v11242_v38 = vadd.f32 %v4434_v7, %v11170_v54 }
 0x37e   : > { %v5225_v19 = vrot.slane %v5218_v26, 4  ;;  %v5220_v52 = vpop.permute.xlu1 %5219 }
 0x37f   : > { %v11239_v50 = vpop.permute.xlu2 %5186  ;;  %v5226_v56 = vrot.slane %v5220_v52, 4 }
 0x381   : > { %5055 = vmatpush.bf16.msra.mxu0 %v7523_v60  ;;  %v5229_v31 = vsel %vm1220_vm0, %v5225_v19, %v5226_v56  ;;  %v8065_v20 = vld [vmem:[#allocation3 + $0xc0] sm:$0xf0]  ;;  %v7676_v48 = vld [vmem:[#allocation3 + $0xc4] sm:$0xf0] }
 0x382   : > { %v5230_v42 = vsel %vm3017_vm8, %v5218_v26, %v5229_v31  ;;  %v7675_v45 = vor.u32 %v8065_v20, %v7674_v29  ;;  %v7679_v22 = vor.u32 %v8062_v37, %v7676_v48  ;;  %v8066_v51 = vld [vmem:[#allocation3 + $0xc8] sm:$0xf0]  ;;  %v7684_v4 = vld [vmem:[#allocation3 + $0xcc] sm:$0xf0]  ;;  %v5190_v29 = vrot.slane %v11211_v17, 4 }
 0x383   : > { %5240 = vst [vmem:[#allocation3 + $0x70] sm:$0xff] %v5230_v42  ;;  %v7682_v54 = vld [vmem:[#allocation3 + $0xb0] sm:$0xf]  ;;  %v8063_v46 = vld [vmem:[#allocation3 + $0xb4] sm:$0xf]  ;;  %v4423_v24 = vpop.f32.mrf.mxu3  ;;  %v5192_v31 = vrot.slane %v11239_v50, 4 }
 0x384   : > { %5534 = vmatpush.bf16.msra.mxu1 %v7675_v45  ;;  %5547 = vmatpush.bf16.msra.mxu2 %v7679_v22  ;;  %v7683_v49 = vor.u32 %v8066_v51, %v7682_v54  ;;  %v7687_v36 = vor.u32 %v8063_v46, %v7684_v4  ;;  %v4436_v18 = vpop.f32.mrf.mxu0 }
 0x385   : > { %5056 = vmatpush.bf16.msra.mxu0 %v7495_v9  ;;  %v5255_v15 = vpop.permute.xlu0 %5254 }
 0x386   : > { %5560 = vmatpush.bf16.msra.mxu3 %v7683_v49  ;;  %v5261_v1 = vrot.slane %v5255_v15, 4  ;;  %v5222_v3 = vpop.permute.xlu1 %5221 }
 0x387   : > { %v11248_v6 = vpop.permute.xlu2 %5112  ;;  %v5227_v11 = vrot.slane %v5222_v3, 4 }
 0x388   : > { %v5264_v23 = vsel %vm1220_vm0, %v5260_v10, %v5261_v1  ;;  %v5266_v57 = vsel %vm1220_vm0, %v5261_v1, %v5262_v2  ;;  %7586 = vmatmul.msk.bf16.vlgmr.msra.gmra.mxu0 %vm12038_vm11, %v11115_v47  ;;  %vm12051_vm11 = vmmov %vm12037_vm6 }
 0x389   : > { %5573 = vmatpush.bf16.msrb.mxu0 %v7687_v36  ;;  %v5265_v27 = vsel %vm12039_vm14, %v11177_v61, %v5264_v23  ;;  %v5267_v55 = vsel %vm12040_vm7, %v5255_v15, %v5266_v57  ;;  %v5231_v21 = vsel %vm1220_vm0, %v5226_v56, %v5227_v11 }
 0x38a   : > { %5275 = vst [vmem:[#allocation3 + $0x8c] sm:$0xff] %v5265_v27  ;;  %v5232_v5 = vsel %vm3017_vm8, %v5220_v52, %v5231_v21  ;;  %v7646_v16 = vld [vmem:[#allocation3 + $0x70] sm:$0xf]  ;;  %v8055_v61 = vld [vmem:[#allocation3 + $0x74] sm:$0xf] }
 0x38b   : > { %5276 = vst [vmem:[#allocation3 + $0x94] sm:$0xff] %v5267_v55 }
 0x38c   : > { %5241 = vst [vmem:[#allocation3 + $0x78] sm:$0xff] %v5232_v5 }
 0x38d   : > { %v5148_v34 = vpop.permute.xlu0 %5147 }
 0x38e   : > { %v5155_v44 = vrot.slane %v5148_v34, 4  ;;  %v5150_v35 = vpop.permute.xlu1 %5149 }
 0x38f   : > { %v11261_v41 = vpop.permute.xlu2 %5116  ;;  %v5156_v25 = vrot.slane %v5150_v35, 4 }
 0x391   : > { %v5159_v47 = vsel %vm1220_vm0, %v5155_v44, %v5156_v25  ;;  %v8058_v63 = vld [vmem:[#allocation3 + $0x88] sm:$0xf0]  ;;  %v7648_v14 = vld [vmem:[#allocation3 + $0x8c] sm:$0xf0] }
 0x392   : > { %v5160_v40 = vsel %vm12041_vm5, %v5148_v34, %v5159_v47  ;;  %v7647_v26 = vor.u32 %v8058_v63, %v7646_v16  ;;  %v7651_v60 = vor.u32 %v8055_v61, %v7648_v14  ;;  %v8059_v7 = vld [vmem:[#allocation3 + $0x90] sm:$0xf0]  ;;  %v7656_v19 = vld [vmem:[#allocation3 + $0x94] sm:$0xf0]  ;;  %vm12054_vm5 = vmmov %vm12040_vm7 }
 0x393   : > { %5170 = vst [vmem:[#allocation3 + $0x38] sm:$0xff] %v5160_v40  ;;  %v7654_v52 = vld [vmem:[#allocation3 + $0x78] sm:$0xf]  ;;  %v8056_v59 = vld [vmem:[#allocation3 + $0x7c] sm:$0xf] }
 0x394   : > { %5535 = vmatpush.bf16.msra.mxu1 %v7647_v26  ;;  %5548 = vmatpush.bf16.msra.mxu2 %v7651_v60  ;;  %v7655_v56 = vor.u32 %v8059_v7, %v7654_v52  ;;  %v7659_v58 = vor.u32 %v8056_v59, %v7656_v19  ;;  %v5120_v59 = vrot.slane %v11248_v6, 4 }
 0x395   : > { %v5185_v43 = vpop.permute.xlu0 %5184 }
 0x396   : > { %5561 = vmatpush.bf16.msra.mxu3 %v7655_v56  ;;  %5574 = vmatpush.bf16.msrb.mxu0 %v7659_v58  ;;  %v5191_v9 = vrot.slane %v5185_v43, 4  ;;  %v11267_v20 = vpop.permute.xlu1 %5151  ;;  %v5122_v56 = vrot.slane %v11261_v41, 4 }
 0x397   : > { %v5224_v37 = vpop.permute.xlu2 %5223  ;;  %v5157_v48 = vrot.slane %v11267_v20, 4 }
 0x398   : > { %v5228_v42 = vrot.slane %v5224_v37, 4  ;;  %v5194_v45 = vsel %vm1220_vm0, %v5190_v29, %v5191_v9  ;;  %v5196_v22 = vsel %vm1220_vm0, %v5191_v9, %v5192_v31 }
 0x399   : > { %v5195_v51 = vsel %vm12042_vm15, %v11211_v17, %v5194_v45  ;;  %v5197_v4 = vsel %vm12043_vm10, %v5185_v43, %v5196_v22  ;;  %v5161_v54 = vsel %vm1220_vm0, %v5156_v25, %v5157_v48  ;;  %vm12055_vm15 = vmmov %vm12044_vm13 }
 0x39a   : > { %v5233_v46 = vsel %vm1220_vm0, %v5227_v11, %v5228_v42  ;;  %5205 = vst [vmem:[#allocation3 + $0x54] sm:$0xff] %v5195_v51  ;;  %v5162_v24 = vsel %vm12044_vm13, %v5150_v35, %v5161_v54  ;;  %v5235_v36 = vsel %vm3017_vm8, %v5224_v37, %v5228_v42  ;;  %v7618_v55 = vld [vmem:[#allocation3 + $0x38] sm:$0xf]  ;;  %v8048_v25 = vld [vmem:[#allocation3 + $0x3c] sm:$0xf] }
 0x39b   : > { %v5234_v49 = vsel %vm3017_vm8, %v5222_v3, %v5233_v46  ;;  %5206 = vst [vmem:[#allocation3 + $0x5c] sm:$0xff] %v5197_v4  ;;  %vm12046_vm8 = vmmov %vm12043_vm10 }
 0x39c   : > { %5171 = vst [vmem:[#allocation3 + $0x40] sm:$0xff] %v5162_v24  ;;  %vm12047_vm1 = vmmov %vm12046_vm8 }
 0x39d   : > { %5242 = vst [vmem:[#allocation3 + $0x80] sm:$0xff] %v5234_v49  ;;  %v5078_v15 = vpop.permute.xlu0 %5077 }
 0x39e   : > { %5243 = vst [vmem:[#allocation3 + $0x88] sm:$0xf] %v5235_v36  ;;  %v4447_v17 = vpop.f32.mrf.mxu1  ;;  %v5085_v18 = vrot.slane %v5078_v15, 4  ;;  %v5080_v10 = vpop.permute.xlu1 %5079 }
 0x39f   : > { %v11283_v1 = vadd.f32 %v4447_v17, %v11180_v0  ;;  %v5086_v23 = vrot.slane %v5080_v10, 4  ;;  %v5189_v11 = vpop.permute.xlu2 %5188 }
 0x3a0   : > { %v5193_v57 = vrot.slane %v5189_v11, 4 }
 0x3a1   : > { %v5089_v27 = vsel %vm1220_vm0, %v5085_v18, %v5086_v23  ;;  %v8051_v3 = vld [vmem:[#allocation3 + $0x50] sm:$0xf0]  ;;  %v7620_v21 = vld [vmem:[#allocation3 + $0x54] sm:$0xf0] }
 0x3a2   : > { %v5090_v5 = vsel %vm12045_vm12, %v5078_v15, %v5089_v27  ;;  %v5198_v34 = vsel %vm1220_vm0, %v5192_v31, %v5193_v57  ;;  %v5200_v44 = vsel %vm12046_vm8, %v5189_v11, %v5193_v57  ;;  %v7619_v35 = vor.u32 %v8051_v3, %v7618_v55  ;;  %v8052_v16 = vld [vmem:[#allocation3 + $0x58] sm:$0xf0]  ;;  %v7628_v47 = vld [vmem:[#allocation3 + $0x5c] sm:$0xf0]  ;;  %vm12058_vm12 = vmmov %vm12055_vm15 }
 0x3a3   : > { %5100 = vst [vmem:[#allocation3] sm:$0xff] %v5090_v5  ;;  %v5199_v0 = vsel %vm12047_vm1, %v11239_v50, %v5198_v34  ;;  %v7623_v63 = vor.u32 %v8048_v25, %v7620_v21  ;;  %v7626_v61 = vld [vmem:[#allocation3 + $0x40] sm:$0xf]  ;;  %v8049_v14 = vld [vmem:[#allocation3 + $0x44] sm:$0xf]  ;;  %vm12059_vm8 = vmmov %vm12050_vm3 }
 0x3a4   : > { %5207 = vst [vmem:[#allocation3 + $0x64] sm:$0xff] %v5199_v0  ;;  %v4460_v40 = vpop.f32.mrf.mxu2  ;;  %5536 = vmatpush.bf16.msra.mxu1 %v7619_v35  ;;  %v7627_v26 = vor.u32 %v8052_v16, %v7626_v61  ;;  %v7631_v60 = vor.u32 %v8049_v14, %v7628_v47  ;;  %v11334_v25 = vld [vmem:[%s11738_s2 + $0x1c] sm:$0xf]  ;;  %vm12060_vm1 = vmmov %vm12050_vm3 }
 0x3a5   : > { %5208 = vst [vmem:[#allocation3 + $0x6c] sm:$0xf] %v5200_v44  ;;  %v11292_v7 = vadd.f32 %v4460_v40, %v11162_v62  ;;  %v4486_v19 = vpop.f32.mrf.mxu0  ;;  %5549 = vmatpush.bf16.msra.mxu2 %v7623_v63  ;;  %v5115_v52 = vpop.permute.xlu0 %5114 }
 0x3a6   : > { %v4449_v50 = vpop.f32.mrf.mxu1  ;;  %v11297_v58 = vadd.f32 %v4486_v19, %v11203_v12  ;;  %5562 = vmatpush.bf16.msra.mxu3 %v7627_v26  ;;  %5575 = vmatpush.bf16.msrb.mxu0 %v7631_v60  ;;  %v5121_v43 = vrot.slane %v5115_v52, 4  ;;  %v11299_v29 = vpop.permute.xlu1 %5081 }
 0x3a7   : > { %v5087_v31 = vrot.slane %v11299_v29, 4 }
 0x3a8   : > { %v5124_v62 = vsel %vm1220_vm0, %v5120_v59, %v5121_v43  ;;  %v5126_v9 = vsel %vm1220_vm0, %v5121_v43, %v5122_v56 }
 0x3a9   : > { %v5125_v37 = vsel %vm12048_vm4, %v11248_v6, %v5124_v62  ;;  %v5127_v42 = vsel %vm12049_vm2, %v5115_v52, %v5126_v9  ;;  %v5091_v12 = vsel %vm1220_vm0, %v5086_v23, %v5087_v31  ;;  %vm12061_vm4 = vmmov %vm12049_vm2 }
 0x3aa   : > { %5135 = vst [vmem:[#allocation3 + $0x1c] sm:$0xff] %v5125_v37  ;;  %v5092_v45 = vsel %vm12050_vm3, %v5080_v10, %v5091_v12  ;;  %v4473_v22 = vpop.f32.mrf.mxu3  ;;  %v7590_v10 = vld [vmem:[#allocation3] sm:$0xf]  ;;  %v8041_v23 = vld [vmem:[#allocation3 + $0x4] sm:$0xf] }
 0x3ab   : > { %5136 = vst [vmem:[#allocation3 + $0x24] sm:$0xff] %v5127_v42  ;;  %v11314_v51 = vadd.f32 %v4473_v22, %v11200_v32 }
 0x3ac   : > { %5101 = vst [vmem:[#allocation3 + $0x8] sm:$0xff] %v5092_v45  ;;  %v4462_v4 = vpop.f32.mrf.mxu2 }
 0x3ad   : > { %v5294_v54 = vpop.permute.xlu0 %5293  ;;  %v4488_v46 = vpop.f32.mrf.mxu0  ;;  %v7662_v4 = vld [vmem:[#allocation3 + $0x80] sm:$0xf] }
 0x3ae   : > { %v4499_v24 = vpop.f32.mrf.mxu1  ;;  %v5298_v6 = vrot.slane %v5294_v54, 4  ;;  %v5329_v49 = vpop.permute.xlu1 %5328  ;;  %v7670_v46 = vld [vmem:[#allocation3 + $0x88] sm:$0xf] }
 0x3af   : > { %v11317_v36 = vadd.f32 %v4499_v24, %v11223_v39  ;;  %v5333_v15 = vrot.slane %v5329_v49, 4 }
 0x3b0   : > { %v5303_v17 = vsel %vm1220_vm0, %v5297_v13, %v5298_v6  ;;  %v5305_v18 = vsel %vm12037_vm6, %v5294_v54, %v5298_v6  ;;  %v8057_v6 = vld [vmem:[#allocation3 + $0x84] sm:$0xf] }
 0x3b1   : > { %v5304_v32 = vsel %vm12051_vm11, %v11209_v8, %v5303_v17  ;;  %5313 = vst [vmem:[#allocation3 + $0xc0] sm:$0xf] %v5305_v18  ;;  %v5338_v11 = vsel %vm1220_vm0, %v5332_v33, %v5333_v15  ;;  %v5340_v39 = vsel %vm3125_vm9, %v5329_v49, %v5333_v15  ;;  %v8044_v57 = vld [vmem:[#allocation3 + $0x18] sm:$0xf0]  ;;  %v7592_v27 = vld [vmem:[#allocation3 + $0x1c] sm:$0xf0] }
 0x3b2   : > { %5312 = vst [vmem:[#allocation3 + $0xb8] sm:$0xff] %v5304_v32  ;;  %v5339_v13 = vsel %vm3125_vm9, %v11164_v30, %v5338_v11  ;;  %v7591_v55 = vor.u32 %v8044_v57, %v7590_v10  ;;  %v7595_v3 = vor.u32 %v8041_v23, %v7592_v27  ;;  %v8045_v21 = vld [vmem:[#allocation3 + $0x20] sm:$0xf0]  ;;  %v7600_v5 = vld [vmem:[#allocation3 + $0x24] sm:$0xf0]  ;;  %v4475_v44 = vpop.f32.mrf.mxu3  ;;  %v11339_v30 = vld [vmem:[%s11739_s3] sm:$0xff] }
 0x3b3   : > { %5347 = vst [vmem:[#allocation3 + $0xd4] sm:$0xff] %v5339_v13  ;;  %v7598_v34 = vld [vmem:[#allocation3 + $0x8] sm:$0xf]  ;;  %v8042_v8 = vld [vmem:[#allocation3 + $0xc] sm:$0xf]  ;;  %5631 = vperm.xlu2 %8118, %v11339_v30   ;;  %vm12052_vm9 = vcmask 523264  }
 0x3b4   : > { %5348 = vst [vmem:[#allocation3 + $0xdc] sm:$0xf] %v5340_v39  ;;  %5537 = vmatpush.bf16.msra.mxu1 %v7591_v55  ;;  %5550 = vmatpush.bf16.msra.mxu2 %v7595_v3  ;;  %v7599_v33 = vor.u32 %v8045_v21, %v7598_v34  ;;  %v7603_v35 = vor.u32 %v8042_v8, %v7600_v5  ;;  %vm12053_vm14 = vmmov %vm12052_vm9  ;;  %v8053_v13 = vld [vmem:[#allocation3 + $0x60] sm:$0xf0]  ;;  %v7636_v55 = vld [vmem:[#allocation3 + $0x64] sm:$0xf0] }
 0x3b5   : > { %v5259_v16 = vpop.permute.xlu0 %5258  ;;  %vm12056_vm10 = vmmov %vm12052_vm9 }
 0x3b6   : > { %5563 = vmatpush.bf16.msra.mxu3 %v7599_v33  ;;  %5576 = vmatpush.bf16.msrb.mxu0 %v7603_v35  ;;  %v5263_v47 = vrot.slane %v5259_v16, 4  ;;  %v5154_v0 = vpop.permute.xlu1 %5153  ;;  %v4501_v63 = vpop.f32.mrf.mxu1  ;;  %vm12057_vm13 = vmmov %vm12052_vm9 }
 0x3b7   : > { %v5158_v61 = vrot.slane %v5154_v0, 4  ;;  %7700 = vmatmul.msk.bf16.vlgmr.msra.gmra.mxu1 %vm12052_vm9, %v11334_v25  ;;  %7701 = vmatmul.msk.bf16.vlgmr.msra.gmra.mxu2 %vm12053_vm14, %v11334_v25 }
 0x3b8   : > { %v5268_v14 = vsel %vm1220_vm0, %v5262_v2, %v5263_v47  ;;  %v5270_v40 = vsel %vm12040_vm7, %v5259_v16, %v5263_v47  ;;  %v7698_v26 = vld [vmem:[#allocation3 + $0xc0] sm:$0xf] }
 0x3b9   : > { %v5269_v60 = vsel %vm12054_vm5, %v11197_v53, %v5268_v14  ;;  %5278 = vst [vmem:[#allocation3 + $0xa4] sm:$0xf] %v5270_v40  ;;  %v5163_v19 = vsel %vm1220_vm0, %v5157_v48, %v5158_v61  ;;  %v5165_v52 = vsel %vm12055_vm15, %v5154_v0, %v5158_v61  ;;  %7702 = vmatmul.msk.bf16.vlgmr.msra.gmra.mxu3 %vm12056_vm10, %v11334_v25  ;;  %v7690_v2 = vld [vmem:[#allocation3 + $0xb8] sm:$0xf]  ;;  %v8064_v59 = vld [vmem:[#allocation3 + $0xbc] sm:$0xf] }
 0x3ba   : > { %7703 = vmatmul.msk.bf16.vlgmr.msrb.gmra.mxu0 %vm12057_vm13, %v11334_v25  ;;  %5277 = vst [vmem:[#allocation3 + $0x9c] sm:$0xff] %v5269_v60  ;;  %v5164_v50 = vsel %vm12058_vm12, %v11267_v20, %v5163_v19  ;;  %v8067_v53 = vld [vmem:[#allocation3 + $0xd0] sm:$0xf0]  ;;  %v7692_v43 = vld [vmem:[#allocation3 + $0xd4] sm:$0xf0] }
 0x3bb   : > { %5172 = vst [vmem:[#allocation3 + $0x48] sm:$0xff] %v5164_v50  ;;  %v8068_v62 = vld [vmem:[#allocation3 + $0xd8] sm:$0xf0]  ;;  %v7691_v9 = vor.u32 %v8067_v53, %v7690_v2  ;;  %v7695_v48 = vor.u32 %v8064_v59, %v7692_v43 }
 0x3bc   : > { %5173 = vst [vmem:[#allocation3 + $0x50] sm:$0xf] %v5165_v52  ;;  %v7699_v37 = vor.u32 %v8068_v62, %v7698_v26 }
 0x3bd   : > { %5586 = vmatpush.bf16.msrb.mxu1 %v7691_v9  ;;  %5599 = vmatpush.bf16.msrb.mxu2 %v7695_v48  ;;  %v5084_v42 = vpop.permute.xlu0 %5083 }
 0x3be   : > { %5612 = vmatpush.bf16.msrb.mxu3 %v7699_v37  ;;  %v5088_v12 = vrot.slane %v5084_v42, 4  ;;  %v5119_v45 = vpop.permute.xlu1 %5118 }
 0x3bf   : > { %v5123_v22 = vrot.slane %v5119_v45, 4 }
 0x3c0   : > { %v5093_v20 = vsel %vm1220_vm0, %v5087_v31, %v5088_v12  ;;  %v5095_v54 = vsel %vm12059_vm8, %v5084_v42, %v5088_v12  ;;  %v8061_v24 = vld [vmem:[#allocation3 + $0xa0] sm:$0xf0] }
 0x3c1   : > { %v5094_v49 = vsel %vm12060_vm1, %v11299_v29, %v5093_v20  ;;  %5103 = vst [vmem:[#allocation3 + $0x18] sm:$0xf] %v5095_v54  ;;  %v5128_v15 = vsel %vm1220_vm0, %v5122_v56, %v5123_v22  ;;  %v5130_v17 = vsel %vm12061_vm4, %v5119_v45, %v5123_v22  ;;  %v7671_v18 = vor.u32 %v8061_v24, %v7670_v46  ;;  %v8060_v10 = vld [vmem:[#allocation3 + $0x98] sm:$0xf0]  ;;  %v7664_v23 = vld [vmem:[#allocation3 + $0x9c] sm:$0xf0]  ;;  %vm12062_vm0 = vmmov %vm12052_vm9 }
 0x3c2   : > { %5102 = vst [vmem:[#allocation3 + $0x10] sm:$0xff] %v5094_v49  ;;  %v5129_v31 = vsel %vm12049_vm2, %v11261_v41, %v5128_v15  ;;  %v7663_v32 = vor.u32 %v8060_v10, %v7662_v4  ;;  %v7667_v11 = vor.u32 %v8057_v6, %v7664_v23  ;;  %v7634_v39 = vld [vmem:[#allocation3 + $0x48] sm:$0xf]  ;;  %v8050_v57 = vld [vmem:[#allocation3 + $0x4c] sm:$0xf]  ;;  %vm12063_vm3 = vmmov %vm12062_vm0  ;;  %v5641_v45 = vlaneseq }
 0x3c3   : > { %5137 = vst [vmem:[#allocation3 + $0x2c] sm:$0xff] %v5129_v31  ;;  %5613 = vmatpush.bf16.msrb.mxu3 %v7671_v18  ;;  %v7642_v29 = vld [vmem:[#allocation3 + $0x50] sm:$0xf]  ;;  %v8054_v56 = vld [vmem:[#allocation3 + $0x68] sm:$0xf0]  ;;  %v7635_v3 = vor.u32 %v8053_v13, %v7634_v39  ;;  %v7639_v21 = vor.u32 %v8050_v57, %v7636_v55  ;;  %vm12064_vm6 = vmmov %vm12062_vm0 }
 0x3c4   : > { %5138 = vst [vmem:[#allocation3 + $0x34] sm:$0xf] %v5130_v17  ;;  %5587 = vmatpush.bf16.msrb.mxu1 %v7663_v32  ;;  %5600 = vmatpush.bf16.msrb.mxu2 %v7667_v11  ;;  %v7643_v27 = vor.u32 %v8054_v56, %v7642_v29  ;;  %v5642_v4 = vand.u32 127, %v5641_v45 }
 0x3c6   : > { %v5643_v54 = vadd.s32 128, %v5642_v4  ;;  %v5653_v15 = vand.u32 31, %v5642_v4  ;;  %v5644_v17 = vadd.s32 256, %v5642_v4  ;;  %v5645_v10 = vadd.s32 384, %v5642_v4 }
 0x3c7   : > { %5614 = vmatpush.bf16.msrb.mxu3 %v7643_v27  ;;  %v5646_v39 = vadd.s32 512, %v5642_v4  ;;  %v5648_v55 = vadd.s32 768, %v5642_v4 }
 0x3c8   : > { %5588 = vmatpush.bf16.msrb.mxu1 %v7635_v3  ;;  %5601 = vmatpush.bf16.msrb.mxu2 %v7639_v21  ;;  %v7614_v41 = vld [vmem:[#allocation3 + $0x18] sm:$0xf]  ;;  %vm11391_vm9 = vcmp.lt.s32.totalorder %v5653_v15, 25  ;;  %v5667_v11 = vand.u32 31, %v5644_v17  ;;  %v5674_v57 = vand.u32 31, %v5645_v10 }
 0x3c9   : > { %v7606_v5 = vld [vmem:[#allocation3 + $0x10] sm:$0xf]  ;;  %v8043_v34 = vld [vmem:[#allocation3 + $0x14] sm:$0xf]  ;;  %vm5746_vm15 = vcmp.lt.s32.totalorder %v5648_v55, 800 }
 0x3ca   : > { %v8046_v8 = vld [vmem:[#allocation3 + $0x28] sm:$0xf0]  ;;  %v7608_v44 = vld [vmem:[#allocation3 + $0x2c] sm:$0xf0]  ;;  %vm11399_vm14 = vcmp.lt.s32.totalorder %v5667_v11, 25  ;;  %vm11405_vm7 = vcmp.lt.s32.totalorder %v5674_v57, 25 }
 0x3cb   : > { %v8047_v33 = vld [vmem:[#allocation3 + $0x30] sm:$0xf0]  ;;  %v7607_v35 = vor.u32 %v8046_v8, %v7606_v5  ;;  %v7611_v16 = vor.u32 %v8043_v34, %v7608_v44  ;;  %v5681_v5 = vand.u32 31, %v5646_v39  ;;  %v5647_v34 = vadd.s32 640, %v5642_v4 }
 0x3cc   : > { %v7615_v47 = vor.u32 %v8047_v33, %v7614_v41 }
 0x3cd   : > { %5589 = vmatpush.bf16.msrb.mxu1 %v7607_v35  ;;  %5602 = vmatpush.bf16.msrb.mxu2 %v7611_v16  ;;  %v5695_v16 = vand.u32 31, %v5648_v55  ;;  %vm11409_vm5 = vcmp.lt.s32.totalorder %v5681_v5, 25 }
 0x3ce   : > { %5615 = vmatpush.bf16.msrb.mxu3 %v7615_v47 }
 0x3cf   : > { %vm5739_vm10 = vcmp.lt.s32.totalorder %v5695_v16, 25 }
 0x3d0   : > { %7704 = vmatmul.msk.bf16.vlgmr.msrb.gmra.mxu1 %vm12062_vm0, %v11334_v25  ;;  %7705 = vmatmul.msk.bf16.vlgmr.msrb.gmra.mxu2 %vm12063_vm3, %v11334_v25  ;;  %vm11421_vm12 = vmand %vm5739_vm10, %vm5746_vm15 }
 0x3d1   : > { %7706 = vmatmul.msk.bf16.vlgmr.msrb.gmra.mxu3 %vm12064_vm6, %v11334_v25 }
 0x3d4   : > { %v4980_v0 = vpop.f32.mrf.mxu2  ;;  %v4993_v63 = vpop.f32.mrf.mxu3 }
 0x3d5   : > { %v5062_v61 = vadd.f32 %v4980_v0, %v11237_v28  ;;  %v5063_v14 = vadd.f32 %v4993_v63, %v11242_v38 }
 0x3dc   : > { %v4982_v40 = vpop.f32.mrf.mxu2  ;;  %v4995_v26 = vpop.f32.mrf.mxu3 }
 0x3f5   : > { %v5006_v60 = vpop.f32.mrf.mxu0  ;;  %v5019_v19 = vpop.f32.mrf.mxu1 }
 0x3f6   : > { %v5064_v52 = vadd.f32 %v5006_v60, %v11283_v1  ;;  %v5065_v2 = vadd.f32 %v5019_v19, %v11292_v7 }
 0x3fc   : > { %v5032_v59 = vpop.f32.mrf.mxu2 }
 0x3fd   : > { %v5045_v50 = vpop.f32.mrf.mxu3  ;;  %v5066_v53 = vadd.f32 %v5032_v59, %v11314_v51  ;;  %v5008_v43 = vpop.f32.mrf.mxu0 }
 0x3fe   : > { %v5067_v25 = vadd.f32 %v5045_v50, %v11297_v58  ;;  %v5021_v62 = vpop.f32.mrf.mxu1  ;;  %v5660_v58 = vand.u32 31, %v5643_v54 }
 0x400   : > { %vm11387_vm11 = vcmp.lt.s32.totalorder %v5660_v58, 25 }
 0x404   : > { %v5034_v9 = vpop.f32.mrf.mxu2 }
 0x405   : > { %v5047_v28 = vpop.f32.mrf.mxu3  ;;  %v5058_v48 = vpop.f32.mrf.mxu0 }
 0x406   : > { %v5068_v38 = vadd.f32 %v5058_v48, %v11317_v36 }
 0x40d   : > { %v5060_v37 = vpop.f32.mrf.mxu0  ;;  %v5632_v49 = vpop.permute.xlu2 %5631 }
 0x434   : > { %v5539_v42 = vpop.f32.mrf.mxu1 }
 0x435   : > { %v5621_v24 = vadd.f32 %v5539_v42, %v5062_v61  ;;  %v5688_v61 = vand.u32 31, %v5647_v34 }
 0x437   : > { %v5578_v12 = vpop.f32.mrf.mxu0  ;;  %v5634_v23 = vadd.f32 %v5632_v49, %v5621_v24  ;;  %vm11417_vm13 = vcmp.lt.s32.totalorder %v5688_v61, 25 }
 0x438   : > { %v5624_v56 = vadd.f32 %v5578_v12, %v5065_v2 }
 0x439   : > { %v5754_v27 = vsel %vm11391_vm9, %v5634_v23, 0.0 }
 0x43a   : > { %v5552_v1 = vpop.f32.mrf.mxu2  ;;  %v5637_v33 = vadd.f32 %v5632_v49, %v5624_v56 }
 0x43b   : > { %v5622_v51 = vadd.f32 %v5552_v1, %v5063_v14 }
 0x43c   : > { %v5565_v22 = vpop.f32.mrf.mxu3  ;;  %v5541_v7 = vpop.f32.mrf.mxu1  ;;  %v5757_v40 = vsel %vm11405_vm7, %v5637_v33, 0.0 }
 0x43d   : > { %v5635_v18 = vadd.f32 %v5632_v49, %v5622_v51  ;;  %v5623_v31 = vadd.f32 %v5565_v22, %v5064_v52 }
 0x43f   : > { %v5580_v20 = vpop.f32.mrf.mxu0  ;;  %v5755_v29 = vsel %vm11387_vm11, %v5635_v18, 0.0  ;;  %v5636_v13 = vadd.f32 %v5632_v49, %v5623_v31 }
 0x440   : > { %v5761_v3 = vadd.f32 %v5755_v29, %v5754_v27 }
 0x441   : > { %v5756_v44 = vsel %vm11399_vm14, %v5636_v13, 0.0 }
 0x442   : > { %v5554_v46 = vpop.f32.mrf.mxu2  ;;  %v5762_v47 = vadd.f32 %v5761_v3, %v5756_v44  ;;  %v8180_v44 = vmov 2  }
 0x443   : > { %8121 = vset.pattern.permute.xlu0 %v8180_v44 }
 0x444   : > { %v5567_v6 = vpop.f32.mrf.mxu3  ;;  %v5763_v52 = vadd.f32 %v5762_v47, %v5757_v40 }
 0x44d   : > { %v5591_v41 = vpop.f32.mrf.mxu1 }
 0x44e   : > { %v5625_v8 = vadd.f32 %v5591_v41, %v5066_v53 }
 0x450   : > { %v5638_v35 = vadd.f32 %v5632_v49, %v5625_v8  ;;  %v8179_v8 = vmov 1  }
 0x451   : > { %8119 = vset.pattern.permute.xlu2 %v8179_v8 }
 0x452   : > { %v5758_v26 = vsel %vm11409_vm5, %v5638_v35, 0.0  ;;  %5837 = vperm.xlu2 %8119, %v11339_v30  }
 0x453   : > { %v5604_v14 = vpop.f32.mrf.mxu2  ;;  %v5764_v43 = vadd.f32 %v5763_v52, %v5758_v26 }
 0x454   : > { %v5617_v60 = vpop.f32.mrf.mxu3  ;;  %v5626_v19 = vadd.f32 %v5604_v14, %v5067_v25 }
 0x455   : > { %v5627_v2 = vadd.f32 %v5617_v60, %v5068_v38  ;;  %v5593_v50 = vpop.f32.mrf.mxu1 }
 0x456   : > { %v5639_v53 = vadd.f32 %v5632_v49, %v5626_v19 }
 0x457   : > { %v5640_v62 = vadd.f32 %v5632_v49, %v5627_v2 }
 0x458   : > { %v5759_v28 = vsel %vm11417_vm13, %v5639_v53, 0.0 }
 0x459   : > { %v5765_v48 = vadd.f32 %v5764_v43, %v5759_v28  ;;  %v5760_v25 = vsel %vm11421_vm12, %v5640_v62, 0.0 }
 0x45a   : > { %8120 = vset.pattern.permute.xlu2 %v8180_v44 }
 0x45b   : > { %v5606_v38 = vpop.f32.mrf.mxu2  ;;  %v5766_v37 = vadd.f32 %v5765_v48, %v5760_v25  ;;  %5848 = vperm.xlu2 %8120, %v11339_v30  }
 0x45c   : > { %v5619_v42 = vpop.f32.mrf.mxu3 }
 0x45d   : > { %5767 = vadd.xlane.f32.xlu0 %v5766_v37 }
 0x4ac   : > { %v5838_v59 = vpop.permute.xlu2 %5837 }
 0x4b5   : > { %v11451_v48 = vpop.permute.xlu2 %5848 }
 0x4d0   : > { %v5768_v12 = vpop.xlane.xlu0 %5767 }
 0x4d1   : > { %v5769_v45 = vrot.slane %v5768_v12, 4 }
 0x4d3   : > { %v5770_v1 = vadd.f32 %v5769_v45, %v5768_v12 }
 0x4d5   : > { %v5771_v22 = vrot.slane %v5770_v1, 2 }
 0x4d7   : > { %v5772_v7 = vadd.f32 %v5771_v22, %v5770_v1 }
 0x4d9   : > { %v5773_v4 = vrot.slane %v5772_v7, 1 }
 0x4db   : > { %v5774_v20 = vadd.f32 %v5773_v4, %v5772_v7 }
 0x4dd   : > { %8070 = vpush %v5774_v20 }
 0x50e   : > { %s8071_s24 = spop %8070 }
 0x50f   : > { %s5776_s25 = smul.f32 0.0002, %s8071_s24 }
 0x511   : > { %v5777_v54 = vstv %s5776_s25 }
 0x512   : > { %v5778_v51 = vsub.f32 %v5634_v23, %v5777_v54  ;;  %v5779_v46 = vsub.f32 %v5635_v18, %v5777_v54  ;;  %v5780_v58 = vsub.f32 %v5636_v13, %v5777_v54  ;;  %v5781_v24 = vsub.f32 %v5637_v33, %v5777_v54 }
 0x513   : > { %v5782_v15 = vsub.f32 %v5638_v35, %v5777_v54  ;;  %v11435_v11 = vsub.f32 %v5639_v53, %v5777_v54  ;;  %v11439_v29 = vsub.f32 %v5640_v62, %v5777_v54 }
 0x514   : > { %v5785_v6 = vsel %vm11391_vm9, %v5778_v51, 0.0  ;;  %v5786_v49 = vsel %vm11387_vm11, %v5779_v46, 0.0  ;;  %v5787_v17 = vsel %vm11399_vm14, %v5780_v58, 0.0  ;;  %v5788_v23 = vsel %vm11405_vm7, %v5781_v24, 0.0 }
 0x515   : > { %v5792_v10 = vmul.f32 %v5785_v6, %v5785_v6  ;;  %v5793_v31 = vmul.f32 %v5786_v49, %v5786_v49  ;;  %v5794_v18 = vmul.f32 %v5787_v17, %v5787_v17  ;;  %v5789_v32 = vsel %vm11409_vm5, %v5782_v15, 0.0 }
 0x516   : > { %v5795_v36 = vmul.f32 %v5788_v23, %v5788_v23  ;;  %v5790_v56 = vsel %vm11417_vm13, %v11435_v11, 0.0  ;;  %v5796_v27 = vmul.f32 %v5789_v32, %v5789_v32  ;;  %v5791_v55 = vsel %vm11421_vm12, %v11439_v29, 0.0 }
 0x517   : > { %v5799_v39 = vadd.f32 %v5793_v31, %v5792_v10  ;;  %v5797_v3 = vmul.f32 %v5790_v56, %v5790_v56  ;;  %v5798_v41 = vmul.f32 %v5791_v55, %v5791_v55 }
 0x519   : > { %v5800_v57 = vadd.f32 %v5799_v39, %v5794_v18 }
 0x51b   : > { %v5801_v13 = vadd.f32 %v5800_v57, %v5795_v36 }
 0x51d   : > { %v5802_v21 = vadd.f32 %v5801_v13, %v5796_v27 }
 0x51f   : > { %v5803_v5 = vadd.f32 %v5802_v21, %v5797_v3 }
 0x521   : > { %v5804_v34 = vadd.f32 %v5803_v5, %v5798_v41 }
 0x523   : > { %5805 = vadd.xlane.f32.xlu1 %v5804_v34 }
 0x596   : > { %v5806_v33 = vpop.xlane.xlu1 %5805 }
 0x597   : > { %v5807_v35 = vrot.slane %v5806_v33, 4 }
 0x599   : > { %v5808_v16 = vadd.f32 %v5807_v35, %v5806_v33 }
 0x59b   : > { %v5809_v47 = vrot.slane %v5808_v16, 2 }
 0x59d   : > { %v5810_v0 = vadd.f32 %v5809_v47, %v5808_v16 }
 0x59f   : > { %v5811_v63 = vrot.slane %v5810_v0, 1 }
 0x5a1   : > { %v5812_v61 = vadd.f32 %v5811_v63, %v5810_v0 }
 0x5a3   : > { %8072 = vpush %v5812_v61 }
 0x5d4   : > { %s8073_s28 = spop %8072 }
 0x5d5   : > { %s5814_s29 = smul.f32 0.0002, %s8073_s28 }
 0x5d7   : > { %s5815_s30 = sadd.f32 1e-05, %s5814_s29 }
 0x5d9   : > { %v5816_v14 = vstv %s5815_s30 }
 0x5da   : > { %8122 = vrsqrt.f32 %v5816_v14  ;;  %vm5823_vm1 = vweird.f32 %v5816_v14 }
 0x5e0   : > { %v8123_v40 = vpop.eup %8122 }
 0x5e1   : > { %v5818_v26 = vmul.f32 %v8123_v40, %v5816_v14  ;;  %vm5824_vm8 = vweird.f32 %v8123_v40 }
 0x5e2   : > { %vm5825_vm4 = vmor %vm5823_vm1, %vm5824_vm8 }
 0x5e3   : > { %v5819_v60 = vmul.f32 %v8123_v40, %v5818_v26 }
 0x5e5   : > { %v5820_v19 = vmul.f32 0.5, %v5819_v60 }
 0x5e7   : > { %v5821_v52 = vsub.f32 1.5, %v5820_v19 }
 0x5e9   : > { %v5822_v30 = vmul.f32 %v8123_v40, %v5821_v52 }
 0x5eb   : > { %v5826_v2 = vsel %vm5825_vm4, %v8123_v40, %v5822_v30 }
 0x5ec   : > { %8074 = vpush %v5826_v2 }
 0x61d   : > { %s8075_s5 = spop %8074 }
 0x61e   : > { %v5828_v50 = vstv %s8075_s5 }
 0x61f   : > { %v5829_v53 = vmul.f32 %v5828_v50, %v5778_v51  ;;  %v5830_v43 = vmul.f32 %v5828_v50, %v5779_v46  ;;  %v5831_v62 = vmul.f32 %v5828_v50, %v5780_v58  ;;  %v5832_v9 = vmul.f32 %v5828_v50, %v5781_v24 }
 0x620   : > { %v5833_v28 = vmul.f32 %v5828_v50, %v5782_v15  ;;  %v5834_v15 = vmul.f32 %v5828_v50, %v11435_v11  ;;  %v5835_v10 = vmul.f32 %v5828_v50, %v11439_v29 }
 0x621   : > { %v5840_v25 = vmul.f32 %v5838_v59, %v5829_v53  ;;  %v5841_v38 = vmul.f32 %v5838_v59, %v5830_v43  ;;  %v5842_v37 = vmul.f32 %v5838_v59, %v5831_v62  ;;  %v5843_v42 = vmul.f32 %v5838_v59, %v5832_v9 }
 0x622   : > { %v5844_v12 = vmul.f32 %v5838_v59, %v5833_v28  ;;  %v5845_v29 = vmul.f32 %v5838_v59, %v5834_v15  ;;  %v5846_v3 = vmul.f32 %v5838_v59, %v5835_v10 }
 0x623   : > { %v11454_v45 = vadd.f32 %v11451_v48, %v5840_v25  ;;  %v11457_v1 = vadd.f32 %v11451_v48, %v5841_v38  ;;  %v11460_v22 = vadd.f32 %v11451_v48, %v5842_v37  ;;  %v11463_v7 = vadd.f32 %v11451_v48, %v5843_v42 }
 0x624   : > { %v11469_v20 = vadd.f32 %v11451_v48, %v5844_v12  ;;  %v11516_v26 = vadd.f32 %v11451_v48, %v5845_v29 }
 0x625   : > { %v11466_v4 = vmul.f32 0.70710677, %v11454_v45  ;;  %v11472_v54 = vmul.f32 0.70710677, %v11457_v1  ;;  %v11475_v51 = vmul.f32 0.70710677, %v11460_v22 }
 0x626   : > { %v11478_v46 = vmul.f32 0.70710677, %v11463_v7  ;;  %v11493_v31 = vmul.f32 0.70710677, %v11469_v20 }
 0x627   : > { %v5872_v58 = vmul.f32 %v11466_v4, %v11466_v4  ;;  %v5912_v24 = vmul.f32 %v11472_v54, %v11472_v54  ;;  %v5952_v6 = vmul.f32 %v11475_v51, %v11475_v51 }
 0x628   : > { %v5992_v49 = vmul.f32 %v11478_v46, %v11478_v46 }
 0x629   : > { %v11489_v17 = vmin.f32 %v5872_v58, 16.0  ;;  %v11495_v23 = vmin.f32 %v5912_v24, 16.0  ;;  %v11497_v18 = vmin.f32 %v5952_v6, 16.0 }
 0x62a   : > { %v11501_v36 = vmin.f32 %v5992_v49, 16.0 }
 0x62b   : > { %v5874_v39 = vmul.f32 2.1237322e-06, %v11489_v17  ;;  %v5885_v32 = vmul.f32 3.8918573e-05, %v11489_v17  ;;  %v5914_v57 = vmul.f32 2.1237322e-06, %v11495_v23 }
 0x62c   : > { %v5925_v11 = vmul.f32 3.8918573e-05, %v11495_v23  ;;  %v5954_v56 = vmul.f32 2.1237322e-06, %v11497_v18  ;;  %v5965_v55 = vmul.f32 3.8918573e-05, %v11497_v18 }
 0x62d   : > { %v5875_v27 = vadd.f32 0.00028619796, %v5874_v39  ;;  %v5886_v13 = vadd.f32 0.001143296, %v5885_v32  ;;  %v5915_v21 = vadd.f32 0.00028619796, %v5914_v57 }
 0x62e   : > { %v5926_v41 = vadd.f32 0.001143296, %v5925_v11  ;;  %v5955_v5 = vadd.f32 0.00028619796, %v5954_v56  ;;  %v5966_v44 = vadd.f32 0.001143296, %v5965_v55 }
 0x62f   : > { %v5876_v34 = vmul.f32 %v5875_v27, %v11489_v17  ;;  %v5887_v8 = vmul.f32 %v5886_v13, %v11489_v17  ;;  %v5994_v33 = vmul.f32 2.1237322e-06, %v11501_v36  ;;  %v5916_v35 = vmul.f32 %v5915_v21, %v11495_v23 }
 0x630   : > { %v5927_v16 = vmul.f32 %v5926_v41, %v11495_v23  ;;  %v5956_v47 = vmul.f32 %v5955_v5, %v11497_v18  ;;  %v6005_v0 = vmul.f32 3.8918573e-05, %v11501_v36  ;;  %v5967_v14 = vmul.f32 %v5966_v44, %v11497_v18 }
 0x631   : > { %v5877_v63 = vadd.f32 0.0036580483, %v5876_v34  ;;  %v5888_v61 = vadd.f32 0.014752088, %v5887_v8  ;;  %v5995_v40 = vadd.f32 0.00028619796, %v5994_v33  ;;  %v6032_v33 = vmul.f32 %v11493_v31, %v11493_v31 }
 0x632   : > { %v5917_v60 = vadd.f32 0.0036580483, %v5916_v35  ;;  %v5928_v19 = vadd.f32 0.014752088, %v5927_v16  ;;  %v5957_v52 = vadd.f32 0.0036580483, %v5956_v47  ;;  %v11541_v35 = vadd.f32 %v11451_v48, %v5846_v3 }
 0x633   : > { %v5878_v30 = vmul.f32 %v5877_v63, %v11489_v17  ;;  %v5889_v2 = vmul.f32 %v5888_v61, %v11489_v17  ;;  %v5968_v59 = vadd.f32 0.014752088, %v5967_v14  ;;  %v5996_v50 = vmul.f32 %v5995_v40, %v11501_v36 }
 0x634   : > { %v5918_v53 = vmul.f32 %v5917_v60, %v11495_v23  ;;  %v5929_v43 = vmul.f32 %v5928_v19, %v11495_v23  ;;  %v5958_v62 = vmul.f32 %v5957_v52, %v11497_v18  ;;  %v6006_v9 = vadd.f32 0.001143296, %v6005_v0 }
 0x635   : > { %v5879_v28 = vadd.f32 0.05243302, %v5878_v30  ;;  %v5890_v25 = vadd.f32 0.112945676, %v5889_v2  ;;  %v5969_v38 = vmul.f32 %v5968_v59, %v11497_v18  ;;  %v5997_v37 = vadd.f32 0.0036580483, %v5996_v50 }
 0x636   : > { %v5919_v42 = vadd.f32 0.05243302, %v5918_v53  ;;  %v5930_v12 = vadd.f32 0.112945676, %v5929_v43  ;;  %v5959_v58 = vadd.f32 0.05243302, %v5958_v62  ;;  %v6007_v24 = vmul.f32 %v6006_v9, %v11501_v36 }
 0x637   : > { %v5880_v6 = vmul.f32 %v5879_v28, %v11489_v17  ;;  %v5891_v49 = vmul.f32 %v5890_v25, %v11489_v17  ;;  %v5970_v15 = vadd.f32 0.112945676, %v5969_v38  ;;  %v5998_v10 = vmul.f32 %v5997_v37, %v11501_v36 }
 0x638   : > { %v5920_v39 = vmul.f32 %v5919_v42, %v11495_v23  ;;  %v5931_v32 = vmul.f32 %v5930_v12, %v11495_v23  ;;  %v5960_v57 = vmul.f32 %v5959_v58, %v11497_v18  ;;  %v6008_v11 = vadd.f32 0.014752088, %v6007_v24 }
 0x639   : > { %v5881_v56 = vadd.f32 0.18741608, %v5880_v6  ;;  %v5892_v29 = vadd.f32 0.4994258, %v5891_v49  ;;  %v5971_v27 = vmul.f32 %v5970_v15, %v11497_v18  ;;  %v5999_v13 = vadd.f32 0.05243302, %v5998_v10 }
 0x63a   : > { %v5921_v55 = vadd.f32 0.18741608, %v5920_v39  ;;  %v5932_v21 = vadd.f32 0.4994258, %v5931_v32  ;;  %v5961_v41 = vadd.f32 0.18741608, %v5960_v57  ;;  %v6009_v5 = vmul.f32 %v6008_v11, %v11501_v36 }
 0x63b   : > { %v11535_v34 = vmul.f32 0.70710677, %v11516_v26  ;;  %v5893_v8 = vmul.f32 %v5892_v29, %v11489_v17  ;;  %v5972_v44 = vadd.f32 0.4994258, %v5971_v27  ;;  %v5882_v16 = vmul.f32 %v5881_v56, %v11489_v17 }
 0x63c   : > { %v5933_v47 = vmul.f32 %v5932_v21, %v11495_v23  ;;  %v6010_v0 = vadd.f32 0.112945676, %v6009_v5  ;;  %v5922_v61 = vmul.f32 %v5921_v55, %v11495_v23  ;;  %v6000_v14 = vmul.f32 %v5999_v13, %v11501_v36 }
 0x63d   : > { %v11545_v63 = vadd.f32 1.0, %v5893_v8  ;;  %v5962_v60 = vmul.f32 %v5961_v41, %v11497_v18  ;;  %v5973_v19 = vmul.f32 %v5972_v44, %v11497_v18  ;;  %v11555_v17 = vmin.f32 %v6032_v33, 16.0 }
 0x63e   : > { %v11549_v40 = vadd.f32 1.0, %v5933_v47  ;;  %v6011_v48 = vmul.f32 %v6010_v0, %v11501_v36  ;;  %v6072_v3 = vmul.f32 %v11535_v34, %v11535_v34  ;;  %v11560_v52 = vmul.f32 0.70710677, %v11541_v35 }
 0x63f   : > { %8124 = vrcp.f32 %v11545_v63  ;;  %v5883_v23 = vadd.f32 1.1283791, %v5882_v16  ;;  %v5923_v30 = vadd.f32 1.1283791, %v5922_v61  ;;  %v6001_v2 = vadd.f32 0.18741608, %v6000_v14 }
 0x640   : > { %8126 = vrcp.f32 %v11549_v40  ;;  %v5963_v59 = vadd.f32 1.1283791, %v5962_v60  ;;  %v11563_v50 = vadd.f32 1.0, %v5973_v19  ;;  %v6012_v18 = vadd.f32 0.4994258, %v6011_v48 }
 0x641   : > { %v5906_v53 = vand.u32 2147483648, %v11545_v63  ;;  %v6034_v43 = vmul.f32 2.1237322e-06, %v11555_v17  ;;  %v6045_v62 = vmul.f32 3.8918573e-05, %v11555_v17  ;;  %v11568_v9 = vmin.f32 %v6072_v3, 16.0 }
 0x642   : > { %v11571_v28 = vmul.f32 %v5883_v23, %v11466_v4  ;;  %v5904_v25 = vand.u32 2147483647, %v11545_v63  ;;  %8128 = vrcp.f32 %v11563_v50  ;;  %v6112_v38 = vmul.f32 %v11560_v52, %v11560_v52 }
 0x643   : > { %vm5900_vm2 = vweird.f32 %v11545_v63  ;;  %v11581_v42 = vmul.f32 %v5923_v30, %v11472_v54  ;;  %v6013_v12 = vmul.f32 %v6012_v18, %v11501_v36  ;;  %v6035_v58 = vadd.f32 0.00028619796, %v6034_v43 }
 0x644   : > { %v6046_v24 = vadd.f32 0.001143296, %v6045_v62  ;;  %v5944_v49 = vand.u32 2147483647, %v11549_v40  ;;  %v5946_v15 = vand.u32 2147483648, %v11549_v40  ;;  %v6002_v10 = vmul.f32 %v6001_v2, %v11501_v36 }
 0x645   : > { %v11577_v37 = vpop.eup %8124  ;;  %v5907_v39 = vor.u32 1.1754944e-38, %v5906_v53  ;;  %v11594_v32 = vmul.f32 %v5963_v59, %v11475_v51  ;;  %v11596_v57 = vadd.f32 1.0, %v6013_v12  ;;  %v5984_v56 = vand.u32 2147483647, %v11563_v50 }
 0x646   : > { %v11584_v4 = vpop.eup %8126  ;;  %v5896_v6 = vmul.f32 %v11577_v37, %v11545_v63  ;;  %v6036_v29 = vmul.f32 %v6035_v58, %v11555_v17  ;;  %v6047_v27 = vmul.f32 %v6046_v24, %v11555_v17  ;;  %vm11601_vm0 = vcmp.eq.f32.partialorder %v5904_v25, 8.507059e+37 }
 0x647   : > { %v5936_v54 = vmul.f32 %v11584_v4, %v11549_v40  ;;  %vm5940_vm3 = vweird.f32 %v11549_v40  ;;  %v5986_v55 = vand.u32 2147483648, %v11563_v50  ;;  %8130 = vrcp.f32 %v11596_v57 }
 0x648   : > { %v5897_v11 = vsub.f32 1.0, %v5896_v6  ;;  %v6074_v51 = vmul.f32 2.1237322e-06, %v11568_v9  ;;  %v8129_v21 = vpop.eup %8128  ;;  %v6003_v5 = vadd.f32 1.1283791, %v6002_v10  ;;  %vm5901_vm6 = vweird.f32 %v11577_v37 }
 0x649   : > { %v5937_v36 = vsub.f32 1.0, %v5936_v54  ;;  %v6037_v8 = vadd.f32 0.0036580483, %v6036_v29  ;;  %v6048_v44 = vadd.f32 0.014752088, %v6047_v27  ;;  %v5947_v16 = vor.u32 1.1754944e-38, %v5946_v15  ;;  %vm11624_vm7 = vmor %vm5900_vm2, %vm5901_vm6 }
 0x64a   : > { %v5898_v41 = vmul.f32 %v11577_v37, %v5897_v11  ;;  %v5976_v47 = vmul.f32 %v8129_v21, %v11563_v50  ;;  %vm5980_vm11 = vweird.f32 %v11563_v50  ;;  %vm5941_vm9 = vweird.f32 %v11584_v4 }
 0x64b   : > { %v5938_v33 = vmul.f32 %v11584_v4, %v5937_v36  ;;  %v6038_v61 = vmul.f32 %v6037_v8, %v11555_v17  ;;  %v6049_v14 = vmul.f32 %v6048_v44, %v11555_v17  ;;  %vm11618_vm14 = vcmp.eq.f32.partialorder %v5944_v49, 8.507059e+37  ;;  %vm11652_vm13 = vmor %vm5940_vm3, %vm5941_vm9 }
 0x64c   : > { %v5899_v0 = vadd.f32 %v11577_v37, %v5898_v41  ;;  %v5977_v19 = vsub.f32 1.0, %v5976_v47  ;;  %v5987_v48 = vor.u32 1.1754944e-38, %v5986_v55  ;;  %v6075_v3 = vadd.f32 0.00028619796, %v6074_v51 }
 0x64d   : > { %vm11628_vm5 = vcmp.eq.f32.partialorder %v5984_v56, 8.507059e+37  ;;  %v6004_v2 = vmul.f32 %v6003_v5, %v11478_v46  ;;  %v6024_v59 = vand.u32 2147483647, %v11596_v57  ;;  %v6050_v18 = vadd.f32 0.112945676, %v6049_v14  ;;  %v8131_v43 = vpop.eup %8130 }
 0x64e   : > { %v6085_v53 = vmul.f32 3.8918573e-05, %v11568_v9  ;;  %v5903_v63 = vsel %vm11624_vm7, %v11577_v37, %v5899_v0  ;;  %v5939_v62 = vadd.f32 %v11584_v4, %v5938_v33  ;;  %v5978_v25 = vmul.f32 %v8129_v21, %v5977_v19 }
 0x64f   : > { %v6039_v12 = vadd.f32 0.05243302, %v6038_v61  ;;  %vm5981_vm15 = vweird.f32 %v8129_v21  ;;  %v6016_v58 = vmul.f32 %v8131_v43, %v11596_v57  ;;  %vm6020_vm10 = vweird.f32 %v11596_v57 }
 0x650   : > { %v6076_v46 = vmul.f32 %v6075_v3, %v11568_v9  ;;  %v5979_v24 = vadd.f32 %v8129_v21, %v5978_v25  ;;  %v6026_v6 = vand.u32 2147483648, %v11596_v57  ;;  %v6051_v49 = vmul.f32 %v6050_v18, %v11555_v17  ;;  %vm11665_vm8 = vmor %vm5980_vm11, %vm5981_vm15 }
 0x651   : > { %v11644_v15 = vmin.f32 %v6112_v38, 16.0  ;;  %v5908_v37 = vsel %vm11601_vm0, %v5907_v39, %v5903_v63  ;;  %v6017_v54 = vsub.f32 1.0, %v6016_v58  ;;  %vm11656_vm12 = vcmp.eq.f32.partialorder %v6024_v59, 8.507059e+37 }
 0x652   : > { %v6086_v56 = vadd.f32 0.001143296, %v6085_v53  ;;  %v5943_v38 = vsel %vm11652_vm13, %v11584_v4, %v5939_v62  ;;  %vm6021_vm1 = vweird.f32 %v8131_v43  ;;  %v6040_v40 = vmul.f32 %v6039_v12, %v11555_v17 }
 0x653   : > { %v6052_v29 = vadd.f32 0.4994258, %v6051_v49  ;;  %v5983_v27 = vsel %vm11665_vm8, %v8129_v21, %v5979_v24  ;;  %v6018_v13 = vmul.f32 %v8131_v43, %v6017_v54  ;;  %v6077_v36 = vadd.f32 0.0036580483, %v6076_v46  ;;  %vm6022_vm4 = vmor %vm6020_vm10, %vm6021_vm1 }
 0x654   : > { %v6087_v55 = vmul.f32 %v6086_v56, %v11568_v9  ;;  %v5909_v51 = vmul.f32 %v5908_v37, %v11571_v28  ;;  %v6027_v4 = vor.u32 1.1754944e-38, %v6026_v6  ;;  %v6114_v41 = vmul.f32 2.1237322e-06, %v11644_v15 }
 0x655   : > { %v6053_v50 = vmul.f32 %v6052_v29, %v11555_v17  ;;  %v5948_v5 = vsel %vm11618_vm14, %v5947_v16, %v5943_v38  ;;  %v6019_v8 = vadd.f32 %v8131_v43, %v6018_v13  ;;  %v6125_v33 = vmul.f32 3.8918573e-05, %v11644_v15 }
 0x656   : > { %v6088_v44 = vadd.f32 0.014752088, %v6087_v55  ;;  %v5988_v21 = vsel %vm11628_vm5, %v5987_v48, %v5983_v27  ;;  %v6041_v28 = vadd.f32 0.18741608, %v6040_v40  ;;  %v6115_v0 = vadd.f32 0.00028619796, %v6114_v41 }
 0x657   : > { %v11684_v47 = vadd.f32 1.0, %v6053_v50  ;;  %v6023_v61 = vsel %vm6022_vm4, %v8131_v43, %v6019_v8  ;;  %v6078_v14 = vmul.f32 %v6077_v36, %v11568_v9  ;;  %v6126_v60 = vadd.f32 0.001143296, %v6125_v33 }
 0x658   : > { %v6089_v16 = vmul.f32 %v6088_v44, %v11568_v9  ;;  %v5949_v19 = vmul.f32 %v5948_v5, %v11581_v42  ;;  %v6028_v48 = vsel %vm11656_vm12, %v6027_v4, %v6023_v61  ;;  %v5989_v57 = vmul.f32 %v5988_v21, %v11594_v32 }
 0x659   : > { %8132 = vrcp.f32 %v11684_v47  ;;  %v6029_v3 = vmul.f32 %v6028_v48, %v6004_v2  ;;  %v6042_v23 = vmul.f32 %v6041_v28, %v11555_v17  ;;  %v6116_v59 = vmul.f32 %v6115_v0, %v11644_v15 }
 0x65a   : > { %v6090_v30 = vadd.f32 0.112945676, %v6089_v16  ;;  %v6127_v18 = vmul.f32 %v6126_v60, %v11644_v15  ;;  %v5858_v53 = vmul.f32 0.5, %v11454_v45  ;;  %v7707_v43 = vclamps-f32 %v5909_v51, 1.0 }
 0x65b   : > { %v6079_v63 = vadd.f32 0.05243302, %v6078_v14  ;;  %v5859_v42 = vmul.f32 0.5, %v11457_v1  ;;  %v7708_v62 = vclamps-f32 %v5949_v19, 1.0  ;;  %v5860_v32 = vmul.f32 0.5, %v11460_v22 }
 0x65c   : > { %v6091_v25 = vmul.f32 %v6090_v30, %v11568_v9  ;;  %v6128_v12 = vadd.f32 0.014752088, %v6127_v18  ;;  %v5861_v17 = vmul.f32 0.5, %v11463_v7  ;;  %v7709_v2 = vclamps-f32 %v5989_v57, 1.0 }
 0x65d   : > { %v7710_v58 = vclamps-f32 %v6029_v3, 1.0  ;;  %v6043_v24 = vadd.f32 1.1283791, %v6042_v23  ;;  %v6117_v49 = vadd.f32 0.0036580483, %v6116_v59  ;;  %v6080_v10 = vmul.f32 %v6079_v63, %v11568_v9 }
 0x65e   : > { %v6092_v6 = vadd.f32 0.4994258, %v6091_v25  ;;  %v6129_v45 = vmul.f32 %v6128_v12, %v11644_v15  ;;  %v6064_v1 = vand.u32 2147483647, %v11684_v47  ;;  %v6152_v54 = vadd.f32 1.0, %v7707_v43 }
 0x65f   : > { %v8133_v46 = vpop.eup %8132  ;;  %v6066_v22 = vand.u32 2147483648, %v11684_v47  ;;  %v6153_v56 = vadd.f32 1.0, %v7708_v62  ;;  %v6154_v39 = vadd.f32 1.0, %v7709_v2  ;;  %v6155_v40 = vadd.f32 1.0, %v7710_v58 }
 0x660   : > { %v6056_v37 = vmul.f32 %v8133_v46, %v11684_v47  ;;  %v6093_v7 = vmul.f32 %v6092_v6, %v11568_v9  ;;  %v6130_v11 = vadd.f32 0.112945676, %v6129_v45  ;;  %v6159_v29 = vmul.f32 %v6152_v54, %v5858_v53 }
 0x661   : > { %v6118_v13 = vmul.f32 %v6117_v49, %v11644_v15  ;;  %v6160_v55 = vmul.f32 %v6153_v56, %v5859_v42  ;;  %vm6061_vm2 = vweird.f32 %v8133_v46  ;;  %v6161_v4 = vmul.f32 %v6154_v39, %v5860_v32 }
 0x662   : > { %v6057_v38 = vsub.f32 1.0, %v6056_v37  ;;  %v6094_v27 = vadd.f32 1.0, %v6093_v7  ;;  %v6131_v36 = vmul.f32 %v6130_v11, %v11644_v15  ;;  %v6162_v50 = vmul.f32 %v6155_v40, %v5861_v17  ;;  %6166 = vst [vmem:[%s11709_s8] sm:$0xff] %v6159_v29 }
 0x663   : > { %6167 = vst [vmem:[%s11709_s8 + $0x8] sm:$0xff] %v6160_v55  ;;  %vm6060_vm0 = vweird.f32 %v11684_v47  ;;  %v6067_v8 = vor.u32 1.1754944e-38, %v6066_v22  ;;  %v6081_v44 = vadd.f32 0.18741608, %v6080_v10  ;;  %v6119_v33 = vadd.f32 0.05243302, %v6118_v13 }
 0x664   : > { %v6058_v51 = vmul.f32 %v8133_v46, %v6057_v38  ;;  %8134 = vrcp.f32 %v6094_v27  ;;  %v6132_v5 = vadd.f32 0.4994258, %v6131_v36  ;;  %6168 = vst [vmem:[%s11709_s8 + $0x10] sm:$0xff] %v6161_v4  ;;  %vm6062_vm3 = vmor %vm6060_vm0, %vm6061_vm2  ;;  %v6044_v21 = vmul.f32 %v6043_v24, %v11493_v31 }
 0x665   : > { %6169 = vst [vmem:[%s11709_s8 + $0x18] sm:$0xff] %v6162_v50  ;;  %vm6065_vm6 = vcmp.eq.f32.partialorder %v6064_v1, 8.507059e+37  ;;  %v6082_v19 = vmul.f32 %v6081_v44, %v11568_v9  ;;  %v6120_v47 = vmul.f32 %v6119_v33, %v11644_v15  ;;  %v5862_v3 = vmul.f32 0.5, %v11469_v20 }
 0x666   : > { %v6059_v41 = vadd.f32 %v8133_v46, %v6058_v51  ;;  %v6133_v0 = vmul.f32 %v6132_v5, %v11644_v15  ;;  %v6106_v59 = vand.u32 2147483648, %v6094_v27  ;;  %v6104_v43 = vand.u32 2147483647, %v6094_v27 }
 0x667   : > { %v6083_v30 = vadd.f32 1.1283791, %v6082_v19  ;;  %v6121_v18 = vadd.f32 0.18741608, %v6120_v47  ;;  %vm6100_vm9 = vweird.f32 %v6094_v27  ;;  %v5863_v37 = vmul.f32 0.5, %v11516_v26 }
 0x668   : > { %v6063_v28 = vsel %vm6062_vm3, %v8133_v46, %v6059_v41  ;;  %v6134_v16 = vadd.f32 1.0, %v6133_v0  ;;  %v6107_v62 = vor.u32 1.1754944e-38, %v6106_v59  ;;  %vm6105_vm7 = vcmp.eq.f32.partialorder %v6104_v43, 8.507059e+37 }
 0x669   : > { %v6068_v61 = vsel %vm6065_vm6, %v6067_v8, %v6063_v28  ;;  %v6122_v25 = vmul.f32 %v6121_v18, %v11644_v15  ;;  %v6084_v12 = vmul.f32 %v6083_v30, %v11535_v34  ;;  %v5864_v38 = vmul.f32 0.5, %v11541_v35 }
 0x66a   : > { %v6069_v14 = vmul.f32 %v6068_v61, %v6044_v21  ;;  %v8135_v60 = vpop.eup %8134  ;;  %8136 = vrcp.f32 %v6134_v16  ;;  %v6146_v24 = vand.u32 2147483648, %v6134_v16  ;;  %v6144_v45 = vand.u32 2147483647, %v6134_v16 }
 0x66b   : > { %v6096_v57 = vmul.f32 %v8135_v60, %v6094_v27  ;;  %vm6101_vm11 = vweird.f32 %v8135_v60  ;;  %v6123_v46 = vadd.f32 1.1283791, %v6122_v25  ;;  %vm6140_vm15 = vweird.f32 %v6134_v16 }
 0x66c   : > { %v7711_v48 = vclamps-f32 %v6069_v14, 1.0  ;;  %vm6102_vm14 = vmor %vm6100_vm9, %vm6101_vm11  ;;  %v6147_v34 = vor.u32 1.1754944e-38, %v6146_v24  ;;  %vm6145_vm13 = vcmp.eq.f32.partialorder %v6144_v45, 8.507059e+37 }
 0x66d   : > { %v6097_v23 = vsub.f32 1.0, %v6096_v57  ;;  %v6124_v10 = vmul.f32 %v6123_v46, %v11560_v52 }
 0x66e   : > { %v6156_v31 = vadd.f32 1.0, %v7711_v48 }
 0x66f   : > { %v6098_v53 = vmul.f32 %v8135_v60, %v6097_v23 }
 0x670   : > { %v6163_v63 = vmul.f32 %v6156_v31, %v5862_v3  ;;  %v8137_v9 = vpop.eup %8136 }
 0x671   : > { %v6099_v42 = vadd.f32 %v8135_v60, %v6098_v53  ;;  %v6136_v32 = vmul.f32 %v8137_v9, %v6134_v16  ;;  %vm6141_vm5 = vweird.f32 %v8137_v9 }
 0x672   : > { %6170 = vst [vmem:[%s11709_s8 + $0x20] sm:$0xff] %v6163_v63  ;;  %vm6142_vm10 = vmor %vm6140_vm15, %vm6141_vm5 }
 0x673   : > { %v6103_v20 = vsel %vm6102_vm14, %v8135_v60, %v6099_v42  ;;  %v6137_v58 = vsub.f32 1.0, %v6136_v32 }
 0x674   : > { %v6108_v17 = vsel %vm6105_vm7, %v6107_v62, %v6103_v20 }
 0x675   : > { %v6109_v2 = vmul.f32 %v6108_v17, %v6084_v12  ;;  %v6138_v49 = vmul.f32 %v8137_v9, %v6137_v58 }
 0x677   : > { %v7712_v6 = vclamps-f32 %v6109_v2, 1.0  ;;  %v6139_v1 = vadd.f32 %v8137_v9, %v6138_v49 }
 0x679   : > { %v6157_v15 = vadd.f32 1.0, %v7712_v6  ;;  %v6143_v54 = vsel %vm6142_vm10, %v8137_v9, %v6139_v1 }
 0x67a   : > { %v6148_v7 = vsel %vm6145_vm13, %v6147_v34, %v6143_v54 }
 0x67b   : > { %v6164_v22 = vmul.f32 %v6157_v15, %v5863_v37  ;;  %v6149_v11 = vmul.f32 %v6148_v7, %v6124_v10 }
 0x67d   : > { %6171 = vst [vmem:[%s11709_s8 + $0x28] sm:$0xff] %v6164_v22  ;;  %v7713_v56 = vclamps-f32 %v6149_v11, 1.0 }
 0x67f   : > { %v6158_v39 = vadd.f32 1.0, %v7713_v56 }
 0x681   : > { %v6165_v40 = vmul.f32 %v6158_v39, %v5864_v38 }
 0x683   : > { %6172 = vst [vmem:[%s11709_s8 + $0x30] sm:$0xff] %v6165_v40 }
 0x684 PF: > { %s14_s15 = sadd.s32 1, %s8145_s15  }
 0x685   : > { %p11_p4 = scmp.ge.s32.totalorder %s14_s15, 4  }
 0x687   :  { %13 = sbr.rel (!%p11_p4) target bundleno = 1 (0x1), region = 73 }

</bundles_post_ra>
